<compile_context>
chip_gen: v5e
topology: v5e:2x2
jax: 0.10.0
libtpu: 0.0.40
codegen_flags: <defaults>
</compile_context>

<pallas_src>
import jax
import jax.numpy as jnp
from jax.experimental import pallas as pl
from jax.experimental.pallas import tpu as pltpu


def _full_spec(a):
    zeros = (0,) * a.ndim
    return pl.BlockSpec(tuple(a.shape), lambda i, _z=zeros: _z)


def prepare_params(params):
    """One-time weight re-layout.  Call once; do NOT run per forward call."""
    K = params["conv1_w"].shape[-1]

    def taps(w):  # (Cout, Cin, K, K) -> (K*K, Cout, Cin); tap index t = ki*K + kj
        return jnp.transpose(w, (2, 3, 0, 1)).reshape(K * K, w.shape[0], w.shape[1])

    return {
        "w1t": taps(params["conv1_w"]), "b1": params["conv1_b"].reshape(-1, 1),
        "w2t": taps(params["conv2_w"]), "b2": params["conv2_b"].reshape(-1, 1),
        "w3t": taps(params["conv3_w"]), "b3": params["conv3_b"].reshape(-1, 1),
        "wfc1": params["fc1_w"],                  # native (C3*H3*W3, 256), NCHW flatten order
        "bfc1": params["fc1_b"].reshape(1, -1),
        "wfc2": params["fc2_w"],                  # native (256, 11), no lane padding
        "bfc2": params["fc2_b"].reshape(1, -1),
    }


def cnn_forward(prepped, x):
    """x: (N, 1, H, W) float32 -> (N, 11) float32 (same semantics as the PyTorch CNN)."""
    Nb, Cin0, H0, W0 = x.shape
    w1t, w2t, w3t = prepped["w1t"], prepped["w2t"], prepped["w3t"]
    KK = w1t.shape[0]
    K = int(round(KK ** 0.5))
    C1, C2, C3 = w1t.shape[1], w2t.shape[1], w3t.shape[1]
    H1, W1s = H0 - K + 1, W0 - K + 1
    H2, W2s = H1 - K + 1, W1s - K + 1
    H3, W3s = H2 - K + 1, W2s - K + 1
    # Row-stride-preserving flattened lengths (row stride = W0 for every conv layer).
    L0 = H0 * W0
    L1 = (H1 - 1) * W0 + W1s
    L2 = (H2 - 1) * W0 + W2s
    L3 = (H3 - 1) * W0 + W3s
    HW3 = H3 * W3s
    FLAT = C3 * HW3
    Nfc1 = prepped["wfc1"].shape[1]
    Nout = prepped["wfc2"].shape[1]
    assert prepped["wfc1"].shape[0] == FLAT

    x_flat = x.reshape(Nb, Cin0, L0)   # pure metadata reshape, free

    def kernel(x_ref, w1_ref, b1_ref, w2_ref, b2_ref, w3_ref, b3_ref,
               bfc1_ref, wfc2_ref, bfc2_ref, wfc1_hbm,
               o_ref, a3c_ref, flat_ref, wfc1_vmem, sem):
        # Kick off the ~1 MB fc1-weight DMA now so it overlaps the conv phase.
        wfc1_copy = pltpu.make_async_copy(wfc1_hbm, wfc1_vmem, sem.at[0])
        wfc1_copy.start()

        # Hoist bias loads out of the per-sample unrolled loop.
        b1 = b1_ref[...]
        b2 = b2_ref[...]
        b3 = b3_ref[...]

        def conv_relu(a, w_ref, bias, cin, l_out):
            # a: (cin, l_in) value; returns (cout, l_out), lane-dense in l_out.
            # Every one of the K*K taps is a contiguous lane slice of `a`.
            acc = None
            for ki in range(K):
                for kj in range(K):
                    t = ki * K + kj
                    off = ki * W0 + kj
                    s = a[:, off:off + l_out]                     # static lane slice
                    w_t = w_ref[t]                                # (cout, cin)
                    if cin == 1:
                        contrib = w_t * s                         # VPU broadcast mul
                    else:
                        contrib = jnp.dot(w_t, s,
                                          preferred_element_type=jnp.float32)
                    acc = contrib if acc is None else acc + contrib
            return jnp.maximum(acc + bias, 0.0)

        # TODO(synk): on v7x, make batch a "parallel" grid axis so the two
        # TensorCores split the samples; with Nb=2 and one TC the unroll is fine.
        for n in range(Nb):
            a0 = x_ref[n]                                         # (Cin0, L0)
            a1 = conv_relu(a0, w1_ref, b1, Cin0, L1)              # (C1, L1)
            a2 = conv_relu(a1, w2_ref, b2, C1, L2)                # (C2, L2)
            a3 = conv_relu(a2, w3_ref, b3, C2, L3)                # (C3, L3)

            # Compact the strided (C3, L3) activation: keep only the valid columns
            # h*W0 .. h*W0 + W3s - 1 (drops the wrap-around garbage lanes).
            for hh in range(H3):
                a3c_ref[:, hh * W3s:(hh + 1) * W3s] = a3[:, hh * W0:hh * W0 + W3s]
            # Scatter channels into PyTorch NCHW flatten order -> row n of (Nb, FLAT).
            for c in range(C3):
                flat_ref[n:n + 1, c * HW3:(c + 1) * HW3] = a3c_ref[c:c + 1, :]

        # fc1 weight needed now; its DMA has been running behind the conv compute.
        wfc1_copy.wait()

        flat = flat_ref[...]                                      # (Nb, FLAT)
        hidden = jnp.dot(flat, wfc1_vmem[...],
                         preferred_element_type=jnp.float32)      # one GEMM for the batch
        hidden = jnp.maximum(hidden + bfc1_ref[...], 0.0)         # (Nb, Nfc1)
        y = jnp.dot(hidden, wfc2_ref[...],
                    preferred_element_type=jnp.float32) + bfc2_ref[...]
        o_ref[...] = y.astype(o_ref.dtype)                        # (Nb, Nout)

    small_inputs = (x_flat, w1t, prepped["b1"], w2t, prepped["b2"], w3t, prepped["b3"],
                    prepped["bfc1"], prepped["wfc2"], prepped["bfc2"])
    wfc1 = prepped["wfc1"]

    flops = 2 * Nb * (L1 * C1 * Cin0 * KK + L2 * C2 * C1 * KK + L3 * C3 * C2 * KK
                      + FLAT * Nfc1 + Nfc1 * Nout)
    bytes_accessed = 4 * (sum(int(a.size) for a in small_inputs)
                          + int(wfc1.size) + Nb * Nout)

    return pl.pallas_call(
        kernel,
        out_shape=jax.ShapeDtypeStruct((Nb, Nout), jnp.float32),
        grid=(1,),
        in_specs=[_full_spec(a) for a in small_inputs]
                 + [pl.BlockSpec(memory_space=pl.ANY)],           # wfc1 stays in HBM
        out_specs=pl.BlockSpec((Nb, Nout), lambda i: (0, 0)),
        scratch_shapes=[
            pltpu.VMEM((C3, HW3), jnp.float32),      # compacted conv3 activation
            pltpu.VMEM((Nb, FLAT), jnp.float32),     # flattened fc1 input (whole batch)
            pltpu.VMEM((FLAT, Nfc1), jnp.float32),   # fc1 weight landing buffer
            pltpu.SemaphoreType.DMA((1,)),
        ],
        compiler_params=pltpu.CompilerParams(dimension_semantics=("arbitrary",)),
        cost_estimate=pl.CostEstimate(flops=flops, transcendentals=0,
                                      bytes_accessed=bytes_accessed),
    )(*small_inputs, wfc1)


def init_params(key, kernel, imageX, imageY):
    keys = jax.random.split(key, 10)
    flat = 16 * (imageX - (kernel - 1) * 3) * (imageY - (kernel - 1) * 3)

    def u(k, shape, fan_in):
        bound = 1.0 / jnp.sqrt(jnp.float32(fan_in))
        return jax.random.uniform(k, shape, jnp.float32, -bound, bound)

    return {
        "conv1_w": u(keys[0], (8, 1, kernel, kernel), 1 * kernel * kernel),
        "conv1_b": u(keys[1], (8,), 1 * kernel * kernel),
        "conv2_w": u(keys[2], (16, 8, kernel, kernel), 8 * kernel * kernel),
        "conv2_b": u(keys[3], (16,), 8 * kernel * kernel),
        "conv3_w": u(keys[4], (16, 16, kernel, kernel), 16 * kernel * kernel),
        "conv3_b": u(keys[5], (16,), 16 * kernel * kernel),
        "fc1_w": u(keys[6], (flat, 256), flat),   # stored as (in, out)
        "fc1_b": u(keys[7], (256,), flat),
        "fc2_w": u(keys[8], (256, 11), 256),
        "fc2_b": u(keys[9], (11,), 256),
    }


def reference_forward(params, x):
    """Pure-JAX/XLA reference with PyTorch semantics (for self-check)."""
    hi = jax.lax.Precision.HIGHEST

    def conv(a, w, b):
        out = jax.lax.conv_general_dilated(
            a, w, window_strides=(1, 1), padding="VALID",
            dimension_numbers=("NCHW", "OIHW", "NCHW"), precision=hi)
        return jnp.maximum(out + b.reshape(1, -1, 1, 1), 0.0)

    a = conv(x, params["conv1_w"], params["conv1_b"])
    a = conv(a, params["conv2_w"], params["conv2_b"])
    a = conv(a, params["conv3_w"], params["conv3_b"])
    a = a.reshape(a.shape[0], -1)                                  # NCHW flatten (C,H,W)
    h = jnp.maximum(jnp.dot(a, params["fc1_w"], precision=hi) + params["fc1_b"], 0.0)
    return jnp.dot(h, params["fc2_w"], precision=hi) + params["fc2_b"]


if __name__ == "__main__":
    kernel_size = 5
    imageX = imageY = 20          # after 3 valid 5x5 convs -> 8x8, flat = 16*8*8 = 1024
    batch = 2

    key = jax.random.PRNGKey(0)
    pkey, xkey = jax.random.split(key)
    params = init_params(pkey, kernel_size, imageX, imageY)
    x = jax.random.normal(xkey, (batch, 1, imageX, imageY), jnp.float32)

    prepped = prepare_params(params)          # one-time layout prep, outside the hot path
    fwd = jax.jit(cnn_forward)

    out = jax.block_until_ready(fwd(prepped, x))
    assert out.shape == (batch, 11), out.shape

    ref = reference_forward(params, x)
    max_err = float(jnp.max(jnp.abs(out - ref)))
    assert max_err < 2e-2, f"mismatch vs reference: {max_err}"

    print("KERNEL_OK")
</pallas_src>

<mosaic_0001>
module attributes {stable_mosaic.version = 11 : i64} {
  func.func @kernel(%arg0: i32, %arg1: memref<2x1x400xf32, #tpu.memory_space<vmem>>, %arg2: memref<25x8x1xf32, #tpu.memory_space<vmem>>, %arg3: memref<8x1xf32, #tpu.memory_space<vmem>>, %arg4: memref<25x16x8xf32, #tpu.memory_space<vmem>>, %arg5: memref<16x1xf32, #tpu.memory_space<vmem>>, %arg6: memref<25x16x16xf32, #tpu.memory_space<vmem>>, %arg7: memref<16x1xf32, #tpu.memory_space<vmem>>, %arg8: memref<1x256xf32, #tpu.memory_space<vmem>>, %arg9: memref<256x11xf32, #tpu.memory_space<vmem>>, %arg10: memref<1x11xf32, #tpu.memory_space<vmem>>, %arg11: memref<1024x256xf32, #tpu.memory_space<any>>, %arg12: memref<2x11xf32, #tpu.memory_space<vmem>>, %arg13: memref<16x64xf32, #tpu.memory_space<vmem>>, %arg14: memref<2x1024xf32, #tpu.memory_space<vmem>>, %arg15: memref<1024x256xf32, #tpu.memory_space<vmem>>, %arg16: memref<1x!tpu.dma_semaphore, #tpu.memory_space<semaphore_mem>>) attributes {dimension_semantics = [#tpu.dimension_semantics<arbitrary>], iteration_bounds = array<i64: 1>, scalar_prefetch = 0 : i64, scratch_operands = 4 : i64, tpu.core_type = #tpu.core_type<tc>, window_params = [{pipeline_mode = #tpu.pipeline_mode<synchronous>, transform_indices = @transform_0, window_bounds = array<i64: 2, 1, 400>}, {pipeline_mode = #tpu.pipeline_mode<synchronous>, transform_indices = @transform_1, window_bounds = array<i64: 25, 8, 1>}, {pipeline_mode = #tpu.pipeline_mode<synchronous>, transform_indices = @transform_2, window_bounds = array<i64: 8, 1>}, {pipeline_mode = #tpu.pipeline_mode<synchronous>, transform_indices = @transform_3, window_bounds = array<i64: 25, 16, 8>}, {pipeline_mode = #tpu.pipeline_mode<synchronous>, transform_indices = @transform_4, window_bounds = array<i64: 16, 1>}, {pipeline_mode = #tpu.pipeline_mode<synchronous>, transform_indices = @transform_5, window_bounds = array<i64: 25, 16, 16>}, {pipeline_mode = #tpu.pipeline_mode<synchronous>, transform_indices = @transform_6, window_bounds = array<i64: 16, 1>}, {pipeline_mode = #tpu.pipeline_mode<synchronous>, transform_indices = @transform_7, window_bounds = array<i64: 1, 256>}, {pipeline_mode = #tpu.pipeline_mode<synchronous>, transform_indices = @transform_8, window_bounds = array<i64: 256, 11>}, {pipeline_mode = #tpu.pipeline_mode<synchronous>, transform_indices = @transform_9, window_bounds = array<i64: 1, 11>}, {}, {pipeline_mode = #tpu.pipeline_mode<synchronous>, transform_indices = @transform_11, window_bounds = array<i64: 2, 11>}]} {
    %c0_i32 = arith.constant 0 : i32
    %0 = tpu.memref_slice %arg16[%c0_i32] : memref<1x!tpu.dma_semaphore, #tpu.memory_space<semaphore_mem>> -> memref<1x!tpu.dma_semaphore, #tpu.memory_space<semaphore_mem>>
    %1 = tpu.memref_squeeze %0 : memref<1x!tpu.dma_semaphore, #tpu.memory_space<semaphore_mem>> -> memref<!tpu.dma_semaphore, #tpu.memory_space<semaphore_mem>>
    tpu.enqueue_dma source(%arg11 : memref<1024x256xf32, #tpu.memory_space<any>>) target(%arg15 : memref<1024x256xf32, #tpu.memory_space<vmem>>) target_semaphore(%1 : memref<!tpu.dma_semaphore, #tpu.memory_space<semaphore_mem>>)
    %c0 = arith.constant 0 : index
    %c0_0 = arith.constant 0 : index
    %2 = vector.load %arg3[%c0, %c0_0] : memref<8x1xf32, #tpu.memory_space<vmem>>, vector<8x1xf32>
    %c0_1 = arith.constant 0 : index
    %c0_2 = arith.constant 0 : index
    %3 = vector.load %arg5[%c0_1, %c0_2] : memref<16x1xf32, #tpu.memory_space<vmem>>, vector<16x1xf32>
    %c0_3 = arith.constant 0 : index
    %c0_4 = arith.constant 0 : index
    %4 = vector.load %arg7[%c0_3, %c0_4] : memref<16x1xf32, #tpu.memory_space<vmem>>, vector<16x1xf32>
    %c0_5 = arith.constant 0 : index
    %c0_6 = arith.constant 0 : index
    %c0_7 = arith.constant 0 : index
    %5 = vector.load %arg1[%c0_5, %c0_6, %c0_7] : memref<2x1x400xf32, #tpu.memory_space<vmem>>, vector<1x1x400xf32>
    %6 = vector.shape_cast %5 : vector<1x1x400xf32> to vector<1x400xf32>
    %7 = vector.extract_strided_slice %6 {offsets = [0, 0], sizes = [1, 316], strides = [1, 1]} : vector<1x400xf32> to vector<1x316xf32>
    %c0_8 = arith.constant 0 : index
    %c0_9 = arith.constant 0 : index
    %c0_10 = arith.constant 0 : index
    %8 = vector.load %arg2[%c0_8, %c0_9, %c0_10] : memref<25x8x1xf32, #tpu.memory_space<vmem>>, vector<1x8x1xf32>
    %9 = vector.shape_cast %8 : vector<1x8x1xf32> to vector<8x1xf32>
    %10 = vector.broadcast %9 : vector<8x1xf32> to vector<8x316xf32>
    %11 = vector.broadcast %7 : vector<1x316xf32> to vector<8x316xf32>
    %12 = arith.mulf %10, %11 : vector<8x316xf32>
    %13 = vector.extract_strided_slice %6 {offsets = [0, 1], sizes = [1, 316], strides = [1, 1]} : vector<1x400xf32> to vector<1x316xf32>
    %c1 = arith.constant 1 : index
    %c0_11 = arith.constant 0 : index
    %c0_12 = arith.constant 0 : index
    %14 = vector.load %arg2[%c1, %c0_11, %c0_12] : memref<25x8x1xf32, #tpu.memory_space<vmem>>, vector<1x8x1xf32>
    %15 = vector.shape_cast %14 : vector<1x8x1xf32> to vector<8x1xf32>
    %16 = vector.broadcast %15 : vector<8x1xf32> to vector<8x316xf32>
    %17 = vector.broadcast %13 : vector<1x316xf32> to vector<8x316xf32>
    %18 = arith.mulf %16, %17 : vector<8x316xf32>
    %19 = arith.addf %12, %18 : vector<8x316xf32>
    %20 = vector.extract_strided_slice %6 {offsets = [0, 2], sizes = [1, 316], strides = [1, 1]} : vector<1x400xf32> to vector<1x316xf32>
    %c2 = arith.constant 2 : index
    %c0_13 = arith.constant 0 : index
    %c0_14 = arith.constant 0 : index
    %21 = vector.load %arg2[%c2, %c0_13, %c0_14] : memref<25x8x1xf32, #tpu.memory_space<vmem>>, vector<1x8x1xf32>
    %22 = vector.shape_cast %21 : vector<1x8x1xf32> to vector<8x1xf32>
    %23 = vector.broadcast %22 : vector<8x1xf32> to vector<8x316xf32>
    %24 = vector.broadcast %20 : vector<1x316xf32> to vector<8x316xf32>
    %25 = arith.mulf %23, %24 : vector<8x316xf32>
    %26 = arith.addf %19, %25 : vector<8x316xf32>
    %27 = vector.extract_strided_slice %6 {offsets = [0, 3], sizes = [1, 316], strides = [1, 1]} : vector<1x400xf32> to vector<1x316xf32>
    %c3 = arith.constant 3 : index
    %c0_15 = arith.constant 0 : index
    %c0_16 = arith.constant 0 : index
    %28 = vector.load %arg2[%c3, %c0_15, %c0_16] : memref<25x8x1xf32, #tpu.memory_space<vmem>>, vector<1x8x1xf32>
    %29 = vector.shape_cast %28 : vector<1x8x1xf32> to vector<8x1xf32>
    %30 = vector.broadcast %29 : vector<8x1xf32> to vector<8x316xf32>
    %31 = vector.broadcast %27 : vector<1x316xf32> to vector<8x316xf32>
    %32 = arith.mulf %30, %31 : vector<8x316xf32>
    %33 = arith.addf %26, %32 : vector<8x316xf32>
    %34 = vector.extract_strided_slice %6 {offsets = [0, 4], sizes = [1, 316], strides = [1, 1]} : vector<1x400xf32> to vector<1x316xf32>
    %c4 = arith.constant 4 : index
    %c0_17 = arith.constant 0 : index
    %c0_18 = arith.constant 0 : index
    %35 = vector.load %arg2[%c4, %c0_17, %c0_18] : memref<25x8x1xf32, #tpu.memory_space<vmem>>, vector<1x8x1xf32>
    %36 = vector.shape_cast %35 : vector<1x8x1xf32> to vector<8x1xf32>
    %37 = vector.broadcast %36 : vector<8x1xf32> to vector<8x316xf32>
    %38 = vector.broadcast %34 : vector<1x316xf32> to vector<8x316xf32>
    %39 = arith.mulf %37, %38 : vector<8x316xf32>
    %40 = arith.addf %33, %39 : vector<8x316xf32>
    %41 = vector.extract_strided_slice %6 {offsets = [0, 20], sizes = [1, 316], strides = [1, 1]} : vector<1x400xf32> to vector<1x316xf32>
    %c5 = arith.constant 5 : index
    %c0_19 = arith.constant 0 : index
    %c0_20 = arith.constant 0 : index
    %42 = vector.load %arg2[%c5, %c0_19, %c0_20] : memref<25x8x1xf32, #tpu.memory_space<vmem>>, vector<1x8x1xf32>
    %43 = vector.shape_cast %42 : vector<1x8x1xf32> to vector<8x1xf32>
    %44 = vector.broadcast %43 : vector<8x1xf32> to vector<8x316xf32>
    %45 = vector.broadcast %41 : vector<1x316xf32> to vector<8x316xf32>
    %46 = arith.mulf %44, %45 : vector<8x316xf32>
    %47 = arith.addf %40, %46 : vector<8x316xf32>
    %48 = vector.extract_strided_slice %6 {offsets = [0, 21], sizes = [1, 316], strides = [1, 1]} : vector<1x400xf32> to vector<1x316xf32>
    %c6 = arith.constant 6 : index
    %c0_21 = arith.constant 0 : index
    %c0_22 = arith.constant 0 : index
    %49 = vector.load %arg2[%c6, %c0_21, %c0_22] : memref<25x8x1xf32, #tpu.memory_space<vmem>>, vector<1x8x1xf32>
    %50 = vector.shape_cast %49 : vector<1x8x1xf32> to vector<8x1xf32>
    %51 = vector.broadcast %50 : vector<8x1xf32> to vector<8x316xf32>
    %52 = vector.broadcast %48 : vector<1x316xf32> to vector<8x316xf32>
    %53 = arith.mulf %51, %52 : vector<8x316xf32>
    %54 = arith.addf %47, %53 : vector<8x316xf32>
    %55 = vector.extract_strided_slice %6 {offsets = [0, 22], sizes = [1, 316], strides = [1, 1]} : vector<1x400xf32> to vector<1x316xf32>
    %c7 = arith.constant 7 : index
    %c0_23 = arith.constant 0 : index
    %c0_24 = arith.constant 0 : index
    %56 = vector.load %arg2[%c7, %c0_23, %c0_24] : memref<25x8x1xf32, #tpu.memory_space<vmem>>, vector<1x8x1xf32>
    %57 = vector.shape_cast %56 : vector<1x8x1xf32> to vector<8x1xf32>
    %58 = vector.broadcast %57 : vector<8x1xf32> to vector<8x316xf32>
    %59 = vector.broadcast %55 : vector<1x316xf32> to vector<8x316xf32>
    %60 = arith.mulf %58, %59 : vector<8x316xf32>
    %61 = arith.addf %54, %60 : vector<8x316xf32>
    %62 = vector.extract_strided_slice %6 {offsets = [0, 23], sizes = [1, 316], strides = [1, 1]} : vector<1x400xf32> to vector<1x316xf32>
    %c8 = arith.constant 8 : index
    %c0_25 = arith.constant 0 : index
    %c0_26 = arith.constant 0 : index
    %63 = vector.load %arg2[%c8, %c0_25, %c0_26] : memref<25x8x1xf32, #tpu.memory_space<vmem>>, vector<1x8x1xf32>
    %64 = vector.shape_cast %63 : vector<1x8x1xf32> to vector<8x1xf32>
    %65 = vector.broadcast %64 : vector<8x1xf32> to vector<8x316xf32>
    %66 = vector.broadcast %62 : vector<1x316xf32> to vector<8x316xf32>
    %67 = arith.mulf %65, %66 : vector<8x316xf32>
    %68 = arith.addf %61, %67 : vector<8x316xf32>
    %69 = vector.extract_strided_slice %6 {offsets = [0, 24], sizes = [1, 316], strides = [1, 1]} : vector<1x400xf32> to vector<1x316xf32>
    %c9 = arith.constant 9 : index
    %c0_27 = arith.constant 0 : index
    %c0_28 = arith.constant 0 : index
    %70 = vector.load %arg2[%c9, %c0_27, %c0_28] : memref<25x8x1xf32, #tpu.memory_space<vmem>>, vector<1x8x1xf32>
    %71 = vector.shape_cast %70 : vector<1x8x1xf32> to vector<8x1xf32>
    %72 = vector.broadcast %71 : vector<8x1xf32> to vector<8x316xf32>
    %73 = vector.broadcast %69 : vector<1x316xf32> to vector<8x316xf32>
    %74 = arith.mulf %72, %73 : vector<8x316xf32>
    %75 = arith.addf %68, %74 : vector<8x316xf32>
    %76 = vector.extract_strided_slice %6 {offsets = [0, 40], sizes = [1, 316], strides = [1, 1]} : vector<1x400xf32> to vector<1x316xf32>
    %c10 = arith.constant 10 : index
    %c0_29 = arith.constant 0 : index
    %c0_30 = arith.constant 0 : index
    %77 = vector.load %arg2[%c10, %c0_29, %c0_30] : memref<25x8x1xf32, #tpu.memory_space<vmem>>, vector<1x8x1xf32>
    %78 = vector.shape_cast %77 : vector<1x8x1xf32> to vector<8x1xf32>
    %79 = vector.broadcast %78 : vector<8x1xf32> to vector<8x316xf32>
    %80 = vector.broadcast %76 : vector<1x316xf32> to vector<8x316xf32>
    %81 = arith.mulf %79, %80 : vector<8x316xf32>
    %82 = arith.addf %75, %81 : vector<8x316xf32>
    %83 = vector.extract_strided_slice %6 {offsets = [0, 41], sizes = [1, 316], strides = [1, 1]} : vector<1x400xf32> to vector<1x316xf32>
    %c11 = arith.constant 11 : index
    %c0_31 = arith.constant 0 : index
    %c0_32 = arith.constant 0 : index
    %84 = vector.load %arg2[%c11, %c0_31, %c0_32] : memref<25x8x1xf32, #tpu.memory_space<vmem>>, vector<1x8x1xf32>
    %85 = vector.shape_cast %84 : vector<1x8x1xf32> to vector<8x1xf32>
    %86 = vector.broadcast %85 : vector<8x1xf32> to vector<8x316xf32>
    %87 = vector.broadcast %83 : vector<1x316xf32> to vector<8x316xf32>
    %88 = arith.mulf %86, %87 : vector<8x316xf32>
    %89 = arith.addf %82, %88 : vector<8x316xf32>
    %90 = vector.extract_strided_slice %6 {offsets = [0, 42], sizes = [1, 316], strides = [1, 1]} : vector<1x400xf32> to vector<1x316xf32>
    %c12 = arith.constant 12 : index
    %c0_33 = arith.constant 0 : index
    %c0_34 = arith.constant 0 : index
    %91 = vector.load %arg2[%c12, %c0_33, %c0_34] : memref<25x8x1xf32, #tpu.memory_space<vmem>>, vector<1x8x1xf32>
    %92 = vector.shape_cast %91 : vector<1x8x1xf32> to vector<8x1xf32>
    %93 = vector.broadcast %92 : vector<8x1xf32> to vector<8x316xf32>
    %94 = vector.broadcast %90 : vector<1x316xf32> to vector<8x316xf32>
    %95 = arith.mulf %93, %94 : vector<8x316xf32>
    %96 = arith.addf %89, %95 : vector<8x316xf32>
    %97 = vector.extract_strided_slice %6 {offsets = [0, 43], sizes = [1, 316], strides = [1, 1]} : vector<1x400xf32> to vector<1x316xf32>
    %c13 = arith.constant 13 : index
    %c0_35 = arith.constant 0 : index
    %c0_36 = arith.constant 0 : index
    %98 = vector.load %arg2[%c13, %c0_35, %c0_36] : memref<25x8x1xf32, #tpu.memory_space<vmem>>, vector<1x8x1xf32>
    %99 = vector.shape_cast %98 : vector<1x8x1xf32> to vector<8x1xf32>
    %100 = vector.broadcast %99 : vector<8x1xf32> to vector<8x316xf32>
    %101 = vector.broadcast %97 : vector<1x316xf32> to vector<8x316xf32>
    %102 = arith.mulf %100, %101 : vector<8x316xf32>
    %103 = arith.addf %96, %102 : vector<8x316xf32>
    %104 = vector.extract_strided_slice %6 {offsets = [0, 44], sizes = [1, 316], strides = [1, 1]} : vector<1x400xf32> to vector<1x316xf32>
    %c14 = arith.constant 14 : index
    %c0_37 = arith.constant 0 : index
    %c0_38 = arith.constant 0 : index
    %105 = vector.load %arg2[%c14, %c0_37, %c0_38] : memref<25x8x1xf32, #tpu.memory_space<vmem>>, vector<1x8x1xf32>
    %106 = vector.shape_cast %105 : vector<1x8x1xf32> to vector<8x1xf32>
    %107 = vector.broadcast %106 : vector<8x1xf32> to vector<8x316xf32>
    %108 = vector.broadcast %104 : vector<1x316xf32> to vector<8x316xf32>
    %109 = arith.mulf %107, %108 : vector<8x316xf32>
    %110 = arith.addf %103, %109 : vector<8x316xf32>
    %111 = vector.extract_strided_slice %6 {offsets = [0, 60], sizes = [1, 316], strides = [1, 1]} : vector<1x400xf32> to vector<1x316xf32>
    %c15 = arith.constant 15 : index
    %c0_39 = arith.constant 0 : index
    %c0_40 = arith.constant 0 : index
    %112 = vector.load %arg2[%c15, %c0_39, %c0_40] : memref<25x8x1xf32, #tpu.memory_space<vmem>>, vector<1x8x1xf32>
    %113 = vector.shape_cast %112 : vector<1x8x1xf32> to vector<8x1xf32>
    %114 = vector.broadcast %113 : vector<8x1xf32> to vector<8x316xf32>
    %115 = vector.broadcast %111 : vector<1x316xf32> to vector<8x316xf32>
    %116 = arith.mulf %114, %115 : vector<8x316xf32>
    %117 = arith.addf %110, %116 : vector<8x316xf32>
    %118 = vector.extract_strided_slice %6 {offsets = [0, 61], sizes = [1, 316], strides = [1, 1]} : vector<1x400xf32> to vector<1x316xf32>
    %c16 = arith.constant 16 : index
    %c0_41 = arith.constant 0 : index
    %c0_42 = arith.constant 0 : index
    %119 = vector.load %arg2[%c16, %c0_41, %c0_42] : memref<25x8x1xf32, #tpu.memory_space<vmem>>, vector<1x8x1xf32>
    %120 = vector.shape_cast %119 : vector<1x8x1xf32> to vector<8x1xf32>
    %121 = vector.broadcast %120 : vector<8x1xf32> to vector<8x316xf32>
    %122 = vector.broadcast %118 : vector<1x316xf32> to vector<8x316xf32>
    %123 = arith.mulf %121, %122 : vector<8x316xf32>
    %124 = arith.addf %117, %123 : vector<8x316xf32>
    %125 = vector.extract_strided_slice %6 {offsets = [0, 62], sizes = [1, 316], strides = [1, 1]} : vector<1x400xf32> to vector<1x316xf32>
    %c17 = arith.constant 17 : index
    %c0_43 = arith.constant 0 : index
    %c0_44 = arith.constant 0 : index
    %126 = vector.load %arg2[%c17, %c0_43, %c0_44] : memref<25x8x1xf32, #tpu.memory_space<vmem>>, vector<1x8x1xf32>
    %127 = vector.shape_cast %126 : vector<1x8x1xf32> to vector<8x1xf32>
    %128 = vector.broadcast %127 : vector<8x1xf32> to vector<8x316xf32>
    %129 = vector.broadcast %125 : vector<1x316xf32> to vector<8x316xf32>
    %130 = arith.mulf %128, %129 : vector<8x316xf32>
    %131 = arith.addf %124, %130 : vector<8x316xf32>
    %132 = vector.extract_strided_slice %6 {offsets = [0, 63], sizes = [1, 316], strides = [1, 1]} : vector<1x400xf32> to vector<1x316xf32>
    %c18 = arith.constant 18 : index
    %c0_45 = arith.constant 0 : index
    %c0_46 = arith.constant 0 : index
    %133 = vector.load %arg2[%c18, %c0_45, %c0_46] : memref<25x8x1xf32, #tpu.memory_space<vmem>>, vector<1x8x1xf32>
    %134 = vector.shape_cast %133 : vector<1x8x1xf32> to vector<8x1xf32>
    %135 = vector.broadcast %134 : vector<8x1xf32> to vector<8x316xf32>
    %136 = vector.broadcast %132 : vector<1x316xf32> to vector<8x316xf32>
    %137 = arith.mulf %135, %136 : vector<8x316xf32>
    %138 = arith.addf %131, %137 : vector<8x316xf32>
    %139 = vector.extract_strided_slice %6 {offsets = [0, 64], sizes = [1, 316], strides = [1, 1]} : vector<1x400xf32> to vector<1x316xf32>
    %c19 = arith.constant 19 : index
    %c0_47 = arith.constant 0 : index
    %c0_48 = arith.constant 0 : index
    %140 = vector.load %arg2[%c19, %c0_47, %c0_48] : memref<25x8x1xf32, #tpu.memory_space<vmem>>, vector<1x8x1xf32>
    %141 = vector.shape_cast %140 : vector<1x8x1xf32> to vector<8x1xf32>
    %142 = vector.broadcast %141 : vector<8x1xf32> to vector<8x316xf32>
    %143 = vector.broadcast %139 : vector<1x316xf32> to vector<8x316xf32>
    %144 = arith.mulf %142, %143 : vector<8x316xf32>
    %145 = arith.addf %138, %144 : vector<8x316xf32>
    %146 = vector.extract_strided_slice %6 {offsets = [0, 80], sizes = [1, 316], strides = [1, 1]} : vector<1x400xf32> to vector<1x316xf32>
    %c20 = arith.constant 20 : index
    %c0_49 = arith.constant 0 : index
    %c0_50 = arith.constant 0 : index
    %147 = vector.load %arg2[%c20, %c0_49, %c0_50] : memref<25x8x1xf32, #tpu.memory_space<vmem>>, vector<1x8x1xf32>
    %148 = vector.shape_cast %147 : vector<1x8x1xf32> to vector<8x1xf32>
    %149 = vector.broadcast %148 : vector<8x1xf32> to vector<8x316xf32>
    %150 = vector.broadcast %146 : vector<1x316xf32> to vector<8x316xf32>
    %151 = arith.mulf %149, %150 : vector<8x316xf32>
    %152 = arith.addf %145, %151 : vector<8x316xf32>
    %153 = vector.extract_strided_slice %6 {offsets = [0, 81], sizes = [1, 316], strides = [1, 1]} : vector<1x400xf32> to vector<1x316xf32>
    %c21 = arith.constant 21 : index
    %c0_51 = arith.constant 0 : index
    %c0_52 = arith.constant 0 : index
    %154 = vector.load %arg2[%c21, %c0_51, %c0_52] : memref<25x8x1xf32, #tpu.memory_space<vmem>>, vector<1x8x1xf32>
    %155 = vector.shape_cast %154 : vector<1x8x1xf32> to vector<8x1xf32>
    %156 = vector.broadcast %155 : vector<8x1xf32> to vector<8x316xf32>
    %157 = vector.broadcast %153 : vector<1x316xf32> to vector<8x316xf32>
    %158 = arith.mulf %156, %157 : vector<8x316xf32>
    %159 = arith.addf %152, %158 : vector<8x316xf32>
    %160 = vector.extract_strided_slice %6 {offsets = [0, 82], sizes = [1, 316], strides = [1, 1]} : vector<1x400xf32> to vector<1x316xf32>
    %c22 = arith.constant 22 : index
    %c0_53 = arith.constant 0 : index
    %c0_54 = arith.constant 0 : index
    %161 = vector.load %arg2[%c22, %c0_53, %c0_54] : memref<25x8x1xf32, #tpu.memory_space<vmem>>, vector<1x8x1xf32>
    %162 = vector.shape_cast %161 : vector<1x8x1xf32> to vector<8x1xf32>
    %163 = vector.broadcast %162 : vector<8x1xf32> to vector<8x316xf32>
    %164 = vector.broadcast %160 : vector<1x316xf32> to vector<8x316xf32>
    %165 = arith.mulf %163, %164 : vector<8x316xf32>
    %166 = arith.addf %159, %165 : vector<8x316xf32>
    %167 = vector.extract_strided_slice %6 {offsets = [0, 83], sizes = [1, 316], strides = [1, 1]} : vector<1x400xf32> to vector<1x316xf32>
    %c23 = arith.constant 23 : index
    %c0_55 = arith.constant 0 : index
    %c0_56 = arith.constant 0 : index
    %168 = vector.load %arg2[%c23, %c0_55, %c0_56] : memref<25x8x1xf32, #tpu.memory_space<vmem>>, vector<1x8x1xf32>
    %169 = vector.shape_cast %168 : vector<1x8x1xf32> to vector<8x1xf32>
    %170 = vector.broadcast %169 : vector<8x1xf32> to vector<8x316xf32>
    %171 = vector.broadcast %167 : vector<1x316xf32> to vector<8x316xf32>
    %172 = arith.mulf %170, %171 : vector<8x316xf32>
    %173 = arith.addf %166, %172 : vector<8x316xf32>
    %174 = vector.extract_strided_slice %6 {offsets = [0, 84], sizes = [1, 316], strides = [1, 1]} : vector<1x400xf32> to vector<1x316xf32>
    %c24 = arith.constant 24 : index
    %c0_57 = arith.constant 0 : index
    %c0_58 = arith.constant 0 : index
    %175 = vector.load %arg2[%c24, %c0_57, %c0_58] : memref<25x8x1xf32, #tpu.memory_space<vmem>>, vector<1x8x1xf32>
    %176 = vector.shape_cast %175 : vector<1x8x1xf32> to vector<8x1xf32>
    %177 = vector.broadcast %176 : vector<8x1xf32> to vector<8x316xf32>
    %178 = vector.broadcast %174 : vector<1x316xf32> to vector<8x316xf32>
    %179 = arith.mulf %177, %178 : vector<8x316xf32>
    %180 = arith.addf %173, %179 : vector<8x316xf32>
    %181 = vector.broadcast %2 : vector<8x1xf32> to vector<8x316xf32>
    %182 = arith.addf %180, %181 : vector<8x316xf32>
    %cst = arith.constant 0.000000e+00 : f32
    %183 = vector.broadcast %cst : f32 to vector<8x316xf32>
    %184 = arith.maximumf %182, %183 : vector<8x316xf32>
    %185 = vector.extract_strided_slice %184 {offsets = [0, 0], sizes = [8, 232], strides = [1, 1]} : vector<8x316xf32> to vector<8x232xf32>
    %c0_59 = arith.constant 0 : index
    %c0_60 = arith.constant 0 : index
    %c0_61 = arith.constant 0 : index
    %186 = vector.load %arg4[%c0_59, %c0_60, %c0_61] : memref<25x16x8xf32, #tpu.memory_space<vmem>>, vector<1x16x8xf32>
    %187 = vector.shape_cast %186 : vector<1x16x8xf32> to vector<16x8xf32>
    %cst_62 = arith.constant dense<0.000000e+00> : vector<16x232xf32>
    %188 = tpu.matmul %187, %185, %cst_62 {dimension_numbers = #tpu.dot_dimension_numbers<[1], [0], [0], [1], [0, 0, 1, 1], [], []>} : vector<16x8xf32>, vector<8x232xf32>, vector<16x232xf32> -> vector<16x232xf32>
    %189 = vector.extract_strided_slice %184 {offsets = [0, 1], sizes = [8, 232], strides = [1, 1]} : vector<8x316xf32> to vector<8x232xf32>
    %c1_63 = arith.constant 1 : index
    %c0_64 = arith.constant 0 : index
    %c0_65 = arith.constant 0 : index
    %190 = vector.load %arg4[%c1_63, %c0_64, %c0_65] : memref<25x16x8xf32, #tpu.memory_space<vmem>>, vector<1x16x8xf32>
    %191 = vector.shape_cast %190 : vector<1x16x8xf32> to vector<16x8xf32>
    %cst_66 = arith.constant dense<0.000000e+00> : vector<16x232xf32>
    %192 = tpu.matmul %191, %189, %cst_66 {dimension_numbers = #tpu.dot_dimension_numbers<[1], [0], [0], [1], [0, 0, 1, 1], [], []>} : vector<16x8xf32>, vector<8x232xf32>, vector<16x232xf32> -> vector<16x232xf32>
    %193 = arith.addf %188, %192 : vector<16x232xf32>
    %194 = vector.extract_strided_slice %184 {offsets = [0, 2], sizes = [8, 232], strides = [1, 1]} : vector<8x316xf32> to vector<8x232xf32>
    %c2_67 = arith.constant 2 : index
    %c0_68 = arith.constant 0 : index
    %c0_69 = arith.constant 0 : index
    %195 = vector.load %arg4[%c2_67, %c0_68, %c0_69] : memref<25x16x8xf32, #tpu.memory_space<vmem>>, vector<1x16x8xf32>
    %196 = vector.shape_cast %195 : vector<1x16x8xf32> to vector<16x8xf32>
    %cst_70 = arith.constant dense<0.000000e+00> : vector<16x232xf32>
    %197 = tpu.matmul %196, %194, %cst_70 {dimension_numbers = #tpu.dot_dimension_numbers<[1], [0], [0], [1], [0, 0, 1, 1], [], []>} : vector<16x8xf32>, vector<8x232xf32>, vector<16x232xf32> -> vector<16x232xf32>
    %198 = arith.addf %193, %197 : vector<16x232xf32>
    %199 = vector.extract_strided_slice %184 {offsets = [0, 3], sizes = [8, 232], strides = [1, 1]} : vector<8x316xf32> to vector<8x232xf32>
    %c3_71 = arith.constant 3 : index
    %c0_72 = arith.constant 0 : index
    %c0_73 = arith.constant 0 : index
    %200 = vector.load %arg4[%c3_71, %c0_72, %c0_73] : memref<25x16x8xf32, #tpu.memory_space<vmem>>, vector<1x16x8xf32>
    %201 = vector.shape_cast %200 : vector<1x16x8xf32> to vector<16x8xf32>
    %cst_74 = arith.constant dense<0.000000e+00> : vector<16x232xf32>
    %202 = tpu.matmul %201, %199, %cst_74 {dimension_numbers = #tpu.dot_dimension_numbers<[1], [0], [0], [1], [0, 0, 1, 1], [], []>} : vector<16x8xf32>, vector<8x232xf32>, vector<16x232xf32> -> vector<16x232xf32>
    %203 = arith.addf %198, %202 : vector<16x232xf32>
    %204 = vector.extract_strided_slice %184 {offsets = [0, 4], sizes = [8, 232], strides = [1, 1]} : vector<8x316xf32> to vector<8x232xf32>
    %c4_75 = arith.constant 4 : index
    %c0_76 = arith.constant 0 : index
    %c0_77 = arith.constant 0 : index
    %205 = vector.load %arg4[%c4_75, %c0_76, %c0_77] : memref<25x16x8xf32, #tpu.memory_space<vmem>>, vector<1x16x8xf32>
    %206 = vector.shape_cast %205 : vector<1x16x8xf32> to vector<16x8xf32>
    %cst_78 = arith.constant dense<0.000000e+00> : vector<16x232xf32>
    %207 = tpu.matmul %206, %204, %cst_78 {dimension_numbers = #tpu.dot_dimension_numbers<[1], [0], [0], [1], [0, 0, 1, 1], [], []>} : vector<16x8xf32>, vector<8x232xf32>, vector<16x232xf32> -> vector<16x232xf32>
    %208 = arith.addf %203, %207 : vector<16x232xf32>
    %209 = vector.extract_strided_slice %184 {offsets = [0, 20], sizes = [8, 232], strides = [1, 1]} : vector<8x316xf32> to vector<8x232xf32>
    %c5_79 = arith.constant 5 : index
    %c0_80 = arith.constant 0 : index
    %c0_81 = arith.constant 0 : index
    %210 = vector.load %arg4[%c5_79, %c0_80, %c0_81] : memref<25x16x8xf32, #tpu.memory_space<vmem>>, vector<1x16x8xf32>
    %211 = vector.shape_cast %210 : vector<1x16x8xf32> to vector<16x8xf32>
    %cst_82 = arith.constant dense<0.000000e+00> : vector<16x232xf32>
    %212 = tpu.matmul %211, %209, %cst_82 {dimension_numbers = #tpu.dot_dimension_numbers<[1], [0], [0], [1], [0, 0, 1, 1], [], []>} : vector<16x8xf32>, vector<8x232xf32>, vector<16x232xf32> -> vector<16x232xf32>
    %213 = arith.addf %208, %212 : vector<16x232xf32>
    %214 = vector.extract_strided_slice %184 {offsets = [0, 21], sizes = [8, 232], strides = [1, 1]} : vector<8x316xf32> to vector<8x232xf32>
    %c6_83 = arith.constant 6 : index
    %c0_84 = arith.constant 0 : index
    %c0_85 = arith.constant 0 : index
    %215 = vector.load %arg4[%c6_83, %c0_84, %c0_85] : memref<25x16x8xf32, #tpu.memory_space<vmem>>, vector<1x16x8xf32>
    %216 = vector.shape_cast %215 : vector<1x16x8xf32> to vector<16x8xf32>
    %cst_86 = arith.constant dense<0.000000e+00> : vector<16x232xf32>
    %217 = tpu.matmul %216, %214, %cst_86 {dimension_numbers = #tpu.dot_dimension_numbers<[1], [0], [0], [1], [0, 0, 1, 1], [], []>} : vector<16x8xf32>, vector<8x232xf32>, vector<16x232xf32> -> vector<16x232xf32>
    %218 = arith.addf %213, %217 : vector<16x232xf32>
    %219 = vector.extract_strided_slice %184 {offsets = [0, 22], sizes = [8, 232], strides = [1, 1]} : vector<8x316xf32> to vector<8x232xf32>
    %c7_87 = arith.constant 7 : index
    %c0_88 = arith.constant 0 : index
    %c0_89 = arith.constant 0 : index
    %220 = vector.load %arg4[%c7_87, %c0_88, %c0_89] : memref<25x16x8xf32, #tpu.memory_space<vmem>>, vector<1x16x8xf32>
    %221 = vector.shape_cast %220 : vector<1x16x8xf32> to vector<16x8xf32>
    %cst_90 = arith.constant dense<0.000000e+00> : vector<16x232xf32>
    %222 = tpu.matmul %221, %219, %cst_90 {dimension_numbers = #tpu.dot_dimension_numbers<[1], [0], [0], [1], [0, 0, 1, 1], [], []>} : vector<16x8xf32>, vector<8x232xf32>, vector<16x232xf32> -> vector<16x232xf32>
    %223 = arith.addf %218, %222 : vector<16x232xf32>
    %224 = vector.extract_strided_slice %184 {offsets = [0, 23], sizes = [8, 232], strides = [1, 1]} : vector<8x316xf32> to vector<8x232xf32>
    %c8_91 = arith.constant 8 : index
    %c0_92 = arith.constant 0 : index
    %c0_93 = arith.constant 0 : index
    %225 = vector.load %arg4[%c8_91, %c0_92, %c0_93] : memref<25x16x8xf32, #tpu.memory_space<vmem>>, vector<1x16x8xf32>
    %226 = vector.shape_cast %225 : vector<1x16x8xf32> to vector<16x8xf32>
    %cst_94 = arith.constant dense<0.000000e+00> : vector<16x232xf32>
    %227 = tpu.matmul %226, %224, %cst_94 {dimension_numbers = #tpu.dot_dimension_numbers<[1], [0], [0], [1], [0, 0, 1, 1], [], []>} : vector<16x8xf32>, vector<8x232xf32>, vector<16x232xf32> -> vector<16x232xf32>
    %228 = arith.addf %223, %227 : vector<16x232xf32>
    %229 = vector.extract_strided_slice %184 {offsets = [0, 24], sizes = [8, 232], strides = [1, 1]} : vector<8x316xf32> to vector<8x232xf32>
    %c9_95 = arith.constant 9 : index
    %c0_96 = arith.constant 0 : index
    %c0_97 = arith.constant 0 : index
    %230 = vector.load %arg4[%c9_95, %c0_96, %c0_97] : memref<25x16x8xf32, #tpu.memory_space<vmem>>, vector<1x16x8xf32>
    %231 = vector.shape_cast %230 : vector<1x16x8xf32> to vector<16x8xf32>
    %cst_98 = arith.constant dense<0.000000e+00> : vector<16x232xf32>
    %232 = tpu.matmul %231, %229, %cst_98 {dimension_numbers = #tpu.dot_dimension_numbers<[1], [0], [0], [1], [0, 0, 1, 1], [], []>} : vector<16x8xf32>, vector<8x232xf32>, vector<16x232xf32> -> vector<16x232xf32>
    %233 = arith.addf %228, %232 : vector<16x232xf32>
    %234 = vector.extract_strided_slice %184 {offsets = [0, 40], sizes = [8, 232], strides = [1, 1]} : vector<8x316xf32> to vector<8x232xf32>
    %c10_99 = arith.constant 10 : index
    %c0_100 = arith.constant 0 : index
    %c0_101 = arith.constant 0 : index
    %235 = vector.load %arg4[%c10_99, %c0_100, %c0_101] : memref<25x16x8xf32, #tpu.memory_space<vmem>>, vector<1x16x8xf32>
    %236 = vector.shape_cast %235 : vector<1x16x8xf32> to vector<16x8xf32>
    %cst_102 = arith.constant dense<0.000000e+00> : vector<16x232xf32>
    %237 = tpu.matmul %236, %234, %cst_102 {dimension_numbers = #tpu.dot_dimension_numbers<[1], [0], [0], [1], [0, 0, 1, 1], [], []>} : vector<16x8xf32>, vector<8x232xf32>, vector<16x232xf32> -> vector<16x232xf32>
    %238 = arith.addf %233, %237 : vector<16x232xf32>
    %239 = vector.extract_strided_slice %184 {offsets = [0, 41], sizes = [8, 232], strides = [1, 1]} : vector<8x316xf32> to vector<8x232xf32>
    %c11_103 = arith.constant 11 : index
    %c0_104 = arith.constant 0 : index
    %c0_105 = arith.constant 0 : index
    %240 = vector.load %arg4[%c11_103, %c0_104, %c0_105] : memref<25x16x8xf32, #tpu.memory_space<vmem>>, vector<1x16x8xf32>
    %241 = vector.shape_cast %240 : vector<1x16x8xf32> to vector<16x8xf32>
    %cst_106 = arith.constant dense<0.000000e+00> : vector<16x232xf32>
    %242 = tpu.matmul %241, %239, %cst_106 {dimension_numbers = #tpu.dot_dimension_numbers<[1], [0], [0], [1], [0, 0, 1, 1], [], []>} : vector<16x8xf32>, vector<8x232xf32>, vector<16x232xf32> -> vector<16x232xf32>
    %243 = arith.addf %238, %242 : vector<16x232xf32>
    %244 = vector.extract_strided_slice %184 {offsets = [0, 42], sizes = [8, 232], strides = [1, 1]} : vector<8x316xf32> to vector<8x232xf32>
    %c12_107 = arith.constant 12 : index
    %c0_108 = arith.constant 0 : index
    %c0_109 = arith.constant 0 : index
    %245 = vector.load %arg4[%c12_107, %c0_108, %c0_109] : memref<25x16x8xf32, #tpu.memory_space<vmem>>, vector<1x16x8xf32>
    %246 = vector.shape_cast %245 : vector<1x16x8xf32> to vector<16x8xf32>
    %cst_110 = arith.constant dense<0.000000e+00> : vector<16x232xf32>
    %247 = tpu.matmul %246, %244, %cst_110 {dimension_numbers = #tpu.dot_dimension_numbers<[1], [0], [0], [1], [0, 0, 1, 1], [], []>} : vector<16x8xf32>, vector<8x232xf32>, vector<16x232xf32> -> vector<16x232xf32>
    %248 = arith.addf %243, %247 : vector<16x232xf32>
    %249 = vector.extract_strided_slice %184 {offsets = [0, 43], sizes = [8, 232], strides = [1, 1]} : vector<8x316xf32> to vector<8x232xf32>
    %c13_111 = arith.constant 13 : index
    %c0_112 = arith.constant 0 : index
    %c0_113 = arith.constant 0 : index
    %250 = vector.load %arg4[%c13_111, %c0_112, %c0_113] : memref<25x16x8xf32, #tpu.memory_space<vmem>>, vector<1x16x8xf32>
    %251 = vector.shape_cast %250 : vector<1x16x8xf32> to vector<16x8xf32>
    %cst_114 = arith.constant dense<0.000000e+00> : vector<16x232xf32>
    %252 = tpu.matmul %251, %249, %cst_114 {dimension_numbers = #tpu.dot_dimension_numbers<[1], [0], [0], [1], [0, 0, 1, 1], [], []>} : vector<16x8xf32>, vector<8x232xf32>, vector<16x232xf32> -> vector<16x232xf32>
    %253 = arith.addf %248, %252 : vector<16x232xf32>
    %254 = vector.extract_strided_slice %184 {offsets = [0, 44], sizes = [8, 232], strides = [1, 1]} : vector<8x316xf32> to vector<8x232xf32>
    %c14_115 = arith.constant 14 : index
    %c0_116 = arith.constant 0 : index
    %c0_117 = arith.constant 0 : index
    %255 = vector.load %arg4[%c14_115, %c0_116, %c0_117] : memref<25x16x8xf32, #tpu.memory_space<vmem>>, vector<1x16x8xf32>
    %256 = vector.shape_cast %255 : vector<1x16x8xf32> to vector<16x8xf32>
    %cst_118 = arith.constant dense<0.000000e+00> : vector<16x232xf32>
    %257 = tpu.matmul %256, %254, %cst_118 {dimension_numbers = #tpu.dot_dimension_numbers<[1], [0], [0], [1], [0, 0, 1, 1], [], []>} : vector<16x8xf32>, vector<8x232xf32>, vector<16x232xf32> -> vector<16x232xf32>
    %258 = arith.addf %253, %257 : vector<16x232xf32>
    %259 = vector.extract_strided_slice %184 {offsets = [0, 60], sizes = [8, 232], strides = [1, 1]} : vector<8x316xf32> to vector<8x232xf32>
    %c15_119 = arith.constant 15 : index
    %c0_120 = arith.constant 0 : index
    %c0_121 = arith.constant 0 : index
    %260 = vector.load %arg4[%c15_119, %c0_120, %c0_121] : memref<25x16x8xf32, #tpu.memory_space<vmem>>, vector<1x16x8xf32>
    %261 = vector.shape_cast %260 : vector<1x16x8xf32> to vector<16x8xf32>
    %cst_122 = arith.constant dense<0.000000e+00> : vector<16x232xf32>
    %262 = tpu.matmul %261, %259, %cst_122 {dimension_numbers = #tpu.dot_dimension_numbers<[1], [0], [0], [1], [0, 0, 1, 1], [], []>} : vector<16x8xf32>, vector<8x232xf32>, vector<16x232xf32> -> vector<16x232xf32>
    %263 = arith.addf %258, %262 : vector<16x232xf32>
    %264 = vector.extract_strided_slice %184 {offsets = [0, 61], sizes = [8, 232], strides = [1, 1]} : vector<8x316xf32> to vector<8x232xf32>
    %c16_123 = arith.constant 16 : index
    %c0_124 = arith.constant 0 : index
    %c0_125 = arith.constant 0 : index
    %265 = vector.load %arg4[%c16_123, %c0_124, %c0_125] : memref<25x16x8xf32, #tpu.memory_space<vmem>>, vector<1x16x8xf32>
    %266 = vector.shape_cast %265 : vector<1x16x8xf32> to vector<16x8xf32>
    %cst_126 = arith.constant dense<0.000000e+00> : vector<16x232xf32>
    %267 = tpu.matmul %266, %264, %cst_126 {dimension_numbers = #tpu.dot_dimension_numbers<[1], [0], [0], [1], [0, 0, 1, 1], [], []>} : vector<16x8xf32>, vector<8x232xf32>, vector<16x232xf32> -> vector<16x232xf32>
    %268 = arith.addf %263, %267 : vector<16x232xf32>
    %269 = vector.extract_strided_slice %184 {offsets = [0, 62], sizes = [8, 232], strides = [1, 1]} : vector<8x316xf32> to vector<8x232xf32>
    %c17_127 = arith.constant 17 : index
    %c0_128 = arith.constant 0 : index
    %c0_129 = arith.constant 0 : index
    %270 = vector.load %arg4[%c17_127, %c0_128, %c0_129] : memref<25x16x8xf32, #tpu.memory_space<vmem>>, vector<1x16x8xf32>
    %271 = vector.shape_cast %270 : vector<1x16x8xf32> to vector<16x8xf32>
    %cst_130 = arith.constant dense<0.000000e+00> : vector<16x232xf32>
    %272 = tpu.matmul %271, %269, %cst_130 {dimension_numbers = #tpu.dot_dimension_numbers<[1], [0], [0], [1], [0, 0, 1, 1], [], []>} : vector<16x8xf32>, vector<8x232xf32>, vector<16x232xf32> -> vector<16x232xf32>
    %273 = arith.addf %268, %272 : vector<16x232xf32>
    %274 = vector.extract_strided_slice %184 {offsets = [0, 63], sizes = [8, 232], strides = [1, 1]} : vector<8x316xf32> to vector<8x232xf32>
    %c18_131 = arith.constant 18 : index
    %c0_132 = arith.constant 0 : index
    %c0_133 = arith.constant 0 : index
    %275 = vector.load %arg4[%c18_131, %c0_132, %c0_133] : memref<25x16x8xf32, #tpu.memory_space<vmem>>, vector<1x16x8xf32>
    %276 = vector.shape_cast %275 : vector<1x16x8xf32> to vector<16x8xf32>
    %cst_134 = arith.constant dense<0.000000e+00> : vector<16x232xf32>
    %277 = tpu.matmul %276, %274, %cst_134 {dimension_numbers = #tpu.dot_dimension_numbers<[1], [0], [0], [1], [0, 0, 1, 1], [], []>} : vector<16x8xf32>, vector<8x232xf32>, vector<16x232xf32> -> vector<16x232xf32>
    %278 = arith.addf %273, %277 : vector<16x232xf32>
    %279 = vector.extract_strided_slice %184 {offsets = [0, 64], sizes = [8, 232], strides = [1, 1]} : vector<8x316xf32> to vector<8x232xf32>
    %c19_135 = arith.constant 19 : index
    %c0_136 = arith.constant 0 : index
    %c0_137 = arith.constant 0 : index
    %280 = vector.load %arg4[%c19_135, %c0_136, %c0_137] : memref<25x16x8xf32, #tpu.memory_space<vmem>>, vector<1x16x8xf32>
    %281 = vector.shape_cast %280 : vector<1x16x8xf32> to vector<16x8xf32>
    %cst_138 = arith.constant dense<0.000000e+00> : vector<16x232xf32>
    %282 = tpu.matmul %281, %279, %cst_138 {dimension_numbers = #tpu.dot_dimension_numbers<[1], [0], [0], [1], [0, 0, 1, 1], [], []>} : vector<16x8xf32>, vector<8x232xf32>, vector<16x232xf32> -> vector<16x232xf32>
    %283 = arith.addf %278, %282 : vector<16x232xf32>
    %284 = vector.extract_strided_slice %184 {offsets = [0, 80], sizes = [8, 232], strides = [1, 1]} : vector<8x316xf32> to vector<8x232xf32>
    %c20_139 = arith.constant 20 : index
    %c0_140 = arith.constant 0 : index
    %c0_141 = arith.constant 0 : index
    %285 = vector.load %arg4[%c20_139, %c0_140, %c0_141] : memref<25x16x8xf32, #tpu.memory_space<vmem>>, vector<1x16x8xf32>
    %286 = vector.shape_cast %285 : vector<1x16x8xf32> to vector<16x8xf32>
    %cst_142 = arith.constant dense<0.000000e+00> : vector<16x232xf32>
    %287 = tpu.matmul %286, %284, %cst_142 {dimension_numbers = #tpu.dot_dimension_numbers<[1], [0], [0], [1], [0, 0, 1, 1], [], []>} : vector<16x8xf32>, vector<8x232xf32>, vector<16x232xf32> -> vector<16x232xf32>
    %288 = arith.addf %283, %287 : vector<16x232xf32>
    %289 = vector.extract_strided_slice %184 {offsets = [0, 81], sizes = [8, 232], strides = [1, 1]} : vector<8x316xf32> to vector<8x232xf32>
    %c21_143 = arith.constant 21 : index
    %c0_144 = arith.constant 0 : index
    %c0_145 = arith.constant 0 : index
    %290 = vector.load %arg4[%c21_143, %c0_144, %c0_145] : memref<25x16x8xf32, #tpu.memory_space<vmem>>, vector<1x16x8xf32>
    %291 = vector.shape_cast %290 : vector<1x16x8xf32> to vector<16x8xf32>
    %cst_146 = arith.constant dense<0.000000e+00> : vector<16x232xf32>
    %292 = tpu.matmul %291, %289, %cst_146 {dimension_numbers = #tpu.dot_dimension_numbers<[1], [0], [0], [1], [0, 0, 1, 1], [], []>} : vector<16x8xf32>, vector<8x232xf32>, vector<16x232xf32> -> vector<16x232xf32>
    %293 = arith.addf %288, %292 : vector<16x232xf32>
    %294 = vector.extract_strided_slice %184 {offsets = [0, 82], sizes = [8, 232], strides = [1, 1]} : vector<8x316xf32> to vector<8x232xf32>
    %c22_147 = arith.constant 22 : index
    %c0_148 = arith.constant 0 : index
    %c0_149 = arith.constant 0 : index
    %295 = vector.load %arg4[%c22_147, %c0_148, %c0_149] : memref<25x16x8xf32, #tpu.memory_space<vmem>>, vector<1x16x8xf32>
    %296 = vector.shape_cast %295 : vector<1x16x8xf32> to vector<16x8xf32>
    %cst_150 = arith.constant dense<0.000000e+00> : vector<16x232xf32>
    %297 = tpu.matmul %296, %294, %cst_150 {dimension_numbers = #tpu.dot_dimension_numbers<[1], [0], [0], [1], [0, 0, 1, 1], [], []>} : vector<16x8xf32>, vector<8x232xf32>, vector<16x232xf32> -> vector<16x232xf32>
    %298 = arith.addf %293, %297 : vector<16x232xf32>
    %299 = vector.extract_strided_slice %184 {offsets = [0, 83], sizes = [8, 232], strides = [1, 1]} : vector<8x316xf32> to vector<8x232xf32>
    %c23_151 = arith.constant 23 : index
    %c0_152 = arith.constant 0 : index
    %c0_153 = arith.constant 0 : index
    %300 = vector.load %arg4[%c23_151, %c0_152, %c0_153] : memref<25x16x8xf32, #tpu.memory_space<vmem>>, vector<1x16x8xf32>
    %301 = vector.shape_cast %300 : vector<1x16x8xf32> to vector<16x8xf32>
    %cst_154 = arith.constant dense<0.000000e+00> : vector<16x232xf32>
    %302 = tpu.matmul %301, %299, %cst_154 {dimension_numbers = #tpu.dot_dimension_numbers<[1], [0], [0], [1], [0, 0, 1, 1], [], []>} : vector<16x8xf32>, vector<8x232xf32>, vector<16x232xf32> -> vector<16x232xf32>
    %303 = arith.addf %298, %302 : vector<16x232xf32>
    %304 = vector.extract_strided_slice %184 {offsets = [0, 84], sizes = [8, 232], strides = [1, 1]} : vector<8x316xf32> to vector<8x232xf32>
    %c24_155 = arith.constant 24 : index
    %c0_156 = arith.constant 0 : index
    %c0_157 = arith.constant 0 : index
    %305 = vector.load %arg4[%c24_155, %c0_156, %c0_157] : memref<25x16x8xf32, #tpu.memory_space<vmem>>, vector<1x16x8xf32>
    %306 = vector.shape_cast %305 : vector<1x16x8xf32> to vector<16x8xf32>
    %cst_158 = arith.constant dense<0.000000e+00> : vector<16x232xf32>
    %307 = tpu.matmul %306, %304, %cst_158 {dimension_numbers = #tpu.dot_dimension_numbers<[1], [0], [0], [1], [0, 0, 1, 1], [], []>} : vector<16x8xf32>, vector<8x232xf32>, vector<16x232xf32> -> vector<16x232xf32>
    %308 = arith.addf %303, %307 : vector<16x232xf32>
    %309 = vector.broadcast %3 : vector<16x1xf32> to vector<16x232xf32>
    %310 = arith.addf %308, %309 : vector<16x232xf32>
    %cst_159 = arith.constant 0.000000e+00 : f32
    %311 = vector.broadcast %cst_159 : f32 to vector<16x232xf32>
    %312 = arith.maximumf %310, %311 : vector<16x232xf32>
    %313 = vector.extract_strided_slice %312 {offsets = [0, 0], sizes = [16, 148], strides = [1, 1]} : vector<16x232xf32> to vector<16x148xf32>
    %c0_160 = arith.constant 0 : index
    %c0_161 = arith.constant 0 : index
    %c0_162 = arith.constant 0 : index
    %314 = vector.load %arg6[%c0_160, %c0_161, %c0_162] : memref<25x16x16xf32, #tpu.memory_space<vmem>>, vector<1x16x16xf32>
    %315 = vector.shape_cast %314 : vector<1x16x16xf32> to vector<16x16xf32>
    %cst_163 = arith.constant dense<0.000000e+00> : vector<16x148xf32>
    %316 = tpu.matmul %315, %313, %cst_163 {dimension_numbers = #tpu.dot_dimension_numbers<[1], [0], [0], [1], [0, 0, 1, 1], [], []>} : vector<16x16xf32>, vector<16x148xf32>, vector<16x148xf32> -> vector<16x148xf32>
    %317 = vector.extract_strided_slice %312 {offsets = [0, 1], sizes = [16, 148], strides = [1, 1]} : vector<16x232xf32> to vector<16x148xf32>
    %c1_164 = arith.constant 1 : index
    %c0_165 = arith.constant 0 : index
    %c0_166 = arith.constant 0 : index
    %318 = vector.load %arg6[%c1_164, %c0_165, %c0_166] : memref<25x16x16xf32, #tpu.memory_space<vmem>>, vector<1x16x16xf32>
    %319 = vector.shape_cast %318 : vector<1x16x16xf32> to vector<16x16xf32>
    %cst_167 = arith.constant dense<0.000000e+00> : vector<16x148xf32>
    %320 = tpu.matmul %319, %317, %cst_167 {dimension_numbers = #tpu.dot_dimension_numbers<[1], [0], [0], [1], [0, 0, 1, 1], [], []>} : vector<16x16xf32>, vector<16x148xf32>, vector<16x148xf32> -> vector<16x148xf32>
    %321 = arith.addf %316, %320 : vector<16x148xf32>
    %322 = vector.extract_strided_slice %312 {offsets = [0, 2], sizes = [16, 148], strides = [1, 1]} : vector<16x232xf32> to vector<16x148xf32>
    %c2_168 = arith.constant 2 : index
    %c0_169 = arith.constant 0 : index
    %c0_170 = arith.constant 0 : index
    %323 = vector.load %arg6[%c2_168, %c0_169, %c0_170] : memref<25x16x16xf32, #tpu.memory_space<vmem>>, vector<1x16x16xf32>
    %324 = vector.shape_cast %323 : vector<1x16x16xf32> to vector<16x16xf32>
    %cst_171 = arith.constant dense<0.000000e+00> : vector<16x148xf32>
    %325 = tpu.matmul %324, %322, %cst_171 {dimension_numbers = #tpu.dot_dimension_numbers<[1], [0], [0], [1], [0, 0, 1, 1], [], []>} : vector<16x16xf32>, vector<16x148xf32>, vector<16x148xf32> -> vector<16x148xf32>
    %326 = arith.addf %321, %325 : vector<16x148xf32>
    %327 = vector.extract_strided_slice %312 {offsets = [0, 3], sizes = [16, 148], strides = [1, 1]} : vector<16x232xf32> to vector<16x148xf32>
    %c3_172 = arith.constant 3 : index
    %c0_173 = arith.constant 0 : index
    %c0_174 = arith.constant 0 : index
    %328 = vector.load %arg6[%c3_172, %c0_173, %c0_174] : memref<25x16x16xf32, #tpu.memory_space<vmem>>, vector<1x16x16xf32>
    %329 = vector.shape_cast %328 : vector<1x16x16xf32> to vector<16x16xf32>
    %cst_175 = arith.constant dense<0.000000e+00> : vector<16x148xf32>
    %330 = tpu.matmul %329, %327, %cst_175 {dimension_numbers = #tpu.dot_dimension_numbers<[1], [0], [0], [1], [0, 0, 1, 1], [], []>} : vector<16x16xf32>, vector<16x148xf32>, vector<16x148xf32> -> vector<16x148xf32>
    %331 = arith.addf %326, %330 : vector<16x148xf32>
    %332 = vector.extract_strided_slice %312 {offsets = [0, 4], sizes = [16, 148], strides = [1, 1]} : vector<16x232xf32> to vector<16x148xf32>
    %c4_176 = arith.constant 4 : index
    %c0_177 = arith.constant 0 : index
    %c0_178 = arith.constant 0 : index
    %333 = vector.load %arg6[%c4_176, %c0_177, %c0_178] : memref<25x16x16xf32, #tpu.memory_space<vmem>>, vector<1x16x16xf32>
    %334 = vector.shape_cast %333 : vector<1x16x16xf32> to vector<16x16xf32>
    %cst_179 = arith.constant dense<0.000000e+00> : vector<16x148xf32>
    %335 = tpu.matmul %334, %332, %cst_179 {dimension_numbers = #tpu.dot_dimension_numbers<[1], [0], [0], [1], [0, 0, 1, 1], [], []>} : vector<16x16xf32>, vector<16x148xf32>, vector<16x148xf32> -> vector<16x148xf32>
    %336 = arith.addf %331, %335 : vector<16x148xf32>
    %337 = vector.extract_strided_slice %312 {offsets = [0, 20], sizes = [16, 148], strides = [1, 1]} : vector<16x232xf32> to vector<16x148xf32>
    %c5_180 = arith.constant 5 : index
    %c0_181 = arith.constant 0 : index
    %c0_182 = arith.constant 0 : index
    %338 = vector.load %arg6[%c5_180, %c0_181, %c0_182] : memref<25x16x16xf32, #tpu.memory_space<vmem>>, vector<1x16x16xf32>
    %339 = vector.shape_cast %338 : vector<1x16x16xf32> to vector<16x16xf32>
    %cst_183 = arith.constant dense<0.000000e+00> : vector<16x148xf32>
    %340 = tpu.matmul %339, %337, %cst_183 {dimension_numbers = #tpu.dot_dimension_numbers<[1], [0], [0], [1], [0, 0, 1, 1], [], []>} : vector<16x16xf32>, vector<16x148xf32>, vector<16x148xf32> -> vector<16x148xf32>
    %341 = arith.addf %336, %340 : vector<16x148xf32>
    %342 = vector.extract_strided_slice %312 {offsets = [0, 21], sizes = [16, 148], strides = [1, 1]} : vector<16x232xf32> to vector<16x148xf32>
    %c6_184 = arith.constant 6 : index
    %c0_185 = arith.constant 0 : index
    %c0_186 = arith.constant 0 : index
    %343 = vector.load %arg6[%c6_184, %c0_185, %c0_186] : memref<25x16x16xf32, #tpu.memory_space<vmem>>, vector<1x16x16xf32>
    %344 = vector.shape_cast %343 : vector<1x16x16xf32> to vector<16x16xf32>
    %cst_187 = arith.constant dense<0.000000e+00> : vector<16x148xf32>
    %345 = tpu.matmul %344, %342, %cst_187 {dimension_numbers = #tpu.dot_dimension_numbers<[1], [0], [0], [1], [0, 0, 1, 1], [], []>} : vector<16x16xf32>, vector<16x148xf32>, vector<16x148xf32> -> vector<16x148xf32>
    %346 = arith.addf %341, %345 : vector<16x148xf32>
    %347 = vector.extract_strided_slice %312 {offsets = [0, 22], sizes = [16, 148], strides = [1, 1]} : vector<16x232xf32> to vector<16x148xf32>
    %c7_188 = arith.constant 7 : index
    %c0_189 = arith.constant 0 : index
    %c0_190 = arith.constant 0 : index
    %348 = vector.load %arg6[%c7_188, %c0_189, %c0_190] : memref<25x16x16xf32, #tpu.memory_space<vmem>>, vector<1x16x16xf32>
    %349 = vector.shape_cast %348 : vector<1x16x16xf32> to vector<16x16xf32>
    %cst_191 = arith.constant dense<0.000000e+00> : vector<16x148xf32>
    %350 = tpu.matmul %349, %347, %cst_191 {dimension_numbers = #tpu.dot_dimension_numbers<[1], [0], [0], [1], [0, 0, 1, 1], [], []>} : vector<16x16xf32>, vector<16x148xf32>, vector<16x148xf32> -> vector<16x148xf32>
    %351 = arith.addf %346, %350 : vector<16x148xf32>
    %352 = vector.extract_strided_slice %312 {offsets = [0, 23], sizes = [16, 148], strides = [1, 1]} : vector<16x232xf32> to vector<16x148xf32>
    %c8_192 = arith.constant 8 : index
    %c0_193 = arith.constant 0 : index
    %c0_194 = arith.constant 0 : index
    %353 = vector.load %arg6[%c8_192, %c0_193, %c0_194] : memref<25x16x16xf32, #tpu.memory_space<vmem>>, vector<1x16x16xf32>
    %354 = vector.shape_cast %353 : vector<1x16x16xf32> to vector<16x16xf32>
    %cst_195 = arith.constant dense<0.000000e+00> : vector<16x148xf32>
    %355 = tpu.matmul %354, %352, %cst_195 {dimension_numbers = #tpu.dot_dimension_numbers<[1], [0], [0], [1], [0, 0, 1, 1], [], []>} : vector<16x16xf32>, vector<16x148xf32>, vector<16x148xf32> -> vector<16x148xf32>
    %356 = arith.addf %351, %355 : vector<16x148xf32>
    %357 = vector.extract_strided_slice %312 {offsets = [0, 24], sizes = [16, 148], strides = [1, 1]} : vector<16x232xf32> to vector<16x148xf32>
    %c9_196 = arith.constant 9 : index
    %c0_197 = arith.constant 0 : index
    %c0_198 = arith.constant 0 : index
    %358 = vector.load %arg6[%c9_196, %c0_197, %c0_198] : memref<25x16x16xf32, #tpu.memory_space<vmem>>, vector<1x16x16xf32>
    %359 = vector.shape_cast %358 : vector<1x16x16xf32> to vector<16x16xf32>
    %cst_199 = arith.constant dense<0.000000e+00> : vector<16x148xf32>
    %360 = tpu.matmul %359, %357, %cst_199 {dimension_numbers = #tpu.dot_dimension_numbers<[1], [0], [0], [1], [0, 0, 1, 1], [], []>} : vector<16x16xf32>, vector<16x148xf32>, vector<16x148xf32> -> vector<16x148xf32>
    %361 = arith.addf %356, %360 : vector<16x148xf32>
    %362 = vector.extract_strided_slice %312 {offsets = [0, 40], sizes = [16, 148], strides = [1, 1]} : vector<16x232xf32> to vector<16x148xf32>
    %c10_200 = arith.constant 10 : index
    %c0_201 = arith.constant 0 : index
    %c0_202 = arith.constant 0 : index
    %363 = vector.load %arg6[%c10_200, %c0_201, %c0_202] : memref<25x16x16xf32, #tpu.memory_space<vmem>>, vector<1x16x16xf32>
    %364 = vector.shape_cast %363 : vector<1x16x16xf32> to vector<16x16xf32>
    %cst_203 = arith.constant dense<0.000000e+00> : vector<16x148xf32>
    %365 = tpu.matmul %364, %362, %cst_203 {dimension_numbers = #tpu.dot_dimension_numbers<[1], [0], [0], [1], [0, 0, 1, 1], [], []>} : vector<16x16xf32>, vector<16x148xf32>, vector<16x148xf32> -> vector<16x148xf32>
    %366 = arith.addf %361, %365 : vector<16x148xf32>
    %367 = vector.extract_strided_slice %312 {offsets = [0, 41], sizes = [16, 148], strides = [1, 1]} : vector<16x232xf32> to vector<16x148xf32>
    %c11_204 = arith.constant 11 : index
    %c0_205 = arith.constant 0 : index
    %c0_206 = arith.constant 0 : index
    %368 = vector.load %arg6[%c11_204, %c0_205, %c0_206] : memref<25x16x16xf32, #tpu.memory_space<vmem>>, vector<1x16x16xf32>
    %369 = vector.shape_cast %368 : vector<1x16x16xf32> to vector<16x16xf32>
    %cst_207 = arith.constant dense<0.000000e+00> : vector<16x148xf32>
    %370 = tpu.matmul %369, %367, %cst_207 {dimension_numbers = #tpu.dot_dimension_numbers<[1], [0], [0], [1], [0, 0, 1, 1], [], []>} : vector<16x16xf32>, vector<16x148xf32>, vector<16x148xf32> -> vector<16x148xf32>
    %371 = arith.addf %366, %370 : vector<16x148xf32>
    %372 = vector.extract_strided_slice %312 {offsets = [0, 42], sizes = [16, 148], strides = [1, 1]} : vector<16x232xf32> to vector<16x148xf32>
    %c12_208 = arith.constant 12 : index
    %c0_209 = arith.constant 0 : index
    %c0_210 = arith.constant 0 : index
    %373 = vector.load %arg6[%c12_208, %c0_209, %c0_210] : memref<25x16x16xf32, #tpu.memory_space<vmem>>, vector<1x16x16xf32>
    %374 = vector.shape_cast %373 : vector<1x16x16xf32> to vector<16x16xf32>
    %cst_211 = arith.constant dense<0.000000e+00> : vector<16x148xf32>
    %375 = tpu.matmul %374, %372, %cst_211 {dimension_numbers = #tpu.dot_dimension_numbers<[1], [0], [0], [1], [0, 0, 1, 1], [], []>} : vector<16x16xf32>, vector<16x148xf32>, vector<16x148xf32> -> vector<16x148xf32>
    %376 = arith.addf %371, %375 : vector<16x148xf32>
    %377 = vector.extract_strided_slice %312 {offsets = [0, 43], sizes = [16, 148], strides = [1, 1]} : vector<16x232xf32> to vector<16x148xf32>
    %c13_212 = arith.constant 13 : index
    %c0_213 = arith.constant 0 : index
    %c0_214 = arith.constant 0 : index
    %378 = vector.load %arg6[%c13_212, %c0_213, %c0_214] : memref<25x16x16xf32, #tpu.memory_space<vmem>>, vector<1x16x16xf32>
    %379 = vector.shape_cast %378 : vector<1x16x16xf32> to vector<16x16xf32>
    %cst_215 = arith.constant dense<0.000000e+00> : vector<16x148xf32>
    %380 = tpu.matmul %379, %377, %cst_215 {dimension_numbers = #tpu.dot_dimension_numbers<[1], [0], [0], [1], [0, 0, 1, 1], [], []>} : vector<16x16xf32>, vector<16x148xf32>, vector<16x148xf32> -> vector<16x148xf32>
    %381 = arith.addf %376, %380 : vector<16x148xf32>
    %382 = vector.extract_strided_slice %312 {offsets = [0, 44], sizes = [16, 148], strides = [1, 1]} : vector<16x232xf32> to vector<16x148xf32>
    %c14_216 = arith.constant 14 : index
    %c0_217 = arith.constant 0 : index
    %c0_218 = arith.constant 0 : index
    %383 = vector.load %arg6[%c14_216, %c0_217, %c0_218] : memref<25x16x16xf32, #tpu.memory_space<vmem>>, vector<1x16x16xf32>
    %384 = vector.shape_cast %383 : vector<1x16x16xf32> to vector<16x16xf32>
    %cst_219 = arith.constant dense<0.000000e+00> : vector<16x148xf32>
    %385 = tpu.matmul %384, %382, %cst_219 {dimension_numbers = #tpu.dot_dimension_numbers<[1], [0], [0], [1], [0, 0, 1, 1], [], []>} : vector<16x16xf32>, vector<16x148xf32>, vector<16x148xf32> -> vector<16x148xf32>
    %386 = arith.addf %381, %385 : vector<16x148xf32>
    %387 = vector.extract_strided_slice %312 {offsets = [0, 60], sizes = [16, 148], strides = [1, 1]} : vector<16x232xf32> to vector<16x148xf32>
    %c15_220 = arith.constant 15 : index
    %c0_221 = arith.constant 0 : index
    %c0_222 = arith.constant 0 : index
    %388 = vector.load %arg6[%c15_220, %c0_221, %c0_222] : memref<25x16x16xf32, #tpu.memory_space<vmem>>, vector<1x16x16xf32>
    %389 = vector.shape_cast %388 : vector<1x16x16xf32> to vector<16x16xf32>
    %cst_223 = arith.constant dense<0.000000e+00> : vector<16x148xf32>
    %390 = tpu.matmul %389, %387, %cst_223 {dimension_numbers = #tpu.dot_dimension_numbers<[1], [0], [0], [1], [0, 0, 1, 1], [], []>} : vector<16x16xf32>, vector<16x148xf32>, vector<16x148xf32> -> vector<16x148xf32>
    %391 = arith.addf %386, %390 : vector<16x148xf32>
    %392 = vector.extract_strided_slice %312 {offsets = [0, 61], sizes = [16, 148], strides = [1, 1]} : vector<16x232xf32> to vector<16x148xf32>
    %c16_224 = arith.constant 16 : index
    %c0_225 = arith.constant 0 : index
    %c0_226 = arith.constant 0 : index
    %393 = vector.load %arg6[%c16_224, %c0_225, %c0_226] : memref<25x16x16xf32, #tpu.memory_space<vmem>>, vector<1x16x16xf32>
    %394 = vector.shape_cast %393 : vector<1x16x16xf32> to vector<16x16xf32>
    %cst_227 = arith.constant dense<0.000000e+00> : vector<16x148xf32>
    %395 = tpu.matmul %394, %392, %cst_227 {dimension_numbers = #tpu.dot_dimension_numbers<[1], [0], [0], [1], [0, 0, 1, 1], [], []>} : vector<16x16xf32>, vector<16x148xf32>, vector<16x148xf32> -> vector<16x148xf32>
    %396 = arith.addf %391, %395 : vector<16x148xf32>
    %397 = vector.extract_strided_slice %312 {offsets = [0, 62], sizes = [16, 148], strides = [1, 1]} : vector<16x232xf32> to vector<16x148xf32>
    %c17_228 = arith.constant 17 : index
    %c0_229 = arith.constant 0 : index
    %c0_230 = arith.constant 0 : index
    %398 = vector.load %arg6[%c17_228, %c0_229, %c0_230] : memref<25x16x16xf32, #tpu.memory_space<vmem>>, vector<1x16x16xf32>
    %399 = vector.shape_cast %398 : vector<1x16x16xf32> to vector<16x16xf32>
    %cst_231 = arith.constant dense<0.000000e+00> : vector<16x148xf32>
    %400 = tpu.matmul %399, %397, %cst_231 {dimension_numbers = #tpu.dot_dimension_numbers<[1], [0], [0], [1], [0, 0, 1, 1], [], []>} : vector<16x16xf32>, vector<16x148xf32>, vector<16x148xf32> -> vector<16x148xf32>
    %401 = arith.addf %396, %400 : vector<16x148xf32>
    %402 = vector.extract_strided_slice %312 {offsets = [0, 63], sizes = [16, 148], strides = [1, 1]} : vector<16x232xf32> to vector<16x148xf32>
    %c18_232 = arith.constant 18 : index
    %c0_233 = arith.constant 0 : index
    %c0_234 = arith.constant 0 : index
    %403 = vector.load %arg6[%c18_232, %c0_233, %c0_234] : memref<25x16x16xf32, #tpu.memory_space<vmem>>, vector<1x16x16xf32>
    %404 = vector.shape_cast %403 : vector<1x16x16xf32> to vector<16x16xf32>
    %cst_235 = arith.constant dense<0.000000e+00> : vector<16x148xf32>
    %405 = tpu.matmul %404, %402, %cst_235 {dimension_numbers = #tpu.dot_dimension_numbers<[1], [0], [0], [1], [0, 0, 1, 1], [], []>} : vector<16x16xf32>, vector<16x148xf32>, vector<16x148xf32> -> vector<16x148xf32>
    %406 = arith.addf %401, %405 : vector<16x148xf32>
    %407 = vector.extract_strided_slice %312 {offsets = [0, 64], sizes = [16, 148], strides = [1, 1]} : vector<16x232xf32> to vector<16x148xf32>
    %c19_236 = arith.constant 19 : index
    %c0_237 = arith.constant 0 : index
    %c0_238 = arith.constant 0 : index
    %408 = vector.load %arg6[%c19_236, %c0_237, %c0_238] : memref<25x16x16xf32, #tpu.memory_space<vmem>>, vector<1x16x16xf32>
    %409 = vector.shape_cast %408 : vector<1x16x16xf32> to vector<16x16xf32>
    %cst_239 = arith.constant dense<0.000000e+00> : vector<16x148xf32>
    %410 = tpu.matmul %409, %407, %cst_239 {dimension_numbers = #tpu.dot_dimension_numbers<[1], [0], [0], [1], [0, 0, 1, 1], [], []>} : vector<16x16xf32>, vector<16x148xf32>, vector<16x148xf32> -> vector<16x148xf32>
    %411 = arith.addf %406, %410 : vector<16x148xf32>
    %412 = vector.extract_strided_slice %312 {offsets = [0, 80], sizes = [16, 148], strides = [1, 1]} : vector<16x232xf32> to vector<16x148xf32>
    %c20_240 = arith.constant 20 : index
    %c0_241 = arith.constant 0 : index
    %c0_242 = arith.constant 0 : index
    %413 = vector.load %arg6[%c20_240, %c0_241, %c0_242] : memref<25x16x16xf32, #tpu.memory_space<vmem>>, vector<1x16x16xf32>
    %414 = vector.shape_cast %413 : vector<1x16x16xf32> to vector<16x16xf32>
    %cst_243 = arith.constant dense<0.000000e+00> : vector<16x148xf32>
    %415 = tpu.matmul %414, %412, %cst_243 {dimension_numbers = #tpu.dot_dimension_numbers<[1], [0], [0], [1], [0, 0, 1, 1], [], []>} : vector<16x16xf32>, vector<16x148xf32>, vector<16x148xf32> -> vector<16x148xf32>
    %416 = arith.addf %411, %415 : vector<16x148xf32>
    %417 = vector.extract_strided_slice %312 {offsets = [0, 81], sizes = [16, 148], strides = [1, 1]} : vector<16x232xf32> to vector<16x148xf32>
    %c21_244 = arith.constant 21 : index
    %c0_245 = arith.constant 0 : index
    %c0_246 = arith.constant 0 : index
    %418 = vector.load %arg6[%c21_244, %c0_245, %c0_246] : memref<25x16x16xf32, #tpu.memory_space<vmem>>, vector<1x16x16xf32>
    %419 = vector.shape_cast %418 : vector<1x16x16xf32> to vector<16x16xf32>
    %cst_247 = arith.constant dense<0.000000e+00> : vector<16x148xf32>
    %420 = tpu.matmul %419, %417, %cst_247 {dimension_numbers = #tpu.dot_dimension_numbers<[1], [0], [0], [1], [0, 0, 1, 1], [], []>} : vector<16x16xf32>, vector<16x148xf32>, vector<16x148xf32> -> vector<16x148xf32>
    %421 = arith.addf %416, %420 : vector<16x148xf32>
    %422 = vector.extract_strided_slice %312 {offsets = [0, 82], sizes = [16, 148], strides = [1, 1]} : vector<16x232xf32> to vector<16x148xf32>
    %c22_248 = arith.constant 22 : index
    %c0_249 = arith.constant 0 : index
    %c0_250 = arith.constant 0 : index
    %423 = vector.load %arg6[%c22_248, %c0_249, %c0_250] : memref<25x16x16xf32, #tpu.memory_space<vmem>>, vector<1x16x16xf32>
    %424 = vector.shape_cast %423 : vector<1x16x16xf32> to vector<16x16xf32>
    %cst_251 = arith.constant dense<0.000000e+00> : vector<16x148xf32>
    %425 = tpu.matmul %424, %422, %cst_251 {dimension_numbers = #tpu.dot_dimension_numbers<[1], [0], [0], [1], [0, 0, 1, 1], [], []>} : vector<16x16xf32>, vector<16x148xf32>, vector<16x148xf32> -> vector<16x148xf32>
    %426 = arith.addf %421, %425 : vector<16x148xf32>
    %427 = vector.extract_strided_slice %312 {offsets = [0, 83], sizes = [16, 148], strides = [1, 1]} : vector<16x232xf32> to vector<16x148xf32>
    %c23_252 = arith.constant 23 : index
    %c0_253 = arith.constant 0 : index
    %c0_254 = arith.constant 0 : index
    %428 = vector.load %arg6[%c23_252, %c0_253, %c0_254] : memref<25x16x16xf32, #tpu.memory_space<vmem>>, vector<1x16x16xf32>
    %429 = vector.shape_cast %428 : vector<1x16x16xf32> to vector<16x16xf32>
    %cst_255 = arith.constant dense<0.000000e+00> : vector<16x148xf32>
    %430 = tpu.matmul %429, %427, %cst_255 {dimension_numbers = #tpu.dot_dimension_numbers<[1], [0], [0], [1], [0, 0, 1, 1], [], []>} : vector<16x16xf32>, vector<16x148xf32>, vector<16x148xf32> -> vector<16x148xf32>
    %431 = arith.addf %426, %430 : vector<16x148xf32>
    %432 = vector.extract_strided_slice %312 {offsets = [0, 84], sizes = [16, 148], strides = [1, 1]} : vector<16x232xf32> to vector<16x148xf32>
    %c24_256 = arith.constant 24 : index
    %c0_257 = arith.constant 0 : index
    %c0_258 = arith.constant 0 : index
    %433 = vector.load %arg6[%c24_256, %c0_257, %c0_258] : memref<25x16x16xf32, #tpu.memory_space<vmem>>, vector<1x16x16xf32>
    %434 = vector.shape_cast %433 : vector<1x16x16xf32> to vector<16x16xf32>
    %cst_259 = arith.constant dense<0.000000e+00> : vector<16x148xf32>
    %435 = tpu.matmul %434, %432, %cst_259 {dimension_numbers = #tpu.dot_dimension_numbers<[1], [0], [0], [1], [0, 0, 1, 1], [], []>} : vector<16x16xf32>, vector<16x148xf32>, vector<16x148xf32> -> vector<16x148xf32>
    %436 = arith.addf %431, %435 : vector<16x148xf32>
    %437 = vector.broadcast %4 : vector<16x1xf32> to vector<16x148xf32>
    %438 = arith.addf %436, %437 : vector<16x148xf32>
    %cst_260 = arith.constant 0.000000e+00 : f32
    %439 = vector.broadcast %cst_260 : f32 to vector<16x148xf32>
    %440 = arith.maximumf %438, %439 : vector<16x148xf32>
    %441 = vector.extract_strided_slice %440 {offsets = [0, 0], sizes = [16, 8], strides = [1, 1]} : vector<16x148xf32> to vector<16x8xf32>
    %c0_261 = arith.constant 0 : index
    %c0_262 = arith.constant 0 : index
    %442 = vector.load %arg13[%c0_261, %c0_262] : memref<16x64xf32, #tpu.memory_space<vmem>>, vector<16x8xf32>
    tpu.vector_store %arg13[%c0_261, %c0_262], %441 {strides = array<i32>} : memref<16x64xf32, #tpu.memory_space<vmem>>, vector<16x8xf32>,
    %443 = vector.extract_strided_slice %440 {offsets = [0, 20], sizes = [16, 8], strides = [1, 1]} : vector<16x148xf32> to vector<16x8xf32>
    %c0_263 = arith.constant 0 : index
    %c8_264 = arith.constant 8 : index
    %444 = vector.load %arg13[%c0_263, %c8_264] : memref<16x64xf32, #tpu.memory_space<vmem>>, vector<16x8xf32>
    tpu.vector_store %arg13[%c0_263, %c8_264], %443 {strides = array<i32>} : memref<16x64xf32, #tpu.memory_space<vmem>>, vector<16x8xf32>,
    %445 = vector.extract_strided_slice %440 {offsets = [0, 40], sizes = [16, 8], strides = [1, 1]} : vector<16x148xf32> to vector<16x8xf32>
    %c0_265 = arith.constant 0 : index
    %c16_266 = arith.constant 16 : index
    %446 = vector.load %arg13[%c0_265, %c16_266] : memref<16x64xf32, #tpu.memory_space<vmem>>, vector<16x8xf32>
    tpu.vector_store %arg13[%c0_265, %c16_266], %445 {strides = array<i32>} : memref<16x64xf32, #tpu.memory_space<vmem>>, vector<16x8xf32>,
    %447 = vector.extract_strided_slice %440 {offsets = [0, 60], sizes = [16, 8], strides = [1, 1]} : vector<16x148xf32> to vector<16x8xf32>
    %c0_267 = arith.constant 0 : index
    %c24_268 = arith.constant 24 : index
    %448 = vector.load %arg13[%c0_267, %c24_268] : memref<16x64xf32, #tpu.memory_space<vmem>>, vector<16x8xf32>
    tpu.vector_store %arg13[%c0_267, %c24_268], %447 {strides = array<i32>} : memref<16x64xf32, #tpu.memory_space<vmem>>, vector<16x8xf32>,
    %449 = vector.extract_strided_slice %440 {offsets = [0, 80], sizes = [16, 8], strides = [1, 1]} : vector<16x148xf32> to vector<16x8xf32>
    %c0_269 = arith.constant 0 : index
    %c32 = arith.constant 32 : index
    %450 = vector.load %arg13[%c0_269, %c32] : memref<16x64xf32, #tpu.memory_space<vmem>>, vector<16x8xf32>
    tpu.vector_store %arg13[%c0_269, %c32], %449 {strides = array<i32>} : memref<16x64xf32, #tpu.memory_space<vmem>>, vector<16x8xf32>,
    %451 = vector.extract_strided_slice %440 {offsets = [0, 100], sizes = [16, 8], strides = [1, 1]} : vector<16x148xf32> to vector<16x8xf32>
    %c0_270 = arith.constant 0 : index
    %c40 = arith.constant 40 : index
    %452 = vector.load %arg13[%c0_270, %c40] : memref<16x64xf32, #tpu.memory_space<vmem>>, vector<16x8xf32>
    tpu.vector_store %arg13[%c0_270, %c40], %451 {strides = array<i32>} : memref<16x64xf32, #tpu.memory_space<vmem>>, vector<16x8xf32>,
    %453 = vector.extract_strided_slice %440 {offsets = [0, 120], sizes = [16, 8], strides = [1, 1]} : vector<16x148xf32> to vector<16x8xf32>
    %c0_271 = arith.constant 0 : index
    %c48 = arith.constant 48 : index
    %454 = vector.load %arg13[%c0_271, %c48] : memref<16x64xf32, #tpu.memory_space<vmem>>, vector<16x8xf32>
    tpu.vector_store %arg13[%c0_271, %c48], %453 {strides = array<i32>} : memref<16x64xf32, #tpu.memory_space<vmem>>, vector<16x8xf32>,
    %455 = vector.extract_strided_slice %440 {offsets = [0, 140], sizes = [16, 8], strides = [1, 1]} : vector<16x148xf32> to vector<16x8xf32>
    %c0_272 = arith.constant 0 : index
    %c56 = arith.constant 56 : index
    %456 = vector.load %arg13[%c0_272, %c56] : memref<16x64xf32, #tpu.memory_space<vmem>>, vector<16x8xf32>
    tpu.vector_store %arg13[%c0_272, %c56], %455 {strides = array<i32>} : memref<16x64xf32, #tpu.memory_space<vmem>>, vector<16x8xf32>,
    %c0_273 = arith.constant 0 : index
    %c0_274 = arith.constant 0 : index
    %457 = vector.load %arg13[%c0_273, %c0_274] : memref<16x64xf32, #tpu.memory_space<vmem>>, vector<1x64xf32>
    %c0_275 = arith.constant 0 : index
    %c0_276 = arith.constant 0 : index
    %458 = vector.load %arg14[%c0_275, %c0_276] : memref<2x1024xf32, #tpu.memory_space<vmem>>, vector<1x64xf32>
    tpu.vector_store %arg14[%c0_275, %c0_276], %457 {strides = array<i32>} : memref<2x1024xf32, #tpu.memory_space<vmem>>, vector<1x64xf32>,
    %c1_277 = arith.constant 1 : index
    %c0_278 = arith.constant 0 : index
    %459 = vector.load %arg13[%c1_277, %c0_278] : memref<16x64xf32, #tpu.memory_space<vmem>>, vector<1x64xf32>
    %c0_279 = arith.constant 0 : index
    %c64 = arith.constant 64 : index
    %460 = vector.load %arg14[%c0_279, %c64] : memref<2x1024xf32, #tpu.memory_space<vmem>>, vector<1x64xf32>
    tpu.vector_store %arg14[%c0_279, %c64], %459 {strides = array<i32>} : memref<2x1024xf32, #tpu.memory_space<vmem>>, vector<1x64xf32>,
    %c2_280 = arith.constant 2 : index
    %c0_281 = arith.constant 0 : index
    %461 = vector.load %arg13[%c2_280, %c0_281] : memref<16x64xf32, #tpu.memory_space<vmem>>, vector<1x64xf32>
    %c0_282 = arith.constant 0 : index
    %c128 = arith.constant 128 : index
    %462 = vector.load %arg14[%c0_282, %c128] : memref<2x1024xf32, #tpu.memory_space<vmem>>, vector<1x64xf32>
    tpu.vector_store %arg14[%c0_282, %c128], %461 {strides = array<i32>} : memref<2x1024xf32, #tpu.memory_space<vmem>>, vector<1x64xf32>,
    %c3_283 = arith.constant 3 : index
    %c0_284 = arith.constant 0 : index
    %463 = vector.load %arg13[%c3_283, %c0_284] : memref<16x64xf32, #tpu.memory_space<vmem>>, vector<1x64xf32>
    %c0_285 = arith.constant 0 : index
    %c192 = arith.constant 192 : index
    %464 = vector.load %arg14[%c0_285, %c192] : memref<2x1024xf32, #tpu.memory_space<vmem>>, vector<1x64xf32>
    tpu.vector_store %arg14[%c0_285, %c192], %463 {strides = array<i32>} : memref<2x1024xf32, #tpu.memory_space<vmem>>, vector<1x64xf32>,
    %c4_286 = arith.constant 4 : index
    %c0_287 = arith.constant 0 : index
    %465 = vector.load %arg13[%c4_286, %c0_287] : memref<16x64xf32, #tpu.memory_space<vmem>>, vector<1x64xf32>
    %c0_288 = arith.constant 0 : index
    %c256 = arith.constant 256 : index
    %466 = vector.load %arg14[%c0_288, %c256] : memref<2x1024xf32, #tpu.memory_space<vmem>>, vector<1x64xf32>
    tpu.vector_store %arg14[%c0_288, %c256], %465 {strides = array<i32>} : memref<2x1024xf32, #tpu.memory_space<vmem>>, vector<1x64xf32>,
    %c5_289 = arith.constant 5 : index
    %c0_290 = arith.constant 0 : index
    %467 = vector.load %arg13[%c5_289, %c0_290] : memref<16x64xf32, #tpu.memory_space<vmem>>, vector<1x64xf32>
    %c0_291 = arith.constant 0 : index
    %c320 = arith.constant 320 : index
    %468 = vector.load %arg14[%c0_291, %c320] : memref<2x1024xf32, #tpu.memory_space<vmem>>, vector<1x64xf32>
    tpu.vector_store %arg14[%c0_291, %c320], %467 {strides = array<i32>} : memref<2x1024xf32, #tpu.memory_space<vmem>>, vector<1x64xf32>,
    %c6_292 = arith.constant 6 : index
    %c0_293 = arith.constant 0 : index
    %469 = vector.load %arg13[%c6_292, %c0_293] : memref<16x64xf32, #tpu.memory_space<vmem>>, vector<1x64xf32>
    %c0_294 = arith.constant 0 : index
    %c384 = arith.constant 384 : index
    %470 = vector.load %arg14[%c0_294, %c384] : memref<2x1024xf32, #tpu.memory_space<vmem>>, vector<1x64xf32>
    tpu.vector_store %arg14[%c0_294, %c384], %469 {strides = array<i32>} : memref<2x1024xf32, #tpu.memory_space<vmem>>, vector<1x64xf32>,
    %c7_295 = arith.constant 7 : index
    %c0_296 = arith.constant 0 : index
    %471 = vector.load %arg13[%c7_295, %c0_296] : memref<16x64xf32, #tpu.memory_space<vmem>>, vector<1x64xf32>
    %c0_297 = arith.constant 0 : index
    %c448 = arith.constant 448 : index
    %472 = vector.load %arg14[%c0_297, %c448] : memref<2x1024xf32, #tpu.memory_space<vmem>>, vector<1x64xf32>
    tpu.vector_store %arg14[%c0_297, %c448], %471 {strides = array<i32>} : memref<2x1024xf32, #tpu.memory_space<vmem>>, vector<1x64xf32>,
    %c8_298 = arith.constant 8 : index
    %c0_299 = arith.constant 0 : index
    %473 = vector.load %arg13[%c8_298, %c0_299] : memref<16x64xf32, #tpu.memory_space<vmem>>, vector<1x64xf32>
    %c0_300 = arith.constant 0 : index
    %c512 = arith.constant 512 : index
    %474 = vector.load %arg14[%c0_300, %c512] : memref<2x1024xf32, #tpu.memory_space<vmem>>, vector<1x64xf32>
    tpu.vector_store %arg14[%c0_300, %c512], %473 {strides = array<i32>} : memref<2x1024xf32, #tpu.memory_space<vmem>>, vector<1x64xf32>,
    %c9_301 = arith.constant 9 : index
    %c0_302 = arith.constant 0 : index
    %475 = vector.load %arg13[%c9_301, %c0_302] : memref<16x64xf32, #tpu.memory_space<vmem>>, vector<1x64xf32>
    %c0_303 = arith.constant 0 : index
    %c576 = arith.constant 576 : index
    %476 = vector.load %arg14[%c0_303, %c576] : memref<2x1024xf32, #tpu.memory_space<vmem>>, vector<1x64xf32>
    tpu.vector_store %arg14[%c0_303, %c576], %475 {strides = array<i32>} : memref<2x1024xf32, #tpu.memory_space<vmem>>, vector<1x64xf32>,
    %c10_304 = arith.constant 10 : index
    %c0_305 = arith.constant 0 : index
    %477 = vector.load %arg13[%c10_304, %c0_305] : memref<16x64xf32, #tpu.memory_space<vmem>>, vector<1x64xf32>
    %c0_306 = arith.constant 0 : index
    %c640 = arith.constant 640 : index
    %478 = vector.load %arg14[%c0_306, %c640] : memref<2x1024xf32, #tpu.memory_space<vmem>>, vector<1x64xf32>
    tpu.vector_store %arg14[%c0_306, %c640], %477 {strides = array<i32>} : memref<2x1024xf32, #tpu.memory_space<vmem>>, vector<1x64xf32>,
    %c11_307 = arith.constant 11 : index
    %c0_308 = arith.constant 0 : index
    %479 = vector.load %arg13[%c11_307, %c0_308] : memref<16x64xf32, #tpu.memory_space<vmem>>, vector<1x64xf32>
    %c0_309 = arith.constant 0 : index
    %c704 = arith.constant 704 : index
    %480 = vector.load %arg14[%c0_309, %c704] : memref<2x1024xf32, #tpu.memory_space<vmem>>, vector<1x64xf32>
    tpu.vector_store %arg14[%c0_309, %c704], %479 {strides = array<i32>} : memref<2x1024xf32, #tpu.memory_space<vmem>>, vector<1x64xf32>,
    %c12_310 = arith.constant 12 : index
    %c0_311 = arith.constant 0 : index
    %481 = vector.load %arg13[%c12_310, %c0_311] : memref<16x64xf32, #tpu.memory_space<vmem>>, vector<1x64xf32>
    %c0_312 = arith.constant 0 : index
    %c768 = arith.constant 768 : index
    %482 = vector.load %arg14[%c0_312, %c768] : memref<2x1024xf32, #tpu.memory_space<vmem>>, vector<1x64xf32>
    tpu.vector_store %arg14[%c0_312, %c768], %481 {strides = array<i32>} : memref<2x1024xf32, #tpu.memory_space<vmem>>, vector<1x64xf32>,
    %c13_313 = arith.constant 13 : index
    %c0_314 = arith.constant 0 : index
    %483 = vector.load %arg13[%c13_313, %c0_314] : memref<16x64xf32, #tpu.memory_space<vmem>>, vector<1x64xf32>
    %c0_315 = arith.constant 0 : index
    %c832 = arith.constant 832 : index
    %484 = vector.load %arg14[%c0_315, %c832] : memref<2x1024xf32, #tpu.memory_space<vmem>>, vector<1x64xf32>
    tpu.vector_store %arg14[%c0_315, %c832], %483 {strides = array<i32>} : memref<2x1024xf32, #tpu.memory_space<vmem>>, vector<1x64xf32>,
    %c14_316 = arith.constant 14 : index
    %c0_317 = arith.constant 0 : index
    %485 = vector.load %arg13[%c14_316, %c0_317] : memref<16x64xf32, #tpu.memory_space<vmem>>, vector<1x64xf32>
    %c0_318 = arith.constant 0 : index
    %c896 = arith.constant 896 : index
    %486 = vector.load %arg14[%c0_318, %c896] : memref<2x1024xf32, #tpu.memory_space<vmem>>, vector<1x64xf32>
    tpu.vector_store %arg14[%c0_318, %c896], %485 {strides = array<i32>} : memref<2x1024xf32, #tpu.memory_space<vmem>>, vector<1x64xf32>,
    %c15_319 = arith.constant 15 : index
    %c0_320 = arith.constant 0 : index
    %487 = vector.load %arg13[%c15_319, %c0_320] : memref<16x64xf32, #tpu.memory_space<vmem>>, vector<1x64xf32>
    %c0_321 = arith.constant 0 : index
    %c960 = arith.constant 960 : index
    %488 = vector.load %arg14[%c0_321, %c960] : memref<2x1024xf32, #tpu.memory_space<vmem>>, vector<1x64xf32>
    tpu.vector_store %arg14[%c0_321, %c960], %487 {strides = array<i32>} : memref<2x1024xf32, #tpu.memory_space<vmem>>, vector<1x64xf32>,
    %c1_322 = arith.constant 1 : index
    %c0_323 = arith.constant 0 : index
    %c0_324 = arith.constant 0 : index
    %489 = vector.load %arg1[%c1_322, %c0_323, %c0_324] : memref<2x1x400xf32, #tpu.memory_space<vmem>>, vector<1x1x400xf32>
    %490 = vector.shape_cast %489 : vector<1x1x400xf32> to vector<1x400xf32>
    %491 = vector.extract_strided_slice %490 {offsets = [0, 0], sizes = [1, 316], strides = [1, 1]} : vector<1x400xf32> to vector<1x316xf32>
    %c0_325 = arith.constant 0 : index
    %c0_326 = arith.constant 0 : index
    %c0_327 = arith.constant 0 : index
    %492 = vector.load %arg2[%c0_325, %c0_326, %c0_327] : memref<25x8x1xf32, #tpu.memory_space<vmem>>, vector<1x8x1xf32>
    %493 = vector.shape_cast %492 : vector<1x8x1xf32> to vector<8x1xf32>
    %494 = vector.broadcast %493 : vector<8x1xf32> to vector<8x316xf32>
    %495 = vector.broadcast %491 : vector<1x316xf32> to vector<8x316xf32>
    %496 = arith.mulf %494, %495 : vector<8x316xf32>
    %497 = vector.extract_strided_slice %490 {offsets = [0, 1], sizes = [1, 316], strides = [1, 1]} : vector<1x400xf32> to vector<1x316xf32>
    %c1_328 = arith.constant 1 : index
    %c0_329 = arith.constant 0 : index
    %c0_330 = arith.constant 0 : index
    %498 = vector.load %arg2[%c1_328, %c0_329, %c0_330] : memref<25x8x1xf32, #tpu.memory_space<vmem>>, vector<1x8x1xf32>
    %499 = vector.shape_cast %498 : vector<1x8x1xf32> to vector<8x1xf32>
    %500 = vector.broadcast %499 : vector<8x1xf32> to vector<8x316xf32>
    %501 = vector.broadcast %497 : vector<1x316xf32> to vector<8x316xf32>
    %502 = arith.mulf %500, %501 : vector<8x316xf32>
    %503 = arith.addf %496, %502 : vector<8x316xf32>
    %504 = vector.extract_strided_slice %490 {offsets = [0, 2], sizes = [1, 316], strides = [1, 1]} : vector<1x400xf32> to vector<1x316xf32>
    %c2_331 = arith.constant 2 : index
    %c0_332 = arith.constant 0 : index
    %c0_333 = arith.constant 0 : index
    %505 = vector.load %arg2[%c2_331, %c0_332, %c0_333] : memref<25x8x1xf32, #tpu.memory_space<vmem>>, vector<1x8x1xf32>
    %506 = vector.shape_cast %505 : vector<1x8x1xf32> to vector<8x1xf32>
    %507 = vector.broadcast %506 : vector<8x1xf32> to vector<8x316xf32>
    %508 = vector.broadcast %504 : vector<1x316xf32> to vector<8x316xf32>
    %509 = arith.mulf %507, %508 : vector<8x316xf32>
    %510 = arith.addf %503, %509 : vector<8x316xf32>
    %511 = vector.extract_strided_slice %490 {offsets = [0, 3], sizes = [1, 316], strides = [1, 1]} : vector<1x400xf32> to vector<1x316xf32>
    %c3_334 = arith.constant 3 : index
    %c0_335 = arith.constant 0 : index
    %c0_336 = arith.constant 0 : index
    %512 = vector.load %arg2[%c3_334, %c0_335, %c0_336] : memref<25x8x1xf32, #tpu.memory_space<vmem>>, vector<1x8x1xf32>
    %513 = vector.shape_cast %512 : vector<1x8x1xf32> to vector<8x1xf32>
    %514 = vector.broadcast %513 : vector<8x1xf32> to vector<8x316xf32>
    %515 = vector.broadcast %511 : vector<1x316xf32> to vector<8x316xf32>
    %516 = arith.mulf %514, %515 : vector<8x316xf32>
    %517 = arith.addf %510, %516 : vector<8x316xf32>
    %518 = vector.extract_strided_slice %490 {offsets = [0, 4], sizes = [1, 316], strides = [1, 1]} : vector<1x400xf32> to vector<1x316xf32>
    %c4_337 = arith.constant 4 : index
    %c0_338 = arith.constant 0 : index
    %c0_339 = arith.constant 0 : index
    %519 = vector.load %arg2[%c4_337, %c0_338, %c0_339] : memref<25x8x1xf32, #tpu.memory_space<vmem>>, vector<1x8x1xf32>
    %520 = vector.shape_cast %519 : vector<1x8x1xf32> to vector<8x1xf32>
    %521 = vector.broadcast %520 : vector<8x1xf32> to vector<8x316xf32>
    %522 = vector.broadcast %518 : vector<1x316xf32> to vector<8x316xf32>
    %523 = arith.mulf %521, %522 : vector<8x316xf32>
    %524 = arith.addf %517, %523 : vector<8x316xf32>
    %525 = vector.extract_strided_slice %490 {offsets = [0, 20], sizes = [1, 316], strides = [1, 1]} : vector<1x400xf32> to vector<1x316xf32>
    %c5_340 = arith.constant 5 : index
    %c0_341 = arith.constant 0 : index
    %c0_342 = arith.constant 0 : index
    %526 = vector.load %arg2[%c5_340, %c0_341, %c0_342] : memref<25x8x1xf32, #tpu.memory_space<vmem>>, vector<1x8x1xf32>
    %527 = vector.shape_cast %526 : vector<1x8x1xf32> to vector<8x1xf32>
    %528 = vector.broadcast %527 : vector<8x1xf32> to vector<8x316xf32>
    %529 = vector.broadcast %525 : vector<1x316xf32> to vector<8x316xf32>
    %530 = arith.mulf %528, %529 : vector<8x316xf32>
    %531 = arith.addf %524, %530 : vector<8x316xf32>
    %532 = vector.extract_strided_slice %490 {offsets = [0, 21], sizes = [1, 316], strides = [1, 1]} : vector<1x400xf32> to vector<1x316xf32>
    %c6_343 = arith.constant 6 : index
    %c0_344 = arith.constant 0 : index
    %c0_345 = arith.constant 0 : index
    %533 = vector.load %arg2[%c6_343, %c0_344, %c0_345] : memref<25x8x1xf32, #tpu.memory_space<vmem>>, vector<1x8x1xf32>
    %534 = vector.shape_cast %533 : vector<1x8x1xf32> to vector<8x1xf32>
    %535 = vector.broadcast %534 : vector<8x1xf32> to vector<8x316xf32>
    %536 = vector.broadcast %532 : vector<1x316xf32> to vector<8x316xf32>
    %537 = arith.mulf %535, %536 : vector<8x316xf32>
    %538 = arith.addf %531, %537 : vector<8x316xf32>
    %539 = vector.extract_strided_slice %490 {offsets = [0, 22], sizes = [1, 316], strides = [1, 1]} : vector<1x400xf32> to vector<1x316xf32>
    %c7_346 = arith.constant 7 : index
    %c0_347 = arith.constant 0 : index
    %c0_348 = arith.constant 0 : index
    %540 = vector.load %arg2[%c7_346, %c0_347, %c0_348] : memref<25x8x1xf32, #tpu.memory_space<vmem>>, vector<1x8x1xf32>
    %541 = vector.shape_cast %540 : vector<1x8x1xf32> to vector<8x1xf32>
    %542 = vector.broadcast %541 : vector<8x1xf32> to vector<8x316xf32>
    %543 = vector.broadcast %539 : vector<1x316xf32> to vector<8x316xf32>
    %544 = arith.mulf %542, %543 : vector<8x316xf32>
    %545 = arith.addf %538, %544 : vector<8x316xf32>
    %546 = vector.extract_strided_slice %490 {offsets = [0, 23], sizes = [1, 316], strides = [1, 1]} : vector<1x400xf32> to vector<1x316xf32>
    %c8_349 = arith.constant 8 : index
    %c0_350 = arith.constant 0 : index
    %c0_351 = arith.constant 0 : index
    %547 = vector.load %arg2[%c8_349, %c0_350, %c0_351] : memref<25x8x1xf32, #tpu.memory_space<vmem>>, vector<1x8x1xf32>
    %548 = vector.shape_cast %547 : vector<1x8x1xf32> to vector<8x1xf32>
    %549 = vector.broadcast %548 : vector<8x1xf32> to vector<8x316xf32>
    %550 = vector.broadcast %546 : vector<1x316xf32> to vector<8x316xf32>
    %551 = arith.mulf %549, %550 : vector<8x316xf32>
    %552 = arith.addf %545, %551 : vector<8x316xf32>
    %553 = vector.extract_strided_slice %490 {offsets = [0, 24], sizes = [1, 316], strides = [1, 1]} : vector<1x400xf32> to vector<1x316xf32>
    %c9_352 = arith.constant 9 : index
    %c0_353 = arith.constant 0 : index
    %c0_354 = arith.constant 0 : index
    %554 = vector.load %arg2[%c9_352, %c0_353, %c0_354] : memref<25x8x1xf32, #tpu.memory_space<vmem>>, vector<1x8x1xf32>
    %555 = vector.shape_cast %554 : vector<1x8x1xf32> to vector<8x1xf32>
    %556 = vector.broadcast %555 : vector<8x1xf32> to vector<8x316xf32>
    %557 = vector.broadcast %553 : vector<1x316xf32> to vector<8x316xf32>
    %558 = arith.mulf %556, %557 : vector<8x316xf32>
    %559 = arith.addf %552, %558 : vector<8x316xf32>
    %560 = vector.extract_strided_slice %490 {offsets = [0, 40], sizes = [1, 316], strides = [1, 1]} : vector<1x400xf32> to vector<1x316xf32>
    %c10_355 = arith.constant 10 : index
    %c0_356 = arith.constant 0 : index
    %c0_357 = arith.constant 0 : index
    %561 = vector.load %arg2[%c10_355, %c0_356, %c0_357] : memref<25x8x1xf32, #tpu.memory_space<vmem>>, vector<1x8x1xf32>
    %562 = vector.shape_cast %561 : vector<1x8x1xf32> to vector<8x1xf32>
    %563 = vector.broadcast %562 : vector<8x1xf32> to vector<8x316xf32>
    %564 = vector.broadcast %560 : vector<1x316xf32> to vector<8x316xf32>
    %565 = arith.mulf %563, %564 : vector<8x316xf32>
    %566 = arith.addf %559, %565 : vector<8x316xf32>
    %567 = vector.extract_strided_slice %490 {offsets = [0, 41], sizes = [1, 316], strides = [1, 1]} : vector<1x400xf32> to vector<1x316xf32>
    %c11_358 = arith.constant 11 : index
    %c0_359 = arith.constant 0 : index
    %c0_360 = arith.constant 0 : index
    %568 = vector.load %arg2[%c11_358, %c0_359, %c0_360] : memref<25x8x1xf32, #tpu.memory_space<vmem>>, vector<1x8x1xf32>
    %569 = vector.shape_cast %568 : vector<1x8x1xf32> to vector<8x1xf32>
    %570 = vector.broadcast %569 : vector<8x1xf32> to vector<8x316xf32>
    %571 = vector.broadcast %567 : vector<1x316xf32> to vector<8x316xf32>
    %572 = arith.mulf %570, %571 : vector<8x316xf32>
    %573 = arith.addf %566, %572 : vector<8x316xf32>
    %574 = vector.extract_strided_slice %490 {offsets = [0, 42], sizes = [1, 316], strides = [1, 1]} : vector<1x400xf32> to vector<1x316xf32>
    %c12_361 = arith.constant 12 : index
    %c0_362 = arith.constant 0 : index
    %c0_363 = arith.constant 0 : index
    %575 = vector.load %arg2[%c12_361, %c0_362, %c0_363] : memref<25x8x1xf32, #tpu.memory_space<vmem>>, vector<1x8x1xf32>
    %576 = vector.shape_cast %575 : vector<1x8x1xf32> to vector<8x1xf32>
    %577 = vector.broadcast %576 : vector<8x1xf32> to vector<8x316xf32>
    %578 = vector.broadcast %574 : vector<1x316xf32> to vector<8x316xf32>
    %579 = arith.mulf %577, %578 : vector<8x316xf32>
    %580 = arith.addf %573, %579 : vector<8x316xf32>
    %581 = vector.extract_strided_slice %490 {offsets = [0, 43], sizes = [1, 316], strides = [1, 1]} : vector<1x400xf32> to vector<1x316xf32>
    %c13_364 = arith.constant 13 : index
    %c0_365 = arith.constant 0 : index
    %c0_366 = arith.constant 0 : index
    %582 = vector.load %arg2[%c13_364, %c0_365, %c0_366] : memref<25x8x1xf32, #tpu.memory_space<vmem>>, vector<1x8x1xf32>
    %583 = vector.shape_cast %582 : vector<1x8x1xf32> to vector<8x1xf32>
    %584 = vector.broadcast %583 : vector<8x1xf32> to vector<8x316xf32>
    %585 = vector.broadcast %581 : vector<1x316xf32> to vector<8x316xf32>
    %586 = arith.mulf %584, %585 : vector<8x316xf32>
    %587 = arith.addf %580, %586 : vector<8x316xf32>
    %588 = vector.extract_strided_slice %490 {offsets = [0, 44], sizes = [1, 316], strides = [1, 1]} : vector<1x400xf32> to vector<1x316xf32>
    %c14_367 = arith.constant 14 : index
    %c0_368 = arith.constant 0 : index
    %c0_369 = arith.constant 0 : index
    %589 = vector.load %arg2[%c14_367, %c0_368, %c0_369] : memref<25x8x1xf32, #tpu.memory_space<vmem>>, vector<1x8x1xf32>
    %590 = vector.shape_cast %589 : vector<1x8x1xf32> to vector<8x1xf32>
    %591 = vector.broadcast %590 : vector<8x1xf32> to vector<8x316xf32>
    %592 = vector.broadcast %588 : vector<1x316xf32> to vector<8x316xf32>
    %593 = arith.mulf %591, %592 : vector<8x316xf32>
    %594 = arith.addf %587, %593 : vector<8x316xf32>
    %595 = vector.extract_strided_slice %490 {offsets = [0, 60], sizes = [1, 316], strides = [1, 1]} : vector<1x400xf32> to vector<1x316xf32>
    %c15_370 = arith.constant 15 : index
    %c0_371 = arith.constant 0 : index
    %c0_372 = arith.constant 0 : index
    %596 = vector.load %arg2[%c15_370, %c0_371, %c0_372] : memref<25x8x1xf32, #tpu.memory_space<vmem>>, vector<1x8x1xf32>
    %597 = vector.shape_cast %596 : vector<1x8x1xf32> to vector<8x1xf32>
    %598 = vector.broadcast %597 : vector<8x1xf32> to vector<8x316xf32>
    %599 = vector.broadcast %595 : vector<1x316xf32> to vector<8x316xf32>
    %600 = arith.mulf %598, %599 : vector<8x316xf32>
    %601 = arith.addf %594, %600 : vector<8x316xf32>
    %602 = vector.extract_strided_slice %490 {offsets = [0, 61], sizes = [1, 316], strides = [1, 1]} : vector<1x400xf32> to vector<1x316xf32>
    %c16_373 = arith.constant 16 : index
    %c0_374 = arith.constant 0 : index
    %c0_375 = arith.constant 0 : index
    %603 = vector.load %arg2[%c16_373, %c0_374, %c0_375] : memref<25x8x1xf32, #tpu.memory_space<vmem>>, vector<1x8x1xf32>
    %604 = vector.shape_cast %603 : vector<1x8x1xf32> to vector<8x1xf32>
    %605 = vector.broadcast %604 : vector<8x1xf32> to vector<8x316xf32>
    %606 = vector.broadcast %602 : vector<1x316xf32> to vector<8x316xf32>
    %607 = arith.mulf %605, %606 : vector<8x316xf32>
    %608 = arith.addf %601, %607 : vector<8x316xf32>
    %609 = vector.extract_strided_slice %490 {offsets = [0, 62], sizes = [1, 316], strides = [1, 1]} : vector<1x400xf32> to vector<1x316xf32>
    %c17_376 = arith.constant 17 : index
    %c0_377 = arith.constant 0 : index
    %c0_378 = arith.constant 0 : index
    %610 = vector.load %arg2[%c17_376, %c0_377, %c0_378] : memref<25x8x1xf32, #tpu.memory_space<vmem>>, vector<1x8x1xf32>
    %611 = vector.shape_cast %610 : vector<1x8x1xf32> to vector<8x1xf32>
    %612 = vector.broadcast %611 : vector<8x1xf32> to vector<8x316xf32>
    %613 = vector.broadcast %609 : vector<1x316xf32> to vector<8x316xf32>
    %614 = arith.mulf %612, %613 : vector<8x316xf32>
    %615 = arith.addf %608, %614 : vector<8x316xf32>
    %616 = vector.extract_strided_slice %490 {offsets = [0, 63], sizes = [1, 316], strides = [1, 1]} : vector<1x400xf32> to vector<1x316xf32>
    %c18_379 = arith.constant 18 : index
    %c0_380 = arith.constant 0 : index
    %c0_381 = arith.constant 0 : index
    %617 = vector.load %arg2[%c18_379, %c0_380, %c0_381] : memref<25x8x1xf32, #tpu.memory_space<vmem>>, vector<1x8x1xf32>
    %618 = vector.shape_cast %617 : vector<1x8x1xf32> to vector<8x1xf32>
    %619 = vector.broadcast %618 : vector<8x1xf32> to vector<8x316xf32>
    %620 = vector.broadcast %616 : vector<1x316xf32> to vector<8x316xf32>
    %621 = arith.mulf %619, %620 : vector<8x316xf32>
    %622 = arith.addf %615, %621 : vector<8x316xf32>
    %623 = vector.extract_strided_slice %490 {offsets = [0, 64], sizes = [1, 316], strides = [1, 1]} : vector<1x400xf32> to vector<1x316xf32>
    %c19_382 = arith.constant 19 : index
    %c0_383 = arith.constant 0 : index
    %c0_384 = arith.constant 0 : index
    %624 = vector.load %arg2[%c19_382, %c0_383, %c0_384] : memref<25x8x1xf32, #tpu.memory_space<vmem>>, vector<1x8x1xf32>
    %625 = vector.shape_cast %624 : vector<1x8x1xf32> to vector<8x1xf32>
    %626 = vector.broadcast %625 : vector<8x1xf32> to vector<8x316xf32>
    %627 = vector.broadcast %623 : vector<1x316xf32> to vector<8x316xf32>
    %628 = arith.mulf %626, %627 : vector<8x316xf32>
    %629 = arith.addf %622, %628 : vector<8x316xf32>
    %630 = vector.extract_strided_slice %490 {offsets = [0, 80], sizes = [1, 316], strides = [1, 1]} : vector<1x400xf32> to vector<1x316xf32>
    %c20_385 = arith.constant 20 : index
    %c0_386 = arith.constant 0 : index
    %c0_387 = arith.constant 0 : index
    %631 = vector.load %arg2[%c20_385, %c0_386, %c0_387] : memref<25x8x1xf32, #tpu.memory_space<vmem>>, vector<1x8x1xf32>
    %632 = vector.shape_cast %631 : vector<1x8x1xf32> to vector<8x1xf32>
    %633 = vector.broadcast %632 : vector<8x1xf32> to vector<8x316xf32>
    %634 = vector.broadcast %630 : vector<1x316xf32> to vector<8x316xf32>
    %635 = arith.mulf %633, %634 : vector<8x316xf32>
    %636 = arith.addf %629, %635 : vector<8x316xf32>
    %637 = vector.extract_strided_slice %490 {offsets = [0, 81], sizes = [1, 316], strides = [1, 1]} : vector<1x400xf32> to vector<1x316xf32>
    %c21_388 = arith.constant 21 : index
    %c0_389 = arith.constant 0 : index
    %c0_390 = arith.constant 0 : index
    %638 = vector.load %arg2[%c21_388, %c0_389, %c0_390] : memref<25x8x1xf32, #tpu.memory_space<vmem>>, vector<1x8x1xf32>
    %639 = vector.shape_cast %638 : vector<1x8x1xf32> to vector<8x1xf32>
    %640 = vector.broadcast %639 : vector<8x1xf32> to vector<8x316xf32>
    %641 = vector.broadcast %637 : vector<1x316xf32> to vector<8x316xf32>
    %642 = arith.mulf %640, %641 : vector<8x316xf32>
    %643 = arith.addf %636, %642 : vector<8x316xf32>
    %644 = vector.extract_strided_slice %490 {offsets = [0, 82], sizes = [1, 316], strides = [1, 1]} : vector<1x400xf32> to vector<1x316xf32>
    %c22_391 = arith.constant 22 : index
    %c0_392 = arith.constant 0 : index
    %c0_393 = arith.constant 0 : index
    %645 = vector.load %arg2[%c22_391, %c0_392, %c0_393] : memref<25x8x1xf32, #tpu.memory_space<vmem>>, vector<1x8x1xf32>
    %646 = vector.shape_cast %645 : vector<1x8x1xf32> to vector<8x1xf32>
    %647 = vector.broadcast %646 : vector<8x1xf32> to vector<8x316xf32>
    %648 = vector.broadcast %644 : vector<1x316xf32> to vector<8x316xf32>
    %649 = arith.mulf %647, %648 : vector<8x316xf32>
    %650 = arith.addf %643, %649 : vector<8x316xf32>
    %651 = vector.extract_strided_slice %490 {offsets = [0, 83], sizes = [1, 316], strides = [1, 1]} : vector<1x400xf32> to vector<1x316xf32>
    %c23_394 = arith.constant 23 : index
    %c0_395 = arith.constant 0 : index
    %c0_396 = arith.constant 0 : index
    %652 = vector.load %arg2[%c23_394, %c0_395, %c0_396] : memref<25x8x1xf32, #tpu.memory_space<vmem>>, vector<1x8x1xf32>
    %653 = vector.shape_cast %652 : vector<1x8x1xf32> to vector<8x1xf32>
    %654 = vector.broadcast %653 : vector<8x1xf32> to vector<8x316xf32>
    %655 = vector.broadcast %651 : vector<1x316xf32> to vector<8x316xf32>
    %656 = arith.mulf %654, %655 : vector<8x316xf32>
    %657 = arith.addf %650, %656 : vector<8x316xf32>
    %658 = vector.extract_strided_slice %490 {offsets = [0, 84], sizes = [1, 316], strides = [1, 1]} : vector<1x400xf32> to vector<1x316xf32>
    %c24_397 = arith.constant 24 : index
    %c0_398 = arith.constant 0 : index
    %c0_399 = arith.constant 0 : index
    %659 = vector.load %arg2[%c24_397, %c0_398, %c0_399] : memref<25x8x1xf32, #tpu.memory_space<vmem>>, vector<1x8x1xf32>
    %660 = vector.shape_cast %659 : vector<1x8x1xf32> to vector<8x1xf32>
    %661 = vector.broadcast %660 : vector<8x1xf32> to vector<8x316xf32>
    %662 = vector.broadcast %658 : vector<1x316xf32> to vector<8x316xf32>
    %663 = arith.mulf %661, %662 : vector<8x316xf32>
    %664 = arith.addf %657, %663 : vector<8x316xf32>
    %665 = vector.broadcast %2 : vector<8x1xf32> to vector<8x316xf32>
    %666 = arith.addf %664, %665 : vector<8x316xf32>
    %cst_400 = arith.constant 0.000000e+00 : f32
    %667 = vector.broadcast %cst_400 : f32 to vector<8x316xf32>
    %668 = arith.maximumf %666, %667 : vector<8x316xf32>
    %669 = vector.extract_strided_slice %668 {offsets = [0, 0], sizes = [8, 232], strides = [1, 1]} : vector<8x316xf32> to vector<8x232xf32>
    %c0_401 = arith.constant 0 : index
    %c0_402 = arith.constant 0 : index
    %c0_403 = arith.constant 0 : index
    %670 = vector.load %arg4[%c0_401, %c0_402, %c0_403] : memref<25x16x8xf32, #tpu.memory_space<vmem>>, vector<1x16x8xf32>
    %671 = vector.shape_cast %670 : vector<1x16x8xf32> to vector<16x8xf32>
    %cst_404 = arith.constant dense<0.000000e+00> : vector<16x232xf32>
    %672 = tpu.matmul %671, %669, %cst_404 {dimension_numbers = #tpu.dot_dimension_numbers<[1], [0], [0], [1], [0, 0, 1, 1], [], []>} : vector<16x8xf32>, vector<8x232xf32>, vector<16x232xf32> -> vector<16x232xf32>
    %673 = vector.extract_strided_slice %668 {offsets = [0, 1], sizes = [8, 232], strides = [1, 1]} : vector<8x316xf32> to vector<8x232xf32>
    %c1_405 = arith.constant 1 : index
    %c0_406 = arith.constant 0 : index
    %c0_407 = arith.constant 0 : index
    %674 = vector.load %arg4[%c1_405, %c0_406, %c0_407] : memref<25x16x8xf32, #tpu.memory_space<vmem>>, vector<1x16x8xf32>
    %675 = vector.shape_cast %674 : vector<1x16x8xf32> to vector<16x8xf32>
    %cst_408 = arith.constant dense<0.000000e+00> : vector<16x232xf32>
    %676 = tpu.matmul %675, %673, %cst_408 {dimension_numbers = #tpu.dot_dimension_numbers<[1], [0], [0], [1], [0, 0, 1, 1], [], []>} : vector<16x8xf32>, vector<8x232xf32>, vector<16x232xf32> -> vector<16x232xf32>
    %677 = arith.addf %672, %676 : vector<16x232xf32>
    %678 = vector.extract_strided_slice %668 {offsets = [0, 2], sizes = [8, 232], strides = [1, 1]} : vector<8x316xf32> to vector<8x232xf32>
    %c2_409 = arith.constant 2 : index
    %c0_410 = arith.constant 0 : index
    %c0_411 = arith.constant 0 : index
    %679 = vector.load %arg4[%c2_409, %c0_410, %c0_411] : memref<25x16x8xf32, #tpu.memory_space<vmem>>, vector<1x16x8xf32>
    %680 = vector.shape_cast %679 : vector<1x16x8xf32> to vector<16x8xf32>
    %cst_412 = arith.constant dense<0.000000e+00> : vector<16x232xf32>
    %681 = tpu.matmul %680, %678, %cst_412 {dimension_numbers = #tpu.dot_dimension_numbers<[1], [0], [0], [1], [0, 0, 1, 1], [], []>} : vector<16x8xf32>, vector<8x232xf32>, vector<16x232xf32> -> vector<16x232xf32>
    %682 = arith.addf %677, %681 : vector<16x232xf32>
    %683 = vector.extract_strided_slice %668 {offsets = [0, 3], sizes = [8, 232], strides = [1, 1]} : vector<8x316xf32> to vector<8x232xf32>
    %c3_413 = arith.constant 3 : index
    %c0_414 = arith.constant 0 : index
    %c0_415 = arith.constant 0 : index
    %684 = vector.load %arg4[%c3_413, %c0_414, %c0_415] : memref<25x16x8xf32, #tpu.memory_space<vmem>>, vector<1x16x8xf32>
    %685 = vector.shape_cast %684 : vector<1x16x8xf32> to vector<16x8xf32>
    %cst_416 = arith.constant dense<0.000000e+00> : vector<16x232xf32>
    %686 = tpu.matmul %685, %683, %cst_416 {dimension_numbers = #tpu.dot_dimension_numbers<[1], [0], [0], [1], [0, 0, 1, 1], [], []>} : vector<16x8xf32>, vector<8x232xf32>, vector<16x232xf32> -> vector<16x232xf32>
    %687 = arith.addf %682, %686 : vector<16x232xf32>
    %688 = vector.extract_strided_slice %668 {offsets = [0, 4], sizes = [8, 232], strides = [1, 1]} : vector<8x316xf32> to vector<8x232xf32>
    %c4_417 = arith.constant 4 : index
    %c0_418 = arith.constant 0 : index
    %c0_419 = arith.constant 0 : index
    %689 = vector.load %arg4[%c4_417, %c0_418, %c0_419] : memref<25x16x8xf32, #tpu.memory_space<vmem>>, vector<1x16x8xf32>
    %690 = vector.shape_cast %689 : vector<1x16x8xf32> to vector<16x8xf32>
    %cst_420 = arith.constant dense<0.000000e+00> : vector<16x232xf32>
    %691 = tpu.matmul %690, %688, %cst_420 {dimension_numbers = #tpu.dot_dimension_numbers<[1], [0], [0], [1], [0, 0, 1, 1], [], []>} : vector<16x8xf32>, vector<8x232xf32>, vector<16x232xf32> -> vector<16x232xf32>
    %692 = arith.addf %687, %691 : vector<16x232xf32>
    %693 = vector.extract_strided_slice %668 {offsets = [0, 20], sizes = [8, 232], strides = [1, 1]} : vector<8x316xf32> to vector<8x232xf32>
    %c5_421 = arith.constant 5 : index
    %c0_422 = arith.constant 0 : index
    %c0_423 = arith.constant 0 : index
    %694 = vector.load %arg4[%c5_421, %c0_422, %c0_423] : memref<25x16x8xf32, #tpu.memory_space<vmem>>, vector<1x16x8xf32>
    %695 = vector.shape_cast %694 : vector<1x16x8xf32> to vector<16x8xf32>
    %cst_424 = arith.constant dense<0.000000e+00> : vector<16x232xf32>
    %696 = tpu.matmul %695, %693, %cst_424 {dimension_numbers = #tpu.dot_dimension_numbers<[1], [0], [0], [1], [0, 0, 1, 1], [], []>} : vector<16x8xf32>, vector<8x232xf32>, vector<16x232xf32> -> vector<16x232xf32>
    %697 = arith.addf %692, %696 : vector<16x232xf32>
    %698 = vector.extract_strided_slice %668 {offsets = [0, 21], sizes = [8, 232], strides = [1, 1]} : vector<8x316xf32> to vector<8x232xf32>
    %c6_425 = arith.constant 6 : index
    %c0_426 = arith.constant 0 : index
    %c0_427 = arith.constant 0 : index
    %699 = vector.load %arg4[%c6_425, %c0_426, %c0_427] : memref<25x16x8xf32, #tpu.memory_space<vmem>>, vector<1x16x8xf32>
    %700 = vector.shape_cast %699 : vector<1x16x8xf32> to vector<16x8xf32>
    %cst_428 = arith.constant dense<0.000000e+00> : vector<16x232xf32>
    %701 = tpu.matmul %700, %698, %cst_428 {dimension_numbers = #tpu.dot_dimension_numbers<[1], [0], [0], [1], [0, 0, 1, 1], [], []>} : vector<16x8xf32>, vector<8x232xf32>, vector<16x232xf32> -> vector<16x232xf32>
    %702 = arith.addf %697, %701 : vector<16x232xf32>
    %703 = vector.extract_strided_slice %668 {offsets = [0, 22], sizes = [8, 232], strides = [1, 1]} : vector<8x316xf32> to vector<8x232xf32>
    %c7_429 = arith.constant 7 : index
    %c0_430 = arith.constant 0 : index
    %c0_431 = arith.constant 0 : index
    %704 = vector.load %arg4[%c7_429, %c0_430, %c0_431] : memref<25x16x8xf32, #tpu.memory_space<vmem>>, vector<1x16x8xf32>
    %705 = vector.shape_cast %704 : vector<1x16x8xf32> to vector<16x8xf32>
    %cst_432 = arith.constant dense<0.000000e+00> : vector<16x232xf32>
    %706 = tpu.matmul %705, %703, %cst_432 {dimension_numbers = #tpu.dot_dimension_numbers<[1], [0], [0], [1], [0, 0, 1, 1], [], []>} : vector<16x8xf32>, vector<8x232xf32>, vector<16x232xf32> -> vector<16x232xf32>
    %707 = arith.addf %702, %706 : vector<16x232xf32>
    %708 = vector.extract_strided_slice %668 {offsets = [0, 23], sizes = [8, 232], strides = [1, 1]} : vector<8x316xf32> to vector<8x232xf32>
    %c8_433 = arith.constant 8 : index
    %c0_434 = arith.constant 0 : index
    %c0_435 = arith.constant 0 : index
    %709 = vector.load %arg4[%c8_433, %c0_434, %c0_435] : memref<25x16x8xf32, #tpu.memory_space<vmem>>, vector<1x16x8xf32>
    %710 = vector.shape_cast %709 : vector<1x16x8xf32> to vector<16x8xf32>
    %cst_436 = arith.constant dense<0.000000e+00> : vector<16x232xf32>
    %711 = tpu.matmul %710, %708, %cst_436 {dimension_numbers = #tpu.dot_dimension_numbers<[1], [0], [0], [1], [0, 0, 1, 1], [], []>} : vector<16x8xf32>, vector<8x232xf32>, vector<16x232xf32> -> vector<16x232xf32>
    %712 = arith.addf %707, %711 : vector<16x232xf32>
    %713 = vector.extract_strided_slice %668 {offsets = [0, 24], sizes = [8, 232], strides = [1, 1]} : vector<8x316xf32> to vector<8x232xf32>
    %c9_437 = arith.constant 9 : index
    %c0_438 = arith.constant 0 : index
    %c0_439 = arith.constant 0 : index
    %714 = vector.load %arg4[%c9_437, %c0_438, %c0_439] : memref<25x16x8xf32, #tpu.memory_space<vmem>>, vector<1x16x8xf32>
    %715 = vector.shape_cast %714 : vector<1x16x8xf32> to vector<16x8xf32>
    %cst_440 = arith.constant dense<0.000000e+00> : vector<16x232xf32>
    %716 = tpu.matmul %715, %713, %cst_440 {dimension_numbers = #tpu.dot_dimension_numbers<[1], [0], [0], [1], [0, 0, 1, 1], [], []>} : vector<16x8xf32>, vector<8x232xf32>, vector<16x232xf32> -> vector<16x232xf32>
    %717 = arith.addf %712, %716 : vector<16x232xf32>
    %718 = vector.extract_strided_slice %668 {offsets = [0, 40], sizes = [8, 232], strides = [1, 1]} : vector<8x316xf32> to vector<8x232xf32>
    %c10_441 = arith.constant 10 : index
    %c0_442 = arith.constant 0 : index
    %c0_443 = arith.constant 0 : index
    %719 = vector.load %arg4[%c10_441, %c0_442, %c0_443] : memref<25x16x8xf32, #tpu.memory_space<vmem>>, vector<1x16x8xf32>
    %720 = vector.shape_cast %719 : vector<1x16x8xf32> to vector<16x8xf32>
    %cst_444 = arith.constant dense<0.000000e+00> : vector<16x232xf32>
    %721 = tpu.matmul %720, %718, %cst_444 {dimension_numbers = #tpu.dot_dimension_numbers<[1], [0], [0], [1], [0, 0, 1, 1], [], []>} : vector<16x8xf32>, vector<8x232xf32>, vector<16x232xf32> -> vector<16x232xf32>
    %722 = arith.addf %717, %721 : vector<16x232xf32>
    %723 = vector.extract_strided_slice %668 {offsets = [0, 41], sizes = [8, 232], strides = [1, 1]} : vector<8x316xf32> to vector<8x232xf32>
    %c11_445 = arith.constant 11 : index
    %c0_446 = arith.constant 0 : index
    %c0_447 = arith.constant 0 : index
    %724 = vector.load %arg4[%c11_445, %c0_446, %c0_447] : memref<25x16x8xf32, #tpu.memory_space<vmem>>, vector<1x16x8xf32>
    %725 = vector.shape_cast %724 : vector<1x16x8xf32> to vector<16x8xf32>
    %cst_448 = arith.constant dense<0.000000e+00> : vector<16x232xf32>
    %726 = tpu.matmul %725, %723, %cst_448 {dimension_numbers = #tpu.dot_dimension_numbers<[1], [0], [0], [1], [0, 0, 1, 1], [], []>} : vector<16x8xf32>, vector<8x232xf32>, vector<16x232xf32> -> vector<16x232xf32>
    %727 = arith.addf %722, %726 : vector<16x232xf32>
    %728 = vector.extract_strided_slice %668 {offsets = [0, 42], sizes = [8, 232], strides = [1, 1]} : vector<8x316xf32> to vector<8x232xf32>
    %c12_449 = arith.constant 12 : index
    %c0_450 = arith.constant 0 : index
    %c0_451 = arith.constant 0 : index
    %729 = vector.load %arg4[%c12_449, %c0_450, %c0_451] : memref<25x16x8xf32, #tpu.memory_space<vmem>>, vector<1x16x8xf32>
    %730 = vector.shape_cast %729 : vector<1x16x8xf32> to vector<16x8xf32>
    %cst_452 = arith.constant dense<0.000000e+00> : vector<16x232xf32>
    %731 = tpu.matmul %730, %728, %cst_452 {dimension_numbers = #tpu.dot_dimension_numbers<[1], [0], [0], [1], [0, 0, 1, 1], [], []>} : vector<16x8xf32>, vector<8x232xf32>, vector<16x232xf32> -> vector<16x232xf32>
    %732 = arith.addf %727, %731 : vector<16x232xf32>
    %733 = vector.extract_strided_slice %668 {offsets = [0, 43], sizes = [8, 232], strides = [1, 1]} : vector<8x316xf32> to vector<8x232xf32>
    %c13_453 = arith.constant 13 : index
    %c0_454 = arith.constant 0 : index
    %c0_455 = arith.constant 0 : index
    %734 = vector.load %arg4[%c13_453, %c0_454, %c0_455] : memref<25x16x8xf32, #tpu.memory_space<vmem>>, vector<1x16x8xf32>
    %735 = vector.shape_cast %734 : vector<1x16x8xf32> to vector<16x8xf32>
    %cst_456 = arith.constant dense<0.000000e+00> : vector<16x232xf32>
    %736 = tpu.matmul %735, %733, %cst_456 {dimension_numbers = #tpu.dot_dimension_numbers<[1], [0], [0], [1], [0, 0, 1, 1], [], []>} : vector<16x8xf32>, vector<8x232xf32>, vector<16x232xf32> -> vector<16x232xf32>
    %737 = arith.addf %732, %736 : vector<16x232xf32>
    %738 = vector.extract_strided_slice %668 {offsets = [0, 44], sizes = [8, 232], strides = [1, 1]} : vector<8x316xf32> to vector<8x232xf32>
    %c14_457 = arith.constant 14 : index
    %c0_458 = arith.constant 0 : index
    %c0_459 = arith.constant 0 : index
    %739 = vector.load %arg4[%c14_457, %c0_458, %c0_459] : memref<25x16x8xf32, #tpu.memory_space<vmem>>, vector<1x16x8xf32>
    %740 = vector.shape_cast %739 : vector<1x16x8xf32> to vector<16x8xf32>
    %cst_460 = arith.constant dense<0.000000e+00> : vector<16x232xf32>
    %741 = tpu.matmul %740, %738, %cst_460 {dimension_numbers = #tpu.dot_dimension_numbers<[1], [0], [0], [1], [0, 0, 1, 1], [], []>} : vector<16x8xf32>, vector<8x232xf32>, vector<16x232xf32> -> vector<16x232xf32>
    %742 = arith.addf %737, %741 : vector<16x232xf32>
    %743 = vector.extract_strided_slice %668 {offsets = [0, 60], sizes = [8, 232], strides = [1, 1]} : vector<8x316xf32> to vector<8x232xf32>
    %c15_461 = arith.constant 15 : index
    %c0_462 = arith.constant 0 : index
    %c0_463 = arith.constant 0 : index
    %744 = vector.load %arg4[%c15_461, %c0_462, %c0_463] : memref<25x16x8xf32, #tpu.memory_space<vmem>>, vector<1x16x8xf32>
    %745 = vector.shape_cast %744 : vector<1x16x8xf32> to vector<16x8xf32>
    %cst_464 = arith.constant dense<0.000000e+00> : vector<16x232xf32>
    %746 = tpu.matmul %745, %743, %cst_464 {dimension_numbers = #tpu.dot_dimension_numbers<[1], [0], [0], [1], [0, 0, 1, 1], [], []>} : vector<16x8xf32>, vector<8x232xf32>, vector<16x232xf32> -> vector<16x232xf32>
    %747 = arith.addf %742, %746 : vector<16x232xf32>
    %748 = vector.extract_strided_slice %668 {offsets = [0, 61], sizes = [8, 232], strides = [1, 1]} : vector<8x316xf32> to vector<8x232xf32>
    %c16_465 = arith.constant 16 : index
    %c0_466 = arith.constant 0 : index
    %c0_467 = arith.constant 0 : index
    %749 = vector.load %arg4[%c16_465, %c0_466, %c0_467] : memref<25x16x8xf32, #tpu.memory_space<vmem>>, vector<1x16x8xf32>
    %750 = vector.shape_cast %749 : vector<1x16x8xf32> to vector<16x8xf32>
    %cst_468 = arith.constant dense<0.000000e+00> : vector<16x232xf32>
    %751 = tpu.matmul %750, %748, %cst_468 {dimension_numbers = #tpu.dot_dimension_numbers<[1], [0], [0], [1], [0, 0, 1, 1], [], []>} : vector<16x8xf32>, vector<8x232xf32>, vector<16x232xf32> -> vector<16x232xf32>
    %752 = arith.addf %747, %751 : vector<16x232xf32>
    %753 = vector.extract_strided_slice %668 {offsets = [0, 62], sizes = [8, 232], strides = [1, 1]} : vector<8x316xf32> to vector<8x232xf32>
    %c17_469 = arith.constant 17 : index
    %c0_470 = arith.constant 0 : index
    %c0_471 = arith.constant 0 : index
    %754 = vector.load %arg4[%c17_469, %c0_470, %c0_471] : memref<25x16x8xf32, #tpu.memory_space<vmem>>, vector<1x16x8xf32>
    %755 = vector.shape_cast %754 : vector<1x16x8xf32> to vector<16x8xf32>
    %cst_472 = arith.constant dense<0.000000e+00> : vector<16x232xf32>
    %756 = tpu.matmul %755, %753, %cst_472 {dimension_numbers = #tpu.dot_dimension_numbers<[1], [0], [0], [1], [0, 0, 1, 1], [], []>} : vector<16x8xf32>, vector<8x232xf32>, vector<16x232xf32> -> vector<16x232xf32>
    %757 = arith.addf %752, %756 : vector<16x232xf32>
    %758 = vector.extract_strided_slice %668 {offsets = [0, 63], sizes = [8, 232], strides = [1, 1]} : vector<8x316xf32> to vector<8x232xf32>
    %c18_473 = arith.constant 18 : index
    %c0_474 = arith.constant 0 : index
    %c0_475 = arith.constant 0 : index
    %759 = vector.load %arg4[%c18_473, %c0_474, %c0_475] : memref<25x16x8xf32, #tpu.memory_space<vmem>>, vector<1x16x8xf32>
    %760 = vector.shape_cast %759 : vector<1x16x8xf32> to vector<16x8xf32>
    %cst_476 = arith.constant dense<0.000000e+00> : vector<16x232xf32>
    %761 = tpu.matmul %760, %758, %cst_476 {dimension_numbers = #tpu.dot_dimension_numbers<[1], [0], [0], [1], [0, 0, 1, 1], [], []>} : vector<16x8xf32>, vector<8x232xf32>, vector<16x232xf32> -> vector<16x232xf32>
    %762 = arith.addf %757, %761 : vector<16x232xf32>
    %763 = vector.extract_strided_slice %668 {offsets = [0, 64], sizes = [8, 232], strides = [1, 1]} : vector<8x316xf32> to vector<8x232xf32>
    %c19_477 = arith.constant 19 : index
    %c0_478 = arith.constant 0 : index
    %c0_479 = arith.constant 0 : index
    %764 = vector.load %arg4[%c19_477, %c0_478, %c0_479] : memref<25x16x8xf32, #tpu.memory_space<vmem>>, vector<1x16x8xf32>
    %765 = vector.shape_cast %764 : vector<1x16x8xf32> to vector<16x8xf32>
    %cst_480 = arith.constant dense<0.000000e+00> : vector<16x232xf32>
    %766 = tpu.matmul %765, %763, %cst_480 {dimension_numbers = #tpu.dot_dimension_numbers<[1], [0], [0], [1], [0, 0, 1, 1], [], []>} : vector<16x8xf32>, vector<8x232xf32>, vector<16x232xf32> -> vector<16x232xf32>
    %767 = arith.addf %762, %766 : vector<16x232xf32>
    %768 = vector.extract_strided_slice %668 {offsets = [0, 80], sizes = [8, 232], strides = [1, 1]} : vector<8x316xf32> to vector<8x232xf32>
    %c20_481 = arith.constant 20 : index
    %c0_482 = arith.constant 0 : index
    %c0_483 = arith.constant 0 : index
    %769 = vector.load %arg4[%c20_481, %c0_482, %c0_483] : memref<25x16x8xf32, #tpu.memory_space<vmem>>, vector<1x16x8xf32>
    %770 = vector.shape_cast %769 : vector<1x16x8xf32> to vector<16x8xf32>
    %cst_484 = arith.constant dense<0.000000e+00> : vector<16x232xf32>
    %771 = tpu.matmul %770, %768, %cst_484 {dimension_numbers = #tpu.dot_dimension_numbers<[1], [0], [0], [1], [0, 0, 1, 1], [], []>} : vector<16x8xf32>, vector<8x232xf32>, vector<16x232xf32> -> vector<16x232xf32>
    %772 = arith.addf %767, %771 : vector<16x232xf32>
    %773 = vector.extract_strided_slice %668 {offsets = [0, 81], sizes = [8, 232], strides = [1, 1]} : vector<8x316xf32> to vector<8x232xf32>
    %c21_485 = arith.constant 21 : index
    %c0_486 = arith.constant 0 : index
    %c0_487 = arith.constant 0 : index
    %774 = vector.load %arg4[%c21_485, %c0_486, %c0_487] : memref<25x16x8xf32, #tpu.memory_space<vmem>>, vector<1x16x8xf32>
    %775 = vector.shape_cast %774 : vector<1x16x8xf32> to vector<16x8xf32>
    %cst_488 = arith.constant dense<0.000000e+00> : vector<16x232xf32>
    %776 = tpu.matmul %775, %773, %cst_488 {dimension_numbers = #tpu.dot_dimension_numbers<[1], [0], [0], [1], [0, 0, 1, 1], [], []>} : vector<16x8xf32>, vector<8x232xf32>, vector<16x232xf32> -> vector<16x232xf32>
    %777 = arith.addf %772, %776 : vector<16x232xf32>
    %778 = vector.extract_strided_slice %668 {offsets = [0, 82], sizes = [8, 232], strides = [1, 1]} : vector<8x316xf32> to vector<8x232xf32>
    %c22_489 = arith.constant 22 : index
    %c0_490 = arith.constant 0 : index
    %c0_491 = arith.constant 0 : index
    %779 = vector.load %arg4[%c22_489, %c0_490, %c0_491] : memref<25x16x8xf32, #tpu.memory_space<vmem>>, vector<1x16x8xf32>
    %780 = vector.shape_cast %779 : vector<1x16x8xf32> to vector<16x8xf32>
    %cst_492 = arith.constant dense<0.000000e+00> : vector<16x232xf32>
    %781 = tpu.matmul %780, %778, %cst_492 {dimension_numbers = #tpu.dot_dimension_numbers<[1], [0], [0], [1], [0, 0, 1, 1], [], []>} : vector<16x8xf32>, vector<8x232xf32>, vector<16x232xf32> -> vector<16x232xf32>
    %782 = arith.addf %777, %781 : vector<16x232xf32>
    %783 = vector.extract_strided_slice %668 {offsets = [0, 83], sizes = [8, 232], strides = [1, 1]} : vector<8x316xf32> to vector<8x232xf32>
    %c23_493 = arith.constant 23 : index
    %c0_494 = arith.constant 0 : index
    %c0_495 = arith.constant 0 : index
    %784 = vector.load %arg4[%c23_493, %c0_494, %c0_495] : memref<25x16x8xf32, #tpu.memory_space<vmem>>, vector<1x16x8xf32>
    %785 = vector.shape_cast %784 : vector<1x16x8xf32> to vector<16x8xf32>
    %cst_496 = arith.constant dense<0.000000e+00> : vector<16x232xf32>
    %786 = tpu.matmul %785, %783, %cst_496 {dimension_numbers = #tpu.dot_dimension_numbers<[1], [0], [0], [1], [0, 0, 1, 1], [], []>} : vector<16x8xf32>, vector<8x232xf32>, vector<16x232xf32> -> vector<16x232xf32>
    %787 = arith.addf %782, %786 : vector<16x232xf32>
    %788 = vector.extract_strided_slice %668 {offsets = [0, 84], sizes = [8, 232], strides = [1, 1]} : vector<8x316xf32> to vector<8x232xf32>
    %c24_497 = arith.constant 24 : index
    %c0_498 = arith.constant 0 : index
    %c0_499 = arith.constant 0 : index
    %789 = vector.load %arg4[%c24_497, %c0_498, %c0_499] : memref<25x16x8xf32, #tpu.memory_space<vmem>>, vector<1x16x8xf32>
    %790 = vector.shape_cast %789 : vector<1x16x8xf32> to vector<16x8xf32>
    %cst_500 = arith.constant dense<0.000000e+00> : vector<16x232xf32>
    %791 = tpu.matmul %790, %788, %cst_500 {dimension_numbers = #tpu.dot_dimension_numbers<[1], [0], [0], [1], [0, 0, 1, 1], [], []>} : vector<16x8xf32>, vector<8x232xf32>, vector<16x232xf32> -> vector<16x232xf32>
    %792 = arith.addf %787, %791 : vector<16x232xf32>
    %793 = vector.broadcast %3 : vector<16x1xf32> to vector<16x232xf32>
    %794 = arith.addf %792, %793 : vector<16x232xf32>
    %cst_501 = arith.constant 0.000000e+00 : f32
    %795 = vector.broadcast %cst_501 : f32 to vector<16x232xf32>
    %796 = arith.maximumf %794, %795 : vector<16x232xf32>
    %797 = vector.extract_strided_slice %796 {offsets = [0, 0], sizes = [16, 148], strides = [1, 1]} : vector<16x232xf32> to vector<16x148xf32>
    %c0_502 = arith.constant 0 : index
    %c0_503 = arith.constant 0 : index
    %c0_504 = arith.constant 0 : index
    %798 = vector.load %arg6[%c0_502, %c0_503, %c0_504] : memref<25x16x16xf32, #tpu.memory_space<vmem>>, vector<1x16x16xf32>
    %799 = vector.shape_cast %798 : vector<1x16x16xf32> to vector<16x16xf32>
    %cst_505 = arith.constant dense<0.000000e+00> : vector<16x148xf32>
    %800 = tpu.matmul %799, %797, %cst_505 {dimension_numbers = #tpu.dot_dimension_numbers<[1], [0], [0], [1], [0, 0, 1, 1], [], []>} : vector<16x16xf32>, vector<16x148xf32>, vector<16x148xf32> -> vector<16x148xf32>
    %801 = vector.extract_strided_slice %796 {offsets = [0, 1], sizes = [16, 148], strides = [1, 1]} : vector<16x232xf32> to vector<16x148xf32>
    %c1_506 = arith.constant 1 : index
    %c0_507 = arith.constant 0 : index
    %c0_508 = arith.constant 0 : index
    %802 = vector.load %arg6[%c1_506, %c0_507, %c0_508] : memref<25x16x16xf32, #tpu.memory_space<vmem>>, vector<1x16x16xf32>
    %803 = vector.shape_cast %802 : vector<1x16x16xf32> to vector<16x16xf32>
    %cst_509 = arith.constant dense<0.000000e+00> : vector<16x148xf32>
    %804 = tpu.matmul %803, %801, %cst_509 {dimension_numbers = #tpu.dot_dimension_numbers<[1], [0], [0], [1], [0, 0, 1, 1], [], []>} : vector<16x16xf32>, vector<16x148xf32>, vector<16x148xf32> -> vector<16x148xf32>
    %805 = arith.addf %800, %804 : vector<16x148xf32>
    %806 = vector.extract_strided_slice %796 {offsets = [0, 2], sizes = [16, 148], strides = [1, 1]} : vector<16x232xf32> to vector<16x148xf32>
    %c2_510 = arith.constant 2 : index
    %c0_511 = arith.constant 0 : index
    %c0_512 = arith.constant 0 : index
    %807 = vector.load %arg6[%c2_510, %c0_511, %c0_512] : memref<25x16x16xf32, #tpu.memory_space<vmem>>, vector<1x16x16xf32>
    %808 = vector.shape_cast %807 : vector<1x16x16xf32> to vector<16x16xf32>
    %cst_513 = arith.constant dense<0.000000e+00> : vector<16x148xf32>
    %809 = tpu.matmul %808, %806, %cst_513 {dimension_numbers = #tpu.dot_dimension_numbers<[1], [0], [0], [1], [0, 0, 1, 1], [], []>} : vector<16x16xf32>, vector<16x148xf32>, vector<16x148xf32> -> vector<16x148xf32>
    %810 = arith.addf %805, %809 : vector<16x148xf32>
    %811 = vector.extract_strided_slice %796 {offsets = [0, 3], sizes = [16, 148], strides = [1, 1]} : vector<16x232xf32> to vector<16x148xf32>
    %c3_514 = arith.constant 3 : index
    %c0_515 = arith.constant 0 : index
    %c0_516 = arith.constant 0 : index
    %812 = vector.load %arg6[%c3_514, %c0_515, %c0_516] : memref<25x16x16xf32, #tpu.memory_space<vmem>>, vector<1x16x16xf32>
    %813 = vector.shape_cast %812 : vector<1x16x16xf32> to vector<16x16xf32>
    %cst_517 = arith.constant dense<0.000000e+00> : vector<16x148xf32>
    %814 = tpu.matmul %813, %811, %cst_517 {dimension_numbers = #tpu.dot_dimension_numbers<[1], [0], [0], [1], [0, 0, 1, 1], [], []>} : vector<16x16xf32>, vector<16x148xf32>, vector<16x148xf32> -> vector<16x148xf32>
    %815 = arith.addf %810, %814 : vector<16x148xf32>
    %816 = vector.extract_strided_slice %796 {offsets = [0, 4], sizes = [16, 148], strides = [1, 1]} : vector<16x232xf32> to vector<16x148xf32>
    %c4_518 = arith.constant 4 : index
    %c0_519 = arith.constant 0 : index
    %c0_520 = arith.constant 0 : index
    %817 = vector.load %arg6[%c4_518, %c0_519, %c0_520] : memref<25x16x16xf32, #tpu.memory_space<vmem>>, vector<1x16x16xf32>
    %818 = vector.shape_cast %817 : vector<1x16x16xf32> to vector<16x16xf32>
    %cst_521 = arith.constant dense<0.000000e+00> : vector<16x148xf32>
    %819 = tpu.matmul %818, %816, %cst_521 {dimension_numbers = #tpu.dot_dimension_numbers<[1], [0], [0], [1], [0, 0, 1, 1], [], []>} : vector<16x16xf32>, vector<16x148xf32>, vector<16x148xf32> -> vector<16x148xf32>
    %820 = arith.addf %815, %819 : vector<16x148xf32>
    %821 = vector.extract_strided_slice %796 {offsets = [0, 20], sizes = [16, 148], strides = [1, 1]} : vector<16x232xf32> to vector<16x148xf32>
    %c5_522 = arith.constant 5 : index
    %c0_523 = arith.constant 0 : index
    %c0_524 = arith.constant 0 : index
    %822 = vector.load %arg6[%c5_522, %c0_523, %c0_524] : memref<25x16x16xf32, #tpu.memory_space<vmem>>, vector<1x16x16xf32>
    %823 = vector.shape_cast %822 : vector<1x16x16xf32> to vector<16x16xf32>
    %cst_525 = arith.constant dense<0.000000e+00> : vector<16x148xf32>
    %824 = tpu.matmul %823, %821, %cst_525 {dimension_numbers = #tpu.dot_dimension_numbers<[1], [0], [0], [1], [0, 0, 1, 1], [], []>} : vector<16x16xf32>, vector<16x148xf32>, vector<16x148xf32> -> vector<16x148xf32>
    %825 = arith.addf %820, %824 : vector<16x148xf32>
    %826 = vector.extract_strided_slice %796 {offsets = [0, 21], sizes = [16, 148], strides = [1, 1]} : vector<16x232xf32> to vector<16x148xf32>
    %c6_526 = arith.constant 6 : index
    %c0_527 = arith.constant 0 : index
    %c0_528 = arith.constant 0 : index
    %827 = vector.load %arg6[%c6_526, %c0_527, %c0_528] : memref<25x16x16xf32, #tpu.memory_space<vmem>>, vector<1x16x16xf32>
    %828 = vector.shape_cast %827 : vector<1x16x16xf32> to vector<16x16xf32>
    %cst_529 = arith.constant dense<0.000000e+00> : vector<16x148xf32>
    %829 = tpu.matmul %828, %826, %cst_529 {dimension_numbers = #tpu.dot_dimension_numbers<[1], [0], [0], [1], [0, 0, 1, 1], [], []>} : vector<16x16xf32>, vector<16x148xf32>, vector<16x148xf32> -> vector<16x148xf32>
    %830 = arith.addf %825, %829 : vector<16x148xf32>
    %831 = vector.extract_strided_slice %796 {offsets = [0, 22], sizes = [16, 148], strides = [1, 1]} : vector<16x232xf32> to vector<16x148xf32>
    %c7_530 = arith.constant 7 : index
    %c0_531 = arith.constant 0 : index
    %c0_532 = arith.constant 0 : index
    %832 = vector.load %arg6[%c7_530, %c0_531, %c0_532] : memref<25x16x16xf32, #tpu.memory_space<vmem>>, vector<1x16x16xf32>
    %833 = vector.shape_cast %832 : vector<1x16x16xf32> to vector<16x16xf32>
    %cst_533 = arith.constant dense<0.000000e+00> : vector<16x148xf32>
    %834 = tpu.matmul %833, %831, %cst_533 {dimension_numbers = #tpu.dot_dimension_numbers<[1], [0], [0], [1], [0, 0, 1, 1], [], []>} : vector<16x16xf32>, vector<16x148xf32>, vector<16x148xf32> -> vector<16x148xf32>
    %835 = arith.addf %830, %834 : vector<16x148xf32>
    %836 = vector.extract_strided_slice %796 {offsets = [0, 23], sizes = [16, 148], strides = [1, 1]} : vector<16x232xf32> to vector<16x148xf32>
    %c8_534 = arith.constant 8 : index
    %c0_535 = arith.constant 0 : index
    %c0_536 = arith.constant 0 : index
    %837 = vector.load %arg6[%c8_534, %c0_535, %c0_536] : memref<25x16x16xf32, #tpu.memory_space<vmem>>, vector<1x16x16xf32>
    %838 = vector.shape_cast %837 : vector<1x16x16xf32> to vector<16x16xf32>
    %cst_537 = arith.constant dense<0.000000e+00> : vector<16x148xf32>
    %839 = tpu.matmul %838, %836, %cst_537 {dimension_numbers = #tpu.dot_dimension_numbers<[1], [0], [0], [1], [0, 0, 1, 1], [], []>} : vector<16x16xf32>, vector<16x148xf32>, vector<16x148xf32> -> vector<16x148xf32>
    %840 = arith.addf %835, %839 : vector<16x148xf32>
    %841 = vector.extract_strided_slice %796 {offsets = [0, 24], sizes = [16, 148], strides = [1, 1]} : vector<16x232xf32> to vector<16x148xf32>
    %c9_538 = arith.constant 9 : index
    %c0_539 = arith.constant 0 : index
    %c0_540 = arith.constant 0 : index
    %842 = vector.load %arg6[%c9_538, %c0_539, %c0_540] : memref<25x16x16xf32, #tpu.memory_space<vmem>>, vector<1x16x16xf32>
    %843 = vector.shape_cast %842 : vector<1x16x16xf32> to vector<16x16xf32>
    %cst_541 = arith.constant dense<0.000000e+00> : vector<16x148xf32>
    %844 = tpu.matmul %843, %841, %cst_541 {dimension_numbers = #tpu.dot_dimension_numbers<[1], [0], [0], [1], [0, 0, 1, 1], [], []>} : vector<16x16xf32>, vector<16x148xf32>, vector<16x148xf32> -> vector<16x148xf32>
    %845 = arith.addf %840, %844 : vector<16x148xf32>
    %846 = vector.extract_strided_slice %796 {offsets = [0, 40], sizes = [16, 148], strides = [1, 1]} : vector<16x232xf32> to vector<16x148xf32>
    %c10_542 = arith.constant 10 : index
    %c0_543 = arith.constant 0 : index
    %c0_544 = arith.constant 0 : index
    %847 = vector.load %arg6[%c10_542, %c0_543, %c0_544] : memref<25x16x16xf32, #tpu.memory_space<vmem>>, vector<1x16x16xf32>
    %848 = vector.shape_cast %847 : vector<1x16x16xf32> to vector<16x16xf32>
    %cst_545 = arith.constant dense<0.000000e+00> : vector<16x148xf32>
    %849 = tpu.matmul %848, %846, %cst_545 {dimension_numbers = #tpu.dot_dimension_numbers<[1], [0], [0], [1], [0, 0, 1, 1], [], []>} : vector<16x16xf32>, vector<16x148xf32>, vector<16x148xf32> -> vector<16x148xf32>
    %850 = arith.addf %845, %849 : vector<16x148xf32>
    %851 = vector.extract_strided_slice %796 {offsets = [0, 41], sizes = [16, 148], strides = [1, 1]} : vector<16x232xf32> to vector<16x148xf32>
    %c11_546 = arith.constant 11 : index
    %c0_547 = arith.constant 0 : index
    %c0_548 = arith.constant 0 : index
    %852 = vector.load %arg6[%c11_546, %c0_547, %c0_548] : memref<25x16x16xf32, #tpu.memory_space<vmem>>, vector<1x16x16xf32>
    %853 = vector.shape_cast %852 : vector<1x16x16xf32> to vector<16x16xf32>
    %cst_549 = arith.constant dense<0.000000e+00> : vector<16x148xf32>
    %854 = tpu.matmul %853, %851, %cst_549 {dimension_numbers = #tpu.dot_dimension_numbers<[1], [0], [0], [1], [0, 0, 1, 1], [], []>} : vector<16x16xf32>, vector<16x148xf32>, vector<16x148xf32> -> vector<16x148xf32>
    %855 = arith.addf %850, %854 : vector<16x148xf32>
    %856 = vector.extract_strided_slice %796 {offsets = [0, 42], sizes = [16, 148], strides = [1, 1]} : vector<16x232xf32> to vector<16x148xf32>
    %c12_550 = arith.constant 12 : index
    %c0_551 = arith.constant 0 : index
    %c0_552 = arith.constant 0 : index
    %857 = vector.load %arg6[%c12_550, %c0_551, %c0_552] : memref<25x16x16xf32, #tpu.memory_space<vmem>>, vector<1x16x16xf32>
    %858 = vector.shape_cast %857 : vector<1x16x16xf32> to vector<16x16xf32>
    %cst_553 = arith.constant dense<0.000000e+00> : vector<16x148xf32>
    %859 = tpu.matmul %858, %856, %cst_553 {dimension_numbers = #tpu.dot_dimension_numbers<[1], [0], [0], [1], [0, 0, 1, 1], [], []>} : vector<16x16xf32>, vector<16x148xf32>, vector<16x148xf32> -> vector<16x148xf32>
    %860 = arith.addf %855, %859 : vector<16x148xf32>
    %861 = vector.extract_strided_slice %796 {offsets = [0, 43], sizes = [16, 148], strides = [1, 1]} : vector<16x232xf32> to vector<16x148xf32>
    %c13_554 = arith.constant 13 : index
    %c0_555 = arith.constant 0 : index
    %c0_556 = arith.constant 0 : index
    %862 = vector.load %arg6[%c13_554, %c0_555, %c0_556] : memref<25x16x16xf32, #tpu.memory_space<vmem>>, vector<1x16x16xf32>
    %863 = vector.shape_cast %862 : vector<1x16x16xf32> to vector<16x16xf32>
    %cst_557 = arith.constant dense<0.000000e+00> : vector<16x148xf32>
    %864 = tpu.matmul %863, %861, %cst_557 {dimension_numbers = #tpu.dot_dimension_numbers<[1], [0], [0], [1], [0, 0, 1, 1], [], []>} : vector<16x16xf32>, vector<16x148xf32>, vector<16x148xf32> -> vector<16x148xf32>
    %865 = arith.addf %860, %864 : vector<16x148xf32>
    %866 = vector.extract_strided_slice %796 {offsets = [0, 44], sizes = [16, 148], strides = [1, 1]} : vector<16x232xf32> to vector<16x148xf32>
    %c14_558 = arith.constant 14 : index
    %c0_559 = arith.constant 0 : index
    %c0_560 = arith.constant 0 : index
    %867 = vector.load %arg6[%c14_558, %c0_559, %c0_560] : memref<25x16x16xf32, #tpu.memory_space<vmem>>, vector<1x16x16xf32>
    %868 = vector.shape_cast %867 : vector<1x16x16xf32> to vector<16x16xf32>
    %cst_561 = arith.constant dense<0.000000e+00> : vector<16x148xf32>
    %869 = tpu.matmul %868, %866, %cst_561 {dimension_numbers = #tpu.dot_dimension_numbers<[1], [0], [0], [1], [0, 0, 1, 1], [], []>} : vector<16x16xf32>, vector<16x148xf32>, vector<16x148xf32> -> vector<16x148xf32>
    %870 = arith.addf %865, %869 : vector<16x148xf32>
    %871 = vector.extract_strided_slice %796 {offsets = [0, 60], sizes = [16, 148], strides = [1, 1]} : vector<16x232xf32> to vector<16x148xf32>
    %c15_562 = arith.constant 15 : index
    %c0_563 = arith.constant 0 : index
    %c0_564 = arith.constant 0 : index
    %872 = vector.load %arg6[%c15_562, %c0_563, %c0_564] : memref<25x16x16xf32, #tpu.memory_space<vmem>>, vector<1x16x16xf32>
    %873 = vector.shape_cast %872 : vector<1x16x16xf32> to vector<16x16xf32>
    %cst_565 = arith.constant dense<0.000000e+00> : vector<16x148xf32>
    %874 = tpu.matmul %873, %871, %cst_565 {dimension_numbers = #tpu.dot_dimension_numbers<[1], [0], [0], [1], [0, 0, 1, 1], [], []>} : vector<16x16xf32>, vector<16x148xf32>, vector<16x148xf32> -> vector<16x148xf32>
    %875 = arith.addf %870, %874 : vector<16x148xf32>
    %876 = vector.extract_strided_slice %796 {offsets = [0, 61], sizes = [16, 148], strides = [1, 1]} : vector<16x232xf32> to vector<16x148xf32>
    %c16_566 = arith.constant 16 : index
    %c0_567 = arith.constant 0 : index
    %c0_568 = arith.constant 0 : index
    %877 = vector.load %arg6[%c16_566, %c0_567, %c0_568] : memref<25x16x16xf32, #tpu.memory_space<vmem>>, vector<1x16x16xf32>
    %878 = vector.shape_cast %877 : vector<1x16x16xf32> to vector<16x16xf32>
    %cst_569 = arith.constant dense<0.000000e+00> : vector<16x148xf32>
    %879 = tpu.matmul %878, %876, %cst_569 {dimension_numbers = #tpu.dot_dimension_numbers<[1], [0], [0], [1], [0, 0, 1, 1], [], []>} : vector<16x16xf32>, vector<16x148xf32>, vector<16x148xf32> -> vector<16x148xf32>
    %880 = arith.addf %875, %879 : vector<16x148xf32>
    %881 = vector.extract_strided_slice %796 {offsets = [0, 62], sizes = [16, 148], strides = [1, 1]} : vector<16x232xf32> to vector<16x148xf32>
    %c17_570 = arith.constant 17 : index
    %c0_571 = arith.constant 0 : index
    %c0_572 = arith.constant 0 : index
    %882 = vector.load %arg6[%c17_570, %c0_571, %c0_572] : memref<25x16x16xf32, #tpu.memory_space<vmem>>, vector<1x16x16xf32>
    %883 = vector.shape_cast %882 : vector<1x16x16xf32> to vector<16x16xf32>
    %cst_573 = arith.constant dense<0.000000e+00> : vector<16x148xf32>
    %884 = tpu.matmul %883, %881, %cst_573 {dimension_numbers = #tpu.dot_dimension_numbers<[1], [0], [0], [1], [0, 0, 1, 1], [], []>} : vector<16x16xf32>, vector<16x148xf32>, vector<16x148xf32> -> vector<16x148xf32>
    %885 = arith.addf %880, %884 : vector<16x148xf32>
    %886 = vector.extract_strided_slice %796 {offsets = [0, 63], sizes = [16, 148], strides = [1, 1]} : vector<16x232xf32> to vector<16x148xf32>
    %c18_574 = arith.constant 18 : index
    %c0_575 = arith.constant 0 : index
    %c0_576 = arith.constant 0 : index
    %887 = vector.load %arg6[%c18_574, %c0_575, %c0_576] : memref<25x16x16xf32, #tpu.memory_space<vmem>>, vector<1x16x16xf32>
    %888 = vector.shape_cast %887 : vector<1x16x16xf32> to vector<16x16xf32>
    %cst_577 = arith.constant dense<0.000000e+00> : vector<16x148xf32>
    %889 = tpu.matmul %888, %886, %cst_577 {dimension_numbers = #tpu.dot_dimension_numbers<[1], [0], [0], [1], [0, 0, 1, 1], [], []>} : vector<16x16xf32>, vector<16x148xf32>, vector<16x148xf32> -> vector<16x148xf32>
    %890 = arith.addf %885, %889 : vector<16x148xf32>
    %891 = vector.extract_strided_slice %796 {offsets = [0, 64], sizes = [16, 148], strides = [1, 1]} : vector<16x232xf32> to vector<16x148xf32>
    %c19_578 = arith.constant 19 : index
    %c0_579 = arith.constant 0 : index
    %c0_580 = arith.constant 0 : index
    %892 = vector.load %arg6[%c19_578, %c0_579, %c0_580] : memref<25x16x16xf32, #tpu.memory_space<vmem>>, vector<1x16x16xf32>
    %893 = vector.shape_cast %892 : vector<1x16x16xf32> to vector<16x16xf32>
    %cst_581 = arith.constant dense<0.000000e+00> : vector<16x148xf32>
    %894 = tpu.matmul %893, %891, %cst_581 {dimension_numbers = #tpu.dot_dimension_numbers<[1], [0], [0], [1], [0, 0, 1, 1], [], []>} : vector<16x16xf32>, vector<16x148xf32>, vector<16x148xf32> -> vector<16x148xf32>
    %895 = arith.addf %890, %894 : vector<16x148xf32>
    %896 = vector.extract_strided_slice %796 {offsets = [0, 80], sizes = [16, 148], strides = [1, 1]} : vector<16x232xf32> to vector<16x148xf32>
    %c20_582 = arith.constant 20 : index
    %c0_583 = arith.constant 0 : index
    %c0_584 = arith.constant 0 : index
    %897 = vector.load %arg6[%c20_582, %c0_583, %c0_584] : memref<25x16x16xf32, #tpu.memory_space<vmem>>, vector<1x16x16xf32>
    %898 = vector.shape_cast %897 : vector<1x16x16xf32> to vector<16x16xf32>
    %cst_585 = arith.constant dense<0.000000e+00> : vector<16x148xf32>
    %899 = tpu.matmul %898, %896, %cst_585 {dimension_numbers = #tpu.dot_dimension_numbers<[1], [0], [0], [1], [0, 0, 1, 1], [], []>} : vector<16x16xf32>, vector<16x148xf32>, vector<16x148xf32> -> vector<16x148xf32>
    %900 = arith.addf %895, %899 : vector<16x148xf32>
    %901 = vector.extract_strided_slice %796 {offsets = [0, 81], sizes = [16, 148], strides = [1, 1]} : vector<16x232xf32> to vector<16x148xf32>
    %c21_586 = arith.constant 21 : index
    %c0_587 = arith.constant 0 : index
    %c0_588 = arith.constant 0 : index
    %902 = vector.load %arg6[%c21_586, %c0_587, %c0_588] : memref<25x16x16xf32, #tpu.memory_space<vmem>>, vector<1x16x16xf32>
    %903 = vector.shape_cast %902 : vector<1x16x16xf32> to vector<16x16xf32>
    %cst_589 = arith.constant dense<0.000000e+00> : vector<16x148xf32>
    %904 = tpu.matmul %903, %901, %cst_589 {dimension_numbers = #tpu.dot_dimension_numbers<[1], [0], [0], [1], [0, 0, 1, 1], [], []>} : vector<16x16xf32>, vector<16x148xf32>, vector<16x148xf32> -> vector<16x148xf32>
    %905 = arith.addf %900, %904 : vector<16x148xf32>
    %906 = vector.extract_strided_slice %796 {offsets = [0, 82], sizes = [16, 148], strides = [1, 1]} : vector<16x232xf32> to vector<16x148xf32>
    %c22_590 = arith.constant 22 : index
    %c0_591 = arith.constant 0 : index
    %c0_592 = arith.constant 0 : index
    %907 = vector.load %arg6[%c22_590, %c0_591, %c0_592] : memref<25x16x16xf32, #tpu.memory_space<vmem>>, vector<1x16x16xf32>
    %908 = vector.shape_cast %907 : vector<1x16x16xf32> to vector<16x16xf32>
    %cst_593 = arith.constant dense<0.000000e+00> : vector<16x148xf32>
    %909 = tpu.matmul %908, %906, %cst_593 {dimension_numbers = #tpu.dot_dimension_numbers<[1], [0], [0], [1], [0, 0, 1, 1], [], []>} : vector<16x16xf32>, vector<16x148xf32>, vector<16x148xf32> -> vector<16x148xf32>
    %910 = arith.addf %905, %909 : vector<16x148xf32>
    %911 = vector.extract_strided_slice %796 {offsets = [0, 83], sizes = [16, 148], strides = [1, 1]} : vector<16x232xf32> to vector<16x148xf32>
    %c23_594 = arith.constant 23 : index
    %c0_595 = arith.constant 0 : index
    %c0_596 = arith.constant 0 : index
    %912 = vector.load %arg6[%c23_594, %c0_595, %c0_596] : memref<25x16x16xf32, #tpu.memory_space<vmem>>, vector<1x16x16xf32>
    %913 = vector.shape_cast %912 : vector<1x16x16xf32> to vector<16x16xf32>
    %cst_597 = arith.constant dense<0.000000e+00> : vector<16x148xf32>
    %914 = tpu.matmul %913, %911, %cst_597 {dimension_numbers = #tpu.dot_dimension_numbers<[1], [0], [0], [1], [0, 0, 1, 1], [], []>} : vector<16x16xf32>, vector<16x148xf32>, vector<16x148xf32> -> vector<16x148xf32>
    %915 = arith.addf %910, %914 : vector<16x148xf32>
    %916 = vector.extract_strided_slice %796 {offsets = [0, 84], sizes = [16, 148], strides = [1, 1]} : vector<16x232xf32> to vector<16x148xf32>
    %c24_598 = arith.constant 24 : index
    %c0_599 = arith.constant 0 : index
    %c0_600 = arith.constant 0 : index
    %917 = vector.load %arg6[%c24_598, %c0_599, %c0_600] : memref<25x16x16xf32, #tpu.memory_space<vmem>>, vector<1x16x16xf32>
    %918 = vector.shape_cast %917 : vector<1x16x16xf32> to vector<16x16xf32>
    %cst_601 = arith.constant dense<0.000000e+00> : vector<16x148xf32>
    %919 = tpu.matmul %918, %916, %cst_601 {dimension_numbers = #tpu.dot_dimension_numbers<[1], [0], [0], [1], [0, 0, 1, 1], [], []>} : vector<16x16xf32>, vector<16x148xf32>, vector<16x148xf32> -> vector<16x148xf32>
    %920 = arith.addf %915, %919 : vector<16x148xf32>
    %921 = vector.broadcast %4 : vector<16x1xf32> to vector<16x148xf32>
    %922 = arith.addf %920, %921 : vector<16x148xf32>
    %cst_602 = arith.constant 0.000000e+00 : f32
    %923 = vector.broadcast %cst_602 : f32 to vector<16x148xf32>
    %924 = arith.maximumf %922, %923 : vector<16x148xf32>
    %925 = vector.extract_strided_slice %924 {offsets = [0, 0], sizes = [16, 8], strides = [1, 1]} : vector<16x148xf32> to vector<16x8xf32>
    %c0_603 = arith.constant 0 : index
    %c0_604 = arith.constant 0 : index
    %926 = vector.load %arg13[%c0_603, %c0_604] : memref<16x64xf32, #tpu.memory_space<vmem>>, vector<16x8xf32>
    tpu.vector_store %arg13[%c0_603, %c0_604], %925 {strides = array<i32>} : memref<16x64xf32, #tpu.memory_space<vmem>>, vector<16x8xf32>,
    %927 = vector.extract_strided_slice %924 {offsets = [0, 20], sizes = [16, 8], strides = [1, 1]} : vector<16x148xf32> to vector<16x8xf32>
    %c0_605 = arith.constant 0 : index
    %c8_606 = arith.constant 8 : index
    %928 = vector.load %arg13[%c0_605, %c8_606] : memref<16x64xf32, #tpu.memory_space<vmem>>, vector<16x8xf32>
    tpu.vector_store %arg13[%c0_605, %c8_606], %927 {strides = array<i32>} : memref<16x64xf32, #tpu.memory_space<vmem>>, vector<16x8xf32>,
    %929 = vector.extract_strided_slice %924 {offsets = [0, 40], sizes = [16, 8], strides = [1, 1]} : vector<16x148xf32> to vector<16x8xf32>
    %c0_607 = arith.constant 0 : index
    %c16_608 = arith.constant 16 : index
    %930 = vector.load %arg13[%c0_607, %c16_608] : memref<16x64xf32, #tpu.memory_space<vmem>>, vector<16x8xf32>
    tpu.vector_store %arg13[%c0_607, %c16_608], %929 {strides = array<i32>} : memref<16x64xf32, #tpu.memory_space<vmem>>, vector<16x8xf32>,
    %931 = vector.extract_strided_slice %924 {offsets = [0, 60], sizes = [16, 8], strides = [1, 1]} : vector<16x148xf32> to vector<16x8xf32>
    %c0_609 = arith.constant 0 : index
    %c24_610 = arith.constant 24 : index
    %932 = vector.load %arg13[%c0_609, %c24_610] : memref<16x64xf32, #tpu.memory_space<vmem>>, vector<16x8xf32>
    tpu.vector_store %arg13[%c0_609, %c24_610], %931 {strides = array<i32>} : memref<16x64xf32, #tpu.memory_space<vmem>>, vector<16x8xf32>,
    %933 = vector.extract_strided_slice %924 {offsets = [0, 80], sizes = [16, 8], strides = [1, 1]} : vector<16x148xf32> to vector<16x8xf32>
    %c0_611 = arith.constant 0 : index
    %c32_612 = arith.constant 32 : index
    %934 = vector.load %arg13[%c0_611, %c32_612] : memref<16x64xf32, #tpu.memory_space<vmem>>, vector<16x8xf32>
    tpu.vector_store %arg13[%c0_611, %c32_612], %933 {strides = array<i32>} : memref<16x64xf32, #tpu.memory_space<vmem>>, vector<16x8xf32>,
    %935 = vector.extract_strided_slice %924 {offsets = [0, 100], sizes = [16, 8], strides = [1, 1]} : vector<16x148xf32> to vector<16x8xf32>
    %c0_613 = arith.constant 0 : index
    %c40_614 = arith.constant 40 : index
    %936 = vector.load %arg13[%c0_613, %c40_614] : memref<16x64xf32, #tpu.memory_space<vmem>>, vector<16x8xf32>
    tpu.vector_store %arg13[%c0_613, %c40_614], %935 {strides = array<i32>} : memref<16x64xf32, #tpu.memory_space<vmem>>, vector<16x8xf32>,
    %937 = vector.extract_strided_slice %924 {offsets = [0, 120], sizes = [16, 8], strides = [1, 1]} : vector<16x148xf32> to vector<16x8xf32>
    %c0_615 = arith.constant 0 : index
    %c48_616 = arith.constant 48 : index
    %938 = vector.load %arg13[%c0_615, %c48_616] : memref<16x64xf32, #tpu.memory_space<vmem>>, vector<16x8xf32>
    tpu.vector_store %arg13[%c0_615, %c48_616], %937 {strides = array<i32>} : memref<16x64xf32, #tpu.memory_space<vmem>>, vector<16x8xf32>,
    %939 = vector.extract_strided_slice %924 {offsets = [0, 140], sizes = [16, 8], strides = [1, 1]} : vector<16x148xf32> to vector<16x8xf32>
    %c0_617 = arith.constant 0 : index
    %c56_618 = arith.constant 56 : index
    %940 = vector.load %arg13[%c0_617, %c56_618] : memref<16x64xf32, #tpu.memory_space<vmem>>, vector<16x8xf32>
    tpu.vector_store %arg13[%c0_617, %c56_618], %939 {strides = array<i32>} : memref<16x64xf32, #tpu.memory_space<vmem>>, vector<16x8xf32>,
    %c0_619 = arith.constant 0 : index
    %c0_620 = arith.constant 0 : index
    %941 = vector.load %arg13[%c0_619, %c0_620] : memref<16x64xf32, #tpu.memory_space<vmem>>, vector<1x64xf32>
    %c1_621 = arith.constant 1 : index
    %c0_622 = arith.constant 0 : index
    %942 = vector.load %arg14[%c1_621, %c0_622] : memref<2x1024xf32, #tpu.memory_space<vmem>>, vector<1x64xf32>
    tpu.vector_store %arg14[%c1_621, %c0_622], %941 {strides = array<i32>} : memref<2x1024xf32, #tpu.memory_space<vmem>>, vector<1x64xf32>,
    %c1_623 = arith.constant 1 : index
    %c0_624 = arith.constant 0 : index
    %943 = vector.load %arg13[%c1_623, %c0_624] : memref<16x64xf32, #tpu.memory_space<vmem>>, vector<1x64xf32>
    %c1_625 = arith.constant 1 : index
    %c64_626 = arith.constant 64 : index
    %944 = vector.load %arg14[%c1_625, %c64_626] : memref<2x1024xf32, #tpu.memory_space<vmem>>, vector<1x64xf32>
    tpu.vector_store %arg14[%c1_625, %c64_626], %943 {strides = array<i32>} : memref<2x1024xf32, #tpu.memory_space<vmem>>, vector<1x64xf32>,
    %c2_627 = arith.constant 2 : index
    %c0_628 = arith.constant 0 : index
    %945 = vector.load %arg13[%c2_627, %c0_628] : memref<16x64xf32, #tpu.memory_space<vmem>>, vector<1x64xf32>
    %c1_629 = arith.constant 1 : index
    %c128_630 = arith.constant 128 : index
    %946 = vector.load %arg14[%c1_629, %c128_630] : memref<2x1024xf32, #tpu.memory_space<vmem>>, vector<1x64xf32>
    tpu.vector_store %arg14[%c1_629, %c128_630], %945 {strides = array<i32>} : memref<2x1024xf32, #tpu.memory_space<vmem>>, vector<1x64xf32>,
    %c3_631 = arith.constant 3 : index
    %c0_632 = arith.constant 0 : index
    %947 = vector.load %arg13[%c3_631, %c0_632] : memref<16x64xf32, #tpu.memory_space<vmem>>, vector<1x64xf32>
    %c1_633 = arith.constant 1 : index
    %c192_634 = arith.constant 192 : index
    %948 = vector.load %arg14[%c1_633, %c192_634] : memref<2x1024xf32, #tpu.memory_space<vmem>>, vector<1x64xf32>
    tpu.vector_store %arg14[%c1_633, %c192_634], %947 {strides = array<i32>} : memref<2x1024xf32, #tpu.memory_space<vmem>>, vector<1x64xf32>,
    %c4_635 = arith.constant 4 : index
    %c0_636 = arith.constant 0 : index
    %949 = vector.load %arg13[%c4_635, %c0_636] : memref<16x64xf32, #tpu.memory_space<vmem>>, vector<1x64xf32>
    %c1_637 = arith.constant 1 : index
    %c256_638 = arith.constant 256 : index
    %950 = vector.load %arg14[%c1_637, %c256_638] : memref<2x1024xf32, #tpu.memory_space<vmem>>, vector<1x64xf32>
    tpu.vector_store %arg14[%c1_637, %c256_638], %949 {strides = array<i32>} : memref<2x1024xf32, #tpu.memory_space<vmem>>, vector<1x64xf32>,
    %c5_639 = arith.constant 5 : index
    %c0_640 = arith.constant 0 : index
    %951 = vector.load %arg13[%c5_639, %c0_640] : memref<16x64xf32, #tpu.memory_space<vmem>>, vector<1x64xf32>
    %c1_641 = arith.constant 1 : index
    %c320_642 = arith.constant 320 : index
    %952 = vector.load %arg14[%c1_641, %c320_642] : memref<2x1024xf32, #tpu.memory_space<vmem>>, vector<1x64xf32>
    tpu.vector_store %arg14[%c1_641, %c320_642], %951 {strides = array<i32>} : memref<2x1024xf32, #tpu.memory_space<vmem>>, vector<1x64xf32>,
    %c6_643 = arith.constant 6 : index
    %c0_644 = arith.constant 0 : index
    %953 = vector.load %arg13[%c6_643, %c0_644] : memref<16x64xf32, #tpu.memory_space<vmem>>, vector<1x64xf32>
    %c1_645 = arith.constant 1 : index
    %c384_646 = arith.constant 384 : index
    %954 = vector.load %arg14[%c1_645, %c384_646] : memref<2x1024xf32, #tpu.memory_space<vmem>>, vector<1x64xf32>
    tpu.vector_store %arg14[%c1_645, %c384_646], %953 {strides = array<i32>} : memref<2x1024xf32, #tpu.memory_space<vmem>>, vector<1x64xf32>,
    %c7_647 = arith.constant 7 : index
    %c0_648 = arith.constant 0 : index
    %955 = vector.load %arg13[%c7_647, %c0_648] : memref<16x64xf32, #tpu.memory_space<vmem>>, vector<1x64xf32>
    %c1_649 = arith.constant 1 : index
    %c448_650 = arith.constant 448 : index
    %956 = vector.load %arg14[%c1_649, %c448_650] : memref<2x1024xf32, #tpu.memory_space<vmem>>, vector<1x64xf32>
    tpu.vector_store %arg14[%c1_649, %c448_650], %955 {strides = array<i32>} : memref<2x1024xf32, #tpu.memory_space<vmem>>, vector<1x64xf32>,
    %c8_651 = arith.constant 8 : index
    %c0_652 = arith.constant 0 : index
    %957 = vector.load %arg13[%c8_651, %c0_652] : memref<16x64xf32, #tpu.memory_space<vmem>>, vector<1x64xf32>
    %c1_653 = arith.constant 1 : index
    %c512_654 = arith.constant 512 : index
    %958 = vector.load %arg14[%c1_653, %c512_654] : memref<2x1024xf32, #tpu.memory_space<vmem>>, vector<1x64xf32>
    tpu.vector_store %arg14[%c1_653, %c512_654], %957 {strides = array<i32>} : memref<2x1024xf32, #tpu.memory_space<vmem>>, vector<1x64xf32>,
    %c9_655 = arith.constant 9 : index
    %c0_656 = arith.constant 0 : index
    %959 = vector.load %arg13[%c9_655, %c0_656] : memref<16x64xf32, #tpu.memory_space<vmem>>, vector<1x64xf32>
    %c1_657 = arith.constant 1 : index
    %c576_658 = arith.constant 576 : index
    %960 = vector.load %arg14[%c1_657, %c576_658] : memref<2x1024xf32, #tpu.memory_space<vmem>>, vector<1x64xf32>
    tpu.vector_store %arg14[%c1_657, %c576_658], %959 {strides = array<i32>} : memref<2x1024xf32, #tpu.memory_space<vmem>>, vector<1x64xf32>,
    %c10_659 = arith.constant 10 : index
    %c0_660 = arith.constant 0 : index
    %961 = vector.load %arg13[%c10_659, %c0_660] : memref<16x64xf32, #tpu.memory_space<vmem>>, vector<1x64xf32>
    %c1_661 = arith.constant 1 : index
    %c640_662 = arith.constant 640 : index
    %962 = vector.load %arg14[%c1_661, %c640_662] : memref<2x1024xf32, #tpu.memory_space<vmem>>, vector<1x64xf32>
    tpu.vector_store %arg14[%c1_661, %c640_662], %961 {strides = array<i32>} : memref<2x1024xf32, #tpu.memory_space<vmem>>, vector<1x64xf32>,
    %c11_663 = arith.constant 11 : index
    %c0_664 = arith.constant 0 : index
    %963 = vector.load %arg13[%c11_663, %c0_664] : memref<16x64xf32, #tpu.memory_space<vmem>>, vector<1x64xf32>
    %c1_665 = arith.constant 1 : index
    %c704_666 = arith.constant 704 : index
    %964 = vector.load %arg14[%c1_665, %c704_666] : memref<2x1024xf32, #tpu.memory_space<vmem>>, vector<1x64xf32>
    tpu.vector_store %arg14[%c1_665, %c704_666], %963 {strides = array<i32>} : memref<2x1024xf32, #tpu.memory_space<vmem>>, vector<1x64xf32>,
    %c12_667 = arith.constant 12 : index
    %c0_668 = arith.constant 0 : index
    %965 = vector.load %arg13[%c12_667, %c0_668] : memref<16x64xf32, #tpu.memory_space<vmem>>, vector<1x64xf32>
    %c1_669 = arith.constant 1 : index
    %c768_670 = arith.constant 768 : index
    %966 = vector.load %arg14[%c1_669, %c768_670] : memref<2x1024xf32, #tpu.memory_space<vmem>>, vector<1x64xf32>
    tpu.vector_store %arg14[%c1_669, %c768_670], %965 {strides = array<i32>} : memref<2x1024xf32, #tpu.memory_space<vmem>>, vector<1x64xf32>,
    %c13_671 = arith.constant 13 : index
    %c0_672 = arith.constant 0 : index
    %967 = vector.load %arg13[%c13_671, %c0_672] : memref<16x64xf32, #tpu.memory_space<vmem>>, vector<1x64xf32>
    %c1_673 = arith.constant 1 : index
    %c832_674 = arith.constant 832 : index
    %968 = vector.load %arg14[%c1_673, %c832_674] : memref<2x1024xf32, #tpu.memory_space<vmem>>, vector<1x64xf32>
    tpu.vector_store %arg14[%c1_673, %c832_674], %967 {strides = array<i32>} : memref<2x1024xf32, #tpu.memory_space<vmem>>, vector<1x64xf32>,
    %c14_675 = arith.constant 14 : index
    %c0_676 = arith.constant 0 : index
    %969 = vector.load %arg13[%c14_675, %c0_676] : memref<16x64xf32, #tpu.memory_space<vmem>>, vector<1x64xf32>
    %c1_677 = arith.constant 1 : index
    %c896_678 = arith.constant 896 : index
    %970 = vector.load %arg14[%c1_677, %c896_678] : memref<2x1024xf32, #tpu.memory_space<vmem>>, vector<1x64xf32>
    tpu.vector_store %arg14[%c1_677, %c896_678], %969 {strides = array<i32>} : memref<2x1024xf32, #tpu.memory_space<vmem>>, vector<1x64xf32>,
    %c15_679 = arith.constant 15 : index
    %c0_680 = arith.constant 0 : index
    %971 = vector.load %arg13[%c15_679, %c0_680] : memref<16x64xf32, #tpu.memory_space<vmem>>, vector<1x64xf32>
    %c1_681 = arith.constant 1 : index
    %c960_682 = arith.constant 960 : index
    %972 = vector.load %arg14[%c1_681, %c960_682] : memref<2x1024xf32, #tpu.memory_space<vmem>>, vector<1x64xf32>
    tpu.vector_store %arg14[%c1_681, %c960_682], %971 {strides = array<i32>} : memref<2x1024xf32, #tpu.memory_space<vmem>>, vector<1x64xf32>,
    %c0_i32_683 = arith.constant 0 : i32
    %973 = tpu.memref_slice %arg16[%c0_i32_683] : memref<1x!tpu.dma_semaphore, #tpu.memory_space<semaphore_mem>> -> memref<1x!tpu.dma_semaphore, #tpu.memory_space<semaphore_mem>>
    %974 = tpu.memref_squeeze %973 : memref<1x!tpu.dma_semaphore, #tpu.memory_space<semaphore_mem>> -> memref<!tpu.dma_semaphore, #tpu.memory_space<semaphore_mem>>
    tpu.wait_dma2 semaphore(%974 : memref<!tpu.dma_semaphore, #tpu.memory_space<semaphore_mem>>) src(%arg11 : memref<1024x256xf32, #tpu.memory_space<any>>) dst(%arg15 : memref<1024x256xf32, #tpu.memory_space<vmem>>)
    %c0_684 = arith.constant 0 : index
    %c0_685 = arith.constant 0 : index
    %975 = vector.load %arg14[%c0_684, %c0_685] : memref<2x1024xf32, #tpu.memory_space<vmem>>, vector<2x1024xf32>
    %c0_686 = arith.constant 0 : index
    %c0_687 = arith.constant 0 : index
    %976 = vector.load %arg15[%c0_686, %c0_687] : memref<1024x256xf32, #tpu.memory_space<vmem>>, vector<1024x256xf32>
    %cst_688 = arith.constant dense<0.000000e+00> : vector<2x256xf32>
    %977 = tpu.matmul %975, %976, %cst_688 {dimension_numbers = #tpu.dot_dimension_numbers<[1], [0], [0], [1], [0, 0, 1, 1], [], []>} : vector<2x1024xf32>, vector<1024x256xf32>, vector<2x256xf32> -> vector<2x256xf32>
    %c0_689 = arith.constant 0 : index
    %c0_690 = arith.constant 0 : index
    %978 = vector.load %arg8[%c0_689, %c0_690] : memref<1x256xf32, #tpu.memory_space<vmem>>, vector<1x256xf32>
    %979 = vector.broadcast %978 : vector<1x256xf32> to vector<2x256xf32>
    %980 = arith.addf %977, %979 : vector<2x256xf32>
    %cst_691 = arith.constant 0.000000e+00 : f32
    %981 = vector.broadcast %cst_691 : f32 to vector<2x256xf32>
    %982 = arith.maximumf %980, %981 : vector<2x256xf32>
    %c0_692 = arith.constant 0 : index
    %c0_693 = arith.constant 0 : index
    %983 = vector.load %arg9[%c0_692, %c0_693] : memref<256x11xf32, #tpu.memory_space<vmem>>, vector<256x11xf32>
    %cst_694 = arith.constant dense<0.000000e+00> : vector<2x11xf32>
    %984 = tpu.matmul %982, %983, %cst_694 {dimension_numbers = #tpu.dot_dimension_numbers<[1], [0], [0], [1], [0, 0, 1, 1], [], []>} : vector<2x256xf32>, vector<256x11xf32>, vector<2x11xf32> -> vector<2x11xf32>
    %c0_695 = arith.constant 0 : index
    %c0_696 = arith.constant 0 : index
    %985 = vector.load %arg10[%c0_695, %c0_696] : memref<1x11xf32, #tpu.memory_space<vmem>>, vector<1x11xf32>
    %986 = vector.broadcast %985 : vector<1x11xf32> to vector<2x11xf32>
    %987 = arith.addf %984, %986 : vector<2x11xf32>
    %c0_697 = arith.constant 0 : index
    %c0_698 = arith.constant 0 : index
    %988 = vector.load %arg12[%c0_697, %c0_698] : memref<2x11xf32, #tpu.memory_space<vmem>>, vector<2x11xf32>
    tpu.vector_store %arg12[%c0_697, %c0_698], %987 {strides = array<i32>} : memref<2x11xf32, #tpu.memory_space<vmem>>, vector<2x11xf32>,
    return
  }
  func.func @transform_0(%arg0: i32) -> (i32, i32, i32) {
    %c0_i32 = arith.constant 0 : i32
    %c0_i32_0 = arith.constant 0 : i32
    %c0_i32_1 = arith.constant 0 : i32
    %c0_i32_2 = arith.constant 0 : i32
    return %c0_i32, %c0_i32_0, %c0_i32_1 : i32, i32, i32
  }
  func.func @transform_1(%arg0: i32) -> (i32, i32, i32) {
    %c0_i32 = arith.constant 0 : i32
    %c0_i32_0 = arith.constant 0 : i32
    %c0_i32_1 = arith.constant 0 : i32
    %c0_i32_2 = arith.constant 0 : i32
    return %c0_i32, %c0_i32_0, %c0_i32_1 : i32, i32, i32
  }
  func.func @transform_2(%arg0: i32) -> (i32, i32) {
    %c0_i32 = arith.constant 0 : i32
    %c0_i32_0 = arith.constant 0 : i32
    %c0_i32_1 = arith.constant 0 : i32
    return %c0_i32, %c0_i32_0 : i32, i32
  }
  func.func @transform_3(%arg0: i32) -> (i32, i32, i32) {
    %c0_i32 = arith.constant 0 : i32
    %c0_i32_0 = arith.constant 0 : i32
    %c0_i32_1 = arith.constant 0 : i32
    %c0_i32_2 = arith.constant 0 : i32
    return %c0_i32, %c0_i32_0, %c0_i32_1 : i32, i32, i32
  }
  func.func @transform_4(%arg0: i32) -> (i32, i32) {
    %c0_i32 = arith.constant 0 : i32
    %c0_i32_0 = arith.constant 0 : i32
    %c0_i32_1 = arith.constant 0 : i32
    return %c0_i32, %c0_i32_0 : i32, i32
  }
  func.func @transform_5(%arg0: i32) -> (i32, i32, i32) {
    %c0_i32 = arith.constant 0 : i32
    %c0_i32_0 = arith.constant 0 : i32
    %c0_i32_1 = arith.constant 0 : i32
    %c0_i32_2 = arith.constant 0 : i32
    return %c0_i32, %c0_i32_0, %c0_i32_1 : i32, i32, i32
  }
  func.func @transform_6(%arg0: i32) -> (i32, i32) {
    %c0_i32 = arith.constant 0 : i32
    %c0_i32_0 = arith.constant 0 : i32
    %c0_i32_1 = arith.constant 0 : i32
    return %c0_i32, %c0_i32_0 : i32, i32
  }
  func.func @transform_7(%arg0: i32) -> (i32, i32) {
    %c0_i32 = arith.constant 0 : i32
    %c0_i32_0 = arith.constant 0 : i32
    %c0_i32_1 = arith.constant 0 : i32
    return %c0_i32, %c0_i32_0 : i32, i32
  }
  func.func @transform_8(%arg0: i32) -> (i32, i32) {
    %c0_i32 = arith.constant 0 : i32
    %c0_i32_0 = arith.constant 0 : i32
    %c0_i32_1 = arith.constant 0 : i32
    return %c0_i32, %c0_i32_0 : i32, i32
  }
  func.func @transform_9(%arg0: i32) -> (i32, i32) {
    %c0_i32 = arith.constant 0 : i32
    %c0_i32_0 = arith.constant 0 : i32
    %c0_i32_1 = arith.constant 0 : i32
    return %c0_i32, %c0_i32_0 : i32, i32
  }
  func.func @transform_11(%arg0: i32) -> (i32, i32) {
    %c0_i32 = arith.constant 0 : i32
    %c0_i32_0 = arith.constant 0 : i32
    %c0_i32_1 = arith.constant 0 : i32
    return %c0_i32, %c0_i32_0 : i32, i32
  }
}

</mosaic_0001>

<bundles_post_ra>
// kernel: cnn_forward.1
= control target key start
LH: loop header
LB: loop body
LE: loop exit
PB: predicated region body
PF: predicated region fallthrough
CT: control target
= control target key end

     0   :  { %s15076_s0 = inlined_call_operand.vmem [shape: f32[2,1,400], index: 0, kind: input, shape index: {}]   ;;  %s15077_s1 = inlined_call_operand.vmem [shape: f32[25,8,1], index: 1, kind: input, shape index: {}]   ;;  %s15078_s2 = inlined_call_operand.vmem [shape: f32[8,1], index: 2, kind: input, shape index: {}]   ;;  %s15079_s3 = inlined_call_operand.vmem [shape: f32[25,16,8], index: 3, kind: input, shape index: {}]   ;;  %s15080_s4 = inlined_call_operand.vmem [shape: f32[16,1], index: 4, kind: input, shape index: {}]   ;;  %s15081_s5 = inlined_call_operand.vmem [shape: f32[25,16,16], index: 5, kind: input, shape index: {}]   ;;  %s15082_s6 = inlined_call_operand.vmem [shape: f32[16,1], index: 6, kind: input, shape index: {}]   ;;  %s15083_s7 = inlined_call_operand.vmem [shape: f32[1,256], index: 7, kind: input, shape index: {}]   ;;  %s15084_s8 = inlined_call_operand.vmem [shape: f32[256,11], index: 8, kind: input, shape index: {}]   ;;  %s15085_s9 = inlined_call_operand.vmem [shape: f32[1,11], index: 9, kind: input, shape index: {}]   ;;  %s15086_s10 = inlined_call_operand.hbm [shape: f32[1024,256], index: 10, kind: input, shape index: {}]   ;;  %s15087_s11 = inlined_call_operand.hbm [shape: f32[2,11], index: 11, kind: output, shape index: {}]  }
   0x1   :  { %15223 = sst [smem:[#allocation81_spill]] %s15083_s7 }
   0x2   :  { %15224 = sst [smem:[#allocation82_spill]] %s15084_s8 }
   0x3   :  { %15225 = sst [smem:[#allocation83_spill]] %s15085_s9 }
   0x4   :  { %15226 = sst [smem:[#allocation84_spill]] %s15086_s10 }
   0x5   :  { %15227 = sst [smem:[#allocation85_spill]] %s15087_s11 }
   0x6   :  { %v56_v0 = vld [vmem:[%s15077_s1] sm:$0xff]  ;;  %v9412_v2 = vld [vmem:[%s15077_s1 + $0x10] sm:$0xff]  ;;  %v10864_v3 = vmov 0  }
   0x7   :  { %v9414_v1 = vld [vmem:[%s15077_s1 + $0x20] sm:$0xff]  ;;  %10084 = vset.pattern.permute.xlu0 %v10864_v3  ;;  %10086 = vset.pattern.permute.xlu1 %v10864_v3 }
   0x8   :  { %59 = vperm.xlu0 %10084, %v56_v0   ;;  %10085 = vset.pattern.permute.xlu2 %v10864_v3 }
   0x9   :  { %160 = vperm.xlu1 %10086, %v9414_v1   ;;  %104 = vperm.xlu2 %10085, %v9412_v2  }
   0xa   :  { %16 = vsyncpa [#allocation7], 0  ;;  %v9411_v4 = vld [vmem:[%s15077_s1 + $0x8] sm:$0xff]  ;;  %v9417_v5 = vld [vmem:[%s15077_s1 + $0x38] sm:$0xff]  ;;  %s15176_s24 = smov 126   ;;  %s15169_s25 = smov 127  }
   0xb   :  { %v9415_v6 = vld [vmem:[%s15077_s1 + $0x28] sm:$0xff]  ;;  %v9413_v7 = vld [vmem:[%s15077_s1 + $0x18] sm:$0xff]  ;;  %v9420_v8 = vld [vmem:[%s15077_s1 + $0x50] sm:$0xff]  ;;  %s15178_s26 = smov 125   ;;  %s15167_s27 = smov 124   ;;  %vm91_vm0 = vcmask 1039360  }
   0xc   :  { %v9418_v9 = vld [vmem:[%s15077_s1 + $0x40] sm:$0xff]  ;;  %v9416_v10 = vld [vmem:[%s15077_s1 + $0x30] sm:$0xff]  ;;  %v9421_v11 = vld [vmem:[%s15077_s1 + $0x58] sm:$0xff]  ;;  %s15151_s28 = smov 108   ;;  %s15149_s29 = smov 107   ;;  %vm119_vm1 = vcmask 1031168  }
   0xd   :  { %v9419_v12 = vld [vmem:[%s15077_s1 + $0x48] sm:$0xff]  ;;  %v10994_v13 = vld [vmem:[%s15076_s0] sm:$0xf]  ;;  %s15147_s30 = smov 106   ;;  %s15145_s12 = smov 105   ;;  %vm147_vm2 = vcmask 1022976  }
   0xe   :  { %v10997_v14 = vperm.slane %v10994_v13, 0  ;;  %v11004_v18 = vperm.slane %v10994_v13, 2  ;;  %v11011_v22 = vperm.slane %v10994_v13, 1  ;;  %s15143_s13 = smov 104   ;;  %s15141_s14 = smov 88   ;;  %v9422_v59 = vld [vmem:[%s15077_s1 + $0x60] sm:$0xff] }
   0xf   :  { %s15139_s15 = smov 87   ;;  %s15134_s18 = smov 86   ;;  %vm175_vm3 = vcmask 1014784   ;;  %vm203_vm4 = vcmask 883712   ;;  %vm15215_vm5 = vcmask 875520   ;;  %vm15214_vm6 = vcmask 867328  }
  0x10   :  { %76 = vperm.xlu0 %10084, %v9411_v4   ;;  %s15128_s21 = smov 85   ;;  %s15130_s16 = smov 84   ;;  %vm15210_vm7 = vcmask 859136   ;;  %vm15211_vm8 = vcmask 850944   ;;  %vm15154_vm9 = vcmask 719872   ;;  %vm15121_vm10 = vcmask 711680  }
  0x11   :  { %244 = vperm.xlu1 %10086, %v9417_v5   ;;  %188 = vperm.xlu2 %10085, %v9415_v6   ;;  %s15132_s20 = smov 68   ;;  %s15088_s17 = smov 67   ;;  %vm15153_vm11 = vcmask 703488   ;;  %vm15120_vm12 = vcmask 695296   ;;  %vm15127_vm13 = vcmask 687104   ;;  %vm15122_vm14 = vcmask 556032  }
  0x12   :  { %s15137_s23 = smov 66   ;;  %s15109_s19 = smov 47   ;;  %vm15123_vm15 = vcmask 547840  }
  0x13   :  { %s15275_s22 = smov 48   ;;  %s15378_s11 = smov 44  }
  0x14   :  { %s15460_s9 = smov 125   ;;  %s15221_s8 = smov 116  }
  0x18   :  { %132 = vperm.xlu0 %10084, %v9413_v7  }
  0x19   :  { %328 = vperm.xlu1 %10086, %v9420_v8   ;;  %272 = vperm.xlu2 %10085, %v9418_v9  }
  0x20   :  { %216 = vperm.xlu0 %10084, %v9416_v10  }
  0x21   :  { %356 = vperm.xlu2 %10085, %v9421_v11  }
  0x28   :  { %300 = vperm.xlu0 %10084, %v9419_v12  }
  0x63   :  { %v105_v15 = vpop.permute.xlu2 %104 }
  0x64   :  { %v107_v16 = vmul.f32 %v105_v15, %v10997_v14  ;;  %v109_v24 = vmul.f32 %v105_v15, %v11004_v18  ;;  %v108_v30 = vmul.f32 %v105_v15, %v11011_v22 }
  0x66   :  { %113 = vrot.lane.b32.xlu0 %v107_v16, %s15176_s24  ;;  %v9423_v16 = vld [vmem:[%s15077_s1 + $0x68] sm:$0xff] }
  0x6b   :  { %v189_v31 = vpop.permute.xlu2 %188 }
  0x6c   :  { %v191_v33 = vmul.f32 %v189_v31, %v10997_v14  ;;  %v193_v36 = vmul.f32 %v189_v31, %v11004_v18  ;;  %v192_v42 = vmul.f32 %v189_v31, %v11011_v22 }
  0x73   :  { %v273_v43 = vpop.permute.xlu2 %272 }
  0x74   :  { %v275_v45 = vmul.f32 %v273_v43, %v10997_v14  ;;  %v277_v48 = vmul.f32 %v273_v43, %v11004_v18  ;;  %v276_v54 = vmul.f32 %v273_v43, %v11011_v22 }
  0x7a   :  { %v11001_v17 = vpop.permute.xlu0 %59 }
  0x7b   :  { %v161_v27 = vpop.permute.xlu1 %160  ;;  %v357_v55 = vpop.permute.xlu2 %356 }
  0x7c   :  { %v164_v28 = vmul.f32 %v161_v27, %v11011_v22  ;;  %v163_v32 = vmul.f32 %v161_v27, %v10997_v14  ;;  %v165_v38 = vmul.f32 %v161_v27, %v11004_v18  ;;  %v359_v57 = vmul.f32 %v357_v55, %v10997_v14 }
  0x7d   :  { %v361_v60 = vmul.f32 %v357_v55, %v11004_v18  ;;  %v360_v62 = vmul.f32 %v357_v55, %v11011_v22 }
  0x82   :  { %v77_v19 = vpop.permute.xlu0 %76 }
  0x83   :  { %v81_v20 = vmul.f32 %v77_v19, %v11004_v18  ;;  %v79_v21 = vmul.f32 %v77_v19, %v10997_v14  ;;  %v80_v26 = vmul.f32 %v77_v19, %v11011_v22  ;;  %v245_v39 = vpop.permute.xlu1 %244 }
  0x84   :  { %v248_v41 = vmul.f32 %v245_v39, %v11011_v22  ;;  %v247_v44 = vmul.f32 %v245_v39, %v10997_v14  ;;  %v249_v50 = vmul.f32 %v245_v39, %v11004_v18 }
  0x85   :  { %89 = vrot.lane.b32.xlu2 %v81_v20, %s15169_s25  ;;  %85 = vrot.lane.b32.xlu1 %v79_v21, %s15169_s25 }
  0x8a   :  { %v133_v23 = vpop.permute.xlu0 %132 }
  0x8b   :  { %v137_v25 = vmul.f32 %v133_v23, %v11004_v18  ;;  %v136_v29 = vmul.f32 %v133_v23, %v11011_v22  ;;  %v135_v34 = vmul.f32 %v133_v23, %v10997_v14  ;;  %v329_v51 = vpop.permute.xlu1 %328 }
  0x8c   :  { %v332_v53 = vmul.f32 %v329_v51, %v11011_v22  ;;  %v331_v56 = vmul.f32 %v329_v51, %v10997_v14  ;;  %v333_v61 = vmul.f32 %v329_v51, %v11004_v18 }
  0x8d   :  { %117 = vrot.lane.b32.xlu2 %v109_v24, %s15176_s24  ;;  %145 = vrot.lane.b32.xlu0 %v137_v25, %s15178_s26 }
  0x8e   :  { %87 = vrot.lane.b32.xlu1 %v80_v26, %s15169_s25 }
  0x92   :  { %v217_v35 = vpop.permute.xlu0 %216 }
  0x93   :  { %v221_v37 = vmul.f32 %v217_v35, %v11004_v18  ;;  %v220_v40 = vmul.f32 %v217_v35, %v11011_v22  ;;  %v219_v46 = vmul.f32 %v217_v35, %v10997_v14 }
  0x95   :  { %143 = vrot.lane.b32.xlu2 %v136_v29, %s15178_s26  ;;  %171 = vrot.lane.b32.xlu0 %v164_v28, %s15167_s27 }
  0x96   :  { %115 = vrot.lane.b32.xlu1 %v108_v30, %s15176_s24 }
  0x9a   :  { %v301_v47 = vpop.permute.xlu0 %300 }
  0x9b   :  { %v305_v49 = vmul.f32 %v301_v47, %v11004_v18  ;;  %v304_v52 = vmul.f32 %v301_v47, %v11011_v22  ;;  %v303_v58 = vmul.f32 %v301_v47, %v10997_v14 }
  0x9d   :  { %169 = vrot.lane.b32.xlu2 %v163_v32, %s15167_s27  ;;  %197 = vrot.lane.b32.xlu0 %v191_v33, %s15151_s28 }
  0x9e   :  { %141 = vrot.lane.b32.xlu1 %v135_v34, %s15178_s26 }
  0xa5   :  { %201 = vrot.lane.b32.xlu2 %v193_v36, %s15151_s28  ;;  %229 = vrot.lane.b32.xlu0 %v221_v37, %s15149_s29 }
  0xa6   :  { %173 = vrot.lane.b32.xlu1 %v165_v38, %s15167_s27 }
  0xad   :  { %227 = vrot.lane.b32.xlu2 %v220_v40, %s15149_s29  ;;  %255 = vrot.lane.b32.xlu0 %v248_v41, %s15147_s30  ;;  %v11148_v40 = vld [vmem:[%s15077_s1 + $0x70] sm:$0xff] }
  0xae   :  { %199 = vrot.lane.b32.xlu1 %v192_v42, %s15151_s28  ;;  %15228 = vst [vmem:[#allocation14_spill] sm:$0xff] %v11148_v40 }
  0xb5   :  { %253 = vrot.lane.b32.xlu2 %v247_v44, %s15147_s30  ;;  %281 = vrot.lane.b32.xlu0 %v275_v45, %s15145_s12 }
  0xb6   :  { %225 = vrot.lane.b32.xlu1 %v219_v46, %s15149_s29 }
  0xbd   :  { %285 = vrot.lane.b32.xlu2 %v277_v48, %s15145_s12  ;;  %313 = vrot.lane.b32.xlu0 %v305_v49, %s15143_s13 }
  0xbe   :  { %257 = vrot.lane.b32.xlu1 %v249_v50, %s15147_s30 }
  0xc5   :  { %311 = vrot.lane.b32.xlu2 %v304_v52, %s15143_s13  ;;  %339 = vrot.lane.b32.xlu0 %v332_v53, %s15141_s14 }
  0xc6   :  { %283 = vrot.lane.b32.xlu1 %v276_v54, %s15145_s12  ;;  %v11178_v54 = vld [vmem:[%s15077_s1 + $0x78] sm:$0xff] }
  0xc7   :  { %15229 = vst [vmem:[#allocation15_spill] sm:$0xff] %v11178_v54 }
  0xcd   :  { %337 = vrot.lane.b32.xlu2 %v331_v56, %s15141_s14  ;;  %365 = vrot.lane.b32.xlu0 %v359_v57, %s15139_s15 }
  0xce   :  { %309 = vrot.lane.b32.xlu1 %v303_v58, %s15143_s13 }
  0xd5   :  { %369 = vrot.lane.b32.xlu2 %v361_v60, %s15139_s15  ;;  %384 = vperm.xlu0 %10084, %v9422_v59  }
  0xd6   :  { %341 = vrot.lane.b32.xlu1 %v333_v61, %s15141_s14 }
  0xd8   :  { %v11076_v63 = vpop.permute.xlu0 %113 }
  0xde   :  { %367 = vrot.lane.b32.xlu1 %v360_v62, %s15139_s15  ;;  %v11196_v62 = vld [vmem:[%s15077_s1 + $0x80] sm:$0xff] }
  0xdf   :  { %v11127_v30 = vpop.permute.xlu2 %89  ;;  %15230 = vst [vmem:[#allocation16_spill] sm:$0xff] %v11196_v62 }
  0xe7   :  { %v11131_v32 = vpop.permute.xlu2 %117 }
  0xef   :  { %v11135_v34 = vpop.permute.xlu2 %143 }
  0xf7   :  { %v11096_v9 = vpop.permute.xlu1 %85  ;;  %v11143_v39 = vpop.permute.xlu2 %169 }
  0xff   :  { %v11078_v0 = vpop.permute.xlu0 %145  ;;  %v11151_v41 = vpop.permute.xlu2 %201 }
 0x100   :  { %v11107_v19 = vpop.permute.xlu1 %87 }
 0x107   :  { %v11080_v1 = vpop.permute.xlu0 %171  ;;  %v11153_v42 = vpop.permute.xlu2 %227 }
 0x108   :  { %v11109_v20 = vpop.permute.xlu1 %115 }
 0x10f   :  { %v11082_v2 = vpop.permute.xlu0 %197  ;;  %v11155_v43 = vpop.permute.xlu2 %253 }
 0x110   :  { %v11111_v21 = vpop.permute.xlu1 %141 }
 0x117   :  { %v11084_v3 = vpop.permute.xlu0 %229  ;;  %v11157_v44 = vpop.permute.xlu2 %285 }
 0x118   :  { %v11113_v23 = vpop.permute.xlu1 %173 }
 0x11f   :  { %v11086_v4 = vpop.permute.xlu0 %255  ;;  %v11159_v45 = vpop.permute.xlu2 %311 }
 0x120   :  { %v11115_v24 = vpop.permute.xlu1 %199 }
 0x127   :  { %v11088_v5 = vpop.permute.xlu0 %281  ;;  %v11161_v46 = vpop.permute.xlu2 %337 }
 0x128   :  { %v11117_v25 = vpop.permute.xlu1 %225 }
 0x12f   :  { %v11090_v6 = vpop.permute.xlu0 %313  ;;  %v11163_v47 = vpop.permute.xlu2 %369 }
 0x130   :  { %v11119_v26 = vpop.permute.xlu1 %257 }
 0x137   :  { %v11092_v7 = vpop.permute.xlu0 %339 }
 0x138   :  { %v11121_v27 = vpop.permute.xlu1 %283 }
 0x13f   :  { %v11094_v8 = vpop.permute.xlu0 %365 }
 0x140   :  { %v11123_v28 = vpop.permute.xlu1 %309 }
 0x147   :  { %v385_v10 = vpop.permute.xlu0 %384 }
 0x148   :  { %v389_v11 = vmul.f32 %v385_v10, %v11004_v18  ;;  %v388_v12 = vmul.f32 %v385_v10, %v11011_v22  ;;  %v387_v15 = vmul.f32 %v385_v10, %v10997_v14  ;;  %v11125_v29 = vpop.permute.xlu1 %341 }
 0x14a   :  { %397 = vrot.lane.b32.xlu0 %v389_v11, %s15134_s18  ;;  %395 = vrot.lane.b32.xlu2 %v388_v12, %s15134_s18 }
 0x14b   :  { %393 = vrot.lane.b32.xlu1 %v387_v15, %s15134_s18 }
 0x150   :  { %v11129_v31 = vpop.permute.xlu1 %367 }
 0x153   :  { %412 = vperm.xlu1 %10086, %v9423_v16  }
 0x1a4   :  { %v11165_v48 = vpop.permute.xlu2 %395 }
 0x1bc   :  { %v11181_v55 = vpop.permute.xlu0 %397 }
 0x1bd   :  { %v11133_v33 = vpop.permute.xlu1 %393 }
 0x1c5   :  { %v413_v35 = vpop.permute.xlu1 %412 }
 0x1c6   :  { %v417_v36 = vmul.f32 %v413_v35, %v11004_v18  ;;  %v416_v37 = vmul.f32 %v413_v35, %v11011_v22  ;;  %v415_v38 = vmul.f32 %v413_v35, %v10997_v14 }
 0x1c8   :  { %425 = vrot.lane.b32.xlu1 %v417_v36, %s15128_s21  ;;  %423 = vrot.lane.b32.xlu0 %v416_v37, %s15128_s21  ;;  %v11214_v37 = vld [vmem:[%s15077_s1 + $0x88] sm:$0xff] }
 0x1c9   :  { %421 = vrot.lane.b32.xlu2 %v415_v38, %s15128_s21  ;;  %15231 = vst [vmem:[#allocation17_spill] sm:$0xff] %v11214_v37 }
 0x1d1   :  { %440 = vperm.xlu2 %10085, %v11148_v40  }
 0x223   :  { %v11167_v49 = vpop.permute.xlu2 %421 }
 0x22b   :  { %v441_v50 = vpop.permute.xlu2 %440 }
 0x22c   :  { %v445_v51 = vmul.f32 %v441_v50, %v11004_v18  ;;  %v444_v52 = vmul.f32 %v441_v50, %v11011_v22  ;;  %v443_v53 = vmul.f32 %v441_v50, %v10997_v14 }
 0x22e   :  { %453 = vrot.lane.b32.xlu2 %v445_v51, %s15130_s16  ;;  %451 = vrot.lane.b32.xlu1 %v444_v52, %s15130_s16 }
 0x22f   :  { %449 = vrot.lane.b32.xlu0 %v443_v53, %s15130_s16 }
 0x237   :  { %468 = vperm.xlu0 %10084, %v11178_v54  }
 0x23a   :  { %v11183_v56 = vpop.permute.xlu0 %423  ;;  %v11199_v10 = vpop.permute.xlu1 %425 }
 0x288   :  { %v11217_v38 = vpop.permute.xlu2 %453 }
 0x2a0   :  { %v11201_v11 = vpop.permute.xlu1 %451 }
 0x2a1   :  { %v11185_v57 = vpop.permute.xlu0 %449 }
 0x2a9   :  { %v469_v58 = vpop.permute.xlu0 %468 }
 0x2aa   :  { %v473_v59 = vmul.f32 %v469_v58, %v11004_v18  ;;  %v472_v60 = vmul.f32 %v469_v58, %v11011_v22  ;;  %v471_v61 = vmul.f32 %v469_v58, %v10997_v14 }
 0x2ac   :  { %481 = vrot.lane.b32.xlu0 %v473_v59, %s15132_s20  ;;  %479 = vrot.lane.b32.xlu2 %v472_v60, %s15132_s20  ;;  %v11232_v60 = vld [vmem:[%s15077_s1 + $0x90] sm:$0xff] }
 0x2ad   :  { %477 = vrot.lane.b32.xlu1 %v471_v61, %s15132_s20  ;;  %15232 = vst [vmem:[#allocation18_spill] sm:$0xff] %v11232_v60 }
 0x2b5   :  { %496 = vperm.xlu1 %10086, %v11196_v62  }
 0x306   :  { %v11219_v50 = vpop.permute.xlu2 %479 }
 0x31e   :  { %v11235_v61 = vpop.permute.xlu0 %481 }
 0x31f   :  { %v11203_v12 = vpop.permute.xlu1 %477 }
 0x327   :  { %v497_v15 = vpop.permute.xlu1 %496 }
 0x328   :  { %v501_v16 = vmul.f32 %v497_v15, %v11004_v18  ;;  %v500_v35 = vmul.f32 %v497_v15, %v11011_v22  ;;  %v499_v36 = vmul.f32 %v497_v15, %v10997_v14 }
 0x32a   :  { %509 = vrot.lane.b32.xlu1 %v501_v16, %s15088_s17  ;;  %507 = vrot.lane.b32.xlu0 %v500_v35, %s15088_s17 }
 0x32b   :  { %505 = vrot.lane.b32.xlu2 %v499_v36, %s15088_s17  ;;  %s15092_s17 = smov 65  }
 0x333   :  { %524 = vperm.xlu2 %10085, %v11214_v37  }
 0x385   :  { %v11221_v51 = vpop.permute.xlu2 %505 }
 0x38d   :  { %v525_v52 = vpop.permute.xlu2 %524 }
 0x38e   :  { %v529_v53 = vmul.f32 %v525_v52, %v11004_v18  ;;  %v528_v58 = vmul.f32 %v525_v52, %v11011_v22  ;;  %v527_v59 = vmul.f32 %v525_v52, %v10997_v14 }
 0x390   :  { %537 = vrot.lane.b32.xlu2 %v529_v53, %s15137_s23  ;;  %535 = vrot.lane.b32.xlu1 %v528_v58, %s15137_s23  ;;  %v11250_v58 = vld [vmem:[%s15077_s1 + $0x98] sm:$0xff] }
 0x391   :  { %533 = vrot.lane.b32.xlu0 %v527_v59, %s15137_s23  ;;  %15234 = vst [vmem:[#allocation20_spill] sm:$0xff] %v11250_v58 }
 0x399   :  { %552 = vperm.xlu0 %10084, %v11232_v60  }
 0x39c   :  { %v11237_v15 = vpop.permute.xlu0 %507  ;;  %v11253_v59 = vpop.permute.xlu1 %509 }
 0x3ea   :  { %v11271_v60 = vpop.permute.xlu2 %537 }
 0x3eb   :  { %15238 = vst [vmem:[#allocation24_spill] sm:$0xff] %v11271_v60 }
 0x402   :  { %v11255_v37 = vpop.permute.xlu1 %535 }
 0x403   :  { %v11239_v16 = vpop.permute.xlu0 %533  ;;  %15235 = vst [vmem:[#allocation21_spill] sm:$0xff] %v11255_v37 }
 0x404   :  { %15233 = vst [vmem:[#allocation19_spill] sm:$0xff] %v11239_v16 }
 0x40b   :  { %v553_v35 = vpop.permute.xlu0 %552 }
 0x40c   :  { %v557_v36 = vmul.f32 %v553_v35, %v11004_v18  ;;  %v556_v52 = vmul.f32 %v553_v35, %v11011_v22  ;;  %v555_v53 = vmul.f32 %v553_v35, %v10997_v14 }
 0x40e   :  { %565 = vrot.lane.b32.xlu0 %v557_v36, %s15092_s17  ;;  %563 = vrot.lane.b32.xlu2 %v556_v52, %s15092_s17 }
 0x40f   :  { %561 = vrot.lane.b32.xlu1 %v555_v53, %s15092_s17  ;;  %s15098_s17 = smov 64  }
 0x417   :  { %580 = vperm.xlu1 %10086, %v11250_v58   ;;  %v11268_v58 = vld [vmem:[%s15077_s1 + $0xa0] sm:$0xff] }
 0x418   :  { %15237 = vst [vmem:[#allocation23_spill] sm:$0xff] %v11268_v58 }
 0x468   :  { %v11273_v62 = vpop.permute.xlu2 %563 }
 0x469   :  { %15239 = vst [vmem:[#allocation25_spill] sm:$0xff] %v11273_v62 }
 0x481   :  { %v11257_v40 = vpop.permute.xlu1 %561 }
 0x482   :  { %15236 = vst [vmem:[#allocation22_spill] sm:$0xff] %v11257_v40 }
 0x489   :  { %v581_v35 = vpop.permute.xlu1 %580 }
 0x48a   :  { %v585_v36 = vmul.f32 %v581_v35, %v11004_v18  ;;  %v584_v52 = vmul.f32 %v581_v35, %v11011_v22  ;;  %v583_v53 = vmul.f32 %v581_v35, %v10997_v14 }
 0x48c   :  { %593 = vrot.lane.b32.xlu1 %v585_v36, %s15098_s17  ;;  %591 = vrot.lane.b32.xlu0 %v584_v52, %s15098_s17 }
 0x48d   :  { %589 = vrot.lane.b32.xlu2 %v583_v53, %s15098_s17  ;;  %s15102_s17 = smov 48  }
 0x495   :  { %608 = vperm.xlu2 %10085, %v11268_v58   ;;  %v11284_v58 = vperm.slane %v10994_v13, 3 }
 0x4e7   :  { %v11275_v54 = vpop.permute.xlu2 %589 }
 0x4e8   :  { %15240 = vst [vmem:[#allocation26_spill] sm:$0xff] %v11275_v54  ;;  %v11289_v54 = vld [vmem:[%s15077_s1 + $0xa8] sm:$0xff] }
 0x4e9   :  { %15241 = vst [vmem:[#allocation27_spill] sm:$0xff] %v11289_v54 }
 0x4ef   :  { %v609_v35 = vpop.permute.xlu2 %608 }
 0x4f0   :  { %v615_v36 = vmul.f32 %v609_v35, %v11004_v18  ;;  %v614_v52 = vmul.f32 %v609_v35, %v11011_v22  ;;  %v613_v53 = vmul.f32 %v609_v35, %v10997_v14  ;;  %v616_v40 = vmul.f32 %v11284_v58, %v609_v35  ;;  %v9432_v35 = vld [vmem:[%s15077_s1 + $0xb0] sm:$0xff] }
 0x4f2   :  { %625 = vrot.lane.b32.xlu2 %v615_v36, %s15102_s17  ;;  %623 = vrot.lane.b32.xlu1 %v614_v52, %s15102_s17 }
 0x4f3   :  { %621 = vrot.lane.b32.xlu0 %v613_v53, %s15102_s17 }
 0x4fa   :  { %643 = vperm.xlu1 %10086, %v11289_v54   ;;  %v11309_v54 = vpop.permute.xlu0 %565 }
 0x4fb   :  { %627 = vrot.lane.b32.xlu0 %v616_v40, %s15102_s17  ;;  %15244 = vst [vmem:[#allocation30_spill] sm:$0xff] %v11309_v54  ;;  %s15114_s17 = smov 46  }
 0x4fe   :  { %v11294_v62 = vpop.permute.xlu1 %593 }
 0x4ff   :  { %15242 = vst [vmem:[#allocation28_spill] sm:$0xff] %v11294_v62 }
 0x564   :  { %v11296_v36 = vpop.permute.xlu1 %623 }
 0x565   :  { %15243 = vst [vmem:[#allocation29_spill] sm:$0xff] %v11296_v36  ;;  %v11311_v36 = vpop.permute.xlu0 %591 }
 0x566   :  { %15245 = vst [vmem:[#allocation31_spill] sm:$0xff] %v11311_v36 }
 0x56c   :  { %v644_v52 = vpop.permute.xlu1 %643 }
 0x56d   :  { %v648_v53 = vmul.f32 %v644_v52, %v11004_v18  ;;  %v646_v13 = vmul.f32 %v644_v52, %v10997_v14  ;;  %v647_v16 = vmul.f32 %v644_v52, %v11011_v22  ;;  %v649_v40 = vmul.f32 %v644_v52, %v11284_v58  ;;  %v11313_v62 = vpop.permute.xlu0 %621 }
 0x56e   :  { %15246 = vst [vmem:[#allocation32_spill] sm:$0xff] %v11313_v62 }
 0x56f   :  { %658 = vrot.lane.b32.xlu1 %v648_v53, %s15109_s19  ;;  %654 = vrot.lane.b32.xlu2 %v646_v13, %s15109_s19 }
 0x570   :  { %656 = vrot.lane.b32.xlu0 %v647_v16, %s15109_s19 }
 0x575   :  { %v11315_v53 = vpop.permute.xlu0 %627 }
 0x576   :  { %15247 = vst [vmem:[#allocation33_spill] sm:$0xff] %v11315_v53  ;;  %v11330_v53 = vpop.permute.xlu2 %625 }
 0x577   :  { %660 = vrot.lane.b32.xlu2 %v649_v40, %s15109_s19  ;;  %v9433_v40 = vld [vmem:[%s15077_s1 + $0xb8] sm:$0xff]  ;;  %s15117_s19 = smov 45  }
 0x578   :  { %676 = vperm.xlu0 %10084, %v9432_v35  }
 0x5e2   :  { %v11317_v13 = vpop.permute.xlu0 %656 }
 0x5e3   :  { %15248 = vst [vmem:[#allocation34_spill] sm:$0xff] %v11317_v13  ;;  %v11332_v13 = vpop.permute.xlu2 %654 }
 0x5e4   :  { %15249 = vst [vmem:[#allocation35_spill] sm:$0xff] %v11332_v13 }
 0x5ea   :  { %v677_v16 = vpop.permute.xlu0 %676 }
 0x5eb   :  { %v681_v52 = vmul.f32 %v677_v16, %v11004_v18  ;;  %v680_v37 = vmul.f32 %v677_v16, %v11011_v22  ;;  %v679_v60 = vmul.f32 %v677_v16, %v10997_v14  ;;  %v682_v35 = vmul.f32 %v677_v16, %v11284_v58  ;;  %v11334_v62 = vpop.permute.xlu2 %660 }
 0x5ec   :  { %15250 = vst [vmem:[#allocation36_spill] sm:$0xff] %v11334_v62 }
 0x5ed   :  { %691 = vrot.lane.b32.xlu0 %v681_v52, %s15114_s17  ;;  %689 = vrot.lane.b32.xlu2 %v680_v37, %s15114_s17 }
 0x5ee   :  { %687 = vrot.lane.b32.xlu1 %v679_v60, %s15114_s17 }
 0x5f5   :  { %709 = vperm.xlu2 %10085, %v9433_v40   ;;  %v9434_v40 = vld [vmem:[%s15077_s1 + $0xc0] sm:$0xff] }
 0x5f6   :  { %693 = vrot.lane.b32.xlu1 %v682_v35, %s15114_s17  ;;  %v11349_v35 = vpop.permute.xlu1 %658  ;;  %s15193_s17 = smov 44  }
 0x647   :  { %v11336_v52 = vpop.permute.xlu2 %689 }
 0x648   :  { %15251 = vst [vmem:[#allocation37_spill] sm:$0xff] %v11336_v52 }
 0x64f   :  { %v710_v37 = vpop.permute.xlu2 %709 }
 0x650   :  { %v714_v60 = vmul.f32 %v710_v37, %v11004_v18  ;;  %v712_v36 = vmul.f32 %v710_v37, %v10997_v14  ;;  %v713_v54 = vmul.f32 %v710_v37, %v11011_v22  ;;  %v715_v16 = vmul.f32 %v710_v37, %v11284_v58 }
 0x652   :  { %724 = vrot.lane.b32.xlu2 %v714_v60, %s15117_s19  ;;  %720 = vrot.lane.b32.xlu0 %v712_v36, %s15117_s19 }
 0x653   :  { %722 = vrot.lane.b32.xlu1 %v713_v54, %s15117_s19 }
 0x65a   :  { %726 = vrot.lane.b32.xlu0 %v715_v16, %s15117_s19  ;;  %v50_v16 = vld [vmem:[%s15078_s2] sm:$0xff]  ;;  %s15273_s2 = smov 67   ;;  %s15274_s19 = smov 65  }
 0x65b   :  { %742 = vperm.xlu1 %10086, %v9434_v40  }
 0x660   :  { %v11351_v62 = vpop.permute.xlu1 %687 }
 0x668   :  { %v11353_v52 = vpop.permute.xlu1 %693 }
 0x669   :  { %15252 = vst [vmem:[#allocation38_spill] sm:$0xff] %v11353_v52  ;;  %v92_v52 = vsel %vm91_vm0, %v11096_v9, %v11107_v19 }
 0x6c5   :  { %v11355_v60 = vpop.permute.xlu1 %722 }
 0x6c6   :  { %15253 = vst [vmem:[#allocation39_spill] sm:$0xff] %v11355_v60 }
 0x6cd   :  { %v743_v36 = vpop.permute.xlu1 %742 }
 0x6ce   :  { %v747_v54 = vmul.f32 %v743_v36, %v11004_v18  ;;  %v746_v37 = vmul.f32 %v743_v36, %v11011_v22  ;;  %v745_v13 = vmul.f32 %v743_v36, %v10997_v14  ;;  %v748_v40 = vmul.f32 %v743_v36, %v11284_v58 }
 0x6cf   :  { %v120_v58 = vsel %vm119_vm1, %v11076_v63, %v11109_v20  ;;  %v121_v36 = vsel %vm119_vm1, %v11109_v20, %v11131_v32  ;;  %v177_v63 = vsel %vm175_vm3, %v11080_v1, %v11113_v23 }
 0x6d0   :  { %757 = vrot.lane.b32.xlu1 %v747_v54, %s15193_s17  ;;  %755 = vrot.lane.b32.xlu0 %v746_v37, %s15193_s17  ;;  %v93_v54 = vsel %vm91_vm0, %v11107_v19, %v11127_v30  ;;  %v70_v37 = vmul.f32 %v11011_v22, %v11001_v17  ;;  %v148_v19 = vsel %vm147_vm2, %v11111_v21, %v11135_v34 }
 0x6d1   :  { %753 = vrot.lane.b32.xlu2 %v745_v13, %s15193_s17  ;;  %v69_v13 = vmul.f32 %v10997_v14, %v11001_v17  ;;  %v149_v22 = vsel %vm147_vm2, %v11135_v34, %v11078_v0  ;;  %v204_v21 = vsel %vm203_vm4, %v11082_v2, %v11115_v24  ;;  %v261_v2 = vsel %vm15214_vm6, %v11086_v4, %v11119_v26 }
 0x6d3   :  { %v97_v9 = vadd.f32 %v92_v52, %v69_v13  ;;  %v176_v52 = vsel %vm175_vm3, %v11143_v39, %v11080_v1  ;;  %v233_v1 = vsel %vm15215_vm5, %v11153_v42, %v11084_v3  ;;  %v260_v39 = vsel %vm15214_vm6, %v11155_v43, %v11086_v4  ;;  %v11425_v43 = vpop.permute.xlu0 %691 }
 0x6d8   :  { %773 = vperm.xlu0 %10084, %v50_v16   ;;  %v98_v16 = vadd.f32 %v93_v54, %v70_v37  ;;  %v205_v54 = vsel %vm203_vm4, %v11115_v24, %v11151_v41  ;;  %v232_v37 = vsel %vm15215_vm5, %v11117_v25, %v11153_v42  ;;  %v288_v25 = vsel %vm15210_vm7, %v11088_v5, %v11121_v27 }
 0x6d9   :  { %759 = vrot.lane.b32.xlu2 %v748_v40, %s15193_s17  ;;  %v125_v40 = vadd.f32 %v120_v58, %v97_v9 }
 0x6da   :  { %v126_v14 = vadd.f32 %v121_v36, %v98_v16 }
 0x6db   :  { %v153_v60 = vadd.f32 %v148_v19, %v125_v40  ;;  %v316_v19 = vsel %vm15211_vm8, %v11123_v28, %v11159_v45  ;;  %v71_v40 = vmul.f32 %v11004_v18, %v11001_v17  ;;  %v345_v28 = vsel %vm15154_vm9, %v11092_v7, %v11125_v29 }
 0x6dc   :  { %v154_v20 = vadd.f32 %v149_v22, %v126_v14  ;;  %v344_v18 = vsel %vm15154_vm9, %v11161_v46, %v11092_v7  ;;  %v400_v7 = vsel %vm15153_vm11, %v11133_v33, %v11165_v48  ;;  %v457_v33 = vsel %vm15127_vm13, %v11201_v11, %v11217_v38 }
 0x6dd   :  { %v181_v13 = vadd.f32 %v176_v52, %v153_v60  ;;  %v289_v60 = vsel %vm15210_vm7, %v11121_v27, %v11157_v44  ;;  %v99_v5 = vadd.f32 %v11127_v30, %v71_v40  ;;  %v317_v27 = vsel %vm15211_vm8, %v11159_v45, %v11090_v6  ;;  %v15259_v40 = vld [vmem:[#allocation22_spill] sm:$0xff] }
 0x6de   :  { %v182_v34 = vadd.f32 %v177_v63, %v154_v20  ;;  %v372_v30 = vsel %vm15121_vm10, %v11094_v8, %v11129_v31  ;;  %v373_v45 = vsel %vm15121_vm10, %v11129_v31, %v11163_v47  ;;  %v429_v31 = vsel %vm15120_vm12, %v11183_v56, %v11199_v10 }
 0x6df   :  { %v209_v58 = vadd.f32 %v204_v21, %v181_v13  ;;  %v127_v63 = vadd.f32 %v11131_v32, %v99_v5  ;;  %v401_v32 = vsel %vm15153_vm11, %v11165_v48, %v11181_v55  ;;  %v721_v13 = vpop.permute.xlu0 %720  ;;  %vm15125_vm10 = vcmask 531456  }
 0x6e0   :  { %v210_v36 = vadd.f32 %v205_v54, %v182_v34 }
 0x6e1   :  { %v237_v9 = vadd.f32 %v232_v37, %v209_v58  ;;  %v155_v20 = vadd.f32 %v11078_v0, %v127_v63  ;;  %v428_v0 = vsel %vm15120_vm12, %v11167_v49, %v11183_v56  ;;  %v485_v56 = vsel %vm15122_vm14, %v11219_v50, %v11235_v61  ;;  %v15262_v63 = vld [vmem:[#allocation28_spill] sm:$0xff] }
 0x6e2   :  { %v238_v24 = vadd.f32 %v233_v1, %v210_v36  ;;  %v484_v36 = vsel %vm15122_vm14, %v11203_v12, %v11219_v50  ;;  %vm15124_vm12 = vcmask 539648   ;;  %v15256_v50 = vld [vmem:[#allocation19_spill] sm:$0xff]  ;;  %vm15126_vm14 = vcmask 523264  }
 0x6e3   :  { %v265_v16 = vadd.f32 %v260_v39, %v237_v9  ;;  %v183_v46 = vadd.f32 %v11113_v23, %v155_v20  ;;  %v456_v23 = vsel %vm15127_vm13, %v11185_v57, %v11201_v11  ;;  %v512_v57 = vsel %vm15123_vm15, %v11221_v51, %v11237_v15  ;;  %v15254_v39 = vld [vmem:[#allocation24_spill] sm:$0xff]  ;;  %v725_v20 = vpop.permute.xlu2 %724 }
 0x6e4   :  { %v266_v42 = vadd.f32 %v261_v2, %v238_v24  ;;  %vm15206_vm13 = vcmask 359424  }
 0x6e5   :  { %v293_v14 = vadd.f32 %v288_v25, %v265_v16  ;;  %v211_v48 = vadd.f32 %v11151_v41, %v183_v46  ;;  %v513_v41 = vsel %vm15123_vm15, %v11237_v15, %v11253_v59  ;;  %v15255_v25 = vld [vmem:[#allocation21_spill] sm:$0xff]  ;;  %vm629_vm15 = vcmask 392192  }
 0x6e6   :  { %v294_v4 = vadd.f32 %v289_v60, %v266_v42  ;;  %v541_v12 = vsel %vm15124_vm12, %v15255_v25, %v15254_v39  ;;  %v540_v60 = vsel %vm15124_vm12, %v15256_v50, %v15255_v25  ;;  %v15258_v15 = vld [vmem:[#allocation25_spill] sm:$0xff]  ;;  %vm662_vm12 = vcmask 384000  }
 0x6e7   :  { %v321_v22 = vadd.f32 %v316_v19, %v293_v14  ;;  %v239_v11 = vadd.f32 %v11084_v3, %v211_v48  ;;  %v15257_v19 = vld [vmem:[#allocation30_spill] sm:$0xff]  ;;  %v568_v14 = vsel %vm15125_vm10, %v15259_v40, %v15258_v15 }
 0x6e8   :  { %v322_v17 = vadd.f32 %v317_v27, %v294_v4  ;;  %v569_v3 = vsel %vm15125_vm10, %v15258_v15, %v15257_v19  ;;  %v11491_v4 = vpop.permute.xlu0 %726  ;;  %v15260_v27 = vld [vmem:[#allocation31_spill] sm:$0xff]  ;;  %vm695_vm10 = vcmask 375808  }
 0x6e9   :  { %v349_v52 = vadd.f32 %v344_v18, %v321_v22  ;;  %v267_v16 = vadd.f32 %v11119_v26, %v239_v11 }
 0x6ea   :  { %v350_v21 = vadd.f32 %v345_v28, %v322_v17  ;;  %v15261_v28 = vld [vmem:[#allocation26_spill] sm:$0xff]  ;;  %v597_v17 = vsel %vm15126_vm14, %v15260_v27, %v15262_v63 }
 0x6eb   :  { %v377_v8 = vadd.f32 %v372_v30, %v349_v52  ;;  %v596_v26 = vsel %vm15126_vm14, %v15261_v28, %v15260_v27  ;;  %v295_v18 = vadd.f32 %v11157_v44, %v267_v16  ;;  %v15263_v52 = vld [vmem:[#allocation29_spill] sm:$0xff]  ;;  %vm15136_vm14 = vcmask 367616  }
 0x6ec   :  { %v378_v54 = vadd.f32 %v373_v45, %v350_v21  ;;  %v631_v21 = vsel %vm629_vm15, %v15263_v52, %v11330_v53 }
 0x6ed   :  { %v405_v37 = vadd.f32 %v400_v7, %v377_v8 }
 0x6ee   :  { %v406_v34 = vadd.f32 %v401_v32, %v378_v54  ;;  %v15264_v32 = vld [vmem:[#allocation32_spill] sm:$0xff]  ;;  %v15265_v54 = vld [vmem:[#allocation34_spill] sm:$0xff] }
 0x6ef   :  { %v433_v58 = vadd.f32 %v428_v0, %v405_v37  ;;  %v630_v7 = vsel %vm629_vm15, %v15264_v32, %v15263_v52  ;;  %v15266_v0 = vld [vmem:[#allocation35_spill] sm:$0xff]  ;;  %v664_v44 = vsel %vm662_vm12, %v15265_v54, %v11349_v35 }
 0x6f0   :  { %v434_v49 = vadd.f32 %v429_v31, %v406_v34  ;;  %v663_v31 = vsel %vm662_vm12, %v15266_v0, %v15265_v54  ;;  %v323_v34 = vadd.f32 %v11090_v6, %v295_v18  ;;  %v53_v54 = vld [vmem:[%s15082_s6] sm:$0xff]  ;;  %v52_v0 = vld [vmem:[%s15080_s4 + $0x8] sm:$0xff] }
 0x6f1   :  { %v461_v1 = vadd.f32 %v456_v23, %v433_v58  ;;  %v15267_v23 = vld [vmem:[#allocation37_spill] sm:$0xff] }
 0x6f2   :  { %v462_v9 = vadd.f32 %v457_v33, %v434_v49  ;;  %v697_v48 = vsel %vm695_vm10, %v15267_v23, %v11425_v43  ;;  %v696_v58 = vsel %vm695_vm10, %v11351_v62, %v15267_v23 }
 0x6f3   :  { %v489_v24 = vadd.f32 %v484_v36, %v461_v1 }
 0x6f4   :  { %v490_v2 = vadd.f32 %v485_v56, %v462_v9  ;;  %v351_v56 = vadd.f32 %v11125_v29, %v323_v34  ;;  %v9734_v34 = vld [vmem:[%s15077_s1 + $0x18] sm:$0xff] }
 0x6f5   :  { %v517_v51 = vadd.f32 %v512_v57, %v489_v24  ;;  %v15268_v57 = vld [vmem:[#allocation39_spill] sm:$0xff] }
 0x6f6   :  { %v518_v42 = vadd.f32 %v513_v41, %v490_v2  ;;  %v729_v6 = vsel %vm15136_vm14, %v721_v13, %v15268_v57  ;;  %v730_v41 = vsel %vm15136_vm14, %v15268_v57, %v725_v20  ;;  %v9735_v57 = vld [vmem:[%s15077_s1 + $0x20] sm:$0xff] }
 0x6f7   :  { %v545_v22 = vadd.f32 %v540_v60, %v517_v51 }
 0x6f8   :  { %v546_v5 = vadd.f32 %v541_v12, %v518_v42  ;;  %v379_v12 = vadd.f32 %v11163_v47, %v351_v56  ;;  %v9435_v56 = vld [vmem:[%s15079_s3 + $0x10] sm:$0xff] }
 0x6f9   :  { %v573_v45 = vadd.f32 %v568_v14, %v545_v22  ;;  %v15270_v22 = vld [vmem:[#allocation33_spill] sm:$0xff] }
 0x6fa   :  { %v574_v30 = vadd.f32 %v569_v3, %v546_v5  ;;  %v407_v60 = vadd.f32 %v11181_v55, %v379_v12  ;;  %v632_v27 = vsel %vm629_vm15, %v11330_v53, %v15270_v22 }
 0x6fb   :  { %v601_v46 = vadd.f32 %v596_v26, %v573_v45 }
 0x6fc   :  { %v602_v8 = vadd.f32 %v597_v17, %v574_v30  ;;  %v435_v13 = vadd.f32 %v11199_v10, %v407_v60  ;;  %v9436_v60 = vld [vmem:[%s15079_s3 + $0x18] sm:$0xff] }
 0x6fd   :  { %v636_v33 = vadd.f32 %v630_v7, %v601_v46  ;;  %v9445_v7 = vld [vmem:[%s15079_s3 + $0x20] sm:$0xff] }
 0x6fe   :  { %v637_v37 = vadd.f32 %v631_v21, %v602_v8  ;;  %v463_v40 = vadd.f32 %v11217_v38, %v435_v13  ;;  %v9446_v8 = vld [vmem:[%s15079_s3 + $0x28] sm:$0xff] }
 0x6ff   :  { %v669_v36 = vadd.f32 %v663_v31, %v636_v33  ;;  %v51_v31 = vld [vmem:[%s15080_s4] sm:$0xff]  ;;  %s15348_s4 = smov 86  }
 0x700   :  { %v670_v9 = vadd.f32 %v664_v44, %v637_v37  ;;  %v491_v55 = vadd.f32 %v11235_v61, %v463_v40  ;;  %v9732_v44 = vld [vmem:[%s15077_s1 + $0x8] sm:$0xff]  ;;  %v9738_v40 = vld [vmem:[%s15077_s1 + $0x38] sm:$0xff] }
 0x701   :  { %v702_v2 = vadd.f32 %v696_v58, %v669_v36  ;;  %v54_v37 = vld [vmem:[%s15082_s6 + $0x8] sm:$0xff]  ;;  %s15316_s6 = smov 105  }
 0x702   :  { %v703_v11 = vadd.f32 %v697_v48, %v670_v9  ;;  %v519_v10 = vadd.f32 %v11253_v59, %v491_v55  ;;  %v15271_v59 = vld [vmem:[#allocation36_spill] sm:$0xff] }
 0x703   :  { %v735_v29 = vadd.f32 %v729_v6, %v702_v2  ;;  %v665_v26 = vsel %vm662_vm12, %v11349_v35, %v15271_v59  ;;  %v9737_v6 = vld [vmem:[%s15077_s1 + $0x30] sm:$0xff] }
 0x704   :  { %v736_v50 = vadd.f32 %v730_v41, %v703_v11  ;;  %v547_v38 = vadd.f32 %v15254_v39, %v519_v10  ;;  %v15272_v39 = vld [vmem:[#allocation38_spill] sm:$0xff] }
 0x705   :  { %v9733_v41 = vld [vmem:[%s15077_s1 + $0x10] sm:$0xff] }
 0x706   :  { %v575_v61 = vadd.f32 %v15257_v19, %v547_v38  ;;  %v698_v19 = vsel %vm695_vm10, %v11425_v43, %v15272_v39  ;;  %v782_v38 = vld [vmem:[%s15079_s3] sm:$0xff]  ;;  %v9741_v59 = vld [vmem:[%s15077_s1 + $0x50] sm:$0xff] }
 0x707   :  { %v9739_v39 = vld [vmem:[%s15077_s1 + $0x40] sm:$0xff] }
 0x708   :  { %v603_v28 = vadd.f32 %v15262_v63, %v575_v61  ;;  %v731_v63 = vsel %vm15136_vm14, %v725_v20, %v11491_v4  ;;  %vm15204_vm14 = vcmask 64512  }
 0x70a   :  { %v638_v17 = vadd.f32 %v632_v27, %v603_v28  ;;  %v9458_v28 = vld [vmem:[%s15079_s3 + $0x48] sm:$0xff] }
 0x70c   :  { %v671_v53 = vadd.f32 %v665_v26, %v638_v17  ;;  %v9743_v26 = vld [vmem:[%s15077_s1 + $0x60] sm:$0xff] }
 0x70e   :  { %v704_v18 = vadd.f32 %v698_v19, %v671_v53 }
 0x710   :  { %v737_v45 = vadd.f32 %v731_v63, %v704_v18 }
 0x72b   :  { %v754_v24 = vpop.permute.xlu2 %753 }
 0x733   :  { %v760_v35 = vpop.permute.xlu2 %759 }
 0x742   :  { %v756_v49 = vpop.permute.xlu0 %755  ;;  %v758_v1 = vpop.permute.xlu1 %757 }
 0x743   :  { %v762_v25 = vsel %vm15206_vm13, %v754_v24, %v756_v49  ;;  %v763_v62 = vsel %vm15206_vm13, %v756_v49, %v758_v1  ;;  %v764_v30 = vsel %vm15206_vm13, %v758_v1, %v760_v35  ;;  %v783_v35 = vld [vmem:[%s15079_s3 + $0x8] sm:$0xff] }
 0x744   :  { %v768_v16 = vadd.f32 %v762_v25, %v735_v29  ;;  %v769_v51 = vadd.f32 %v763_v62, %v736_v50  ;;  %v770_v52 = vadd.f32 %v764_v30, %v737_v45  ;;  %v9469_v30 = vld [vmem:[%s15079_s3 + $0x60] sm:$0xff] }
 0x74a   :  { %v11528_v42 = vpop.permute.xlu0 %773 }
 0x74b   :  { %15269 = vst [vmem:[#allocation24_spill] sm:$0xff] %v11528_v42  ;;  %v11532_v15 = vadd.f32 %v11528_v42, %v768_v16  ;;  %v11535_v3 = vadd.f32 %v11528_v42, %v769_v51  ;;  %v778_v43 = vadd.f32 %v11528_v42, %v770_v52  ;;  %v9457_v16 = vld [vmem:[%s15079_s3 + $0x40] sm:$0xff] }
 0x74d   :  { %v779_v47 = vmax.f32 %v11532_v15, 0.0  ;;  %v780_v14 = vmax.f32 %v11535_v3, 0.0  ;;  %v781_v21 = vmax.f32 %v778_v43, 0.0 }
 0x74f   :  { %v11545_v5 = vpack.i.bf16 %v780_v14, %v779_v47 }
 0x751   :  { %10098 = vrot.lane.b32.xlu0 %v11545_v5, %s15178_s26  ;;  %10093 = vrot.lane.b32.xlu2 %v11545_v5, %s15176_s24 }
 0x752   :  { %10088 = vrot.lane.b32.xlu1 %v11545_v5, %s15169_s25 }
 0x759   :  { %10113 = vrot.lane.b32.xlu0 %v11545_v5, %s15149_s29  ;;  %10108 = vrot.lane.b32.xlu2 %v11545_v5, %s15151_s28  ;;  %s15318_s29 = smov 88   ;;  %s15350_s28 = smov 68  }
 0x75a   :  { %10103 = vrot.lane.b32.xlu1 %v11545_v5, %s15167_s27 }
 0x761   :  { %10128 = vrot.lane.b32.xlu0 %v11545_v5, %s15143_s13  ;;  %10123 = vrot.lane.b32.xlu2 %v11545_v5, %s15145_s12  ;;  %s15317_s12 = smov 104   ;;  %s15351_s13 = smov 84  }
 0x762   :  { %10118 = vrot.lane.b32.xlu1 %v11545_v5, %s15147_s30  ;;  %s15319_s30 = smov 87  }
 0x769   :  { %10138 = vrot.lane.b32.xlu0 %v11545_v5, %s15139_s15  ;;  %1437 = vrot.lane.b32.xlu2 %v781_v21, %s15141_s14 }
 0x76a   :  { %10133 = vrot.lane.b32.xlu1 %v11545_v5, %s15141_s14  ;;  %s15352_s14 = smov 85  }
 0x771   :  { %1575 = vrot.lane.b32.xlu0 %v781_v21, %s15134_s18  ;;  %10143 = vrot.lane.b32.xlu2 %v11545_v5, %s15134_s18  ;;  %s15279_s18 = smov 46  }
 0x772   :  { %1506 = vrot.lane.b32.xlu1 %v781_v21, %s15139_s15  ;;  %s15315_s15 = smov 106  }
 0x779   :  { %10153 = vrot.lane.b32.xlu0 %v11545_v5, %s15130_s16  ;;  %1644 = vrot.lane.b32.xlu2 %v781_v21, %s15128_s21 }
 0x77a   :  { %10148 = vrot.lane.b32.xlu1 %v11545_v5, %s15128_s21  ;;  %s15276_s21 = smov 64  }
 0x781   :  { %1782 = vrot.lane.b32.xlu0 %v781_v21, %s15132_s20  ;;  %10158 = vrot.lane.b32.xlu2 %v11545_v5, %s15132_s20  ;;  %s15278_s20 = smov 45  }
 0x782   :  { %1713 = vrot.lane.b32.xlu1 %v781_v21, %s15130_s16  ;;  %s15277_s16 = smov 47  }
 0x789   :  { %10168 = vrot.lane.b32.xlu0 %v11545_v5, %s15137_s23  ;;  %1851 = vrot.lane.b32.xlu2 %v781_v21, %s15273_s2 }
 0x78a   :  { %10163 = vrot.lane.b32.xlu1 %v11545_v5, %s15273_s2 }
 0x791   :  { %1989 = vrot.lane.b32.xlu0 %v781_v21, %s15274_s19  ;;  %10173 = vrot.lane.b32.xlu2 %v11545_v5, %s15274_s19 }
 0x792   :  { %1920 = vrot.lane.b32.xlu1 %v781_v21, %s15137_s23  ;;  %s15311_s23 = smov 108  }
 0x799   :  { %10183 = vrot.lane.b32.xlu0 %v11545_v5, %s15275_s22  ;;  %2058 = vrot.lane.b32.xlu2 %v781_v21, %s15276_s21 }
 0x79a   :  { %10178 = vrot.lane.b32.xlu1 %v11545_v5, %s15276_s21 }
 0x7a1   :  { %2196 = vrot.lane.b32.xlu0 %v781_v21, %s15277_s16  ;;  %10188 = vrot.lane.b32.xlu2 %v11545_v5, %s15277_s16 }
 0x7a2   :  { %2127 = vrot.lane.b32.xlu1 %v781_v21, %s15275_s22 }
 0x7a9   :  { %10198 = vrot.lane.b32.xlu0 %v11545_v5, %s15278_s20  ;;  %2265 = vrot.lane.b32.xlu2 %v781_v21, %s15279_s18 }
 0x7aa   :  { %10193 = vrot.lane.b32.xlu1 %v11545_v5, %s15279_s18 }
 0x7ab   :  { %v10094_v4 = vpop.permute.xlu2 %10093 }
 0x7ac   :  { %v10095_v20 = vunpack.i.l.bf16 %v10094_v4  ;;  %v10096_v32 = vunpack.i.h.bf16 %v10094_v4 }
 0x7ae   :  { %955 = vmatpush.msra.mxu1 %v10096_v32  ;;  %v908_v46 = vsel %vm119_vm1, %v10095_v20, %v10096_v32  ;;  %v10807_v20 = vld [vmem:[%s15077_s1 + $0x68] sm:$0xff] }
 0x7af   :  { %932 = vmatpush.msra.mxu0 %v908_v46  ;;  %9449 = vmatmul.msk.f32.vlgmr.msra.gmra.mxu1 %vm15204_vm14, %v9445_v7  ;;  %v9451_v46 = vld [vmem:[%s15079_s3 + $0x30] sm:$0xff] }
 0x7b0   :  { %9447 = vmatmul.msk.f32.vlgmr.msra.gmra.mxu0 %vm15204_vm14, %v9445_v7  ;;  %v15280_v7 = vld [vmem:[#allocation15_spill] sm:$0xff] }
 0x7b1   :  { %2403 = vrot.lane.b32.xlu0 %v781_v21, %s15193_s17  ;;  %10203 = vrot.lane.b32.xlu2 %v11545_v5, %s15193_s17 }
 0x7b2   :  { %2334 = vrot.lane.b32.xlu1 %v781_v21, %s15278_s20  ;;  %v9742_v21 = vld [vmem:[%s15077_s1 + $0x58] sm:$0xff] }
 0x7b3   :  { %v11656_v33 = vpop.permute.xlu2 %10108 }
 0x7b4   :  { %v10111_v61 = vunpack.i.h.bf16 %v11656_v33  ;;  %v10110_v22 = vunpack.i.l.bf16 %v11656_v33 }
 0x7b6   :  { %v1106_v17 = vsel %vm203_vm4, %v10110_v22, %v10111_v61 }
 0x7b7   :  { %9450 = vmatmul.msk.f32.gmra.mxu1 %vm15204_vm14, %v9446_v8 }
 0x7b8   :  { %9448 = vmatmul.msk.f32.gmra.mxu0 %vm15204_vm14, %v9446_v8 }
 0x7b9   :  { %4292 = vperm.xlu0 %10084, %v53_v54   ;;  %2472 = vperm.xlu2 %10085, %v52_v0   ;;  %v9470_v0 = vld [vmem:[%s15079_s3 + $0x68] sm:$0xff] }
 0x7ba   :  { %2467 = vperm.xlu1 %10086, %v51_v31  }
 0x7bb   :  { %v10124_v24 = vpop.permute.xlu2 %10123 }
 0x7bc   :  { %v10126_v13 = vunpack.i.h.bf16 %v10124_v24  ;;  %v10125_v15 = vunpack.i.l.bf16 %v10124_v24  ;;  %v15285_v24 = vld [vmem:[#allocation17_spill] sm:$0xff] }
 0x7be   :  { %v1304_v5 = vsel %vm15210_vm7, %v10125_v15, %v10126_v13  ;;  %v9464_v15 = vld [vmem:[%s15079_s3 + $0x58] sm:$0xff] }
 0x7c1   :  { %4464 = vperm.xlu0 %10084, %v9732_v44   ;;  %4516 = vperm.xlu2 %10085, %v9734_v34  }
 0x7c2   :  { %4297 = vperm.xlu1 %10086, %v54_v37   ;;  %v15281_v37 = vld [vmem:[#allocation16_spill] sm:$0xff] }
 0x7c3   :  { %v10099_v23 = vpop.permute.xlu0 %10098  ;;  %v1438_v27 = vpop.permute.xlu2 %1437 }
 0x7c4   :  { %v10089_v48 = vpop.permute.xlu1 %10088  ;;  %v10101_v36 = vunpack.i.h.bf16 %v10099_v23  ;;  %v10100_v9 = vunpack.i.l.bf16 %v10099_v23  ;;  %v15282_v23 = vld [vmem:[#allocation18_spill] sm:$0xff] }
 0x7c5   :  { %v10090_v58 = vunpack.i.l.bf16 %v10089_v48  ;;  %v10091_v49 = vunpack.i.h.bf16 %v10089_v48  ;;  %v15283_v48 = vld [vmem:[#allocation14_spill] sm:$0xff] }
 0x7c6   :  { %v974_v11 = vsel %vm147_vm2, %v10100_v9, %v10101_v36 }
 0x7c7   :  { %841 = vmatpush.msra.mxu3 %v10091_v49  ;;  %v793_v1 = vsel %vm91_vm0, %v10090_v58, %v10091_v49  ;;  %v9452_v58 = vld [vmem:[%s15079_s3 + $0x38] sm:$0xff]  ;;  %v9481_v49 = vld [vmem:[%s15079_s3 + $0x80] sm:$0xff] }
 0x7c8   :  { %818 = vmatpush.msra.mxu2 %v793_v1  ;;  %9439 = vmatmul.msk.f32.vlgmr.msra.gmra.mxu3 %vm15204_vm14, %v9435_v56  ;;  %v4445_v1 = vld [vmem:[%s15077_s1] sm:$0xff] }
 0x7c9   :  { %893 = vmatpush.msrb.mxu3 %v780_v14  ;;  %9437 = vmatmul.msk.f32.vlgmr.msra.gmra.mxu2 %vm15204_vm14, %v9435_v56  ;;  %v9736_v14 = vld [vmem:[%s15077_s1 + $0x28] sm:$0xff] }
 0x7ca   :  { %870 = vmatpush.msrb.mxu2 %v779_v47  ;;  %4542 = vperm.xlu0 %10084, %v9735_v57   ;;  %v9740_v47 = vld [vmem:[%s15077_s1 + $0x48] sm:$0xff] }
 0x7cb   :  { %1021 = vmatpush.msra.mxu3 %v10101_v36  ;;  %4594 = vperm.xlu2 %10085, %v9737_v6   ;;  %v10114_v2 = vpop.permute.xlu0 %10113  ;;  %v10144_v52 = vpop.permute.xlu2 %10143 }
 0x7cc   :  { %4490 = vperm.xlu1 %10086, %v9733_v41   ;;  %998 = vmatpush.msra.mxu2 %v974_v11  ;;  %v10116_v25 = vunpack.i.h.bf16 %v10114_v2  ;;  %v10115_v62 = vunpack.i.l.bf16 %v10114_v2  ;;  %v10104_v12 = vpop.permute.xlu1 %10103  ;;  %v10146_v56 = vunpack.i.h.bf16 %v10144_v52  ;;  %v10145_v36 = vunpack.i.l.bf16 %v10144_v52  ;;  %v15284_v11 = vld [vmem:[#allocation20_spill] sm:$0xff] }
 0x7cd   :  { %v10105_v29 = vunpack.i.l.bf16 %v10104_v12  ;;  %v10106_v50 = vunpack.i.h.bf16 %v10104_v12 }
 0x7ce   :  { %v1172_v3 = vsel %vm15215_vm5, %v10115_v62, %v10116_v25  ;;  %v1577_v57 = vsel %vm15153_vm11, %v10145_v36, %v10146_v56 }
 0x7cf   :  { %1087 = vmatpush.msrb.mxu1 %v10106_v50  ;;  %v1040_v51 = vsel %vm175_vm3, %v10105_v29, %v10106_v50  ;;  %v9482_v29 = vld [vmem:[%s15079_s3 + $0x88] sm:$0xff] }
 0x7d0   :  { %9440 = vmatmul.msk.f32.gmra.mxu3 %vm15204_vm14, %v9436_v60  ;;  %1064 = vmatpush.msrb.mxu0 %v1040_v51 }
 0x7d1   :  { %9461 = vmatmul.msk.f32.vlgmr.msrb.gmra.mxu1 %vm15204_vm14, %v9457_v16  ;;  %9438 = vmatmul.msk.f32.gmra.mxu2 %vm15204_vm14, %v9436_v60 }
 0x7d2   :  { %1219 = vmatpush.msra.mxu1 %v10116_v25  ;;  %9459 = vmatmul.msk.f32.vlgmr.msrb.gmra.mxu0 %vm15204_vm14, %v9457_v16  ;;  %v9463_v25 = vld [vmem:[%s15079_s3 + $0x50] sm:$0xff] }
 0x7d3   :  { %1196 = vmatpush.msra.mxu0 %v1172_v3  ;;  %v11699_v55 = vpop.permute.xlu0 %10128  ;;  %4620 = vperm.xlu0 %10084, %v9738_v40   ;;  %v11755_v31 = vpop.permute.xlu2 %1644  ;;  %v15286_v16 = vld [vmem:[#allocation27_spill] sm:$0xff]  ;;  %v9493_v40 = vld [vmem:[%s15079_s3 + $0xa0] sm:$0xff] }
 0x7d4   :  { %1351 = vmatpush.msrb.mxu1 %v10126_v13  ;;  %4672 = vperm.xlu2 %10085, %v9740_v47   ;;  %v10119_v10 = vpop.permute.xlu1 %10118  ;;  %v10131_v62 = vunpack.i.h.bf16 %v11699_v55  ;;  %v10130_v12 = vunpack.i.l.bf16 %v11699_v55  ;;  %v15287_v13 = vld [vmem:[#allocation23_spill] sm:$0xff] }
 0x7d5   :  { %4568 = vperm.xlu1 %10086, %v9736_v14   ;;  %1328 = vmatpush.msrb.mxu0 %v1304_v5  ;;  %v10121_v8 = vunpack.i.h.bf16 %v10119_v10  ;;  %v10120_v54 = vunpack.i.l.bf16 %v10119_v10 }
 0x7d6   :  { %v1370_v50 = vsel %vm15211_vm8, %v10130_v12, %v10131_v62 }
 0x7d7   :  { %v1238_v44 = vsel %vm15214_vm6, %v10120_v54, %v10121_v8 }
 0x7d8   :  { %9443 = vmatmul.msk.f32.vlgmr.msrb.gmra.mxu3 %vm15204_vm14, %v782_v38 }
 0x7d9   :  { %9462 = vmatmul.msk.f32.gmra.mxu1 %vm15204_vm14, %v9458_v28  ;;  %1153 = vmatpush.msrb.mxu3 %v10111_v61  ;;  %v9475_v61 = vld [vmem:[%s15079_s3 + $0x70] sm:$0xff] }
 0x7da   :  { %9441 = vmatmul.msk.f32.vlgmr.msrb.gmra.mxu2 %vm15204_vm14, %v782_v38  ;;  %9460 = vmatmul.msk.f32.gmra.mxu0 %vm15204_vm14, %v9458_v28  ;;  %v9494_v28 = vld [vmem:[%s15079_s3 + $0xa8] sm:$0xff] }
 0x7db   :  { %1130 = vmatpush.msrb.mxu2 %v1106_v17  ;;  %v11724_v19 = vpop.permute.xlu0 %10138  ;;  %4698 = vperm.xlu0 %10084, %v9741_v59   ;;  %v11782_v41 = vpop.permute.xlu2 %10158 }
 0x7dc   :  { %4750 = vperm.xlu2 %10085, %v9743_v26   ;;  %v10134_v53 = vpop.permute.xlu1 %10133  ;;  %v10141_v22 = vunpack.i.h.bf16 %v11724_v19  ;;  %v10161_v36 = vunpack.i.h.bf16 %v11782_v41 }
 0x7dd   :  { %4646 = vperm.xlu1 %10086, %v9739_v39   ;;  %v10136_v63 = vunpack.i.h.bf16 %v10134_v53  ;;  %v10135_v18 = vunpack.i.l.bf16 %v10134_v53 }
 0x7df   :  { %v1440_v45 = vsel %vm15154_vm9, %v10136_v63, %v1438_v27  ;;  %v1439_v43 = vsel %vm15154_vm9, %v10135_v18, %v10136_v63  ;;  %v10140_v27 = vunpack.i.l.bf16 %v11724_v19  ;;  %v9476_v63 = vld [vmem:[%s15079_s3 + $0x78] sm:$0xff]  ;;  %v9505_v18 = vld [vmem:[%s15079_s3 + $0xc0] sm:$0xff] }
 0x7e0   :  { %9444 = vmatmul.msk.f32.gmra.mxu3 %vm15204_vm14, %v783_v35 }
 0x7e1   :  { %9473 = vmatmul.msk.f32.vlgmr.msra.gmra.mxu1 %vm15204_vm14, %v9469_v30 }
 0x7e2   :  { %1487 = vmatpush.msra.mxu1 %v1440_v45  ;;  %9442 = vmatmul.msk.f32.gmra.mxu2 %vm15204_vm14, %v783_v35 }
 0x7e3   :  { %9471 = vmatmul.msk.f32.vlgmr.msra.gmra.mxu0 %vm15204_vm14, %v9469_v30  ;;  %v1576_v4 = vpop.permute.xlu0 %1575  ;;  %4776 = vperm.xlu0 %10084, %v10807_v20   ;;  %v1852_v3 = vpop.permute.xlu2 %1851  ;;  %v9487_v20 = vld [vmem:[%s15079_s3 + $0x90] sm:$0xff] }
 0x7e4   :  { %1464 = vmatpush.msra.mxu0 %v1439_v43  ;;  %v11744_v32 = vpop.permute.xlu1 %1506  ;;  %4828 = vperm.xlu2 %10085, %v15280_v7   ;;  %v1578_v9 = vsel %vm15153_vm11, %v10146_v56, %v1576_v4  ;;  %vm15288_vm11 = vcmask 687104   ;;  %v9506_v7 = vld [vmem:[%s15079_s3 + $0xc8] sm:$0xff]  ;;  %v9499_v56 = vld [vmem:[%s15079_s3 + $0xb0] sm:$0xff] }
 0x7e5   :  { %4724 = vperm.xlu1 %10086, %v9742_v21   ;;  %vm15289_vm9 = vmmov %vm15288_vm11 }
 0x7e8   :  { %9455 = vmatmul.msk.f32.vlgmr.msra.gmra.mxu3 %vm15204_vm14, %v9451_v46 }
 0x7e9   :  { %9474 = vmatmul.msk.f32.gmra.mxu1 %vm15204_vm14, %v9470_v0  ;;  %1285 = vmatpush.msra.mxu3 %v10121_v8 }
 0x7ea   :  { %9453 = vmatmul.msk.f32.vlgmr.msra.gmra.mxu2 %vm15204_vm14, %v9451_v46 }
 0x7eb   :  { %9472 = vmatmul.msk.f32.gmra.mxu0 %vm15204_vm14, %v9470_v0  ;;  %1262 = vmatpush.msra.mxu2 %v1238_v44  ;;  %v10154_v34 = vpop.permute.xlu0 %10153  ;;  %v10174_v26 = vpop.permute.xlu2 %10173 }
 0x7ec   :  { %4854 = vperm.xlu0 %10084, %v15281_v37   ;;  %v11761_v33 = vpop.permute.xlu1 %10148  ;;  %4906 = vperm.xlu2 %10085, %v15282_v23   ;;  %v10156_v47 = vunpack.i.h.bf16 %v10154_v34  ;;  %v10155_v14 = vunpack.i.l.bf16 %v10154_v34  ;;  %v9517_v34 = vld [vmem:[%s15079_s3 + $0xe0] sm:$0xff]  ;;  %v10176_v37 = vunpack.i.h.bf16 %v10174_v26 }
 0x7ed   :  { %4802 = vperm.xlu1 %10086, %v15283_v48   ;;  %v10151_v21 = vunpack.i.h.bf16 %v11761_v33 }
 0x7ee   :  { %v1715_v5 = vsel %vm15289_vm9, %v10155_v14, %v10156_v47 }
 0x7f0   :  { %9456 = vmatmul.msk.f32.gmra.mxu3 %vm15204_vm14, %v9452_v58 }
 0x7f1   :  { %9485 = vmatmul.msk.f32.vlgmr.msrb.gmra.mxu1 %vm15204_vm14, %v9481_v49 }
 0x7f2   :  { %1625 = vmatpush.msrb.mxu1 %v1578_v9  ;;  %9454 = vmatmul.msk.f32.gmra.mxu2 %vm15204_vm14, %v9452_v58  ;;  %v10160_v9 = vunpack.i.l.bf16 %v11782_v41 }
 0x7f3   :  { %9483 = vmatmul.msk.f32.vlgmr.msrb.gmra.mxu0 %vm15204_vm14, %v9481_v49  ;;  %v11780_v6 = vpop.permute.xlu0 %1782  ;;  %v11845_v45 = vpop.permute.xlu2 %2058 }
 0x7f4   :  { %1602 = vmatpush.msrb.mxu0 %v1577_v57  ;;  %4932 = vperm.xlu0 %10084, %v15284_v11   ;;  %v1714_v2 = vpop.permute.xlu1 %1713  ;;  %v9518_v57 = vld [vmem:[%s15079_s3 + $0xe8] sm:$0xff] }
 0x7f5   :  { %4448 = vperm.xlu2 %10085, %v4445_v1   ;;  %4880 = vperm.xlu1 %10086, %v15285_v24   ;;  %v1716_v55 = vsel %vm15288_vm11, %v10156_v47, %v1714_v2  ;;  %vm15290_vm11 = vcmask 711680  }
 0x7f6   :  { %v1509_v59 = vsel %vm15290_vm11, %v10141_v22, %v11744_v32  ;;  %vm15291_vm9 = vmmov %vm15290_vm11  ;;  %vm15292_vm11 = vcmask 547840   ;;  %v10150_v32 = vunpack.i.l.bf16 %v11761_v33  ;;  %v10175_v33 = vunpack.i.l.bf16 %v10174_v26  ;;  %v9512_v26 = vld [vmem:[%s15079_s3 + $0xd8] sm:$0xff] }
 0x7f7   :  { %v1508_v17 = vsel %vm15291_vm9, %v10140_v27, %v10141_v22  ;;  %vm15293_vm9 = vmmov %vm15292_vm11  ;;  %v9530_v27 = vld [vmem:[%s15079_s3 + $0x108] sm:$0xff] }
 0x7f8   :  { %9467 = vmatmul.msk.f32.vlgmr.msrb.gmra.mxu3 %vm15204_vm14, %v9463_v25 }
 0x7f9   :  { %9486 = vmatmul.msk.f32.gmra.mxu1 %vm15204_vm14, %v9482_v29  ;;  %1417 = vmatpush.msrb.mxu3 %v10131_v62 }
 0x7fa   :  { %9465 = vmatmul.msk.f32.vlgmr.msrb.gmra.mxu2 %vm15204_vm14, %v9463_v25  ;;  %v9529_v25 = vld [vmem:[%s15079_s3 + $0x100] sm:$0xff] }
 0x7fb   :  { %9484 = vmatmul.msk.f32.gmra.mxu0 %vm15204_vm14, %v9482_v29  ;;  %1394 = vmatpush.msrb.mxu2 %v1370_v50  ;;  %v11799_v60 = vpop.permute.xlu0 %10168  ;;  %v11869_v0 = vpop.permute.xlu2 %10188  ;;  %v9731_v29 = vld [vmem:[%s15076_s0 + $0x4] sm:$0xf] }
 0x7fc   :  { %4991 = vperm.xlu0 %10084, %v15286_v16   ;;  %v10164_v51 = vpop.permute.xlu1 %10163  ;;  %v10170_v22 = vunpack.i.l.bf16 %v11799_v60 }
 0x7fd   :  { %4958 = vperm.xlu1 %10086, %v15287_v13   ;;  %v10166_v53 = vunpack.i.h.bf16 %v10164_v51  ;;  %v10165_v35 = vunpack.i.l.bf16 %v10164_v51  ;;  %v11926_v51 = vperm.slane %v9731_v29, 0  ;;  %v11928_v13 = vperm.slane %v9731_v29, 1 }
 0x7ff   :  { %v1854_v30 = vsel %vm15292_vm11, %v10166_v53, %v1852_v3  ;;  %v1853_v52 = vsel %vm15293_vm9, %v10165_v35, %v10166_v53  ;;  %vm15294_vm11 = vcmask 695296   ;;  %15302 = vst [vmem:[#allocation30_spill] sm:$0xff] %v11926_v51  ;;  %v9541_v35 = vld [vmem:[%s15079_s3 + $0x120] sm:$0xff] }
 0x800   :  { %9468 = vmatmul.msk.f32.gmra.mxu3 %vm15204_vm14, %v9464_v15  ;;  %v1647_v46 = vsel %vm15294_vm11, %v10151_v21, %v11755_v31  ;;  %vm15295_vm9 = vmmov %vm15294_vm11  ;;  %v9488_v31 = vld [vmem:[%s15079_s3 + $0x98] sm:$0xff]  ;;  %vm15296_vm11 = vcmask 531456   ;;  %15303 = vst [vmem:[#allocation25_spill] sm:$0xff] %v11928_v13 }
 0x801   :  { %9497 = vmatmul.msk.f32.vlgmr.msra.gmra.mxu1 %vm15204_vm14, %v9493_v40  ;;  %v1646_v8 = vsel %vm15295_vm9, %v10150_v32, %v10151_v21  ;;  %vm15297_vm9 = vmmov %vm15296_vm11 }
 0x802   :  { %1763 = vmatpush.msra.mxu1 %v1716_v55  ;;  %9466 = vmatmul.msk.f32.gmra.mxu2 %vm15204_vm14, %v9464_v15  ;;  %v1991_v48 = vsel %vm15297_vm9, %v10175_v33, %v10176_v37  ;;  %v11930_v15 = vperm.slane %v9731_v29, 2 }
 0x803   :  { %9495 = vmatmul.msk.f32.vlgmr.msra.gmra.mxu0 %vm15204_vm14, %v9493_v40  ;;  %v1990_v10 = vpop.permute.xlu0 %1989  ;;  %v11894_v1 = vpop.permute.xlu2 %2265 }
 0x804   :  { %1740 = vmatpush.msra.mxu0 %v1715_v5  ;;  %v11815_v38 = vpop.permute.xlu1 %1920  ;;  %v1992_v23 = vsel %vm15296_vm11, %v10176_v37, %v1990_v10  ;;  %vm15298_vm11 = vcmask 556032   ;;  %15304 = vst [vmem:[#allocation22_spill] sm:$0xff] %v11930_v15  ;;  %v9511_v10 = vld [vmem:[%s15079_s3 + $0xd0] sm:$0xff] }
 0x805   :  { %v1785_v11 = vsel %vm15298_vm11, %v10161_v36, %v11780_v6  ;;  %vm15299_vm9 = vmmov %vm15298_vm11  ;;  %v9500_v6 = vld [vmem:[%s15079_s3 + $0xb8] sm:$0xff]  ;;  %vm15306_vm11 = vcmask 539648  }
 0x806   :  { %v1784_v2 = vsel %vm15299_vm9, %v10160_v9, %v10161_v36  ;;  %vm15308_vm9 = vmmov %vm15306_vm11  ;;  %v9755_v9 = vld [vmem:[%s15077_s1 + $0xc0] sm:$0xff] }
 0x808   :  { %9479 = vmatmul.msk.f32.vlgmr.msra.gmra.mxu3 %vm15204_vm14, %v9475_v61 }
 0x809   :  { %9498 = vmatmul.msk.f32.gmra.mxu1 %vm15204_vm14, %v9494_v28  ;;  %1556 = vmatpush.msra.mxu3 %v1509_v59 }
 0x80a   :  { %9477 = vmatmul.msk.f32.vlgmr.msra.gmra.mxu2 %vm15204_vm14, %v9475_v61  ;;  %v10171_v61 = vunpack.i.h.bf16 %v11799_v60 }
 0x80b   :  { %9496 = vmatmul.msk.f32.gmra.mxu0 %vm15204_vm14, %v9494_v28  ;;  %1533 = vmatpush.msra.mxu2 %v1508_v17  ;;  %v11832_v39 = vpop.permute.xlu0 %10183  ;;  %v11921_v50 = vpop.permute.xlu2 %10203 }
 0x80c   :  { %v11834_v19 = vpop.permute.xlu1 %10178  ;;  %v10186_v62 = vunpack.i.h.bf16 %v11832_v39  ;;  %v10185_v12 = vunpack.i.l.bf16 %v11832_v39  ;;  %v1923_v28 = vsel %vm15306_vm11, %v10171_v61, %v11815_v38  ;;  %v1922_v60 = vsel %vm15308_vm9, %v10170_v22, %v10171_v61 }
 0x80d   :  { %v10181_v32 = vunpack.i.h.bf16 %v11834_v19  ;;  %vm15309_vm11 = vcmask 523264  }
 0x80e   :  { %v2129_v3 = vsel %vm629_vm15, %v10185_v12, %v10186_v62  ;;  %vm15310_vm9 = vmmov %vm15309_vm11 }
 0x80f   :  { %v2061_v33 = vsel %vm15309_vm11, %v10181_v32, %v11845_v45  ;;  %v9524_v45 = vld [vmem:[%s15079_s3 + $0xf8] sm:$0xff]  ;;  %vm15313_vm11 = vcmask 367616  }
 0x810   :  { %9480 = vmatmul.msk.f32.gmra.mxu3 %vm15204_vm14, %v9476_v63 }
 0x811   :  { %9509 = vmatmul.msk.f32.vlgmr.msrb.gmra.mxu1 %vm15204_vm14, %v9505_v18 }
 0x812   :  { %1901 = vmatpush.msrb.mxu1 %v1854_v30  ;;  %9478 = vmatmul.msk.f32.gmra.mxu2 %vm15204_vm14, %v9476_v63 }
 0x813   :  { %9507 = vmatmul.msk.f32.vlgmr.msrb.gmra.mxu0 %vm15204_vm14, %v9505_v18  ;;  %v11850_v43 = vpop.permute.xlu0 %2196  ;;  %v11955_v59 = vpop.permute.xlu2 %2472  ;;  %v10808_v18 = vld [vmem:[%s15077_s1 + $0xb0] sm:$0xff] }
 0x814   :  { %1878 = vmatpush.msrb.mxu0 %v1853_v52  ;;  %v2128_v4 = vpop.permute.xlu1 %2127  ;;  %15307 = vst [vmem:[#allocation26_spill] sm:$0xff] %v11955_v59 }
 0x815   :  { %v2130_v16 = vsel %vm629_vm15, %v10186_v62, %v2128_v4 }
 0x818   :  { %9491 = vmatmul.msk.f32.vlgmr.msrb.gmra.mxu3 %vm15204_vm14, %v9487_v20 }
 0x819   :  { %9510 = vmatmul.msk.f32.gmra.mxu1 %vm15204_vm14, %v9506_v7  ;;  %1694 = vmatpush.msrb.mxu3 %v1647_v46  ;;  %v9523_v46 = vld [vmem:[%s15079_s3 + $0xf0] sm:$0xff] }
 0x81a   :  { %9489 = vmatmul.msk.f32.vlgmr.msrb.gmra.mxu2 %vm15204_vm14, %v9487_v20 }
 0x81b   :  { %9508 = vmatmul.msk.f32.gmra.mxu0 %vm15204_vm14, %v9506_v7  ;;  %1671 = vmatpush.msrb.mxu2 %v1646_v8  ;;  %v11867_v54 = vpop.permute.xlu0 %10198  ;;  %v4517_v20 = vpop.permute.xlu2 %4516  ;;  %v10180_v8 = vunpack.i.l.bf16 %v11834_v19  ;;  %v10809_v19 = vld [vmem:[%s15077_s1 + $0xb8] sm:$0xff]  ;;  %s15312_s1 = smov 107  }
 0x81c   :  { %v11871_v44 = vpop.permute.xlu1 %10193  ;;  %v4520_v36 = vmul.f32 %v4517_v20, %v11928_v13 }
 0x81d   :  { %v10196_v38 = vunpack.i.h.bf16 %v11871_v44  ;;  %v10195_v39 = vunpack.i.l.bf16 %v11871_v44  ;;  %v4519_v44 = vmul.f32 %v4517_v20, %v11926_v51 }
 0x81f   :  { %v2268_v21 = vsel %vm695_vm10, %v10196_v38, %v11894_v1  ;;  %v2267_v4 = vsel %vm695_vm10, %v10195_v39, %v10196_v38  ;;  %v4521_v1 = vmul.f32 %v4517_v20, %v11930_v15  ;;  %v9536_v38 = vld [vmem:[%s15079_s3 + $0x118] sm:$0xff] }
 0x820   :  { %9492 = vmatmul.msk.f32.gmra.mxu3 %vm15204_vm14, %v9488_v31 }
 0x821   :  { %9521 = vmatmul.msk.f32.vlgmr.msra.gmra.mxu1 %vm15204_vm14, %v9517_v34 }
 0x822   :  { %2039 = vmatpush.msra.mxu1 %v1992_v23  ;;  %9490 = vmatmul.msk.f32.gmra.mxu2 %vm15204_vm14, %v9488_v31  ;;  %v9542_v31 = vld [vmem:[%s15079_s3 + $0x128] sm:$0xff]  ;;  %v2060_v23 = vsel %vm15310_vm9, %v10180_v8, %v10181_v32  ;;  %v9547_v32 = vld [vmem:[%s15079_s3 + $0x130] sm:$0xff]  ;;  %vm15314_vm9 = vmmov %vm15313_vm11 }
 0x823   :  { %9519 = vmatmul.msk.f32.vlgmr.msra.gmra.mxu0 %vm15204_vm14, %v9517_v34  ;;  %v11885_v58 = vpop.permute.xlu0 %2403 }
 0x824   :  { %2016 = vmatpush.msra.mxu0 %v1991_v48  ;;  %v11887_v49 = vpop.permute.xlu1 %2334 }
 0x828   :  { %9503 = vmatmul.msk.f32.vlgmr.msra.gmra.mxu3 %vm15204_vm14, %v9499_v56 }
 0x829   :  { %9522 = vmatmul.msk.f32.gmra.mxu1 %vm15204_vm14, %v9518_v57  ;;  %1832 = vmatpush.msra.mxu3 %v1785_v11  ;;  %v10206_v11 = vunpack.i.h.bf16 %v11921_v50 }
 0x82a   :  { %9501 = vmatmul.msk.f32.vlgmr.msra.gmra.mxu2 %vm15204_vm14, %v9499_v56 }
 0x82b   :  { %9520 = vmatmul.msk.f32.gmra.mxu0 %vm15204_vm14, %v9518_v57  ;;  %1809 = vmatpush.msra.mxu2 %v1784_v2  ;;  %v11906_v41 = vpop.permute.xlu0 %4292  ;;  %v9553_v57 = vld [vmem:[%s15079_s3 + $0x140] sm:$0xff]  ;;  %v10205_v2 = vunpack.i.l.bf16 %v11921_v50  ;;  %v2406_v62 = vsel %vm15206_vm13, %v10206_v11, %v11885_v58  ;;  %v9535_v58 = vld [vmem:[%s15079_s3 + $0x110] sm:$0xff] }
 0x82c   :  { %15300 = vst [vmem:[#allocation21_spill] sm:$0xff] %v11906_v41  ;;  %v11908_v24 = vpop.permute.xlu1 %2467  ;;  %v11974_v30 = vpop.f32.mrf.mxu1 }
 0x82d   :  { %15301 = vst [vmem:[#allocation19_spill] sm:$0xff] %v11908_v24  ;;  %v11976_v52 = vpop.f32.mrf.mxu0  ;;  %v2405_v50 = vsel %vm15206_vm13, %v10205_v2, %v10206_v11  ;;  %vm15385_vm13 = vcmask 703488  }
 0x830   :  { %9504 = vmatmul.msk.f32.gmra.mxu3 %vm15204_vm14, %v9500_v6 }
 0x831   :  { %9533 = vmatmul.msk.f32.vlgmr.msrb.gmra.mxu1 %vm15204_vm14, %v9529_v25 }
 0x832   :  { %2177 = vmatpush.msrb.mxu1 %v2130_v16  ;;  %9502 = vmatmul.msk.f32.gmra.mxu2 %vm15204_vm14, %v9500_v6 }
 0x833   :  { %9531 = vmatmul.msk.f32.vlgmr.msrb.gmra.mxu0 %vm15204_vm14, %v9529_v25  ;;  %v4465_v40 = vpop.permute.xlu0 %4464 }
 0x834   :  { %2154 = vmatpush.msrb.mxu0 %v2129_v3  ;;  %v4467_v47 = vmul.f32 %v4465_v40, %v11926_v51  ;;  %v4468_v14 = vmul.f32 %v4465_v40, %v11928_v13  ;;  %v4469_v55 = vmul.f32 %v4465_v40, %v11930_v15  ;;  %v11938_v5 = vpop.permute.xlu1 %4297  ;;  %v11998_v34 = vpop.f32.mrf.mxu1  ;;  %v10191_v40 = vunpack.i.h.bf16 %v11869_v0 }
 0x835   :  { %15305 = vst [vmem:[#allocation31_spill] sm:$0xff] %v11938_v5  ;;  %v12000_v37 = vpop.f32.mrf.mxu0 }
 0x836   :  { %4477 = vrot.lane.b32.xlu0 %v4469_v55, %s15169_s25  ;;  %4475 = vrot.lane.b32.xlu2 %v4468_v14, %s15169_s25  ;;  %v2199_v22 = vsel %vm662_vm12, %v10191_v40, %v11850_v43 }
 0x837   :  { %4473 = vrot.lane.b32.xlu1 %v4467_v47, %s15169_s25  ;;  %v10190_v47 = vunpack.i.l.bf16 %v11869_v0  ;;  %v9554_v0 = vld [vmem:[%s15079_s3 + $0x148] sm:$0xff] }
 0x838   :  { %9515 = vmatmul.msk.f32.vlgmr.msrb.gmra.mxu3 %vm15204_vm14, %v9511_v10 }
 0x839   :  { %9534 = vmatmul.msk.f32.gmra.mxu1 %vm15204_vm14, %v9530_v27  ;;  %1970 = vmatpush.msrb.mxu3 %v1923_v28  ;;  %v2198_v28 = vsel %vm662_vm12, %v10190_v47, %v10191_v40  ;;  %v9559_v47 = vld [vmem:[%s15079_s3 + $0x150] sm:$0xff] }
 0x83a   :  { %9513 = vmatmul.msk.f32.vlgmr.msrb.gmra.mxu2 %vm15204_vm14, %v9511_v10 }
 0x83b   :  { %9532 = vmatmul.msk.f32.gmra.mxu0 %vm15204_vm14, %v9530_v27  ;;  %1947 = vmatpush.msrb.mxu2 %v1922_v60 }
 0x83c   :  { %v4543_v12 = vpop.permute.xlu0 %4542 }
 0x83d   :  { %v4545_v3 = vmul.f32 %v4543_v12, %v11926_v51  ;;  %v4546_v14 = vmul.f32 %v4543_v12, %v11928_v13  ;;  %v4547_v55 = vmul.f32 %v4543_v12, %v11930_v15  ;;  %v9577_v12 = vld [vmem:[%s15079_s3 + $0x180] sm:$0xff] }
 0x83e   :  { %v4491_v17 = vpop.permute.xlu1 %4490 }
 0x83f   :  { %v4493_v53 = vmul.f32 %v4491_v17, %v11926_v51  ;;  %v4494_v63 = vmul.f32 %v4491_v17, %v11928_v13  ;;  %5022 = vperm.xlu1 %10086, %v10808_v18   ;;  %v4495_v7 = vmul.f32 %v4491_v17, %v11930_v15  ;;  %v9565_v18 = vld [vmem:[%s15079_s3 + $0x160] sm:$0xff] }
 0x840   :  { %9516 = vmatmul.msk.f32.gmra.mxu3 %vm15204_vm14, %v9512_v26 }
 0x841   :  { %4501 = vrot.lane.b32.xlu0 %v4494_v63, %s15176_s24  ;;  %4499 = vrot.lane.b32.xlu2 %v4493_v53, %s15176_s24 }
 0x842   :  { %9545 = vmatmul.msk.f32.vlgmr.msra.gmra.mxu1 %vm15204_vm14, %v9541_v35  ;;  %9514 = vmatmul.msk.f32.gmra.mxu2 %vm15204_vm14, %v9512_v26 }
 0x843   :  { %2315 = vmatpush.msra.mxu1 %v2268_v21  ;;  %9543 = vmatmul.msk.f32.vlgmr.msra.gmra.mxu0 %vm15204_vm14, %v9541_v35  ;;  %v4595_v35 = vpop.permute.xlu2 %4594 }
 0x844   :  { %2292 = vmatpush.msra.mxu0 %v2267_v4  ;;  %v4597_v4 = vmul.f32 %v4595_v35, %v11926_v51  ;;  %v4598_v8 = vmul.f32 %v4595_v35, %v11928_v13 }
 0x847   :  { %4503 = vrot.lane.b32.xlu1 %v4495_v7, %s15176_s24  ;;  %v4569_v27 = vpop.permute.xlu1 %4568  ;;  %v10201_v7 = vunpack.i.h.bf16 %v11867_v54 }
 0x848   :  { %9527 = vmatmul.msk.f32.vlgmr.msra.gmra.mxu3 %vm15204_vm14, %v9523_v46  ;;  %v4571_v43 = vmul.f32 %v4569_v27, %v11926_v51  ;;  %v4572_v17 = vmul.f32 %v4569_v27, %v11928_v13  ;;  %v4573_v39 = vmul.f32 %v4569_v27, %v11930_v15  ;;  %v9578_v27 = vld [vmem:[%s15079_s3 + $0x188] sm:$0xff] }
 0x849   :  { %4525 = vrot.lane.b32.xlu0 %v4519_v44, %s15178_s26  ;;  %5053 = vperm.xlu2 %10085, %v10809_v19   ;;  %v4599_v44 = vmul.f32 %v4595_v35, %v11930_v15 }
 0x84a   :  { %9546 = vmatmul.msk.f32.gmra.mxu1 %vm15204_vm14, %v9542_v31  ;;  %2108 = vmatpush.msra.mxu3 %v2061_v33  ;;  %v2337_v33 = vsel %vm15313_vm11, %v10201_v7, %v11887_v49  ;;  %vm2506_vm11 = vcmask 130048  }
 0x84b   :  { %9525 = vmatmul.msk.f32.vlgmr.msra.gmra.mxu2 %vm15204_vm14, %v9523_v46  ;;  %9544 = vmatmul.msk.f32.gmra.mxu0 %vm15204_vm14, %v9542_v31  ;;  %v12012_v48 = vpop.f32.mrf.mxu3  ;;  %v10200_v46 = vunpack.i.l.bf16 %v11867_v54  ;;  %v9566_v54 = vld [vmem:[%s15079_s3 + $0x168] sm:$0xff] }
 0x84c   :  { %2085 = vmatpush.msra.mxu2 %v2060_v23  ;;  %v12014_v56 = vpop.f32.mrf.mxu2  ;;  %v4621_v23 = vpop.permute.xlu0 %4620 }
 0x84d   :  { %v4623_v49 = vmul.f32 %v4621_v23, %v11926_v51  ;;  %v4625_v11 = vmul.f32 %v4621_v23, %v11930_v15 }
 0x84e   :  { %v12031_v6 = vpop.f32.mrf.mxu1 }
 0x84f   :  { %4527 = vrot.lane.b32.xlu1 %v4520_v36, %s15178_s26  ;;  %v12033_v25 = vpop.f32.mrf.mxu0  ;;  %v2336_v36 = vsel %vm15314_vm9, %v10200_v46, %v10201_v7  ;;  %vm15383_vm9 = vcmask 719872  }
 0x850   :  { %9528 = vmatmul.msk.f32.gmra.mxu3 %vm15204_vm14, %v9524_v45 }
 0x851   :  { %5084 = vperm.xlu0 %10084, %v9755_v9   ;;  %4529 = vrot.lane.b32.xlu2 %v4521_v1, %s15178_s26  ;;  %v9548_v1 = vld [vmem:[%s15079_s3 + $0x138] sm:$0xff] }
 0x852   :  { %9557 = vmatmul.msk.f32.vlgmr.msrb.gmra.mxu1 %vm15204_vm14, %v9553_v57 }
 0x853   :  { %2453 = vmatpush.msrb.mxu1 %v2406_v62  ;;  %9526 = vmatmul.msk.f32.gmra.mxu2 %vm15204_vm14, %v9524_v45  ;;  %v12040_v29 = vpop.f32.mrf.mxu3 }
 0x854   :  { %9555 = vmatmul.msk.f32.vlgmr.msrb.gmra.mxu0 %vm15204_vm14, %v9553_v57  ;;  %v12044_v16 = vpop.f32.mrf.mxu2  ;;  %v4624_v57 = vmul.f32 %v4621_v23, %v11928_v13  ;;  %v4699_v7 = vpop.permute.xlu0 %4698 }
 0x855   :  { %2430 = vmatpush.msrb.mxu0 %v2405_v50  ;;  %v4647_v50 = vpop.permute.xlu1 %4646  ;;  %v4703_v23 = vmul.f32 %v4699_v7, %v11930_v15 }
 0x856   :  { %v12056_v10 = vpop.f32.mrf.mxu1 }
 0x857   :  { %4551 = vrot.lane.b32.xlu1 %v4545_v3, %s15167_s27  ;;  %v12058_v61 = vpop.f32.mrf.mxu0 }
 0x858   :  { %9539 = vmatmul.msk.f32.vlgmr.msrb.gmra.mxu3 %vm15204_vm14, %v9535_v58 }
 0x859   :  { %4555 = vrot.lane.b32.xlu0 %v4547_v55, %s15167_s27  ;;  %4553 = vrot.lane.b32.xlu2 %v4546_v14, %s15167_s27  ;;  %v4650_v14 = vmul.f32 %v4647_v50, %v11928_v13  ;;  %v4651_v55 = vmul.f32 %v4647_v50, %v11930_v15 }
 0x85a   :  { %2246 = vmatpush.msrb.mxu3 %v2199_v22  ;;  %9558 = vmatmul.msk.f32.gmra.mxu1 %vm15204_vm14, %v9554_v0 }
 0x85b   :  { %9537 = vmatmul.msk.f32.vlgmr.msrb.gmra.mxu2 %vm15204_vm14, %v9535_v58  ;;  %v12070_v60 = vpop.f32.mrf.mxu3  ;;  %v4649_v58 = vmul.f32 %v4647_v50, %v11926_v51  ;;  %v9572_v50 = vld [vmem:[%s15079_s3 + $0x178] sm:$0xff] }
 0x85c   :  { %2223 = vmatpush.msrb.mxu2 %v2198_v28  ;;  %9556 = vmatmul.msk.f32.gmra.mxu0 %vm15204_vm14, %v9554_v0  ;;  %v4673_v28 = vpop.permute.xlu2 %4672 }
 0x85d   :  { %v12074_v26 = vpop.f32.mrf.mxu2  ;;  %v4677_v35 = vmul.f32 %v4673_v28, %v11930_v15 }
 0x85e   :  { %v12083_v53 = vpop.f32.mrf.mxu1 }
 0x85f   :  { %4577 = vrot.lane.b32.xlu1 %v4571_v43, %s15311_s23 }
 0x860   :  { %9540 = vmatmul.msk.f32.gmra.mxu3 %vm15204_vm14, %v9536_v38  ;;  %v12085_v63 = vpop.f32.mrf.mxu0 }
 0x861   :  { %4581 = vrot.lane.b32.xlu0 %v4573_v39, %s15311_s23  ;;  %4579 = vrot.lane.b32.xlu2 %v4572_v17, %s15311_s23  ;;  %v9560_v39 = vld [vmem:[%s15079_s3 + $0x158] sm:$0xff] }
 0x862   :  { %9569 = vmatmul.msk.f32.vlgmr.msra.gmra.mxu1 %vm15204_vm14, %v9565_v18 }
 0x863   :  { %9538 = vmatmul.msk.f32.gmra.mxu2 %vm15204_vm14, %v9536_v38  ;;  %v12094_v21 = vpop.f32.mrf.mxu3  ;;  %v4675_v38 = vmul.f32 %v4673_v28, %v11926_v51 }
 0x864   :  { %9567 = vmatmul.msk.f32.vlgmr.msra.gmra.mxu0 %vm15204_vm14, %v9565_v18  ;;  %v4676_v18 = vmul.f32 %v4673_v28, %v11928_v13 }
 0x865   :  { %v12098_v20 = vpop.f32.mrf.mxu2 }
 0x866   :  { %v12109_v31 = vpop.f32.mrf.mxu1 }
 0x867   :  { %4603 = vrot.lane.b32.xlu1 %v4597_v4, %s15312_s1 }
 0x868   :  { %9551 = vmatmul.msk.f32.vlgmr.msra.gmra.mxu3 %vm15204_vm14, %v9547_v32  ;;  %v12111_v19 = vpop.f32.mrf.mxu0 }
 0x869   :  { %4607 = vrot.lane.b32.xlu0 %v4599_v44, %s15312_s1  ;;  %4605 = vrot.lane.b32.xlu2 %v4598_v8, %s15312_s1  ;;  %v4701_v8 = vmul.f32 %v4699_v7, %v11926_v51 }
 0x86a   :  { %2384 = vmatpush.msra.mxu3 %v2337_v33  ;;  %9570 = vmatmul.msk.f32.gmra.mxu1 %vm15204_vm14, %v9566_v54  ;;  %v9571_v33 = vld [vmem:[%s15079_s3 + $0x170] sm:$0xff] }
 0x86b   :  { %9549 = vmatmul.msk.f32.vlgmr.msra.gmra.mxu2 %vm15204_vm14, %v9547_v32  ;;  %v12123_v45 = vpop.f32.mrf.mxu3 }
 0x86c   :  { %2361 = vmatpush.msra.mxu2 %v2336_v36  ;;  %9568 = vmatmul.msk.f32.gmra.mxu0 %vm15204_vm14, %v9566_v54  ;;  %v4702_v54 = vmul.f32 %v4699_v7, %v11928_v13 }
 0x86d   :  { %v12127_v9 = vpop.f32.mrf.mxu2 }
 0x86e   :  { %v12136_v2 = vpop.f32.mrf.mxu1 }
 0x86f   :  { %4629 = vrot.lane.b32.xlu1 %v4623_v49, %s15315_s15  ;;  %v4725_v49 = vpop.permute.xlu1 %4724 }
 0x870   :  { %9552 = vmatmul.msk.f32.gmra.mxu3 %vm15204_vm14, %v9548_v1  ;;  %v12138_v62 = vpop.f32.mrf.mxu0 }
 0x871   :  { %4633 = vrot.lane.b32.xlu0 %v4625_v11, %s15315_s15  ;;  %4631 = vrot.lane.b32.xlu2 %v4624_v57, %s15315_s15  ;;  %v4727_v11 = vmul.f32 %v4725_v49, %v11926_v51 }
 0x872   :  { %9581 = vmatmul.msk.f32.vlgmr.msrb.gmra.mxu1 %vm15204_vm14, %v9577_v12 }
 0x873   :  { %9550 = vmatmul.msk.f32.gmra.mxu2 %vm15204_vm14, %v9548_v1  ;;  %v12147_v3 = vpop.f32.mrf.mxu3 }
 0x874   :  { %9579 = vmatmul.msk.f32.vlgmr.msrb.gmra.mxu0 %vm15204_vm14, %v9577_v12 }
 0x875   :  { %v12151_v40 = vpop.f32.mrf.mxu2 }
 0x876   :  { %v12160_v22 = vpop.f32.mrf.mxu1 }
 0x877   :  { %4655 = vrot.lane.b32.xlu1 %v4649_v58, %s15316_s6  ;;  %v4728_v58 = vmul.f32 %v4725_v49, %v11928_v13 }
 0x878   :  { %9563 = vmatmul.msk.f32.vlgmr.msrb.gmra.mxu3 %vm15204_vm14, %v9559_v47  ;;  %v12162_v0 = vpop.f32.mrf.mxu0 }
 0x879   :  { %4659 = vrot.lane.b32.xlu0 %v4651_v55, %s15316_s6  ;;  %4657 = vrot.lane.b32.xlu2 %v4650_v14, %s15316_s6 }
 0x87a   :  { %9582 = vmatmul.msk.f32.gmra.mxu1 %vm15204_vm14, %v9578_v27 }
 0x87b   :  { %9561 = vmatmul.msk.f32.vlgmr.msrb.gmra.mxu2 %vm15204_vm14, %v9559_v47  ;;  %v12171_v43 = vpop.f32.mrf.mxu3  ;;  %v4729_v47 = vmul.f32 %v4725_v49, %v11930_v15 }
 0x87c   :  { %9580 = vmatmul.msk.f32.gmra.mxu0 %vm15204_vm14, %v9578_v27 }
 0x87d   :  { %v12175_v17 = vpop.f32.mrf.mxu2 }
 0x87e   :  { %v12184_v4 = vpop.f32.mrf.mxu1 }
 0x87f   :  { %4681 = vrot.lane.b32.xlu1 %v4675_v38, %s15317_s12 }
 0x880   :  { %9564 = vmatmul.msk.f32.gmra.mxu3 %vm15204_vm14, %v9560_v39  ;;  %v12186_v32 = vpop.f32.mrf.mxu0 }
 0x881   :  { %4685 = vrot.lane.b32.xlu0 %v4677_v35, %s15317_s12  ;;  %4683 = vrot.lane.b32.xlu2 %v4676_v18, %s15317_s12 }
 0x883   :  { %9562 = vmatmul.msk.f32.gmra.mxu2 %vm15204_vm14, %v9560_v39  ;;  %v12191_v46 = vpop.f32.mrf.mxu3 }
 0x885   :  { %v12194_v44 = vpop.f32.mrf.mxu2 }
 0x886   :  { %v12203_v36 = vpop.f32.mrf.mxu1 }
 0x887   :  { %4707 = vrot.lane.b32.xlu1 %v4701_v8, %s15318_s29 }
 0x888   :  { %9575 = vmatmul.msk.f32.vlgmr.msra.gmra.mxu3 %vm15204_vm14, %v9571_v33  ;;  %v12207_v1 = vpop.f32.mrf.mxu0 }
 0x889   :  { %4711 = vrot.lane.b32.xlu0 %v4703_v23, %s15318_s29  ;;  %4709 = vrot.lane.b32.xlu2 %v4702_v54, %s15318_s29 }
 0x88b   :  { %9573 = vmatmul.msk.f32.vlgmr.msra.gmra.mxu2 %vm15204_vm14, %v9571_v33  ;;  %v12210_v57 = vpop.f32.mrf.mxu3 }
 0x88d   :  { %v12213_v12 = vpop.f32.mrf.mxu2 }
 0x88e   :  { %v12224_v14 = vpop.f32.mrf.mxu1 }
 0x88f   :  { %4733 = vrot.lane.b32.xlu1 %v4727_v11, %s15319_s30 }
 0x890   :  { %9576 = vmatmul.msk.f32.gmra.mxu3 %vm15204_vm14, %v9572_v50  ;;  %v12229_v27 = vpop.f32.mrf.mxu0 }
 0x891   :  { %4737 = vrot.lane.b32.xlu0 %v4729_v47, %s15319_s30  ;;  %4735 = vrot.lane.b32.xlu2 %v4728_v58, %s15319_s30 }
 0x893   :  { %9574 = vmatmul.msk.f32.gmra.mxu2 %vm15204_vm14, %v9572_v50  ;;  %v12227_v55 = vpop.f32.mrf.mxu3  ;;  %vm15384_vm14 = vmmov %vm15383_vm9 }
 0x895   :  { %v12231_v28 = vpop.f32.mrf.mxu2 }
 0x896   :  { %v12233_v39 = vpop.f32.mrf.mxu1 }
 0x898   :  { %v12237_v35 = vpop.f32.mrf.mxu0 }
 0x899   :  { %15320 = vst [vmem:[#allocation28_spill] sm:$0xff] %v12237_v35 }
 0x89b   :  { %v1419_v38 = vpop.f32.mrf.mxu3 }
 0x89d   :  { %v12235_v18 = vpop.f32.mrf.mxu2 }
 0x89e   :  { %v12243_v33 = vpop.f32.mrf.mxu1 }
 0x8a0   :  { %v12245_v54 = vpop.f32.mrf.mxu0 }
 0x8a1   :  { %15321 = vst [vmem:[#allocation29_spill] sm:$0xff] %v12245_v54 }
 0x8a3   :  { %v12239_v7 = vpop.f32.mrf.mxu3 }
 0x8a5   :  { %v12241_v8 = vpop.f32.mrf.mxu2 }
 0x8a6   :  { %v12251_v11 = vpop.f32.mrf.mxu1 }
 0x8a7   :  { %15322 = vst [vmem:[#allocation32_spill] sm:$0xff] %v12251_v11 }
 0x8a8   :  { %v12253_v50 = vpop.f32.mrf.mxu0 }
 0x8a9   :  { %15323 = vst [vmem:[#allocation34_spill] sm:$0xff] %v12253_v50  ;;  %v896_v50 = vadd.f32 %v12070_v60, %v12012_v48  ;;  %v899_v48 = vadd.f32 %v12094_v21, %v12040_v29 }
 0x8ab   :  { %v12247_v23 = vpop.f32.mrf.mxu3 }
 0x8ad   :  { %v12249_v49 = vpop.f32.mrf.mxu2 }
 0x8ae   :  { %v12259_v5 = vpop.f32.mrf.mxu1 }
 0x8af   :  { %15324 = vst [vmem:[#allocation35_spill] sm:$0xff] %v12259_v5  ;;  %v873_v5 = vadd.f32 %v12074_v26, %v12014_v56  ;;  %v876_v56 = vadd.f32 %v12098_v20, %v12044_v16 }
 0x8b0   :  { %v12263_v42 = vpop.f32.mrf.mxu0 }
 0x8b1   :  { %15325 = vst [vmem:[#allocation37_spill] sm:$0xff] %v12263_v42 }
 0x8b3   :  { %v12255_v58 = vpop.f32.mrf.mxu3 }
 0x8b5   :  { %v12257_v47 = vpop.f32.mrf.mxu2 }
 0x8b6   :  { %v12269_v13 = vpop.f32.mrf.mxu1 }
 0x8b7   :  { %15327 = vst [vmem:[#allocation33_spill] sm:$0xff] %v12269_v13  ;;  %v963_v13 = vadd.f32 %v11976_v52, %v873_v5  ;;  %v966_v5 = vadd.f32 %v11998_v34, %v899_v48 }
 0x8b8   :  { %v12273_v24 = vpop.f32.mrf.mxu0 }
 0x8b9   :  { %15329 = vst [vmem:[#allocation38_spill] sm:$0xff] %v12273_v24  ;;  %v1029_v60 = vadd.f32 %v12127_v9, %v963_v13  ;;  %v965_v13 = vadd.f32 %v12000_v37, %v876_v56  ;;  %v1032_v21 = vadd.f32 %v12147_v3, %v966_v5 }
 0x8bb   :  { %v12261_v41 = vpop.f32.mrf.mxu3  ;;  %v1098_v34 = vadd.f32 %v12056_v10, %v1032_v21 }
 0x8bd   :  { %v12265_v51 = vpop.f32.mrf.mxu2  ;;  %v1164_v3 = vadd.f32 %v12191_v46, %v1098_v34 }
 0x8bf   :  { %v12283_v42 = vpop.f32.mrf.mxu1  ;;  %v1230_v10 = vadd.f32 %v12109_v31, %v1164_v3 }
 0x8c0   :  { %15330 = vst [vmem:[#allocation15_spill] sm:$0xff] %v12283_v42  ;;  %v12286_v54 = vpop.f32.mrf.mxu0 }
 0x8c3   :  { %v12267_v15 = vpop.f32.mrf.mxu3 }
 0x8c4   :  { %15326 = vst [vmem:[#allocation39_spill] sm:$0xff] %v12267_v15  ;;  %v964_v15 = vadd.f32 %v11974_v30, %v896_v50  ;;  %v12300_v30 = vpop.permute.xlu2 %4750 }
 0x8c5   :  { %v12271_v59 = vpop.f32.mrf.mxu2 }
 0x8c6   :  { %15328 = vst [vmem:[#allocation36_spill] sm:$0xff] %v12271_v59  ;;  %v1030_v24 = vadd.f32 %v12123_v45, %v964_v15  ;;  %v1095_v15 = vadd.f32 %v12033_v25, %v1029_v60 }
 0x8c7   :  { %v12305_v29 = vpop.f32.mrf.mxu1 }
 0x8c8   :  { %v1096_v26 = vadd.f32 %v12031_v6, %v1030_v24  ;;  %v1161_v16 = vadd.f32 %v12175_v17, %v1095_v15  ;;  %v12310_v20 = vpop.f32.mrf.mxu0  ;;  %v1031_v24 = vadd.f32 %v12151_v40, %v965_v13 }
 0x8ca   :  { %v1162_v52 = vadd.f32 %v12171_v43, %v1096_v26  ;;  %v1227_v25 = vadd.f32 %v12085_v63, %v1161_v16  ;;  %v1097_v37 = vadd.f32 %v12058_v61, %v1031_v24 }
 0x8cb   :  { %v12277_v11 = vpop.f32.mrf.mxu3 }
 0x8cc   :  { %v1228_v6 = vadd.f32 %v12083_v53, %v1162_v52  ;;  %v1293_v17 = vadd.f32 %v12213_v12, %v1227_v25  ;;  %v12322_v50 = vpop.permute.xlu2 %4828  ;;  %v1163_v40 = vadd.f32 %v12194_v44, %v1097_v37  ;;  %v1296_v12 = vadd.f32 %v12227_v55, %v1230_v10 }
 0x8ce   :  { %v12281_v35 = vpop.f32.mrf.mxu2  ;;  %v1294_v9 = vadd.f32 %v12210_v57, %v1228_v6  ;;  %v1359_v63 = vadd.f32 %v12138_v62, %v1293_v17  ;;  %v1229_v46 = vadd.f32 %v12111_v19, %v1163_v40  ;;  %v1362_v31 = vadd.f32 %v12160_v22, %v1296_v12  ;;  %v15334_v40 = vld [vmem:[#allocation36_spill] sm:$0xff] }
 0x8cf   :  { %v12326_v48 = vpop.f32.mrf.mxu1 }
 0x8d0   :  { %v1360_v53 = vadd.f32 %v12136_v2, %v1294_v9  ;;  %v1425_v56 = vadd.f32 %v12235_v18, %v1359_v63  ;;  %v1295_v2 = vadd.f32 %v12231_v28, %v1229_v46  ;;  %v1428_v19 = vadd.f32 %v12239_v7, %v1362_v31  ;;  %v15336_v63 = vld [vmem:[#allocation32_spill] sm:$0xff] }
 0x8d1   :  { %v12332_v61 = vpop.f32.mrf.mxu0 }
 0x8d2   :  { %v1426_v57 = vadd.f32 %v1419_v38, %v1360_v53  ;;  %v1495_v62 = vadd.f32 %v12186_v32, %v1425_v56  ;;  %v1361_v15 = vadd.f32 %v12162_v0, %v1295_v2  ;;  %v12353_v32 = vpop.permute.xlu0 %4776 }
 0x8d3   :  { %v12293_v59 = vpop.f32.mrf.mxu3 }
 0x8d4   :  { %v1496_v26 = vadd.f32 %v12184_v4, %v1426_v57  ;;  %v12342_v5 = vpop.permute.xlu2 %4906  ;;  %v1564_v55 = vadd.f32 %v12249_v49, %v1495_v62  ;;  %v1427_v28 = vadd.f32 %v12241_v8, %v1361_v15 }
 0x8d6   :  { %v12298_v42 = vpop.f32.mrf.mxu2  ;;  %v1565_v38 = vadd.f32 %v12247_v23, %v1496_v26  ;;  %v1498_v23 = vadd.f32 %v12203_v36, %v1428_v19  ;;  %v1633_v0 = vadd.f32 %v12229_v27, %v1564_v55  ;;  %v1497_v49 = vadd.f32 %v12207_v1, %v1427_v28  ;;  %v15331_v36 = vld [vmem:[#allocation29_spill] sm:$0xff]  ;;  %v15332_v1 = vld [vmem:[#allocation28_spill] sm:$0xff]  ;;  %v15338_v26 = vld [vmem:[#allocation34_spill] sm:$0xff] }
 0x8d7   :  { %v12347_v52 = vpop.f32.mrf.mxu1  ;;  %v15339_v19 = vld [vmem:[#allocation15_spill] sm:$0xff] }
 0x8d8   :  { %v1634_v4 = vadd.f32 %v12224_v14, %v1565_v38  ;;  %v1567_v21 = vadd.f32 %v12255_v58, %v1498_v23  ;;  %v1702_v16 = vadd.f32 %v12265_v51, %v1633_v0  ;;  %v1566_v8 = vadd.f32 %v12257_v47, %v1497_v49  ;;  %v15333_v58 = vld [vmem:[#allocation39_spill] sm:$0xff] }
 0x8d9   :  { %v12351_v13 = vpop.f32.mrf.mxu0 }
 0x8da   :  { %v1703_v7 = vadd.f32 %v12261_v41, %v1634_v4  ;;  %v1636_v34 = vadd.f32 %v12233_v39, %v1567_v21  ;;  %v1771_v25 = vadd.f32 %v15331_v36, %v1702_v16  ;;  %v1635_v37 = vadd.f32 %v15332_v1, %v1566_v8  ;;  %v12371_v17 = vpop.permute.xlu0 %4854  ;;  %v15335_v39 = vld [vmem:[#allocation35_spill] sm:$0xff]  ;;  %v15340_v4 = vld [vmem:[#allocation33_spill] sm:$0xff]  ;;  %v15341_v16 = vld [vmem:[#allocation38_spill] sm:$0xff] }
 0x8db   :  { %v1972_v45 = vpop.f32.mrf.mxu3 }
 0x8dc   :  { %v1772_v14 = vadd.f32 %v12243_v33, %v1703_v7  ;;  %v12363_v6 = vpop.permute.xlu2 %4448  ;;  %v1705_v3 = vadd.f32 %v15333_v58, %v1636_v34  ;;  %v1840_v51 = vadd.f32 %v12281_v35, %v1771_v25  ;;  %v12373_v33 = vpop.permute.xlu1 %4802  ;;  %v1704_v53 = vadd.f32 %v15334_v40, %v1635_v37 }
 0x8de   :  { %v12317_v43 = vpop.f32.mrf.mxu2  ;;  %v1841_v27 = vadd.f32 %v12277_v11, %v1772_v14  ;;  %v1774_v57 = vadd.f32 %v15336_v63, %v1705_v3  ;;  %v15337_v11 = vld [vmem:[#allocation37_spill] sm:$0xff]  ;;  %v1773_v31 = vadd.f32 %v15338_v26, %v1704_v53 }
 0x8df   :  { %v2317_v9 = vpop.f32.mrf.mxu1  ;;  %v1909_v46 = vadd.f32 %v15337_v11, %v1840_v51 }
 0x8e0   :  { %v1910_v10 = vadd.f32 %v15335_v39, %v1841_v27  ;;  %v1843_v35 = vadd.f32 %v12293_v59, %v1774_v57  ;;  %v1842_v15 = vadd.f32 %v12298_v42, %v1773_v31 }
 0x8e1   :  { %v2294_v47 = vpop.f32.mrf.mxu0  ;;  %v1978_v62 = vadd.f32 %v12317_v43, %v1909_v46 }
 0x8e2   :  { %v1979_v12 = vadd.f32 %v1972_v45, %v1910_v10  ;;  %v1912_v23 = vadd.f32 %v15340_v4, %v1843_v35  ;;  %v12388_v49 = vpop.permute.xlu0 %4932  ;;  %v1911_v59 = vadd.f32 %v15341_v16, %v1842_v15 }
 0x8e3   :  { %v12330_v60 = vpop.f32.mrf.mxu3  ;;  %v2047_v0 = vadd.f32 %v12286_v54, %v1978_v62 }
 0x8e4   :  { %v12379_v2 = vpop.permute.xlu2 %4475  ;;  %v2048_v55 = vadd.f32 %v15339_v19, %v1979_v12  ;;  %v12390_v21 = vpop.permute.xlu1 %4880  ;;  %v1981_v43 = vadd.f32 %v12330_v60, %v1912_v23 }
 0x8e6   :  { %v1952_v44 = vpop.f32.mrf.mxu2  ;;  %v2050_v54 = vadd.f32 %v12305_v29, %v1981_v43 }
 0x8e7   :  { %v2320_v28 = vpop.f32.mrf.mxu1  ;;  %v1980_v42 = vadd.f32 %v1952_v44, %v1911_v59 }
 0x8e9   :  { %v2297_v7 = vpop.f32.mrf.mxu0  ;;  %v2049_v1 = vadd.f32 %v12310_v20, %v1980_v42 }
 0x8ea   :  { %v12400_v44 = vpop.permute.xlu0 %4991 }
 0x8eb   :  { %v2110_v18 = vpop.f32.mrf.mxu3  ;;  %15342 = vst [vmem:[#allocation16_spill] sm:$0xff] %v12400_v44 }
 0x8ec   :  { %v2117_v45 = vadd.f32 %v2110_v18, %v2048_v55  ;;  %v12395_v25 = vpop.permute.xlu2 %4499 }
 0x8ee   :  { %v2087_v22 = vpop.f32.mrf.mxu2  ;;  %v2186_v34 = vadd.f32 %v12326_v48, %v2117_v45  ;;  %v12402_v48 = vpop.permute.xlu1 %4958 }
 0x8ef   :  { %v2116_v8 = vadd.f32 %v2087_v22, %v2047_v0  ;;  %v2455_v3 = vpop.f32.mrf.mxu1  ;;  %15343 = vst [vmem:[#allocation18_spill] sm:$0xff] %v12402_v48  ;;  %v15346_v0 = vld [vmem:[#allocation26_spill] sm:$0xff] }
 0x8f1   :  { %v2185_v18 = vadd.f32 %v12332_v61, %v2116_v8  ;;  %v2432_v40 = vpop.f32.mrf.mxu0 }
 0x8f3   :  { %v2113_v24 = vpop.f32.mrf.mxu3 }
 0x8f4   :  { %v2119_v37 = vadd.f32 %v2113_v24, %v2050_v54  ;;  %v12406_v57 = vpop.permute.xlu2 %5053 }
 0x8f5   :  { %15344 = vst [vmem:[#allocation14_spill] sm:$0xff] %v12406_v57 }
 0x8f6   :  { %v2090_v41 = vpop.f32.mrf.mxu2  ;;  %v2188_v53 = vadd.f32 %v12347_v52, %v2119_v37  ;;  %v12412_v35 = vpop.permute.xlu1 %4473 }
 0x8f7   :  { %v2118_v51 = vadd.f32 %v2090_v41, %v2049_v1  ;;  %v2458_v52 = vpop.f32.mrf.mxu1 }
 0x8f9   :  { %v2187_v61 = vadd.f32 %v12351_v13, %v2118_v51  ;;  %v2435_v19 = vpop.f32.mrf.mxu0 }
 0x8fb   :  { %v2248_v56 = vpop.f32.mrf.mxu3 }
 0x8fc   :  { %v2255_v27 = vadd.f32 %v2248_v56, %v2186_v34  ;;  %v12418_v16 = vpop.permute.xlu2 %4529 }
 0x8fe   :  { %v2225_v38 = vpop.f32.mrf.mxu2  ;;  %v2324_v60 = vadd.f32 %v2317_v9, %v2255_v27  ;;  %v15345_v9 = vld [vmem:[#allocation19_spill] sm:$0xff]  ;;  %v12421_v8 = vpop.permute.xlu1 %5022 }
 0x8ff   :  { %v2254_v58 = vadd.f32 %v2225_v38, %v2185_v18  ;;  %15347 = vst [vmem:[#allocation20_spill] sm:$0xff] %v12421_v8 }
 0x901   :  { %v2323_v39 = vadd.f32 %v2294_v47, %v2254_v58  ;;  %v12410_v47 = vpop.permute.xlu0 %4477 }
 0x903   :  { %v2251_v14 = vpop.f32.mrf.mxu3 }
 0x904   :  { %v2257_v63 = vadd.f32 %v2251_v14, %v2188_v53  ;;  %v12430_v34 = vpop.permute.xlu2 %4553 }
 0x906   :  { %v2228_v36 = vpop.f32.mrf.mxu2  ;;  %v2326_v12 = vadd.f32 %v2320_v28, %v2257_v63  ;;  %v15356_v63 = vld [vmem:[#allocation22_spill] sm:$0xff] }
 0x907   :  { %v2256_v41 = vadd.f32 %v2228_v36, %v2187_v61  ;;  %v12432_v36 = vpop.permute.xlu1 %4503 }
 0x909   :  { %v2325_v13 = vadd.f32 %v2297_v7, %v2256_v41  ;;  %v12425_v42 = vpop.permute.xlu0 %4501 }
 0x90b   :  { %v2386_v22 = vpop.f32.mrf.mxu3 }
 0x90c   :  { %v2393_v29 = vadd.f32 %v2386_v22, %v2324_v60  ;;  %v12439_v18 = vpop.permute.xlu2 %4579 }
 0x90e   :  { %v2363_v10 = vpop.f32.mrf.mxu2  ;;  %v2462_v24 = vadd.f32 %v2455_v3, %v2393_v29  ;;  %v15354_v29 = vld [vmem:[#allocation25_spill] sm:$0xff] }
 0x90f   :  { %v2392_v20 = vadd.f32 %v2363_v10, %v2323_v39  ;;  %v12444_v27 = vpop.permute.xlu1 %4527  ;;  %v4754_v10 = vmul.f32 %v12300_v30, %v15354_v29 }
 0x910   :  { %v2476_v11 = vadd.f32 %v15345_v9, %v2462_v24 }
 0x911   :  { %v2461_v46 = vadd.f32 %v2432_v40, %v2392_v20  ;;  %v12436_v54 = vpop.permute.xlu0 %4525  ;;  %v4755_v20 = vmul.f32 %v12300_v30, %v15356_v63 }
 0x912   :  { %v2480_v56 = vmax.f32 %v2476_v11, 0.0  ;;  %v15357_v11 = vld [vmem:[#allocation30_spill] sm:$0xff] }
 0x913   :  { %v2475_v26 = vadd.f32 %v15345_v9, %v2461_v46  ;;  %v2389_v31 = vpop.f32.mrf.mxu3  ;;  %v4753_v46 = vmul.f32 %v12300_v30, %v15357_v11  ;;  %v4779_v30 = vmul.f32 %v12353_v32, %v15357_v11  ;;  %v4937_v9 = vmul.f32 %v12388_v49, %v15356_v63 }
 0x914   :  { %v2395_v38 = vadd.f32 %v2389_v31, %v2326_v12  ;;  %v12448_v37 = vpop.permute.xlu2 %4605  ;;  %v4780_v12 = vmul.f32 %v12353_v32, %v15354_v29 }
 0x915   :  { %v2479_v62 = vmax.f32 %v2475_v26, 0.0 }
 0x916   :  { %v2366_v15 = vpop.f32.mrf.mxu2  ;;  %v2464_v4 = vadd.f32 %v2458_v52, %v2395_v38  ;;  %v4805_v38 = vmul.f32 %v12373_v33, %v15357_v11 }
 0x917   :  { %v2394_v55 = vadd.f32 %v2366_v15, %v2325_v13  ;;  %v10217_v23 = vpack.i.bf16 %v2480_v56, %v2479_v62  ;;  %v12453_v58 = vpop.permute.xlu1 %4551  ;;  %v4806_v13 = vmul.f32 %v12373_v33, %v15354_v29 }
 0x918   :  { %v2478_v45 = vadd.f32 %v15346_v0, %v2464_v4  ;;  %v4832_v4 = vmul.f32 %v12322_v50, %v15354_v29 }
 0x919   :  { %v2463_v28 = vadd.f32 %v2435_v19, %v2394_v55  ;;  %10218 = vrot.lane.b32.xlu1 %v10217_v23, %s15178_s26  ;;  %10213 = vrot.lane.b32.xlu2 %v10217_v23, %s15176_s24  ;;  %v12446_v1 = vpop.permute.xlu0 %5084 }
 0x91a   :  { %10208 = vrot.lane.b32.xlu0 %v10217_v23, %s15169_s25  ;;  %v2482_v59 = vmax.f32 %v2478_v45, 0.0  ;;  %15349 = vst [vmem:[#allocation17_spill] sm:$0xff] %v12446_v1 }
 0x91b   :  { %v2477_v7 = vadd.f32 %v15346_v0, %v2463_v28  ;;  %v4936_v0 = vmul.f32 %v12388_v49, %v15354_v29 }
 0x91c   :  { %2602 = vmatpush.msra.mxu1 %v2482_v59  ;;  %v12460_v51 = vpop.permute.xlu2 %4631 }
 0x91d   :  { %v2481_v43 = vmax.f32 %v2477_v7, 0.0  ;;  %v4858_v7 = vmul.f32 %v12371_v17, %v15354_v29 }
 0x91e   :  { %2603 = vmatpush.msra.mxu1 %v2480_v56  ;;  %v4781_v56 = vmul.f32 %v12353_v32, %v15356_v63  ;;  %v4807_v32 = vmul.f32 %v12373_v33, %v15356_v63 }
 0x91f   :  { %2579 = vmatpush.msra.mxu0 %v2481_v43  ;;  %v12423_v14 = vpack.i.bf16 %v2482_v59, %v2481_v43  ;;  %v12462_v60 = vpop.permute.xlu1 %4577  ;;  %v4831_v59 = vmul.f32 %v12322_v50, %v15357_v11 }
 0x921   :  { %10233 = vrot.lane.b32.xlu1 %v10217_v23, %s15312_s1  ;;  %10228 = vrot.lane.b32.xlu2 %v10217_v23, %s15311_s23  ;;  %v12455_v3 = vpop.permute.xlu0 %4555 }
 0x922   :  { %10223 = vrot.lane.b32.xlu0 %v10217_v23, %s15167_s27  ;;  %2580 = vmatpush.msra.mxu0 %v2479_v62  ;;  %s15353_s27 = smov 66  }
 0x924   :  { %v12469_v40 = vpop.permute.xlu2 %4657 }
 0x927   :  { %v12471_v53 = vpop.permute.xlu1 %4603 }
 0x929   :  { %10248 = vrot.lane.b32.xlu1 %v10217_v23, %s15317_s12  ;;  %10243 = vrot.lane.b32.xlu2 %v10217_v23, %s15316_s6  ;;  %v12464_v22 = vpop.permute.xlu0 %4581 }
 0x92a   :  { %10238 = vrot.lane.b32.xlu0 %v10217_v23, %s15315_s15 }
 0x92c   :  { %v12480_v61 = vpop.permute.xlu2 %4683 }
 0x92d   :  { %15355 = vst [vmem:[#allocation27_spill] sm:$0xff] %v12480_v61 }
 0x92f   :  { %v12488_v24 = vpop.permute.xlu1 %4629 }
 0x931   :  { %10263 = vrot.lane.b32.xlu1 %v10217_v23, %s15348_s4  ;;  %10258 = vrot.lane.b32.xlu2 %v10217_v23, %s15319_s30  ;;  %v12475_v39 = vpop.permute.xlu0 %4607 }
 0x932   :  { %10253 = vrot.lane.b32.xlu0 %v10217_v23, %s15318_s29 }
 0x934   :  { %v12498_v26 = vpop.permute.xlu2 %4709 }
 0x935   :  { %15358 = vst [vmem:[#allocation23_spill] sm:$0xff] %v12498_v26 }
 0x937   :  { %v12503_v31 = vpop.permute.xlu1 %4655 }
 0x939   :  { %10278 = vrot.lane.b32.xlu1 %v10217_v23, %s15350_s28  ;;  %10273 = vrot.lane.b32.xlu2 %v10217_v23, %s15351_s13  ;;  %v12490_v41 = vpop.permute.xlu0 %4633 }
 0x93a   :  { %10268 = vrot.lane.b32.xlu0 %v10217_v23, %s15352_s14 }
 0x93c   :  { %v12515_v62 = vpop.permute.xlu2 %4735 }
 0x93d   :  { %15359 = vst [vmem:[#allocation29_spill] sm:$0xff] %v12515_v62 }
 0x93f   :  { %v12519_v15 = vpop.permute.xlu1 %4681 }
 0x940   :  { %15360 = vst [vmem:[#allocation28_spill] sm:$0xff] %v12519_v15 }
 0x941   :  { %10293 = vrot.lane.b32.xlu1 %v10217_v23, %s15274_s19  ;;  %10288 = vrot.lane.b32.xlu2 %v10217_v23, %s15353_s27  ;;  %v12505_v52 = vpop.permute.xlu0 %4659 }
 0x942   :  { %10283 = vrot.lane.b32.xlu0 %v10217_v23, %s15273_s2 }
 0x947   :  { %v12535_v45 = vpop.permute.xlu1 %4707 }
 0x948   :  { %15362 = vst [vmem:[#allocation36_spill] sm:$0xff] %v12535_v45 }
 0x949   :  { %10308 = vrot.lane.b32.xlu1 %v10217_v23, %s15277_s16  ;;  %10303 = vrot.lane.b32.xlu2 %v10217_v23, %s15275_s22  ;;  %v12523_v19 = vpop.permute.xlu0 %4685 }
 0x94a   :  { %10298 = vrot.lane.b32.xlu0 %v10217_v23, %s15276_s21  ;;  %15361 = vst [vmem:[#allocation39_spill] sm:$0xff] %v12523_v19 }
 0x94f   :  { %v12553_v43 = vpop.permute.xlu1 %4733 }
 0x950   :  { %15365 = vst [vmem:[#allocation32_spill] sm:$0xff] %v12553_v43  ;;  %v4963_v43 = vmul.f32 %v12402_v48, %v15357_v11 }
 0x951   :  { %10323 = vrot.lane.b32.xlu1 %v10217_v23, %s15193_s17  ;;  %10318 = vrot.lane.b32.xlu2 %v10217_v23, %s15278_s20  ;;  %v12540_v33 = vpop.permute.xlu0 %4711  ;;  %s15462_s17 = smov 127  }
 0x952   :  { %10313 = vrot.lane.b32.xlu0 %v10217_v23, %s15279_s18  ;;  %v4833_v23 = vmul.f32 %v12322_v50, %v15356_v63  ;;  %15364 = vst [vmem:[#allocation35_spill] sm:$0xff] %v12540_v33  ;;  %v4859_v50 = vmul.f32 %v12371_v17, %v15356_v63  ;;  %v4995_v33 = vmul.f32 %v12400_v44, %v15354_v29 }
 0x959   :  { %10328 = vrot.lane.b32.xlu1 %v12423_v14, %s15169_s25  ;;  %4761 = vrot.lane.b32.xlu2 %v4754_v10, %s15348_s4  ;;  %s15363_s25 = smov 124  }
 0x95a   :  { %4763 = vrot.lane.b32.xlu0 %v4755_v20, %s15348_s4  ;;  %v12557_v20 = vpop.permute.xlu0 %4737 }
 0x95b   :  { %15366 = vst [vmem:[#allocation37_spill] sm:$0xff] %v12557_v20  ;;  %v4964_v20 = vmul.f32 %v12402_v48, %v15354_v29 }
 0x961   :  { %4759 = vrot.lane.b32.xlu1 %v4753_v46, %s15348_s4  ;;  %4787 = vrot.lane.b32.xlu2 %v4780_v12, %s15352_s14  ;;  %v4857_v46 = vmul.f32 %v12371_v17, %v15357_v11 }
 0x962   :  { %4789 = vrot.lane.b32.xlu0 %v4781_v56, %s15352_s14 }
 0x969   :  { %4785 = vrot.lane.b32.xlu1 %v4779_v30, %s15352_s14  ;;  %4813 = vrot.lane.b32.xlu2 %v4806_v13, %s15351_s13  ;;  %v4884_v13 = vmul.f32 %v12390_v21, %v15354_v29 }
 0x96a   :  { %10333 = vrot.lane.b32.xlu0 %v12423_v14, %s15176_s24  ;;  %s15538_s24 = smov 64  }
 0x971   :  { %4811 = vrot.lane.b32.xlu1 %v4805_v38, %s15351_s13  ;;  %10338 = vrot.lane.b32.xlu2 %v12423_v14, %s15178_s26  ;;  %v4885_v38 = vmul.f32 %v12390_v21, %v15356_v63  ;;  %s15461_s26 = smov 126  }
 0x972   :  { %4815 = vrot.lane.b32.xlu0 %v4807_v32, %s15351_s13 }
 0x973   :  { %v12529_v55 = vpop.permute.xlu2 %10213 }
 0x979   :  { %10343 = vrot.lane.b32.xlu1 %v12423_v14, %s15363_s25  ;;  %4839 = vrot.lane.b32.xlu2 %v4832_v4, %s15350_s28 }
 0x97a   :  { %4841 = vrot.lane.b32.xlu0 %v4833_v23, %s15350_s28  ;;  %v4910_v23 = vmul.f32 %v12342_v5, %v15354_v29 }
 0x97b   :  { %v12543_v28 = vpop.permute.xlu2 %10228 }
 0x981   :  { %4837 = vrot.lane.b32.xlu1 %v4831_v59, %s15350_s28  ;;  %4865 = vrot.lane.b32.xlu2 %v4858_v7, %s15273_s2  ;;  %v4883_v59 = vmul.f32 %v12390_v21, %v15357_v11 }
 0x982   :  { %10348 = vrot.lane.b32.xlu0 %v12423_v14, %s15311_s23 }
 0x983   :  { %v12555_v10 = vpop.permute.xlu2 %10243 }
 0x989   :  { %4863 = vrot.lane.b32.xlu1 %v4857_v46, %s15273_s2  ;;  %10353 = vrot.lane.b32.xlu2 %v12423_v14, %s15312_s1 }
 0x98a   :  { %4867 = vrot.lane.b32.xlu0 %v4859_v50, %s15273_s2 }
 0x98b   :  { %v12567_v12 = vpop.permute.xlu1 %10218  ;;  %v12569_v56 = vpop.permute.xlu2 %10258 }
 0x98c   :  { %v12571_v30 = vpop.permute.xlu0 %10208 }
 0x98d   :  { %v10210_v19 = vunpack.i.l.bf16 %v12571_v30 }
 0x991   :  { %10358 = vrot.lane.b32.xlu1 %v12423_v14, %s15315_s15  ;;  %4891 = vrot.lane.b32.xlu2 %v4884_v13, %s15353_s27  ;;  %v4909_v13 = vmul.f32 %v12342_v5, %v15357_v11 }
 0x992   :  { %4893 = vrot.lane.b32.xlu0 %v4885_v38, %s15353_s27  ;;  %v4911_v38 = vmul.f32 %v12342_v5, %v15356_v63 }
 0x993   :  { %v12581_v17 = vpop.permute.xlu1 %10233  ;;  %v12583_v32 = vpop.permute.xlu2 %10273 }
 0x994   :  { %v12585_v4 = vpop.permute.xlu0 %10223 }
 0x999   :  { %4889 = vrot.lane.b32.xlu1 %v4883_v59, %s15353_s27  ;;  %4917 = vrot.lane.b32.xlu2 %v4910_v23, %s15274_s19 }
 0x99a   :  { %10363 = vrot.lane.b32.xlu0 %v12423_v14, %s15316_s6 }
 0x99b   :  { %v12595_v7 = vpop.permute.xlu1 %10248  ;;  %v12597_v46 = vpop.permute.xlu2 %10288 }
 0x99c   :  { %v12599_v50 = vpop.permute.xlu0 %10238 }
 0x9a1   :  { %4915 = vrot.lane.b32.xlu1 %v4909_v13, %s15274_s19  ;;  %10368 = vrot.lane.b32.xlu2 %v12423_v14, %s15317_s12 }
 0x9a2   :  { %4919 = vrot.lane.b32.xlu0 %v4911_v38, %s15274_s19 }
 0x9a3   :  { %v12609_v21 = vpop.permute.xlu1 %10263  ;;  %v12611_v23 = vpop.permute.xlu2 %10303 }
 0x9a4   :  { %15367 = vst [vmem:[#allocation34_spill] sm:$0xff] %v12611_v23  ;;  %v12613_v59 = vpop.permute.xlu0 %10253  ;;  %v4935_v23 = vmul.f32 %v12388_v49, %v15357_v11  ;;  %v2483_v49 = vld [vmem:[%s15081_s5] sm:$0xff] }
 0x9a5   :  { %9591 = vmatmul.msk.f32.vlgmr.msra.gmra.mxu1 %vm2506_vm11, %v2483_v49  ;;  %9589 = vmatmul.msk.f32.vlgmr.msra.gmra.mxu0 %vm2506_vm11, %v2483_v49 }
 0x9a9   :  { %10373 = vrot.lane.b32.xlu1 %v12423_v14, %s15318_s29  ;;  %4943 = vrot.lane.b32.xlu2 %v4936_v0, %s15276_s21 }
 0x9aa   :  { %4945 = vrot.lane.b32.xlu0 %v4937_v9, %s15276_s21 }
 0x9ab   :  { %v12623_v5 = vpop.permute.xlu1 %10278  ;;  %v12625_v13 = vpop.permute.xlu2 %10318 }
 0x9ac   :  { %15368 = vst [vmem:[#allocation15_spill] sm:$0xff] %v12625_v13  ;;  %v12627_v38 = vpop.permute.xlu0 %10268 }
 0x9b1   :  { %4941 = vrot.lane.b32.xlu1 %v4935_v23, %s15276_s21  ;;  %4973 = vrot.lane.b32.xlu2 %v4964_v20, %s15275_s22  ;;  %v4965_v20 = vmul.f32 %v12402_v48, %v15356_v63 }
 0x9b2   :  { %10378 = vrot.lane.b32.xlu0 %v12423_v14, %s15319_s30 }
 0x9b3   :  { %v12637_v9 = vpop.permute.xlu1 %10293  ;;  %v12639_v0 = vpop.permute.xlu2 %4761 }
 0x9b4   :  { %15369 = vst [vmem:[#allocation33_spill] sm:$0xff] %v12639_v0  ;;  %v12641_v13 = vpop.permute.xlu0 %10283 }
 0x9b9   :  { %4971 = vrot.lane.b32.xlu1 %v4963_v43, %s15275_s22  ;;  %10383 = vrot.lane.b32.xlu2 %v12423_v14, %s15348_s4  ;;  %v2484_v43 = vld [vmem:[%s15081_s5 + $0x8] sm:$0xff] }
 0x9ba   :  { %4975 = vrot.lane.b32.xlu0 %v4965_v20, %s15275_s22  ;;  %9592 = vmatmul.msk.f32.gmra.mxu1 %vm2506_vm11, %v2484_v43 }
 0x9bb   :  { %v12656_v23 = vpop.permute.xlu1 %10308  ;;  %v12658_v0 = vpop.permute.xlu2 %4787  ;;  %9590 = vmatmul.msk.f32.gmra.mxu0 %vm2506_vm11, %v2484_v43 }
 0x9bc   :  { %15370 = vst [vmem:[#allocation38_spill] sm:$0xff] %v12656_v23  ;;  %v12660_v62 = vpop.permute.xlu0 %10298 }
 0x9bd   :  { %15371 = vst [vmem:[#allocation25_spill] sm:$0xff] %v12658_v0 }
 0x9be   :  { %15372 = vst [vmem:[#allocation30_spill] sm:$0xff] %v12660_v62  ;;  %v10220_v62 = vunpack.i.l.bf16 %v12567_v12 }
 0x9c1   :  { %10388 = vrot.lane.b32.xlu1 %v12423_v14, %s15352_s14  ;;  %5004 = vrot.lane.b32.xlu2 %v4995_v33, %s15277_s16  ;;  %v4994_v33 = vmul.f32 %v12400_v44, %v15357_v11 }
 0x9c2   :  { %10393 = vrot.lane.b32.xlu0 %v12423_v14, %s15351_s13 }
 0x9c3   :  { %v12673_v49 = vpop.permute.xlu1 %10323  ;;  %v12675_v20 = vpop.permute.xlu2 %4813 }
 0x9c4   :  { %15373 = vst [vmem:[#allocation40_spill] sm:$0xff] %v12673_v49  ;;  %v12678_v48 = vpop.permute.xlu0 %10313 }
 0x9c5   :  { %15374 = vst [vmem:[#allocation41_spill] sm:$0xff] %v12675_v20 }
 0x9c6   :  { %15375 = vst [vmem:[#allocation42_spill] sm:$0xff] %v12678_v48  ;;  %v10211_v48 = vunpack.i.h.bf16 %v12571_v30 }
 0x9c9   :  { %5002 = vrot.lane.b32.xlu1 %v4994_v33, %s15277_s16  ;;  %10398 = vrot.lane.b32.xlu2 %v12423_v14, %s15350_s28  ;;  %v10221_v33 = vunpack.i.h.bf16 %v12567_v12  ;;  %v2500_v12 = vsel %vm91_vm0, %v10210_v19, %v10211_v48  ;;  %v9584_v19 = vld [vmem:[%s15081_s5 + $0x18] sm:$0xff] }
 0x9ca   :  { %10408 = vrot.lane.b32.xlu0 %v12423_v14, %s15353_s27 }
 0x9cb   :  { %v10329_v23 = vpop.permute.xlu1 %10328  ;;  %v10339_v0 = vpop.permute.xlu2 %10338 }
 0x9cc   :  { %v10331_v49 = vunpack.i.h.bf16 %v10329_v23  ;;  %v10330_v45 = vunpack.i.l.bf16 %v10329_v23  ;;  %v10341_v20 = vunpack.i.h.bf16 %v10339_v0  ;;  %v10340_v26 = vunpack.i.l.bf16 %v10339_v0  ;;  %v12687_v43 = vpop.permute.xlu0 %4763  ;;  %v9583_v0 = vld [vmem:[%s15081_s5 + $0x10] sm:$0xff] }
 0x9ce   :  { %2550 = vmatpush.msrb.mxu3 %v10331_v49  ;;  %2744 = vmatpush.msrb.mxu1 %v10341_v20  ;;  %v2501_v15 = vsel %vm91_vm0, %v10330_v45, %v10331_v49  ;;  %v2696_v61 = vsel %vm147_vm2, %v10340_v26, %v10341_v20  ;;  %v9599_v26 = vld [vmem:[%s15081_s5 + $0x30] sm:$0xff] }
 0x9cf   :  { %2527 = vmatpush.msrb.mxu2 %v2501_v15  ;;  %2721 = vmatpush.msrb.mxu0 %v2696_v61  ;;  %v2695_v61 = vsel %vm147_vm2, %v10220_v62, %v10221_v33  ;;  %v9600_v62 = vld [vmem:[%s15081_s5 + $0x38] sm:$0xff] }
 0x9d0   :  { %2551 = vmatpush.msrb.mxu3 %v10211_v48  ;;  %2745 = vmatpush.msrb.mxu1 %v10221_v33 }
 0x9d1   :  { %10403 = vrot.lane.b32.xlu1 %v12423_v14, %s15273_s2  ;;  %10413 = vrot.lane.b32.xlu2 %v12423_v14, %s15274_s19 }
 0x9d2   :  { %10423 = vrot.lane.b32.xlu0 %v12423_v14, %s15275_s22  ;;  %2528 = vmatpush.msrb.mxu2 %v2500_v12  ;;  %v10215_v12 = vunpack.i.l.bf16 %v12529_v55 }
 0x9d3   :  { %9587 = vmatmul.msk.f32.vlgmr.msrb.gmra.mxu3 %vm2506_vm11, %v9583_v0  ;;  %2722 = vmatpush.msrb.mxu0 %v2695_v61  ;;  %v12710_v15 = vpop.permute.xlu1 %4759  ;;  %v12712_v45 = vpop.permute.xlu2 %4839  ;;  %v5026_v61 = vmul.f32 %v12421_v8, %v15354_v29 }
 0x9d4   :  { %15376 = vst [vmem:[#allocation43_spill] sm:$0xff] %v12712_v45  ;;  %9585 = vmatmul.msk.f32.vlgmr.msrb.gmra.mxu2 %vm2506_vm11, %v9583_v0  ;;  %v12715_v48 = vpop.permute.xlu0 %4789  ;;  %9603 = vmatmul.msk.f32.vlgmr.msrb.gmra.mxu1 %vm2506_vm11, %v9599_v26  ;;  %v10216_v0 = vunpack.i.h.bf16 %v12529_v55 }
 0x9d5   :  { %9601 = vmatmul.msk.f32.vlgmr.msrb.gmra.mxu0 %vm2506_vm11, %v9599_v26 }
 0x9d6   :  { %v2622_v55 = vsel %vm119_vm1, %v10215_v12, %v10216_v0 }
 0x9d9   :  { %10418 = vrot.lane.b32.xlu1 %v12423_v14, %s15276_s21  ;;  %10428 = vrot.lane.b32.xlu2 %v12423_v14, %s15277_s16 }
 0x9da   :  { %10438 = vrot.lane.b32.xlu0 %v12423_v14, %s15278_s20 }
 0x9db   :  { %9588 = vmatmul.msk.f32.gmra.mxu3 %vm2506_vm11, %v9584_v19  ;;  %v12732_v30 = vpop.permute.xlu1 %4785  ;;  %v12734_v23 = vpop.permute.xlu2 %4865 }
 0x9dc   :  { %15377 = vst [vmem:[#allocation44_spill] sm:$0xff] %v12734_v23  ;;  %9586 = vmatmul.msk.f32.gmra.mxu2 %vm2506_vm11, %v9584_v19  ;;  %v10334_v49 = vpop.permute.xlu0 %10333  ;;  %9604 = vmatmul.msk.f32.gmra.mxu1 %vm2506_vm11, %v9600_v62  ;;  %v4996_v19 = vmul.f32 %v12400_v44, %v15356_v63 }
 0x9dd   :  { %v10336_v20 = vunpack.i.h.bf16 %v10334_v49  ;;  %v10335_v33 = vunpack.i.l.bf16 %v10334_v49  ;;  %9602 = vmatmul.msk.f32.gmra.mxu0 %vm2506_vm11, %v9600_v62  ;;  %v9593_v49 = vld [vmem:[%s15081_s5 + $0x20] sm:$0xff] }
 0x9df   :  { %2671 = vmatpush.msra.mxu3 %v10336_v20  ;;  %v2623_v26 = vsel %vm119_vm1, %v10335_v33, %v10336_v20 }
 0x9e0   :  { %2648 = vmatpush.msra.mxu2 %v2623_v26  ;;  %v5025_v26 = vmul.f32 %v12421_v8, %v15357_v11 }
 0x9e1   :  { %2672 = vmatpush.msra.mxu3 %v10216_v0  ;;  %10433 = vrot.lane.b32.xlu1 %v12423_v14, %s15279_s18  ;;  %v9594_v0 = vld [vmem:[%s15081_s5 + $0x28] sm:$0xff] }
 0x9e2   :  { %5035 = vrot.lane.b32.xlu2 %v5026_v61, %s15279_s18  ;;  %5006 = vrot.lane.b32.xlu0 %v4996_v19, %s15277_s16  ;;  %v5027_v61 = vmul.f32 %v12421_v8, %v15356_v63 }
 0x9e3   :  { %2649 = vmatpush.msra.mxu2 %v2622_v55  ;;  %9597 = vmatmul.msk.f32.vlgmr.msra.gmra.mxu3 %vm2506_vm11, %v9593_v49  ;;  %v12755_v62 = vpop.permute.xlu1 %4811  ;;  %v10354_v20 = vpop.permute.xlu2 %10353  ;;  %v10225_v55 = vunpack.i.l.bf16 %v12585_v4 }
 0x9e4   :  { %9595 = vmatmul.msk.f32.vlgmr.msra.gmra.mxu2 %vm2506_vm11, %v9593_v49  ;;  %v12758_v33 = vpop.permute.xlu0 %4815  ;;  %v10226_v49 = vunpack.i.h.bf16 %v12585_v4  ;;  %v10355_v45 = vunpack.i.l.bf16 %v10354_v20  ;;  %v10236_v4 = vunpack.i.h.bf16 %v12581_v17 }
 0x9e9   :  { %5033 = vrot.lane.b32.xlu1 %v5025_v26, %s15279_s18  ;;  %v10356_v26 = vunpack.i.h.bf16 %v10354_v20  ;;  %v2768_v20 = vsel %vm175_vm3, %v10225_v55, %v10226_v49 }
 0x9ea   :  { %10443 = vrot.lane.b32.xlu2 %v12423_v14, %s15378_s11  ;;  %5037 = vrot.lane.b32.xlu0 %v5027_v61, %s15279_s18  ;;  %v5056_v61 = vmul.f32 %v12406_v57, %v15357_v11 }
 0x9eb   :  { %9598 = vmatmul.msk.f32.gmra.mxu3 %vm2506_vm11, %v9594_v0  ;;  %v10344_v12 = vpop.permute.xlu1 %10343  ;;  %v12772_v19 = vpop.permute.xlu2 %4891 }
 0x9ec   :  { %15379 = vst [vmem:[#allocation45_spill] sm:$0xff] %v12772_v19  ;;  %9596 = vmatmul.msk.f32.gmra.mxu2 %vm2506_vm11, %v9594_v0  ;;  %v10346_v44 = vunpack.i.h.bf16 %v10344_v12  ;;  %v10345_v8 = vunpack.i.l.bf16 %v10344_v12  ;;  %v12777_v23 = vpop.permute.xlu0 %4841  ;;  %v5057_v19 = vmul.f32 %v12406_v57, %v15354_v29  ;;  %v10235_v0 = vunpack.i.l.bf16 %v12581_v17 }
 0x9ed   :  { %v5058_v12 = vmul.f32 %v12406_v57, %v15356_v63 }
 0x9ee   :  { %2817 = vmatpush.msrb.mxu3 %v10346_v44  ;;  %v2769_v14 = vsel %vm175_vm3, %v10345_v8, %v10346_v44  ;;  %v9605_v44 = vld [vmem:[%s15081_s5 + $0x40] sm:$0xff]  ;;  %v2915_v8 = vsel %vm15215_vm5, %v10355_v45, %v10356_v26  ;;  %v2914_v55 = vsel %vm15215_vm5, %v10235_v0, %v10236_v4  ;;  %v10230_v45 = vunpack.i.l.bf16 %v12543_v28 }
 0x9ef   :  { %2794 = vmatpush.msrb.mxu2 %v2769_v14  ;;  %v5089_v0 = vmul.f32 %v12446_v1, %v15356_v63 }
 0x9f0   :  { %2818 = vmatpush.msrb.mxu3 %v10226_v49 }
 0x9f1   :  { %5064 = vrot.lane.b32.xlu1 %v5056_v61, %s15278_s20  ;;  %2795 = vmatpush.msrb.mxu2 %v2768_v20 }
 0x9f2   :  { %5066 = vrot.lane.b32.xlu2 %v5057_v19, %s15278_s20  ;;  %5068 = vrot.lane.b32.xlu0 %v5058_v12, %s15278_s20  ;;  %v10231_v19 = vunpack.i.h.bf16 %v12543_v28  ;;  %v9611_v28 = vld [vmem:[%s15081_s5 + $0x50] sm:$0xff] }
 0x9f3   :  { %9609 = vmatmul.msk.f32.vlgmr.msrb.gmra.mxu3 %vm2506_vm11, %v9605_v44  ;;  %2940 = vmatpush.msra.mxu2 %v2915_v8  ;;  %v12797_v17 = vpop.permute.xlu1 %4837  ;;  %v12799_v14 = vpop.permute.xlu2 %4917  ;;  %v5087_v8 = vmul.f32 %v12446_v1, %v15357_v11 }
 0x9f4   :  { %2963 = vmatpush.msra.mxu3 %v10356_v26  ;;  %9607 = vmatmul.msk.f32.vlgmr.msrb.gmra.mxu2 %vm2506_vm11, %v9605_v44  ;;  %v10349_v49 = vpop.permute.xlu0 %10348  ;;  %v5088_v26 = vmul.f32 %v12446_v1, %v15354_v29  ;;  %v9606_v44 = vld [vmem:[%s15081_s5 + $0x48] sm:$0xff]  ;;  %v10250_v1 = vunpack.i.l.bf16 %v12595_v7 }
 0x9f5   :  { %v10351_v61 = vunpack.i.h.bf16 %v10349_v49  ;;  %v10350_v20 = vunpack.i.l.bf16 %v10349_v49  ;;  %2941 = vmatpush.msra.mxu2 %v2914_v55 }
 0x9f6   :  { %2964 = vmatpush.msra.mxu3 %v10236_v4  ;;  %v2841_v4 = vsel %vm203_vm4, %v10230_v45, %v10231_v19 }
 0x9f7   :  { %2890 = vmatpush.msra.mxu1 %v10351_v61  ;;  %v2842_v12 = vsel %vm203_vm4, %v10350_v20, %v10351_v61  ;;  %v9617_v20 = vld [vmem:[%s15081_s5 + $0x60] sm:$0xff] }
 0x9f8   :  { %2867 = vmatpush.msra.mxu0 %v2842_v12  ;;  %v10241_v12 = vunpack.i.h.bf16 %v12599_v50 }
 0x9f9   :  { %2891 = vmatpush.msra.mxu1 %v10231_v19  ;;  %5095 = vrot.lane.b32.xlu1 %v5087_v8, %s15378_s11  ;;  %v9612_v19 = vld [vmem:[%s15081_s5 + $0x58] sm:$0xff]  ;;  %v10240_v8 = vunpack.i.l.bf16 %v12599_v50  ;;  %v9618_v50 = vld [vmem:[%s15081_s5 + $0x68] sm:$0xff] }
 0x9fa   :  { %5097 = vrot.lane.b32.xlu2 %v5088_v26, %s15378_s11  ;;  %5099 = vrot.lane.b32.xlu0 %v5089_v0, %s15378_s11 }
 0x9fb   :  { %9610 = vmatmul.msk.f32.gmra.mxu3 %vm2506_vm11, %v9606_v44  ;;  %2868 = vmatpush.msra.mxu0 %v2841_v4  ;;  %v12823_v49 = vpop.permute.xlu1 %4863  ;;  %v10369_v55 = vpop.permute.xlu2 %10368 }
 0x9fc   :  { %9615 = vmatmul.msk.f32.vlgmr.msra.gmra.mxu1 %vm2506_vm11, %v9611_v28  ;;  %9608 = vmatmul.msk.f32.gmra.mxu2 %vm2506_vm11, %v9606_v44  ;;  %v12827_v61 = vpop.permute.xlu0 %4867  ;;  %v10370_v4 = vunpack.i.l.bf16 %v10369_v55 }
 0x9fd   :  { %9613 = vmatmul.msk.f32.vlgmr.msra.gmra.mxu0 %vm2506_vm11, %v9611_v28  ;;  %v10371_v28 = vunpack.i.h.bf16 %v10369_v55  ;;  %v9623_v55 = vld [vmem:[%s15081_s5 + $0x70] sm:$0xff] }
 0xa03   :  { %9621 = vmatmul.msk.f32.vlgmr.msra.gmra.mxu3 %vm2506_vm11, %v9617_v20  ;;  %v10359_v45 = vpop.permute.xlu1 %10358  ;;  %v12844_v63 = vpop.permute.xlu2 %4943 }
 0xa04   :  { %9616 = vmatmul.msk.f32.gmra.mxu1 %vm2506_vm11, %v9612_v19  ;;  %9619 = vmatmul.msk.f32.vlgmr.msra.gmra.mxu2 %vm2506_vm11, %v9617_v20  ;;  %v10361_v26 = vunpack.i.h.bf16 %v10359_v45  ;;  %v10360_v0 = vunpack.i.l.bf16 %v10359_v45  ;;  %v12841_v44 = vpop.permute.xlu0 %4893  ;;  %15380 = vst [vmem:[#allocation46_spill] sm:$0xff] %v12844_v63  ;;  %v2987_v20 = vsel %vm15214_vm6, %v10240_v8, %v10241_v12  ;;  %v10251_v45 = vunpack.i.h.bf16 %v12595_v7 }
 0xa05   :  { %9614 = vmatmul.msk.f32.gmra.mxu0 %vm2506_vm11, %v9612_v19  ;;  %v3134_v19 = vsel %vm15211_vm8, %v10370_v4, %v10371_v28  ;;  %v10245_v8 = vunpack.i.l.bf16 %v12555_v10 }
 0xa06   :  { %3036 = vmatpush.msrb.mxu1 %v10361_v26  ;;  %v2988_v57 = vsel %vm15214_vm6, %v10360_v0, %v10361_v26 }
 0xa07   :  { %3013 = vmatpush.msrb.mxu0 %v2988_v57 }
 0xa08   :  { %3037 = vmatpush.msrb.mxu1 %v10241_v12  ;;  %v10246_v12 = vunpack.i.h.bf16 %v12555_v10  ;;  %v9624_v10 = vld [vmem:[%s15081_s5 + $0x78] sm:$0xff] }
 0xa09   :  { %3014 = vmatpush.msrb.mxu0 %v2987_v20 }
 0xa0a   :  { %3182 = vmatpush.msra.mxu1 %v10371_v28  ;;  %v3133_v28 = vsel %vm15211_vm8, %v10250_v1, %v10251_v45 }
 0xa0b   :  { %3159 = vmatpush.msra.mxu0 %v3134_v19  ;;  %9622 = vmatmul.msk.f32.gmra.mxu3 %vm2506_vm11, %v9618_v50  ;;  %v12858_v57 = vpop.permute.xlu1 %4889  ;;  %v12867_v20 = vpop.permute.xlu2 %4973  ;;  %v9630_v19 = vld [vmem:[%s15081_s5 + $0x88] sm:$0xff] }
 0xa0c   :  { %3183 = vmatpush.msra.mxu1 %v10251_v45  ;;  %9620 = vmatmul.msk.f32.gmra.mxu2 %vm2506_vm11, %v9618_v50  ;;  %v10364_v7 = vpop.permute.xlu0 %10363  ;;  %15381 = vst [vmem:[#allocation47_spill] sm:$0xff] %v12867_v20  ;;  %v9629_v50 = vld [vmem:[%s15081_s5 + $0x80] sm:$0xff] }
 0xa0d   :  { %9627 = vmatmul.msk.f32.vlgmr.msrb.gmra.mxu1 %vm2506_vm11, %v9623_v55  ;;  %9625 = vmatmul.msk.f32.vlgmr.msrb.gmra.mxu0 %vm2506_vm11, %v9623_v55  ;;  %v10366_v26 = vunpack.i.h.bf16 %v10364_v7  ;;  %v10365_v0 = vunpack.i.l.bf16 %v10364_v7  ;;  %v3060_v55 = vsel %vm15210_vm7, %v10245_v8, %v10246_v12 }
 0xa0e   :  { %3160 = vmatpush.msra.mxu0 %v3133_v28 }
 0xa0f   :  { %3109 = vmatpush.msrb.mxu3 %v10366_v26  ;;  %v3061_v4 = vsel %vm15210_vm7, %v10365_v0, %v10366_v26  ;;  %v10256_v26 = vunpack.i.h.bf16 %v12613_v59  ;;  %v10255_v0 = vunpack.i.l.bf16 %v12613_v59  ;;  %v9641_v59 = vld [vmem:[%s15081_s5 + $0xa0] sm:$0xff] }
 0xa10   :  { %3086 = vmatpush.msrb.mxu2 %v3061_v4 }
 0xa11   :  { %3110 = vmatpush.msrb.mxu3 %v10246_v12  ;;  %v9635_v12 = vld [vmem:[%s15081_s5 + $0x90] sm:$0xff]  ;;  %v3206_v63 = vsel %vm15384_vm14, %v10255_v0, %v10256_v26  ;;  %v10260_v0 = vunpack.i.l.bf16 %v12569_v56  ;;  %vm15387_vm14 = vcmask 711680  }
 0xa12   :  { %3087 = vmatpush.msrb.mxu2 %v3060_v55 }
 0xa13   :  { %9633 = vmatmul.msk.f32.vlgmr.msrb.gmra.mxu3 %vm2506_vm11, %v9629_v50  ;;  %v12877_v1 = vpop.permute.xlu1 %4915  ;;  %v10384_v7 = vpop.permute.xlu2 %10383 }
 0xa14   :  { %9631 = vmatmul.msk.f32.vlgmr.msrb.gmra.mxu2 %vm2506_vm11, %v9629_v50  ;;  %v12881_v45 = vpop.permute.xlu0 %4919  ;;  %v10385_v55 = vunpack.i.l.bf16 %v10384_v7 }
 0xa15   :  { %9628 = vmatmul.msk.f32.gmra.mxu1 %vm2506_vm11, %v9624_v10  ;;  %9626 = vmatmul.msk.f32.gmra.mxu0 %vm2506_vm11, %v9624_v10  ;;  %v10386_v10 = vunpack.i.h.bf16 %v10384_v7  ;;  %v9636_v7 = vld [vmem:[%s15081_s5 + $0x98] sm:$0xff] }
 0xa1b   :  { %9634 = vmatmul.msk.f32.gmra.mxu3 %vm2506_vm11, %v9630_v19  ;;  %v10374_v8 = vpop.permute.xlu1 %10373 }
 0xa1c   :  { %9632 = vmatmul.msk.f32.gmra.mxu2 %vm2506_vm11, %v9630_v19  ;;  %v10376_v28 = vunpack.i.h.bf16 %v10374_v8  ;;  %v10375_v4 = vunpack.i.l.bf16 %v10374_v8  ;;  %v12895_v50 = vpop.permute.xlu0 %4945  ;;  %v10266_v19 = vunpack.i.h.bf16 %v12609_v21  ;;  %v10265_v8 = vunpack.i.l.bf16 %v12609_v21 }
 0xa1d   :  { %9639 = vmatmul.msk.f32.vlgmr.msra.gmra.mxu1 %vm2506_vm11, %v9635_v12  ;;  %15382 = vst [vmem:[#allocation48_spill] sm:$0xff] %v12895_v50  ;;  %9637 = vmatmul.msk.f32.vlgmr.msra.gmra.mxu0 %vm2506_vm11, %v9635_v12  ;;  %v3353_v12 = vsel %vm15385_vm13, %v10385_v55, %v10386_v10 }
 0xa1e   :  { %3255 = vmatpush.msra.mxu3 %v10376_v28  ;;  %v3207_v20 = vsel %vm15383_vm9, %v10375_v4, %v10376_v28  ;;  %v12916_v28 = vpop.permute.xlu2 %5004  ;;  %vm15388_vm9 = vmmov %vm15387_vm14 }
 0xa1f   :  { %3232 = vmatpush.msra.mxu2 %v3207_v20  ;;  %15386 = vst [vmem:[#allocation49_spill] sm:$0xff] %v12916_v28 }
 0xa20   :  { %3256 = vmatpush.msra.mxu3 %v10256_v26  ;;  %v10261_v26 = vunpack.i.h.bf16 %v12569_v56 }
 0xa21   :  { %3233 = vmatpush.msra.mxu2 %v3206_v63 }
 0xa22   :  { %3401 = vmatpush.msrb.mxu3 %v10386_v10  ;;  %v3352_v10 = vsel %vm15385_vm13, %v10265_v8, %v10266_v19  ;;  %v3279_v56 = vsel %vm15388_vm9, %v10260_v0, %v10261_v26  ;;  %vm15391_vm13 = vcmask 695296  }
 0xa23   :  { %3378 = vmatpush.msrb.mxu2 %v3353_v12  ;;  %9645 = vmatmul.msk.f32.vlgmr.msra.gmra.mxu3 %vm2506_vm11, %v9641_v59  ;;  %v12910_v20 = vpop.permute.xlu1 %4941  ;;  %vm15393_vm9 = vmmov %vm15391_vm13 }
 0xa24   :  { %9643 = vmatmul.msk.f32.vlgmr.msra.gmra.mxu2 %vm2506_vm11, %v9641_v59  ;;  %v10379_v21 = vpop.permute.xlu0 %10378  ;;  %3402 = vmatpush.msrb.mxu3 %v10266_v19  ;;  %v9642_v59 = vld [vmem:[%s15081_s5 + $0xa8] sm:$0xff] }
 0xa25   :  { %9640 = vmatmul.msk.f32.gmra.mxu1 %vm2506_vm11, %v9636_v7  ;;  %9638 = vmatmul.msk.f32.gmra.mxu0 %vm2506_vm11, %v9636_v7  ;;  %v10381_v63 = vunpack.i.h.bf16 %v10379_v21  ;;  %v10380_v4 = vunpack.i.l.bf16 %v10379_v21  ;;  %v9647_v7 = vld [vmem:[%s15081_s5 + $0xb0] sm:$0xff]  ;;  %v9648_v21 = vld [vmem:[%s15081_s5 + $0xb8] sm:$0xff] }
 0xa26   :  { %3379 = vmatpush.msrb.mxu2 %v3352_v10  ;;  %v10399_v12 = vpop.permute.xlu2 %10398 }
 0xa27   :  { %3328 = vmatpush.msrb.mxu1 %v10381_v63  ;;  %v3280_v55 = vsel %vm15387_vm14, %v10380_v4, %v10381_v63  ;;  %v10271_v63 = vunpack.i.h.bf16 %v12627_v38  ;;  %v10270_v4 = vunpack.i.l.bf16 %v12627_v38  ;;  %v10400_v50 = vunpack.i.l.bf16 %v10399_v12 }
 0xa28   :  { %3305 = vmatpush.msrb.mxu0 %v3280_v55  ;;  %vm15392_vm14 = vcmask 687104  }
 0xa29   :  { %3329 = vmatpush.msrb.mxu1 %v10261_v26  ;;  %v9653_v26 = vld [vmem:[%s15081_s5 + $0xc0] sm:$0xff] }
 0xa2a   :  { %3306 = vmatpush.msrb.mxu0 %v3279_v56  ;;  %v10276_v56 = vunpack.i.h.bf16 %v12583_v32 }
 0xa2b   :  { %9646 = vmatmul.msk.f32.gmra.mxu3 %vm2506_vm11, %v9642_v59  ;;  %v12929_v19 = vpop.permute.xlu1 %4971 }
 0xa2c   :  { %15389 = vst [vmem:[#allocation50_spill] sm:$0xff] %v12929_v19  ;;  %9644 = vmatmul.msk.f32.gmra.mxu2 %vm2506_vm11, %v9642_v59  ;;  %v12933_v8 = vpop.permute.xlu0 %4975  ;;  %v10401_v19 = vunpack.i.h.bf16 %v10399_v12  ;;  %v10281_v12 = vunpack.i.h.bf16 %v12623_v5 }
 0xa2d   :  { %9651 = vmatmul.msk.f32.vlgmr.msrb.gmra.mxu1 %vm2506_vm11, %v9647_v7  ;;  %15390 = vst [vmem:[#allocation51_spill] sm:$0xff] %v12933_v8  ;;  %9649 = vmatmul.msk.f32.vlgmr.msrb.gmra.mxu0 %vm2506_vm11, %v9647_v7  ;;  %v10275_v7 = vunpack.i.l.bf16 %v12583_v32  ;;  %v3425_v32 = vsel %vm15393_vm9, %v10270_v4, %v10271_v63 }
 0xa33   :  { %9657 = vmatmul.msk.f32.vlgmr.msrb.gmra.mxu3 %vm2506_vm11, %v9653_v26  ;;  %v10389_v0 = vpop.permute.xlu1 %10388 }
 0xa34   :  { %9655 = vmatmul.msk.f32.vlgmr.msrb.gmra.mxu2 %vm2506_vm11, %v9653_v26  ;;  %v10391_v10 = vunpack.i.h.bf16 %v10389_v0  ;;  %v10390_v55 = vunpack.i.l.bf16 %v10389_v0  ;;  %v10394_v59 = vpop.permute.xlu0 %10393  ;;  %v9654_v0 = vld [vmem:[%s15081_s5 + $0xc8] sm:$0xff] }
 0xa35   :  { %9652 = vmatmul.msk.f32.gmra.mxu1 %vm2506_vm11, %v9648_v21  ;;  %9650 = vmatmul.msk.f32.gmra.mxu0 %vm2506_vm11, %v9648_v21  ;;  %v10396_v28 = vunpack.i.h.bf16 %v10394_v59  ;;  %v10395_v8 = vunpack.i.l.bf16 %v10394_v59  ;;  %v4479_v21 = vsel %vm91_vm0, %v12412_v35, %v12379_v2  ;;  %v4480_v59 = vsel %vm91_vm0, %v12379_v2, %v12410_v47 }
 0xa36   :  { %3474 = vmatpush.msra.mxu1 %v10391_v10  ;;  %v3426_v38 = vsel %vm15391_vm13, %v10390_v55, %v10391_v10  ;;  %v10280_v10 = vunpack.i.l.bf16 %v12623_v5  ;;  %v12961_v55 = vpop.permute.xlu2 %10413  ;;  %vm15394_vm13 = vmmov %vm15392_vm14  ;;  %v4459_v5 = vmul.f32 %v15354_v29, %v12363_v6 }
 0xa37   :  { %3547 = vmatpush.msra.mxu3 %v10396_v28  ;;  %3451 = vmatpush.msra.mxu0 %v3426_v38  ;;  %v3499_v26 = vsel %vm15392_vm14, %v10395_v8, %v10396_v28  ;;  %v9659_v28 = vld [vmem:[%s15081_s5 + $0xd0] sm:$0xff]  ;;  %v3498_v8 = vsel %vm15394_vm13, %v10275_v7, %v10276_v56  ;;  %vm15395_vm14 = vcmask 556032   ;;  %v10291_v7 = vunpack.i.h.bf16 %v12597_v46 }
 0xa38   :  { %3524 = vmatpush.msra.mxu2 %v3499_v26  ;;  %3475 = vmatpush.msra.mxu1 %v10271_v63  ;;  %v4458_v63 = vmul.f32 %v15357_v11, %v12363_v6  ;;  %v3572_v35 = vsel %vm15395_vm14, %v10400_v50, %v10401_v19  ;;  %v4505_v11 = vsel %vm119_vm1, %v12395_v25, %v12425_v42  ;;  %v10290_v50 = vunpack.i.l.bf16 %v12597_v46  ;;  %vm15396_vm9 = vmmov %vm15395_vm14 }
 0xa39   :  { %3548 = vmatpush.msra.mxu3 %v10276_v56  ;;  %3452 = vmatpush.msra.mxu0 %v3425_v32  ;;  %v3571_v2 = vsel %vm15396_vm9, %v10280_v10, %v10281_v12  ;;  %v4506_v25 = vsel %vm119_vm1, %v12425_v42, %v12432_v36  ;;  %v4531_v26 = vsel %vm147_vm2, %v12436_v54, %v12444_v27  ;;  %vm15397_vm13 = vcmask 539648   ;;  %v9665_v42 = vld [vmem:[%s15081_s5 + $0xe0] sm:$0xff] }
 0xa3a   :  { %3525 = vmatpush.msra.mxu2 %v3498_v8  ;;  %3620 = vmatpush.msrb.mxu1 %v10401_v19  ;;  %v4484_v56 = vadd.f32 %v4479_v21, %v4458_v63  ;;  %v4532_v21 = vsel %vm147_vm2, %v12444_v27, %v12418_v16  ;;  %vm15398_vm14 = vmmov %vm15397_vm13  ;;  %v4558_v27 = vsel %vm175_vm3, %v12430_v34, %v12455_v3  ;;  %vm15399_vm9 = vcmask 547840  }
 0xa3b   :  { %9658 = vmatmul.msk.f32.gmra.mxu3 %vm2506_vm11, %v9654_v0  ;;  %3597 = vmatpush.msrb.mxu0 %v3572_v35  ;;  %v12973_v4 = vpop.permute.xlu1 %5002  ;;  %v3717_v8 = vsel %vm15398_vm14, %v10290_v50, %v10291_v7  ;;  %v4584_v35 = vsel %vm203_vm4, %v12439_v18, %v12464_v22  ;;  %vm15401_vm14 = vcmask 531456  }
 0xa3c   :  { %9656 = vmatmul.msk.f32.gmra.mxu2 %vm2506_vm11, %v9654_v0  ;;  %v10409_v29 = vpop.permute.xlu0 %10408  ;;  %3621 = vmatpush.msrb.mxu1 %v10281_v12  ;;  %v4485_v0 = vadd.f32 %v4480_v59, %v4459_v5  ;;  %v4510_v32 = vadd.f32 %v4505_v11, %v4484_v56  ;;  %v4557_v12 = vsel %vm175_vm3, %v12453_v58, %v12430_v34  ;;  %v10286_v11 = vunpack.i.h.bf16 %v12641_v13 }
 0xa3d   :  { %9663 = vmatmul.msk.f32.vlgmr.msra.gmra.mxu1 %vm2506_vm11, %v9659_v28  ;;  %9661 = vmatmul.msk.f32.vlgmr.msra.gmra.mxu0 %vm2506_vm11, %v9659_v28  ;;  %v10411_v19 = vunpack.i.h.bf16 %v10409_v29  ;;  %v10410_v38 = vunpack.i.l.bf16 %v10409_v29  ;;  %v9660_v28 = vld [vmem:[%s15081_s5 + $0xd8] sm:$0xff]  ;;  %v4583_v5 = vsel %vm203_vm4, %v12462_v60, %v12439_v18  ;;  %v10285_v34 = vunpack.i.l.bf16 %v12641_v13 }
 0xa3e   :  { %3598 = vmatpush.msrb.mxu0 %v3571_v2  ;;  %v4511_v54 = vadd.f32 %v4506_v25, %v4485_v0  ;;  %v4536_v10 = vadd.f32 %v4531_v26, %v4510_v32  ;;  %v13016_v59 = vpop.permute.xlu2 %10428  ;;  %v4609_v18 = vsel %vm15215_vm5, %v12471_v53, %v12448_v37  ;;  %v10416_v60 = vunpack.i.h.bf16 %v12961_v55  ;;  %v9666_v32 = vld [vmem:[%s15081_s5 + $0xe8] sm:$0xff] }
 0xa3f   :  { %3766 = vmatpush.msra.mxu1 %v10411_v19  ;;  %v3718_v46 = vsel %vm15397_vm13, %v10410_v38, %v10411_v19  ;;  %v10415_v38 = vunpack.i.l.bf16 %v12961_v55  ;;  %v4610_v2 = vsel %vm15215_vm5, %v12448_v37, %v12475_v39  ;;  %v4636_v53 = vsel %vm15214_vm6, %v12460_v51, %v12490_v41  ;;  %vm15400_vm13 = vmmov %vm15399_vm9 }
 0xa40   :  { %3743 = vmatpush.msra.mxu0 %v3718_v46  ;;  %v4537_v58 = vadd.f32 %v4532_v21, %v4511_v54  ;;  %v4562_v63 = vadd.f32 %v4557_v12, %v4536_v10  ;;  %v4635_v55 = vsel %vm15214_vm6, %v12488_v24, %v12460_v51  ;;  %v3644_v37 = vsel %vm15400_vm13, %v10285_v34, %v10286_v11  ;;  %v15405_v34 = vld [vmem:[#allocation39_spill] sm:$0xff] }
 0xa41   :  { %3767 = vmatpush.msra.mxu1 %v10291_v7  ;;  %v10296_v21 = vunpack.i.h.bf16 %v12637_v9  ;;  %v10295_v12 = vunpack.i.l.bf16 %v12637_v9  ;;  %v3791_v51 = vsel %vm15401_vm14, %v10415_v38, %v10416_v60  ;;  %v4661_v24 = vsel %vm15210_vm7, %v12503_v31, %v12469_v40  ;;  %v15402_v9 = vld [vmem:[#allocation27_spill] sm:$0xff]  ;;  %v15408_v38 = vld [vmem:[#allocation36_spill] sm:$0xff] }
 0xa42   :  { %3744 = vmatpush.msra.mxu0 %v3717_v8  ;;  %v4563_v19 = vadd.f32 %v4558_v27, %v4537_v58  ;;  %v4588_v13 = vadd.f32 %v4583_v5, %v4562_v63  ;;  %v15403_v8 = vld [vmem:[#allocation28_spill] sm:$0xff]  ;;  %v15404_v63 = vld [vmem:[#allocation30_spill] sm:$0xff]  ;;  %vm15409_vm13 = vcmask 719872  }
 0xa43   :  { %9669 = vmatmul.msk.f32.vlgmr.msra.gmra.mxu3 %vm2506_vm11, %v9665_v42  ;;  %v10404_v56 = vpop.permute.xlu1 %10403  ;;  %v4687_v27 = vsel %vm15211_vm8, %v15403_v8, %v15402_v9  ;;  %v10300_v5 = vunpack.i.l.bf16 %v15404_v63 }
 0xa44   :  { %9667 = vmatmul.msk.f32.vlgmr.msra.gmra.mxu2 %vm2506_vm11, %v9665_v42  ;;  %v10406_v7 = vunpack.i.h.bf16 %v10404_v56  ;;  %v10405_v29 = vunpack.i.l.bf16 %v10404_v56  ;;  %v13023_v50 = vpop.permute.xlu0 %10423  ;;  %v4589_v26 = vadd.f32 %v4584_v35, %v4563_v19  ;;  %v4614_v0 = vadd.f32 %v4609_v18, %v4588_v13  ;;  %v9671_v42 = vld [vmem:[%s15081_s5 + $0xf0] sm:$0xff] }
 0xa45   :  { %9664 = vmatmul.msk.f32.gmra.mxu1 %vm2506_vm11, %v9660_v28  ;;  %9662 = vmatmul.msk.f32.gmra.mxu0 %vm2506_vm11, %v9660_v28  ;;  %v4662_v28 = vsel %vm15210_vm7, %v12469_v40, %v12505_v52  ;;  %v10301_v35 = vunpack.i.h.bf16 %v15404_v63  ;;  %vm15412_vm7 = vmmov %vm15409_vm13  ;;  %v15421_v63 = vld [vmem:[#allocation34_spill] sm:$0xff] }
 0xa46   :  { %3693 = vmatpush.msrb.mxu3 %v10406_v7  ;;  %v3645_v25 = vsel %vm15399_vm9, %v10405_v29, %v10406_v7  ;;  %v4615_v46 = vadd.f32 %v4610_v2, %v4589_v26  ;;  %v4640_v10 = vadd.f32 %v4635_v55, %v4614_v0  ;;  %v4688_v7 = vsel %vm15211_vm8, %v15402_v9, %v15405_v34  ;;  %v13070_v29 = vpop.permute.xlu2 %5035  ;;  %vm15406_vm9 = vmmov %vm15401_vm14  ;;  %v15411_v26 = vld [vmem:[#allocation35_spill] sm:$0xff]  ;;  %v15413_v55 = vld [vmem:[#allocation29_spill] sm:$0xff] }
 0xa47   :  { %3670 = vmatpush.msrb.mxu2 %v3645_v25  ;;  %v3790_v19 = vsel %vm15406_vm9, %v10295_v12, %v10296_v21  ;;  %vm15410_vm14 = vcmask 523264   ;;  %vm15415_vm8 = vcmask 711680   ;;  %v15419_v9 = vld [vmem:[#allocation33_spill] sm:$0xff] }
 0xa48   :  { %3694 = vmatpush.msrb.mxu3 %v10286_v11  ;;  %v4641_v54 = vadd.f32 %v4636_v53, %v4615_v46  ;;  %v4666_v40 = vadd.f32 %v4661_v24, %v4640_v10  ;;  %v9677_v46 = vld [vmem:[%s15081_s5 + $0x100] sm:$0xff]  ;;  %vm15416_vm9 = vmmov %vm15410_vm14  ;;  %v10426_v24 = vunpack.i.h.bf16 %v13023_v50  ;;  %v9672_v10 = vld [vmem:[%s15081_s5 + $0xf8] sm:$0xff] }
 0xa49   :  { %3671 = vmatpush.msrb.mxu2 %v3644_v37 }
 0xa4a   :  { %3839 = vmatpush.msra.mxu3 %v10416_v60  ;;  %v4667_v18 = vadd.f32 %v4662_v28, %v4641_v54  ;;  %v15407_v60 = vld [vmem:[#allocation23_spill] sm:$0xff]  ;;  %v4692_v25 = vadd.f32 %v4687_v27, %v4666_v40  ;;  %v10425_v54 = vunpack.i.l.bf16 %v13023_v50  ;;  %v13099_v27 = vpop.f32.mrf.mxu0  ;;  %v15423_v40 = vld [vmem:[#allocation25_spill] sm:$0xff] }
 0xa4b   :  { %3816 = vmatpush.msra.mxu2 %v3791_v51  ;;  %9670 = vmatmul.msk.f32.gmra.mxu3 %vm2506_vm11, %v9666_v32  ;;  %v10419_v58 = vpop.permute.xlu1 %10418  ;;  %v4713_v13 = vsel %vm15409_vm13, %v15408_v38, %v15407_v60  ;;  %v4714_v0 = vsel %vm15412_vm7, %v15407_v60, %v15411_v26  ;;  %vm15418_vm13 = vmmov %vm15415_vm8  ;;  %vm15420_vm7 = vcmask 703488  }
 0xa4c   :  { %9668 = vmatmul.msk.f32.gmra.mxu2 %vm2506_vm11, %v9666_v32  ;;  %v10421_v31 = vunpack.i.h.bf16 %v10419_v58  ;;  %v10420_v56 = vunpack.i.l.bf16 %v10419_v58  ;;  %v13065_v11 = vpop.permute.xlu0 %10438  ;;  %3840 = vmatpush.msra.mxu3 %v10296_v21  ;;  %v4693_v53 = vadd.f32 %v4688_v7, %v4667_v18  ;;  %v15414_v32 = vld [vmem:[#allocation32_spill] sm:$0xff]  ;;  %v3863_v21 = vsel %vm15416_vm9, %v10300_v5, %v10301_v35 }
 0xa4d   :  { %9675 = vmatmul.msk.f32.vlgmr.msrb.gmra.mxu1 %vm2506_vm11, %v9671_v42  ;;  %9673 = vmatmul.msk.f32.vlgmr.msrb.gmra.mxu0 %vm2506_vm11, %v9671_v42  ;;  %v4739_v37 = vsel %vm15415_vm8, %v15414_v32, %v15413_v55  ;;  %v4718_v12 = vadd.f32 %v4713_v13, %v4692_v25  ;;  %v15417_v42 = vld [vmem:[#allocation37_spill] sm:$0xff]  ;;  %v4765_v8 = vsel %vm15420_vm7, %v12710_v15, %v15419_v9  ;;  %v10305_v5 = vunpack.i.l.bf16 %v15421_v63  ;;  %vm15422_vm8 = vmmov %vm15420_vm7 }
 0xa4e   :  { %3817 = vmatpush.msra.mxu2 %v3790_v19  ;;  %3912 = vmatpush.msrb.mxu1 %v10421_v31  ;;  %v3864_v2 = vsel %vm15410_vm14, %v10420_v56, %v10421_v31  ;;  %v4740_v51 = vsel %vm15418_vm13, %v15413_v55, %v15417_v42  ;;  %v4719_v28 = vadd.f32 %v4714_v0, %v4693_v53  ;;  %vm15424_vm14 = vcmask 695296   ;;  %v15426_v13 = vld [vmem:[#allocation41_spill] sm:$0xff]  ;;  %v13127_v0 = vpop.permute.xlu2 %10443 }
 0xa4f   :  { %3889 = vmatpush.msrb.mxu0 %v3864_v2  ;;  %v4744_v58 = vadd.f32 %v4739_v37, %v4718_v12  ;;  %v4766_v50 = vsel %vm15422_vm8, %v15419_v9, %v12687_v43  ;;  %v4791_v15 = vsel %vm15424_vm14, %v12732_v30, %v15423_v40  ;;  %vm15425_vm9 = vmmov %vm15424_vm14  ;;  %v3937_v60 = vsel %vm629_vm15, %v10425_v54, %v10426_v24  ;;  %v15429_v37 = vld [vmem:[#allocation43_spill] sm:$0xff]  ;;  %v15432_v54 = vld [vmem:[#allocation44_spill] sm:$0xff] }
 0xa50   :  { %3913 = vmatpush.msrb.mxu1 %v10301_v35  ;;  %v10306_v35 = vunpack.i.h.bf16 %v15421_v63  ;;  %v4745_v56 = vadd.f32 %v4740_v51, %v4719_v28  ;;  %v4792_v18 = vsel %vm15425_vm9, %v15423_v40, %v12715_v48  ;;  %vm15427_vm13 = vcmask 687104   ;;  %v9683_v51 = vld [vmem:[%s15081_s5 + $0x110] sm:$0xff] }
 0xa51   :  { %3890 = vmatpush.msrb.mxu0 %v3863_v21  ;;  %v4770_v19 = vadd.f32 %v4765_v8, %v4744_v58  ;;  %v4817_v30 = vsel %vm15427_vm13, %v12755_v62, %v15426_v13  ;;  %vm15428_vm7 = vmmov %vm15427_vm13  ;;  %vm15430_vm8 = vcmask 556032   ;;  %v9678_v62 = vld [vmem:[%s15081_s5 + $0x108] sm:$0xff]  ;;  %vm15433_vm9 = vcmask 547840  }
 0xa52   :  { %v4771_v38 = vadd.f32 %v4766_v50, %v4745_v56  ;;  %v4818_v25 = vsel %vm15428_vm7, %v15426_v13, %v12758_v33  ;;  %v3936_v53 = vsel %vm629_vm15, %v10305_v5, %v10306_v35  ;;  %vm15431_vm14 = vmmov %vm15430_vm8  ;;  %v10430_v28 = vunpack.i.l.bf16 %v13016_v59  ;;  %v15435_v63 = vld [vmem:[#allocation38_spill] sm:$0xff]  ;;  %v15436_v56 = vld [vmem:[#allocation45_spill] sm:$0xff]  ;;  %v13161_v40 = vpop.f32.mrf.mxu0 }
 0xa53   :  { %9681 = vmatmul.msk.f32.vlgmr.msrb.gmra.mxu3 %vm2506_vm11, %v9677_v46  ;;  %v13107_v31 = vpop.permute.xlu1 %10433  ;;  %v4796_v2 = vadd.f32 %v4791_v15, %v4770_v19  ;;  %v4844_v12 = vsel %vm15431_vm14, %v15429_v37, %v12777_v23  ;;  %vm15434_vm13 = vmmov %vm15433_vm9  ;;  %v10310_v5 = vunpack.i.l.bf16 %v15435_v63  ;;  %vm15437_vm7 = vcmask 539648  }
 0xa54   :  { %3985 = vmatpush.msrb.mxu3 %v10426_v24  ;;  %v13113_v7 = vpop.permute.xlu0 %5006  ;;  %9679 = vmatmul.msk.f32.vlgmr.msrb.gmra.mxu2 %vm2506_vm11, %v9677_v46  ;;  %v4797_v32 = vadd.f32 %v4792_v18, %v4771_v38  ;;  %v4843_v46 = vsel %vm15430_vm8, %v12797_v17, %v15429_v37  ;;  %v10431_v17 = vunpack.i.h.bf16 %v13016_v59  ;;  %v4870_v8 = vsel %vm15434_vm13, %v15432_v54, %v12827_v61  ;;  %vm15438_vm8 = vmmov %vm15437_vm7 }
 0xa55   :  { %9676 = vmatmul.msk.f32.gmra.mxu1 %vm2506_vm11, %v9672_v10  ;;  %9674 = vmatmul.msk.f32.gmra.mxu0 %vm2506_vm11, %v9672_v10  ;;  %v4822_v21 = vadd.f32 %v4817_v30, %v4796_v2  ;;  %v4869_v10 = vsel %vm15433_vm9, %v12823_v49, %v15432_v54  ;;  %v4895_v49 = vsel %vm15437_vm7, %v12858_v57, %v15436_v56  ;;  %vm15439_vm14 = vcmask 531456   ;;  %v15446_v54 = vld [vmem:[#allocation50_spill] sm:$0xff] }
 0xa56   :  { %3962 = vmatpush.msrb.mxu2 %v3937_v60  ;;  %3986 = vmatpush.msrb.mxu3 %v10306_v35  ;;  %v4823_v24 = vadd.f32 %v4818_v25, %v4797_v32  ;;  %v10311_v35 = vunpack.i.h.bf16 %v15435_v63  ;;  %v4896_v19 = vsel %vm15438_vm8, %v15436_v56, %v12841_v44  ;;  %v4921_v60 = vsel %vm15439_vm14, %v12877_v1, %v12799_v14  ;;  %vm15440_vm9 = vmmov %vm15439_vm14  ;;  %v15441_v25 = vld [vmem:[#allocation46_spill] sm:$0xff]  ;;  %v9689_v32 = vld [vmem:[%s15081_s5 + $0x120] sm:$0xff] }
 0xa57   :  { %v13130_v55 = vpop.f32.mrf.mxu2  ;;  %v4848_v9 = vadd.f32 %v4843_v46, %v4822_v21  ;;  %v4010_v57 = vsel %vm662_vm12, %v10430_v28, %v10431_v17  ;;  %v4922_v13 = vsel %vm15440_vm9, %v12799_v14, %v12881_v45  ;;  %vm15442_vm13 = vcmask 523264   ;;  %v15443_v46 = vld [vmem:[#allocation48_spill] sm:$0xff]  ;;  %v15448_v63 = vld [vmem:[#allocation51_spill] sm:$0xff] }
 0xa58   :  { %3963 = vmatpush.msrb.mxu2 %v3936_v53  ;;  %v4849_v50 = vadd.f32 %v4844_v12, %v4823_v24  ;;  %v4947_v53 = vsel %vm15442_vm13, %v12910_v20, %v15441_v25  ;;  %v4009_v1 = vsel %vm662_vm12, %v10310_v5, %v10311_v35  ;;  %vm15444_vm7 = vmmov %vm15442_vm13  ;;  %v10436_v21 = vunpack.i.h.bf16 %v13107_v31  ;;  %v9684_v20 = vld [vmem:[%s15081_s5 + $0x118] sm:$0xff] }
 0xa59   :  { %v4874_v15 = vadd.f32 %v4869_v10, %v4848_v9  ;;  %v4948_v14 = vsel %vm15444_vm7, %v15441_v25, %v15443_v46  ;;  %v10435_v12 = vunpack.i.l.bf16 %v13107_v31  ;;  %v15445_v24 = vld [vmem:[#allocation47_spill] sm:$0xff]  ;;  %vm15450_vm8 = vcmask 367616  }
 0xa5a   :  { %v4875_v18 = vadd.f32 %v4870_v8, %v4849_v50  ;;  %v4979_v10 = vsel %vm629_vm15, %v15446_v54, %v15445_v24  ;;  %v15449_v50 = vld [vmem:[#allocation49_spill] sm:$0xff]  ;;  %vm15451_vm14 = vmmov %vm15450_vm8  ;;  %v15452_v54 = vld [vmem:[#allocation15_spill] sm:$0xff]  ;;  %vm15453_vm9 = vcmask 359424  }
 0xa5b   :  { %9682 = vmatmul.msk.f32.gmra.mxu3 %vm2506_vm11, %v9678_v62  ;;  %v5034_v58 = vpop.permute.xlu1 %5033  ;;  %v4900_v38 = vadd.f32 %v4895_v49, %v4874_v15  ;;  %v5010_v56 = vsel %vm662_vm12, %v12973_v4, %v15449_v50  ;;  %v13215_v4 = vpop.f32.mrf.mxu0  ;;  %vm15454_vm13 = vmmov %vm15453_vm9 }
 0xa5c   :  { %v13159_v59 = vpop.permute.xlu0 %5037  ;;  %9680 = vmatmul.msk.f32.gmra.mxu2 %vm2506_vm11, %v9678_v62  ;;  %v4901_v2 = vadd.f32 %v4896_v19, %v4875_v18  ;;  %v5067_v62 = vpop.permute.xlu2 %5066  ;;  %v5011_v19 = vsel %vm662_vm12, %v15449_v50, %v13113_v7  ;;  %v4083_v18 = vsel %vm695_vm10, %v10435_v12, %v10436_v21  ;;  %vm15455_vm7 = vmmov %vm15450_vm8 }
 0xa5d   :  { %9687 = vmatmul.msk.f32.vlgmr.msra.gmra.mxu1 %vm2506_vm11, %v9683_v51  ;;  %9685 = vmatmul.msk.f32.vlgmr.msra.gmra.mxu0 %vm2506_vm11, %v9683_v51  ;;  %v4926_v37 = vadd.f32 %v4921_v60, %v4900_v38 }
 0xa5e   :  { %4058 = vmatpush.msra.mxu1 %v10431_v17  ;;  %4035 = vmatpush.msra.mxu0 %v4010_v57  ;;  %v4927_v51 = vadd.f32 %v4922_v13, %v4901_v2  ;;  %v15447_v17 = vld [vmem:[#allocation42_spill] sm:$0xff]  ;;  %v5041_v57 = vsel %vm695_vm10, %v5034_v58, %v13070_v29  ;;  %v5042_v13 = vsel %vm695_vm10, %v13070_v29, %v13159_v59 }
 0xa5f   :  { %v13175_v30 = vpop.f32.mrf.mxu2  ;;  %v10316_v28 = vunpack.i.h.bf16 %v15447_v17  ;;  %v10315_v9 = vunpack.i.l.bf16 %v15447_v17  ;;  %v4952_v8 = vadd.f32 %v4947_v53, %v4926_v37  ;;  %v9690_v58 = vld [vmem:[%s15081_s5 + $0x128] sm:$0xff]  ;;  %v9695_v29 = vld [vmem:[%s15081_s5 + $0x130] sm:$0xff]  ;;  %v10320_v17 = vunpack.i.l.bf16 %v15452_v54 }
 0xa60   :  { %4059 = vmatpush.msra.mxu1 %v10311_v35  ;;  %4036 = vmatpush.msra.mxu0 %v4009_v1  ;;  %v4980_v35 = vsel %vm629_vm15, %v15445_v24, %v15448_v63  ;;  %v4953_v5 = vadd.f32 %v4948_v14, %v4927_v51  ;;  %v10441_v14 = vunpack.i.h.bf16 %v13065_v11 }
 0xa61   :  { %v4985_v15 = vadd.f32 %v4979_v10, %v4952_v8  ;;  %v4082_v2 = vsel %vm695_vm10, %v10315_v9, %v10316_v28  ;;  %v10321_v10 = vunpack.i.h.bf16 %v15452_v54  ;;  %v15463_v54 = vld [vmem:[#allocation20_spill] sm:$0xff] }
 0xa62   :  { %v4986_v60 = vadd.f32 %v4980_v35, %v4953_v5  ;;  %v15456_v5 = vld [vmem:[#allocation24_spill] sm:$0xff] }
 0xa63   :  { %9693 = vmatmul.msk.f32.vlgmr.msra.gmra.mxu3 %vm2506_vm11, %v9689_v32  ;;  %v5065_v31 = vpop.permute.xlu1 %5064  ;;  %v5016_v38 = vadd.f32 %v5010_v56, %v4985_v15 }
 0xa64   :  { %4131 = vmatpush.msra.mxu3 %v10436_v21  ;;  %v13205_v49 = vpop.permute.xlu0 %5068  ;;  %9691 = vmatmul.msk.f32.vlgmr.msra.gmra.mxu2 %vm2506_vm11, %v9689_v32  ;;  %v5017_v53 = vadd.f32 %v5011_v19, %v4986_v60  ;;  %v5072_v1 = vsel %vm15450_vm8, %v5065_v31, %v5067_v62  ;;  %v10440_v21 = vunpack.i.l.bf16 %v13065_v11  ;;  %vm15457_vm8 = vmmov %vm15455_vm7  ;;  %v13254_v60 = vpop.f32.mrf.mxu0 }
 0xa65   :  { %9688 = vmatmul.msk.f32.gmra.mxu1 %vm2506_vm11, %v9684_v20  ;;  %9686 = vmatmul.msk.f32.gmra.mxu0 %vm2506_vm11, %v9684_v20  ;;  %v5047_v32 = vadd.f32 %v5041_v57, %v5016_v38  ;;  %v5073_v37 = vsel %vm15451_vm14, %v5067_v62, %v13205_v49  ;;  %v5098_v20 = vpop.permute.xlu2 %5097  ;;  %v4155_v19 = vsel %vm15457_vm8, %v10320_v17, %v10321_v10  ;;  %v10446_v57 = vunpack.i.h.bf16 %v13127_v0  ;;  %vm15459_vm14 = vmmov %vm15453_vm9  ;;  %v15464_v17 = vld [vmem:[#allocation16_spill] sm:$0xff] }
 0xa66   :  { %4108 = vmatpush.msra.mxu2 %v4083_v18  ;;  %4132 = vmatpush.msra.mxu3 %v10316_v28  ;;  %v5048_v12 = vadd.f32 %v5042_v13, %v5017_v53  ;;  %v4156_v35 = vsel %vm15455_vm7, %v10440_v21, %v10441_v14  ;;  %v9701_v18 = vld [vmem:[%s15081_s5 + $0x140] sm:$0xff]  ;;  %v10445_v38 = vunpack.i.l.bf16 %v13127_v0  ;;  %v9702_v21 = vld [vmem:[%s15081_s5 + $0x148] sm:$0xff] }
 0xa67   :  { %v13221_v25 = vpop.f32.mrf.mxu2  ;;  %v5078_v51 = vadd.f32 %v5072_v1, %v5047_v32  ;;  %v15458_v1 = vld [vmem:[#allocation40_spill] sm:$0xff] }
 0xa68   :  { %4109 = vmatpush.msra.mxu2 %v4082_v2  ;;  %v5079_v28 = vadd.f32 %v5073_v37, %v5048_v12  ;;  %v9696_v2 = vld [vmem:[%s15081_s5 + $0x138] sm:$0xff]  ;;  %v10325_v32 = vunpack.i.l.bf16 %v15458_v1  ;;  %v4229_v0 = vsel %vm15459_vm14, %v10445_v38, %v10446_v57  ;;  %v10810_v12 = vld [vmem:[%s15076_s0 + $0x4] sm:$0xf] }
 0xa6b   :  { %9694 = vmatmul.msk.f32.gmra.mxu3 %vm2506_vm11, %v9690_v58  ;;  %v5096_v24 = vpop.permute.xlu1 %5095 }
 0xa6c   :  { %v5103_v62 = vsel %vm15453_vm9, %v5096_v24, %v5098_v20  ;;  %v13239_v9 = vpop.permute.xlu0 %5099  ;;  %9692 = vmatmul.msk.f32.gmra.mxu2 %vm2506_vm11, %v9690_v58  ;;  %v10326_v58 = vunpack.i.h.bf16 %v15458_v1 }
 0xa6d   :  { %9699 = vmatmul.msk.f32.vlgmr.msrb.gmra.mxu1 %vm2506_vm11, %v9695_v29  ;;  %v5109_v11 = vadd.f32 %v5103_v62, %v5078_v51  ;;  %v5104_v8 = vsel %vm15454_vm13, %v5098_v20, %v13239_v9  ;;  %9697 = vmatmul.msk.f32.vlgmr.msrb.gmra.mxu0 %vm2506_vm11, %v9695_v29  ;;  %v4961_v20 = vperm.slane %v10810_v12, 3  ;;  %v9707_v51 = vld [vmem:[%s15081_s5 + $0x150] sm:$0xff]  ;;  %v9726_v12 = vld [vmem:[%s15081_s5 + $0x188] sm:$0xff]  ;;  %vm15477_vm13 = vcmask 64512  }
 0xa6e   :  { %4204 = vmatpush.msrb.mxu1 %v10441_v14  ;;  %v5110_v31 = vadd.f32 %v5104_v8, %v5079_v28  ;;  %4181 = vmatpush.msrb.mxu0 %v4156_v35  ;;  %v4228_v29 = vsel %vm15453_vm9, %v10325_v32, %v10326_v58  ;;  %v15465_v62 = vld [vmem:[#allocation18_spill] sm:$0xff]  ;;  %v9713_v35 = vld [vmem:[%s15081_s5 + $0x160] sm:$0xff]  ;;  %v13344_v32 = vpop.f32.mrf.mxu3  ;;  %vm15478_vm7 = vmmov %vm15477_vm13 }
 0xa6f   :  { %v5112_v50 = vadd.f32 %v5109_v11, %v15456_v5  ;;  %v13247_v56 = vpop.f32.mrf.mxu2  ;;  %v4997_v28 = vmul.f32 %v15464_v17, %v4961_v20  ;;  %v4966_v11 = vmul.f32 %v4961_v20, %v15465_v62  ;;  %15468 = vst [vmem:[#allocation27_spill] sm:$0xff] %v13344_v32  ;;  %v13379_v17 = vpop.f32.mrf.mxu1  ;;  %vm15482_vm8 = vmmov %vm15478_vm7 }
 0xa70   :  { %4205 = vmatpush.msrb.mxu1 %v10321_v10  ;;  %v5113_v15 = vadd.f32 %v5110_v31, %v15456_v5  ;;  %4182 = vmatpush.msrb.mxu0 %v4155_v19  ;;  %v5028_v10 = vmul.f32 %v15463_v54, %v4961_v20  ;;  %v9708_v31 = vld [vmem:[%s15081_s5 + $0x158] sm:$0xff]  ;;  %15470 = vst [vmem:[#allocation30_spill] sm:$0xff] %v13379_v17  ;;  %vm15483_vm14 = vmmov %vm15478_vm7 }
 0xa71   :  { %v5115_v13 = vmax.f32 %v5112_v50, 0.0  ;;  %vm15490_vm9 = vmmov %vm15478_vm7 }
 0xa72   :  { %v5116_v53 = vmax.f32 %v5113_v15, 0.0  ;;  %v15466_v15 = vld [vmem:[#allocation17_spill] sm:$0xff] }
 0xa73   :  { %9705 = vmatmul.msk.f32.vlgmr.msrb.gmra.mxu3 %vm2506_vm11, %v9701_v18  ;;  %v5090_v19 = vmul.f32 %v15466_v15, %v4961_v20 }
 0xa74   :  { %4277 = vmatpush.msrb.mxu3 %v10446_v57  ;;  %v13264_v37 = vpack.i.bf16 %v5116_v53, %v5115_v13  ;;  %9703 = vmatmul.msk.f32.vlgmr.msrb.gmra.mxu2 %vm2506_vm11, %v9701_v18  ;;  %v15467_v18 = vld [vmem:[#allocation14_spill] sm:$0xff] }
 0xa75   :  { %9700 = vmatmul.msk.f32.gmra.mxu1 %vm2506_vm11, %v9696_v2  ;;  %4254 = vmatpush.msrb.mxu2 %v4229_v0  ;;  %v5059_v57 = vmul.f32 %v15467_v18, %v4961_v20  ;;  %v9720_v0 = vld [vmem:[%s15081_s5 + $0x178] sm:$0xff] }
 0xa76   :  { %4278 = vmatpush.msrb.mxu3 %v10326_v58  ;;  %10458 = vrot.lane.b32.xlu0 %v13264_v37, %s15460_s9  ;;  %v9725_v58 = vld [vmem:[%s15081_s5 + $0x180] sm:$0xff] }
 0xa77   :  { %10453 = vrot.lane.b32.xlu2 %v13264_v37, %s15461_s26  ;;  %v13274_v14 = vpop.f32.mrf.mxu2  ;;  %4255 = vmatpush.msrb.mxu2 %v4228_v29 }
 0xa78   :  { %10448 = vrot.lane.b32.xlu1 %v13264_v37, %s15462_s17  ;;  %9698 = vmatmul.msk.f32.gmra.mxu0 %vm2506_vm11, %v9696_v2  ;;  %v9714_v2 = vld [vmem:[%s15081_s5 + $0x168] sm:$0xff] }
 0xa7a   :  { %v13288_v24 = vpop.f32.mrf.mxu0 }
 0xa7b   :  { %9706 = vmatmul.msk.f32.gmra.mxu3 %vm2506_vm11, %v9702_v21 }
 0xa7c   :  { %9704 = vmatmul.msk.f32.gmra.mxu2 %vm2506_vm11, %v9702_v21 }
 0xa7d   :  { %9711 = vmatmul.msk.f32.vlgmr.msra.gmra.mxu1 %vm2506_vm11, %v9707_v51 }
 0xa7e   :  { %5039 = vrot.lane.b32.xlu0 %v5028_v10, %s15279_s18 }
 0xa7f   :  { %5008 = vrot.lane.b32.xlu2 %v4997_v28, %s15277_s16  ;;  %v13298_v8 = vpop.f32.mrf.mxu2 }
 0xa80   :  { %4977 = vrot.lane.b32.xlu1 %v4966_v11, %s15275_s22  ;;  %9709 = vmatmul.msk.f32.vlgmr.msra.gmra.mxu0 %vm2506_vm11, %v9707_v51  ;;  %v13369_v51 = vpop.f32.mrf.mxu3 }
 0xa81   :  { %15469 = vst [vmem:[#allocation28_spill] sm:$0xff] %v13369_v51 }
 0xa82   :  { %v13308_v50 = vpop.f32.mrf.mxu0 }
 0xa83   :  { %9717 = vmatmul.msk.f32.vlgmr.msra.gmra.mxu3 %vm2506_vm11, %v9713_v35 }
 0xa84   :  { %5227 = vmatpush.msra.mxu3 %v5116_v53  ;;  %9715 = vmatmul.msk.f32.vlgmr.msra.gmra.mxu2 %vm2506_vm11, %v9713_v35  ;;  %v13387_v35 = vpop.f32.mrf.mxu1 }
 0xa85   :  { %9712 = vmatmul.msk.f32.gmra.mxu1 %vm2506_vm11, %v9708_v31  ;;  %5204 = vmatpush.msra.mxu2 %v5115_v13  ;;  %v9719_v13 = vld [vmem:[%s15081_s5 + $0x170] sm:$0xff]  ;;  %15472 = vst [vmem:[#allocation23_spill] sm:$0xff] %v13387_v35 }
 0xa86   :  { %5101 = vrot.lane.b32.xlu0 %v5090_v19, %s15378_s11 }
 0xa87   :  { %10463 = vrot.lane.b32.xlu2 %v13264_v37, %s15363_s25  ;;  %v13318_v38 = vpop.f32.mrf.mxu2 }
 0xa88   :  { %5070 = vrot.lane.b32.xlu1 %v5059_v57, %s15278_s20  ;;  %9710 = vmatmul.msk.f32.gmra.mxu0 %vm2506_vm11, %v9708_v31  ;;  %v13385_v11 = vpop.f32.mrf.mxu3 }
 0xa89   :  { %15471 = vst [vmem:[#allocation39_spill] sm:$0xff] %v13385_v11 }
 0xa8a   :  { %v13328_v53 = vpop.f32.mrf.mxu0 }
 0xa8b   :  { %9718 = vmatmul.msk.f32.gmra.mxu3 %vm2506_vm11, %v9714_v2 }
 0xa8c   :  { %9716 = vmatmul.msk.f32.gmra.mxu2 %vm2506_vm11, %v9714_v2  ;;  %v13397_v57 = vpop.f32.mrf.mxu1 }
 0xa8d   :  { %9723 = vmatmul.msk.f32.vlgmr.msrb.gmra.mxu1 %vm2506_vm11, %v9719_v13  ;;  %15474 = vst [vmem:[#allocation35_spill] sm:$0xff] %v13397_v57 }
 0xa8e   :  { %10478 = vrot.lane.b32.xlu0 %v13264_v37, %s15315_s15 }
 0xa8f   :  { %10473 = vrot.lane.b32.xlu2 %v13264_v37, %s15312_s1  ;;  %v13337_v1 = vpop.f32.mrf.mxu2 }
 0xa90   :  { %10468 = vrot.lane.b32.xlu1 %v13264_v37, %s15311_s23  ;;  %9721 = vmatmul.msk.f32.vlgmr.msrb.gmra.mxu0 %vm2506_vm11, %v9719_v13  ;;  %v13393_v19 = vpop.f32.mrf.mxu3  ;;  %v2583_v13 = vadd.f32 %v13099_v27, %v13130_v55  ;;  %v5118_v27 = vld [vmem:[%s15079_s3] sm:$0xff]  ;;  %v15479_v55 = vld [vmem:[#allocation22_spill] sm:$0xff] }
 0xa91   :  { %15473 = vst [vmem:[#allocation36_spill] sm:$0xff] %v13393_v19  ;;  %v2586_v19 = vadd.f32 %v13161_v40, %v13175_v30 }
 0xa92   :  { %v13350_v29 = vpop.f32.mrf.mxu0 }
 0xa93   :  { %9729 = vmatmul.msk.f32.vlgmr.msrb.gmra.mxu3 %vm2506_vm11, %v9725_v58 }
 0xa94   :  { %9727 = vmatmul.msk.f32.vlgmr.msrb.gmra.mxu2 %vm2506_vm11, %v9725_v58  ;;  %v13410_v51 = vpop.f32.mrf.mxu1 }
 0xa95   :  { %9724 = vmatmul.msk.f32.gmra.mxu1 %vm2506_vm11, %v9720_v0  ;;  %15476 = vst [vmem:[#allocation32_spill] sm:$0xff] %v13410_v51  ;;  %v2682_v51 = vadd.f32 %v13247_v56, %v2586_v19 }
 0xa96   :  { %10493 = vrot.lane.b32.xlu0 %v13264_v37, %s15318_s29 }
 0xa97   :  { %10488 = vrot.lane.b32.xlu2 %v13264_v37, %s15317_s12  ;;  %v13359_v21 = vpop.f32.mrf.mxu2  ;;  %v2755_v17 = vadd.f32 %v13254_v60, %v2682_v51 }
 0xa98   :  { %10483 = vrot.lane.b32.xlu1 %v13264_v37, %s15316_s6  ;;  %9722 = vmatmul.msk.f32.gmra.mxu0 %vm2506_vm11, %v9720_v0  ;;  %v13403_v58 = vpop.f32.mrf.mxu3 }
 0xa99   :  { %15475 = vst [vmem:[#allocation29_spill] sm:$0xff] %v13403_v58 }
 0xa9a   :  { %v13367_v20 = vpop.f32.mrf.mxu0 }
 0xa9b   :  { %9730 = vmatmul.msk.f32.gmra.mxu3 %vm2506_vm11, %v9726_v12 }
 0xa9c   :  { %9728 = vmatmul.msk.f32.gmra.mxu2 %vm2506_vm11, %v9726_v12  ;;  %v2680_v12 = vadd.f32 %v13221_v25, %v2583_v13  ;;  %v4460_v25 = vmul.f32 %v15479_v55, %v12363_v6  ;;  %v13432_v58 = vpop.f32.mrf.mxu1  ;;  %v5119_v6 = vld [vmem:[%s15079_s3 + $0x8] sm:$0xff] }
 0xa9d   :  { %15481 = vst [vmem:[#allocation33_spill] sm:$0xff] %v13432_v58 }
 0xa9e   :  { %v2753_v57 = vadd.f32 %v13215_v4, %v2680_v12  ;;  %v4486_v4 = vadd.f32 %v12410_v47, %v4460_v25 }
 0xa9f   :  { %10498 = vrot.lane.b32.xlu2 %v13264_v37, %s15319_s30  ;;  %v13375_v54 = vpop.f32.mrf.mxu2 }
 0xaa0   :  { %v13424_v13 = vpop.f32.mrf.mxu3  ;;  %v2826_v40 = vadd.f32 %v13274_v14, %v2753_v57  ;;  %v4512_v12 = vadd.f32 %v12432_v36, %v4486_v4  ;;  %v2828_v36 = vadd.f32 %v13298_v8, %v2755_v17 }
 0xaa1   :  { %15480 = vst [vmem:[#allocation37_spill] sm:$0xff] %v13424_v13 }
 0xaa2   :  { %v13377_v10 = vpop.f32.mrf.mxu0  ;;  %v4538_v47 = vadd.f32 %v12418_v16, %v4512_v12  ;;  %v2901_v57 = vadd.f32 %v13308_v50, %v2828_v36 }
 0xaa3   :  { %9764 = vmatmul.msk.f32.vlgmr.msra.gmra.mxu3 %vm15478_vm7, %v5118_v27 }
 0xaa4   :  { %9762 = vmatmul.msk.f32.vlgmr.msra.gmra.mxu2 %vm15477_vm13, %v5118_v27  ;;  %v2899_v27 = vadd.f32 %v13288_v24, %v2826_v40  ;;  %v4564_v60 = vadd.f32 %v12455_v3, %v4538_v47  ;;  %v13457_v25 = vpop.f32.mrf.mxu1  ;;  %v2974_v3 = vadd.f32 %v13337_v1, %v2901_v57  ;;  %vm15491_vm13 = vmmov %vm15478_vm7 }
 0xaa5   :  { %15485 = vst [vmem:[#allocation25_spill] sm:$0xff] %v13457_v25 }
 0xaa6   :  { %v2972_v56 = vadd.f32 %v13318_v38, %v2899_v27  ;;  %v4590_v51 = vadd.f32 %v12464_v22, %v4564_v60 }
 0xaa7   :  { %v13381_v28 = vpop.f32.mrf.mxu2 }
 0xaa8   :  { %v13449_v24 = vpop.f32.mrf.mxu3  ;;  %v3045_v55 = vadd.f32 %v13328_v53, %v2972_v56  ;;  %v4616_v16 = vadd.f32 %v12475_v39, %v4590_v51  ;;  %v3047_v39 = vadd.f32 %v13350_v29, %v2974_v3 }
 0xaa9   :  { %15484 = vst [vmem:[#allocation34_spill] sm:$0xff] %v13449_v24 }
 0xaaa   :  { %v13383_v62 = vpop.f32.mrf.mxu0  ;;  %v4642_v38 = vadd.f32 %v12490_v41, %v4616_v16  ;;  %v3118_v17 = vadd.f32 %v13359_v21, %v3045_v55 }
 0xaab   :  { %9765 = vmatmul.msk.f32.gmra.mxu3 %vm15483_vm14, %v5119_v6  ;;  %vm15495_vm14 = vmmov %vm15478_vm7 }
 0xaac   :  { %9763 = vmatmul.msk.f32.gmra.mxu2 %vm15482_vm8, %v5119_v6  ;;  %v4668_v22 = vadd.f32 %v12505_v52, %v4642_v38  ;;  %v3191_v53 = vadd.f32 %v13367_v20, %v3118_v17  ;;  %v13478_v21 = vpop.f32.mrf.mxu1  ;;  %v3120_v52 = vadd.f32 %v13375_v54, %v3047_v39  ;;  %vm15493_vm8 = vmmov %vm15478_vm7 }
 0xaad   :  { %15487 = vst [vmem:[#allocation43_spill] sm:$0xff] %v13478_v21 }
 0xaae   :  { %v4694_v50 = vadd.f32 %v15405_v34, %v4668_v22  ;;  %v3264_v34 = vadd.f32 %v13381_v28, %v3191_v53 }
 0xaaf   :  { %v13389_v31 = vpop.f32.mrf.mxu2 }
 0xab0   :  { %v13468_v4 = vpop.f32.mrf.mxu3  ;;  %v4720_v12 = vadd.f32 %v15411_v26, %v4694_v50  ;;  %v3193_v26 = vadd.f32 %v13377_v10, %v3120_v52  ;;  %v3337_v20 = vadd.f32 %v13383_v62, %v3264_v34 }
 0xab1   :  { %15486 = vst [vmem:[#allocation41_spill] sm:$0xff] %v13468_v4 }
 0xab2   :  { %v13391_v15 = vpop.f32.mrf.mxu0  ;;  %v4746_v1 = vadd.f32 %v15417_v42, %v4720_v12 }
 0xab4   :  { %v4772_v6 = vadd.f32 %v12687_v43, %v4746_v1  ;;  %v3266_v43 = vadd.f32 %v13389_v31, %v3193_v26  ;;  %v13496_v10 = vpop.f32.mrf.mxu1 }
 0xab5   :  { %15489 = vst [vmem:[#allocation38_spill] sm:$0xff] %v13496_v10 }
 0xab6   :  { %v4798_v29 = vadd.f32 %v12715_v48, %v4772_v6  ;;  %v3339_v39 = vadd.f32 %v13391_v15, %v3266_v43 }
 0xab7   :  { %v13395_v18 = vpop.f32.mrf.mxu2 }
 0xab8   :  { %v4824_v36 = vadd.f32 %v12758_v33, %v4798_v29  ;;  %v13489_v56 = vpop.f32.mrf.mxu3  ;;  %v3410_v51 = vadd.f32 %v13395_v18, %v3337_v20  ;;  %v9757_v20 = vld [vmem:[%s15079_s3 + $0x18] sm:$0xff] }
 0xab9   :  { %15488 = vst [vmem:[#allocation44_spill] sm:$0xff] %v13489_v56 }
 0xaba   :  { %v13399_v2 = vpop.f32.mrf.mxu0  ;;  %v4850_v54 = vadd.f32 %v12777_v23, %v4824_v36  ;;  %v9756_v23 = vld [vmem:[%s15079_s3 + $0x10] sm:$0xff] }
 0xabb   :  { %v3483_v53 = vadd.f32 %v13399_v2, %v3410_v51 }
 0xabc   :  { %v4876_v3 = vadd.f32 %v12827_v61, %v4850_v54  ;;  %v9772_v61 = vld [vmem:[%s15079_s3 + $0x30] sm:$0xff]  ;;  %v13533_v54 = vpop.f32.mrf.mxu1 }
 0xabd   :  { %15494 = vst [vmem:[#allocation46_spill] sm:$0xff] %v13533_v54 }
 0xabf   :  { %v13405_v0 = vpop.f32.mrf.mxu2 }
 0xac0   :  { %v13521_v52 = vpop.f32.mrf.mxu3  ;;  %v3412_v6 = vadd.f32 %v13405_v0, %v3339_v39 }
 0xac1   :  { %15492 = vst [vmem:[#allocation45_spill] sm:$0xff] %v13521_v52 }
 0xac2   :  { %v13408_v35 = vpop.f32.mrf.mxu0 }
 0xac3   :  { %v3485_v0 = vadd.f32 %v13408_v35, %v3412_v6 }
 0xac7   :  { %v13415_v11 = vpop.f32.mrf.mxu2 }
 0xaca   :  { %v13428_v30 = vpop.f32.mrf.mxu0 }
 0xacf   :  { %v13436_v32 = vpop.f32.mrf.mxu2 }
 0xad1   :  { %v13452_v19 = vpop.permute.xlu2 %10453 }
 0xad2   :  { %v13446_v14 = vpop.f32.mrf.mxu0  ;;  %v10456_v62 = vunpack.i.h.bf16 %v13452_v19  ;;  %v10455_v33 = vunpack.i.l.bf16 %v13452_v19  ;;  %v4902_v19 = vadd.f32 %v12841_v44, %v4876_v3 }
 0xad4   :  { %v5241_v12 = vsel %vm119_vm1, %v10455_v33, %v10456_v62  ;;  %v4928_v1 = vadd.f32 %v12881_v45, %v4902_v19  ;;  %v3556_v45 = vadd.f32 %v13415_v11, %v3483_v53 }
 0xad6   :  { %v4954_v2 = vadd.f32 %v15443_v46, %v4928_v1 }
 0xad7   :  { %v13459_v8 = vpop.f32.mrf.mxu2 }
 0xad9   :  { %v13473_v27 = vpop.permute.xlu2 %5008 }
 0xada   :  { %v13465_v40 = vpop.f32.mrf.mxu0  ;;  %v5012_v46 = vsel %vm662_vm12, %v13113_v7, %v13473_v27  ;;  %v3558_v27 = vadd.f32 %v13436_v32, %v3485_v0 }
 0xadf   :  { %v13475_v41 = vpop.f32.mrf.mxu2 }
 0xae1   :  { %v10464_v60 = vpop.permute.xlu2 %10463 }
 0xae2   :  { %v13483_v47 = vpop.f32.mrf.mxu0  ;;  %v10466_v31 = vunpack.i.h.bf16 %v10464_v60  ;;  %v10465_v17 = vunpack.i.l.bf16 %v10464_v60 }
 0xae4   :  { %v5371_v15 = vsel %vm175_vm3, %v10465_v17, %v10466_v31 }
 0xae7   :  { %v13491_v42 = vpop.f32.mrf.mxu2 }
 0xae8   :  { %v10459_v28 = vpop.permute.xlu0 %10458 }
 0xae9   :  { %v10461_v57 = vunpack.i.h.bf16 %v10459_v28  ;;  %v10460_v48 = vunpack.i.l.bf16 %v10459_v28  ;;  %v3629_v28 = vadd.f32 %v13428_v30, %v3556_v45  ;;  %v10474_v43 = vpop.permute.xlu2 %10473 }
 0xaea   :  { %v10449_v55 = vpop.permute.xlu1 %10448  ;;  %v13505_v22 = vpop.f32.mrf.mxu0  ;;  %v10475_v33 = vunpack.i.l.bf16 %v10474_v43 }
 0xaeb   :  { %v10451_v16 = vunpack.i.h.bf16 %v10449_v55  ;;  %v10450_v38 = vunpack.i.l.bf16 %v10449_v55  ;;  %5353 = vmatpush.msrb.mxu3 %v10461_v57  ;;  %v5306_v18 = vsel %vm147_vm2, %v10460_v48, %v10461_v57  ;;  %v13554_v55 = vpop.f32.mrf.mxu3  ;;  %v3702_v30 = vadd.f32 %v13459_v8, %v3629_v28 }
 0xaec   :  { %5330 = vmatpush.msrb.mxu2 %v5306_v18  ;;  %9776 = vmatmul.msk.f32.vlgmr.msrb.gmra.mxu3 %vm15493_vm8, %v9772_v61  ;;  %15498 = vst [vmem:[#allocation48_spill] sm:$0xff] %v13554_v55  ;;  %vm15499_vm8 = vcmask 367616   ;;  %v3631_v8 = vadd.f32 %v13446_v14, %v3558_v27 }
 0xaed   :  { %5175 = vmatpush.msra.mxu1 %v10451_v16  ;;  %v5128_v50 = vsel %vm91_vm0, %v10450_v38, %v10451_v16  ;;  %9774 = vmatmul.msk.f32.vlgmr.msrb.gmra.mxu2 %vm15478_vm7, %v9772_v61  ;;  %v3775_v17 = vadd.f32 %v13465_v40, %v3702_v30 }
 0xaee   :  { %5152 = vmatpush.msra.mxu0 %v5128_v50  ;;  %9760 = vmatmul.msk.f32.vlgmr.msra.gmra.mxu1 %vm15490_vm9, %v9756_v23  ;;  %vm15496_vm9 = vmmov %vm15478_vm7  ;;  %v3704_v14 = vadd.f32 %v13475_v41, %v3631_v8 }
 0xaef   :  { %5288 = vmatpush.msrb.mxu1 %v10456_v62  ;;  %9758 = vmatmul.msk.f32.vlgmr.msra.gmra.mxu0 %vm15491_vm13, %v9756_v23  ;;  %v13518_v44 = vpop.f32.mrf.mxu2  ;;  %vm15497_vm13 = vmmov %vm15478_vm7  ;;  %v10476_v62 = vunpack.i.h.bf16 %v10474_v43  ;;  %v3848_v40 = vadd.f32 %v13491_v42, %v3775_v17  ;;  %v9784_v42 = vld [vmem:[%s15079_s3 + $0x50] sm:$0xff]  ;;  %v9778_v43 = vld [vmem:[%s15079_s3 + $0x40] sm:$0xff] }
 0xaf0   :  { %5265 = vmatpush.msrb.mxu0 %v5241_v12  ;;  %v5040_v34 = vpop.permute.xlu0 %5039  ;;  %v3777_v45 = vadd.f32 %v13483_v47, %v3704_v14 }
 0xaf1   :  { %5418 = vmatpush.msra.mxu1 %v10466_v31  ;;  %v5043_v7 = vsel %vm695_vm10, %v13159_v59, %v5040_v34  ;;  %v9766_v59 = vld [vmem:[%s15079_s3 + $0x20] sm:$0xff]  ;;  %v13565_v31 = vpop.f32.mrf.mxu1  ;;  %v10489_v19 = vpop.permute.xlu2 %10488  ;;  %v9767_v34 = vld [vmem:[%s15079_s3 + $0x28] sm:$0xff] }
 0xaf2   :  { %5395 = vmatpush.msra.mxu0 %v5371_v15  ;;  %v4978_v29 = vpop.permute.xlu1 %4977  ;;  %15502 = vst [vmem:[#allocation47_spill] sm:$0xff] %v13565_v31  ;;  %v10490_v6 = vunpack.i.l.bf16 %v10489_v19  ;;  %v3850_v47 = vadd.f32 %v13518_v44, %v3777_v45  ;;  %v9785_v44 = vld [vmem:[%s15079_s3 + $0x58] sm:$0xff] }
 0xaf3   :  { %v4981_v26 = vsel %vm629_vm15, %v15448_v63, %v4978_v29  ;;  %v9773_v63 = vld [vmem:[%s15079_s3 + $0x38] sm:$0xff] }
 0xaf4   :  { %v4987_v36 = vadd.f32 %v4981_v26, %v4954_v2  ;;  %9777 = vmatmul.msk.f32.gmra.mxu3 %vm15478_vm7, %v9773_v63  ;;  %v10491_v2 = vunpack.i.h.bf16 %v10489_v19  ;;  %v3921_v26 = vadd.f32 %v13505_v22, %v3848_v40  ;;  %v9790_v40 = vld [vmem:[%s15079_s3 + $0x60] sm:$0xff]  ;;  %v15531_v45 = vld [vmem:[#allocation31_spill] sm:$0xff] }
 0xaf5   :  { %v13540_v11 = vpop.f32.mrf.mxu0  ;;  %9775 = vmatmul.msk.f32.gmra.mxu2 %vm15497_vm13, %v9773_v63  ;;  %vm15503_vm13 = vmmov %vm15478_vm7 }
 0xaf6   :  { %v5018_v60 = vadd.f32 %v5012_v46, %v4987_v36  ;;  %9761 = vmatmul.msk.f32.gmra.mxu1 %vm15495_vm14, %v9757_v20  ;;  %vm15500_vm14 = vcmask 359424  }
 0xaf7   :  { %9759 = vmatmul.msk.f32.gmra.mxu0 %vm15496_vm9, %v9757_v20  ;;  %v13547_v51 = vpop.f32.mrf.mxu2  ;;  %vm15501_vm9 = vmmov %vm15478_vm7 }
 0xaf8   :  { %v5102_v35 = vpop.permute.xlu0 %5101  ;;  %v5049_v57 = vadd.f32 %v5043_v7, %v5018_v60  ;;  %v3994_v22 = vadd.f32 %v13547_v51, %v3921_v26 }
 0xaf9   :  { %v5105_v32 = vsel %vm15500_vm14, %v13239_v9, %v5102_v35  ;;  %vm15506_vm14 = vmmov %vm15478_vm7  ;;  %v13598_v46 = vpop.f32.mrf.mxu1  ;;  %v3923_v35 = vadd.f32 %v13540_v11, %v3850_v47  ;;  %v9802_v47 = vld [vmem:[%s15079_s3 + $0x80] sm:$0xff] }
 0xafa   :  { %v5071_v48 = vpop.permute.xlu1 %5070  ;;  %15508 = vst [vmem:[#allocation42_spill] sm:$0xff] %v13598_v46 }
 0xafb   :  { %v5074_v16 = vsel %vm15499_vm8, %v13205_v49, %v5071_v48  ;;  %v5501_v49 = vsel %vm15215_vm5, %v10475_v33, %v10476_v62  ;;  %vm15505_vm8 = vmmov %vm15478_vm7  ;;  %v13622_v48 = vpop.permute.xlu2 %10498 }
 0xafc   :  { %v5080_v38 = vadd.f32 %v5074_v16, %v5049_v57  ;;  %v10500_v11 = vunpack.i.l.bf16 %v13622_v48 }
 0xafd   :  { %v4038_v3 = vpop.f32.mrf.mxu0 }
 0xafe   :  { %v5111_v23 = vadd.f32 %v5105_v32, %v5080_v38  ;;  %9770 = vmatmul.msk.f32.vlgmr.msrb.gmra.mxu1 %vm15501_vm9, %v9766_v59  ;;  %vm15507_vm9 = vmmov %vm15478_vm7  ;;  %v4067_v27 = vadd.f32 %v4038_v3, %v3994_v22  ;;  %v9779_v38 = vld [vmem:[%s15079_s3 + $0x48] sm:$0xff]  ;;  %v9796_v32 = vld [vmem:[%s15079_s3 + $0x70] sm:$0xff] }
 0xaff   :  { %5548 = vmatpush.msrb.mxu1 %v10476_v62  ;;  %9768 = vmatmul.msk.f32.vlgmr.msrb.gmra.mxu0 %vm15503_vm13, %v9766_v59  ;;  %v3968_v50 = vpop.f32.mrf.mxu2  ;;  %vm15509_vm13 = vcmask 850944   ;;  %v10501_v59 = vunpack.i.h.bf16 %v13622_v48 }
 0xb00   :  { %v5114_v18 = vadd.f32 %v5111_v23, %v15456_v5  ;;  %5525 = vmatpush.msrb.mxu0 %v5501_v49  ;;  %v10479_v9 = vpop.permute.xlu0 %10478  ;;  %v13583_v5 = vpop.f32.mrf.mxu3  ;;  %v5696_v0 = vsel %vm15509_vm13, %v10490_v6, %v10491_v2  ;;  %vm15514_vm13 = vmmov %vm15505_vm8  ;;  %v3996_v33 = vadd.f32 %v3968_v50, %v3923_v35 }
 0xb01   :  { %v10481_v61 = vunpack.i.h.bf16 %v10479_v9  ;;  %v10480_v53 = vunpack.i.l.bf16 %v10479_v9  ;;  %15504 = vst [vmem:[#allocation50_spill] sm:$0xff] %v13583_v5  ;;  %v13625_v62 = vpop.f32.mrf.mxu1 }
 0xb02   :  { %v13572_v39 = vmax.f32 %v5114_v18, 0.0  ;;  %v10469_v12 = vpop.permute.xlu1 %10468  ;;  %15515 = vst [vmem:[#allocation49_spill] sm:$0xff] %v13625_v62 }
 0xb03   :  { %v10471_v1 = vunpack.i.h.bf16 %v10469_v12  ;;  %v10470_v15 = vunpack.i.l.bf16 %v10469_v12  ;;  %v5566_v29 = vsel %vm15214_vm6, %v10480_v53, %v10481_v61  ;;  %v15522_v53 = vld [vmem:[#allocation21_spill] sm:$0xff] }
 0xb04   :  { %5898 = vrot.lane.b32.xlu2 %v13572_v39, %s15348_s4  ;;  %5830 = vrot.lane.b32.xlu0 %v13572_v39, %s15319_s30 }
 0xb05   :  { %5762 = vrot.lane.b32.xlu1 %v13572_v39, %s15318_s29  ;;  %5483 = vmatpush.msra.mxu3 %v10471_v1  ;;  %v5436_v41 = vsel %vm203_vm4, %v10470_v15, %v10471_v1  ;;  %v4041_v36 = vpop.f32.mrf.mxu0 }
 0xb06   :  { %9771 = vmatmul.msk.f32.gmra.mxu1 %vm15478_vm7, %v9767_v34  ;;  %5460 = vmatpush.msra.mxu2 %v5436_v41  ;;  %vm15510_vm7 = vcmask 859136   ;;  %v4069_v23 = vadd.f32 %v4041_v36, %v3996_v33  ;;  %v9815_v33 = vld [vmem:[%s15079_s3 + $0xa8] sm:$0xff] }
 0xb07   :  { %5613 = vmatpush.msrb.mxu3 %v10481_v61  ;;  %9769 = vmatmul.msk.f32.gmra.mxu0 %vm15505_vm8, %v9767_v34  ;;  %v4111_v20 = vpop.f32.mrf.mxu2  ;;  %v9797_v34 = vld [vmem:[%s15079_s3 + $0x78] sm:$0xff] }
 0xb08   :  { %9786 = vmatmul.msk.f32.vlgmr.msra.gmra.mxu2 %vm15506_vm14, %v9784_v42  ;;  %9788 = vmatmul.msk.f32.vlgmr.msra.gmra.mxu3 %vm15507_vm9, %v9784_v42  ;;  %v13617_v7 = vpop.f32.mrf.mxu3  ;;  %vm15512_vm14 = vmmov %vm15505_vm8  ;;  %v4140_v16 = vadd.f32 %v4111_v20, %v4067_v27  ;;  %v13643_v8 = vpop.permute.xlu0 %10493  ;;  %v9791_v20 = vld [vmem:[%s15079_s3 + $0x68] sm:$0xff]  ;;  %v9814_v27 = vld [vmem:[%s15079_s3 + $0xa0] sm:$0xff] }
 0xb09   :  { %5590 = vmatpush.msrb.mxu2 %v5566_v29  ;;  %5743 = vmatpush.msra.mxu3 %v10491_v2  ;;  %15511 = vst [vmem:[#allocation51_spill] sm:$0xff] %v13617_v7  ;;  %vm15513_vm9 = vmmov %vm15505_vm8  ;;  %v10496_v9 = vunpack.i.h.bf16 %v13643_v8  ;;  %v10495_v19 = vunpack.i.l.bf16 %v13643_v8  ;;  %v13662_v1 = vpop.f32.mrf.mxu1 }
 0xb0a   :  { %v10484_v60 = vpop.permute.xlu1 %10483  ;;  %15523 = vst [vmem:[#allocation24_spill] sm:$0xff] %v13662_v1 }
 0xb0b   :  { %5720 = vmatpush.msra.mxu2 %v5696_v0  ;;  %v10486_v63 = vunpack.i.h.bf16 %v10484_v60  ;;  %v10485_v28 = vunpack.i.l.bf16 %v10484_v60  ;;  %v9808_v0 = vld [vmem:[%s15079_s3 + $0x90] sm:$0xff] }
 0xb0c   :  { %10513 = vrot.lane.b32.xlu2 %v13264_v37, %s15351_s13  ;;  %10508 = vrot.lane.b32.xlu0 %v13264_v37, %s15352_s14 }
 0xb0d   :  { %10503 = vrot.lane.b32.xlu1 %v13264_v37, %s15348_s4  ;;  %v5631_v51 = vsel %vm15510_vm7, %v10485_v28, %v10486_v63  ;;  %v4184_v30 = vpop.f32.mrf.mxu0  ;;  %vm15516_vm7 = vmmov %vm15505_vm8 }
 0xb0e   :  { %9782 = vmatmul.msk.f32.vlgmr.msra.gmra.mxu1 %vm15505_vm8, %v9778_v43  ;;  %v4213_v3 = vadd.f32 %v4184_v30, %v4140_v16  ;;  %vm15517_vm8 = vmmov %vm15516_vm7 }
 0xb0f   :  { %5678 = vmatpush.msra.mxu1 %v10486_v63  ;;  %9780 = vmatmul.msk.f32.vlgmr.msra.gmra.mxu0 %vm15512_vm14, %v9778_v43  ;;  %v4114_v57 = vpop.f32.mrf.mxu2  ;;  %vm15518_vm14 = vmmov %vm15516_vm7  ;;  %v9809_v63 = vld [vmem:[%s15079_s3 + $0x98] sm:$0xff]  ;;  %v9803_v43 = vld [vmem:[%s15079_s3 + $0x88] sm:$0xff] }
 0xb10   :  { %9787 = vmatmul.msk.f32.gmra.mxu2 %vm15513_vm9, %v9785_v44  ;;  %5655 = vmatpush.msra.mxu0 %v5631_v51  ;;  %vm15519_vm9 = vcmask 711680   ;;  %v13649_v18 = vpop.f32.mrf.mxu3  ;;  %v4142_v61 = vadd.f32 %v4114_v57, %v4069_v23  ;;  %vm15529_vm6 = vmmov %vm15516_vm7  ;;  %v9821_v57 = vld [vmem:[%s15079_s3 + $0xb8] sm:$0xff] }
 0xb11   :  { %9789 = vmatmul.msk.f32.gmra.mxu3 %vm15514_vm13, %v9785_v44  ;;  %v5832_v17 = vsel %vm15519_vm9, %v10500_v11, %v10501_v59  ;;  %15520 = vst [vmem:[#allocation15_spill] sm:$0xff] %v13649_v18  ;;  %vm15521_vm13 = vmmov %vm15516_vm7  ;;  %vm15527_vm9 = vcmask 719872   ;;  %v13698_v60 = vpop.f32.mrf.mxu1  ;;  %v9820_v44 = vld [vmem:[%s15079_s3 + $0xb0] sm:$0xff] }
 0xb12   :  { %v5764_v6 = vsel %vm15527_vm9, %v10495_v19, %v10496_v9  ;;  %15533 = vst [vmem:[#allocation18_spill] sm:$0xff] %v13698_v60  ;;  %vm15537_vm9 = vmmov %vm15529_vm6 }
 0xb14   :  { %6102 = vrot.lane.b32.xlu2 %v13572_v39, %s15350_s28  ;;  %6034 = vrot.lane.b32.xlu0 %v13572_v39, %s15351_s13 }
 0xb15   :  { %5966 = vrot.lane.b32.xlu1 %v13572_v39, %s15352_s14  ;;  %v4187_v14 = vpop.f32.mrf.mxu0 }
 0xb16   :  { %9783 = vmatmul.msk.f32.gmra.mxu1 %vm15516_vm7, %v9779_v38  ;;  %v4215_v2 = vadd.f32 %v4187_v14, %v4142_v61 }
 0xb17   :  { %9781 = vmatmul.msk.f32.gmra.mxu0 %vm15517_vm8, %v9779_v38  ;;  %v4257_v49 = vpop.f32.mrf.mxu2  ;;  %vm15525_vm8 = vmmov %vm15516_vm7 }
 0xb18   :  { %9798 = vmatmul.msk.f32.vlgmr.msrb.gmra.mxu2 %vm15518_vm14, %v9796_v32  ;;  %v4286_v50 = vadd.f32 %v4257_v49, %v4213_v3  ;;  %vm15526_vm14 = vmmov %vm15516_vm7  ;;  %v13680_v29 = vpop.f32.mrf.mxu3 }
 0xb19   :  { %5857 = vmatpush.msrb.mxu2 %v5832_v17  ;;  %9800 = vmatmul.msk.f32.vlgmr.msrb.gmra.mxu3 %vm15521_vm13, %v9796_v32  ;;  %vm15528_vm13 = vmmov %vm15516_vm7  ;;  %15530 = vst [vmem:[#allocation20_spill] sm:$0xff] %v13680_v29  ;;  %v13722_v28 = vpop.f32.mrf.mxu1 }
 0xb1a   :  { %v4300_v12 = vadd.f32 %v15522_v53, %v4286_v50  ;;  %15542 = vst [vmem:[#allocation14_spill] sm:$0xff] %v13722_v28 }
 0xb1c   :  { %10528 = vrot.lane.b32.xlu2 %v13264_v37, %s15353_s27  ;;  %10523 = vrot.lane.b32.xlu0 %v13264_v37, %s15273_s2  ;;  %v13664_v15 = vmax.f32 %v4300_v12, 0.0 }
 0xb1d   :  { %10518 = vrot.lane.b32.xlu1 %v13264_v37, %s15350_s28 }
 0xb1e   :  { %15524 = vst [vmem:[#allocation40_spill] sm:$0xff] %v13664_v15  ;;  %9794 = vmatmul.msk.f32.vlgmr.msrb.gmra.mxu1 %vm15516_vm7, %v9790_v40  ;;  %vm15534_vm7 = vmmov %vm15529_vm6 }
 0xb1f   :  { %4308 = vst.msk [vmem:[#allocation2] sm:$0xff] %vm15525_vm8, %v13664_v15  ;;  %9792 = vmatmul.msk.f32.vlgmr.msrb.gmra.mxu0 %vm15526_vm14, %v9790_v40  ;;  %v4260_v41 = vpop.f32.mrf.mxu2  ;;  %vm15535_vm8 = vmmov %vm15529_vm6 }
 0xb20   :  { %5789 = vmatpush.msrb.mxu0 %v5764_v6  ;;  %9799 = vmatmul.msk.f32.gmra.mxu2 %vm15528_vm13, %v9797_v34  ;;  %v4288_v42 = vadd.f32 %v4260_v41, %v4215_v2  ;;  %vm15536_vm14 = vmmov %vm15529_vm6  ;;  %v13712_v22 = vpop.f32.mrf.mxu3 }
 0xb21   :  { %9801 = vmatmul.msk.f32.gmra.mxu3 %vm15529_vm6, %v9797_v34  ;;  %15539 = vst [vmem:[#allocation17_spill] sm:$0xff] %v13712_v22  ;;  %vm15540_vm13 = vmmov %vm15529_vm6  ;;  %v13742_v35 = vpop.f32.mrf.mxu1 }
 0xb22   :  { %v4302_v26 = vadd.f32 %v15531_v45, %v4288_v42  ;;  %15548 = vst [vmem:[#allocation52_spill] sm:$0xff] %v13742_v35 }
 0xb24   :  { %6306 = vrot.lane.b32.xlu2 %v13572_v39, %s15274_s19  ;;  %6238 = vrot.lane.b32.xlu0 %v13572_v39, %s15353_s27  ;;  %v13690_v36 = vmax.f32 %v4302_v26, 0.0 }
 0xb25   :  { %6170 = vrot.lane.b32.xlu1 %v13572_v39, %s15273_s2 }
 0xb26   :  { %15532 = vst [vmem:[#allocation16_spill] sm:$0xff] %v13690_v36  ;;  %9795 = vmatmul.msk.f32.gmra.mxu1 %vm15529_vm6, %v9791_v20 }
 0xb27   :  { %4309 = vst.msk [vmem:[#allocation2 + $0x8] sm:$0xff] %vm15534_vm7, %v13690_v36  ;;  %9793 = vmatmul.msk.f32.gmra.mxu0 %vm15535_vm8, %v9791_v20  ;;  %vm15541_vm7 = vmmov %vm15529_vm6 }
 0xb28   :  { %9810 = vmatmul.msk.f32.vlgmr.msra.gmra.mxu2 %vm15536_vm14, %v9808_v0  ;;  %vm15543_vm8 = vmmov %vm15529_vm6  ;;  %v13738_v51 = vpop.f32.mrf.mxu3 }
 0xb29   :  { %9812 = vmatmul.msk.f32.vlgmr.msra.gmra.mxu3 %vm15537_vm9, %v9808_v0  ;;  %vm15544_vm14 = vmmov %vm15529_vm6  ;;  %15545 = vst [vmem:[#allocation22_spill] sm:$0xff] %v13738_v51  ;;  %v13767_v16 = vpop.f32.mrf.mxu1 }
 0xb2a   :  { %vm15546_vm9 = vmmov %vm15529_vm6  ;;  %15551 = vst [vmem:[#allocation54_spill] sm:$0xff] %v13767_v16 }
 0xb2c   :  { %10543 = vrot.lane.b32.xlu2 %v13264_v37, %s15275_s22  ;;  %10538 = vrot.lane.b32.xlu0 %v13264_v37, %s15538_s24 }
 0xb2d   :  { %10533 = vrot.lane.b32.xlu1 %v13264_v37, %s15274_s19 }
 0xb2e   :  { %9806 = vmatmul.msk.f32.vlgmr.msra.gmra.mxu1 %vm15540_vm13, %v9802_v47  ;;  %vm15547_vm13 = vmmov %vm15529_vm6 }
 0xb2f   :  { %9804 = vmatmul.msk.f32.vlgmr.msra.gmra.mxu0 %vm15529_vm6, %v9802_v47 }
 0xb30   :  { %9811 = vmatmul.msk.f32.gmra.mxu2 %vm15541_vm7, %v9809_v63  ;;  %vm15549_vm7 = vmmov %vm15529_vm6  ;;  %v13758_v30 = vpop.f32.mrf.mxu3 }
 0xb31   :  { %9813 = vmatmul.msk.f32.gmra.mxu3 %vm15543_vm8, %v9809_v63  ;;  %15550 = vst [vmem:[#allocation53_spill] sm:$0xff] %v13758_v30  ;;  %vm15552_vm8 = vmmov %vm15529_vm6  ;;  %v13780_v38 = vpop.f32.mrf.mxu1 }
 0xb32   :  { %15554 = vst [vmem:[#allocation56_spill] sm:$0xff] %v13780_v38 }
 0xb34   :  { %6510 = vrot.lane.b32.xlu2 %v13572_v39, %s15277_s16  ;;  %6442 = vrot.lane.b32.xlu0 %v13572_v39, %s15275_s22 }
 0xb35   :  { %6374 = vrot.lane.b32.xlu1 %v13572_v39, %s15538_s24 }
 0xb36   :  { %9807 = vmatmul.msk.f32.gmra.mxu1 %vm15544_vm14, %v9803_v43  ;;  %vm15563_vm14 = vcmask 711680  }
 0xb37   :  { %9805 = vmatmul.msk.f32.gmra.mxu0 %vm15546_vm9, %v9803_v43  ;;  %vm15564_vm9 = vcmask 719872  }
 0xb38   :  { %9822 = vmatmul.msk.f32.vlgmr.msrb.gmra.mxu2 %vm15547_vm13, %v9820_v44  ;;  %v13772_v11 = vpop.f32.mrf.mxu3  ;;  %vm15565_vm13 = vmmov %vm15529_vm6 }
 0xb39   :  { %15553 = vst [vmem:[#allocation55_spill] sm:$0xff] %v13772_v11  ;;  %v13788_v32 = vpop.f32.mrf.mxu1 }
 0xb3a   :  { %15556 = vst [vmem:[#allocation58_spill] sm:$0xff] %v13788_v32 }
 0xb3c   :  { %10558 = vrot.lane.b32.xlu2 %v13264_v37, %s15278_s20  ;;  %10553 = vrot.lane.b32.xlu0 %v13264_v37, %s15279_s18 }
 0xb3d   :  { %10548 = vrot.lane.b32.xlu1 %v13264_v37, %s15277_s16 }
 0xb3f   :  { %9816 = vmatmul.msk.f32.vlgmr.msrb.gmra.mxu0 %vm15529_vm6, %v9814_v27 }
 0xb40   :  { %9823 = vmatmul.msk.f32.gmra.mxu2 %vm15549_vm7, %v9821_v57  ;;  %vm15568_vm7 = vmmov %vm15529_vm6 }
 0xb41   :  { %v13792_v17 = vpop.f32.mrf.mxu1 }
 0xb42   :  { %15558 = vst [vmem:[#allocation60_spill] sm:$0xff] %v13792_v17 }
 0xb44   :  { %6714 = vrot.lane.b32.xlu2 %v13572_v39, %s15378_s11  ;;  %6646 = vrot.lane.b32.xlu0 %v13572_v39, %s15278_s20 }
 0xb45   :  { %6578 = vrot.lane.b32.xlu1 %v13572_v39, %s15279_s18  ;;  %v13784_v39 = vpop.f32.mrf.mxu3 }
 0xb46   :  { %15555 = vst [vmem:[#allocation57_spill] sm:$0xff] %v13784_v39 }
 0xb47   :  { %9817 = vmatmul.msk.f32.gmra.mxu0 %vm15552_vm8, %v9815_v33  ;;  %vm15569_vm8 = vcmask 695296  }
 0xb4c   :  { %4314 = vrot.lane.b32.xlu0 %v13690_v36, %s15221_s8  ;;  %4312 = vrot.lane.b32.xlu2 %v13664_v15, %s15221_s8 }
 0xb4d   :  { %10563 = vrot.lane.b32.xlu1 %v13264_v37, %s15378_s11  ;;  %v13790_v3 = vpop.f32.mrf.mxu3  ;;  %v13796_v37 = vpop.f32.mrf.mxu1 }
 0xb4e   :  { %15557 = vst [vmem:[#allocation59_spill] sm:$0xff] %v13790_v3 }
 0xb4f   :  { %15560 = vst [vmem:[#allocation62_spill] sm:$0xff] %v13796_v37 }
 0xb54   :  { %4323 = vrot.lane.b32.xlu2 %v13690_v36, %s15317_s12 }
 0xb55   :  { %4321 = vrot.lane.b32.xlu1 %v13664_v15, %s15317_s12  ;;  %v13794_v50 = vpop.f32.mrf.mxu3  ;;  %v13804_v40 = vpop.f32.mrf.mxu1 }
 0xb56   :  { %15559 = vst [vmem:[#allocation61_spill] sm:$0xff] %v13794_v50 }
 0xb57   :  { %15562 = vst [vmem:[#allocation64_spill] sm:$0xff] %v13804_v40 }
 0xb5d   :  { %v13800_v61 = vpop.f32.mrf.mxu3  ;;  %v13818_v43 = vpop.f32.mrf.mxu1 }
 0xb5e   :  { %v5899_v23 = vpop.permute.xlu2 %5898  ;;  %15561 = vst [vmem:[#allocation63_spill] sm:$0xff] %v13800_v61 }
 0xb5f   :  { %15567 = vst [vmem:[#allocation66_spill] sm:$0xff] %v13818_v43 }
 0xb65   :  { %v13814_v41 = vpop.f32.mrf.mxu3 }
 0xb66   :  { %v10514_v49 = vpop.permute.xlu2 %10513  ;;  %15566 = vst [vmem:[#allocation65_spill] sm:$0xff] %v13814_v41 }
 0xb67   :  { %v10515_v47 = vunpack.i.l.bf16 %v10514_v49 }
 0xb6e   :  { %v13798_v19 = vpop.permute.xlu2 %6102 }
 0xb76   :  { %v13802_v12 = vpop.permute.xlu2 %10528  ;;  %v5831_v14 = vpop.permute.xlu0 %5830 }
 0xb77   :  { %v5833_v34 = vsel %vm15563_vm14, %v10501_v59, %v5831_v14  ;;  %v5763_v2 = vpop.permute.xlu1 %5762  ;;  %v10516_v59 = vunpack.i.h.bf16 %v10514_v49  ;;  %vm15570_vm14 = vmmov %vm15529_vm6 }
 0xb78   :  { %v5765_v6 = vsel %vm15564_vm9, %v10496_v9, %v5763_v2  ;;  %5880 = vmatpush.msrb.mxu3 %v5833_v34  ;;  %vm15571_vm9 = vcmask 703488  }
 0xb79   :  { %5812 = vmatpush.msrb.mxu1 %v5765_v6  ;;  %9824 = vmatmul.msk.f32.vlgmr.msrb.gmra.mxu3 %vm15565_vm13, %v9820_v44  ;;  %v9826_v44 = vld [vmem:[%s15079_s3 + $0xc0] sm:$0xff]  ;;  %vm15572_vm13 = vmmov %vm15571_vm9 }
 0xb7a   :  { %9818 = vmatmul.msk.f32.vlgmr.msrb.gmra.mxu1 %vm15529_vm6, %v9814_v27  ;;  %v9832_v27 = vld [vmem:[%s15079_s3 + $0xd0] sm:$0xff] }
 0xb7e   :  { %v13816_v42 = vpop.permute.xlu2 %6306  ;;  %v10509_v26 = vpop.permute.xlu0 %10508 }
 0xb7f   :  { %v10511_v20 = vunpack.i.h.bf16 %v10509_v26  ;;  %v10510_v48 = vunpack.i.l.bf16 %v10509_v26  ;;  %v10504_v0 = vpop.permute.xlu1 %10503  ;;  %v13837_v26 = vpop.f32.mrf.mxu3 }
 0xb80   :  { %v10506_v63 = vunpack.i.h.bf16 %v10504_v0  ;;  %v10505_v8 = vunpack.i.l.bf16 %v10504_v0  ;;  %15576 = vst [vmem:[#allocation67_spill] sm:$0xff] %v13837_v26  ;;  %v9833_v0 = vld [vmem:[%s15079_s3 + $0xd8] sm:$0xff] }
 0xb81   :  { %9825 = vmatmul.msk.f32.gmra.mxu3 %vm15568_vm7, %v9821_v57  ;;  %v5968_v9 = vsel %vm15569_vm8, %v10510_v48, %v10511_v20  ;;  %vm15573_vm7 = vmmov %vm15529_vm6  ;;  %vm15574_vm8 = vcmask 687104   ;;  %v9827_v48 = vld [vmem:[%s15079_s3 + $0xc8] sm:$0xff] }
 0xb82   :  { %9819 = vmatmul.msk.f32.gmra.mxu1 %vm15570_vm14, %v9815_v33  ;;  %v5900_v49 = vsel %vm15571_vm9, %v10505_v8, %v10506_v63  ;;  %v5901_v14 = vsel %vm15572_vm13, %v10506_v63, %v5899_v23  ;;  %5993 = vmatpush.msra.mxu2 %v5968_v9  ;;  %v6036_v57 = vsel %vm15574_vm8, %v10515_v47, %v10516_v59  ;;  %vm15575_vm5 = vmmov %vm15574_vm8  ;;  %vm15577_vm14 = vcmask 695296   ;;  %v13850_v47 = vpop.f32.mrf.mxu0 }
 0xb83   :  { %5925 = vmatpush.msra.mxu0 %v5900_v49  ;;  %5948 = vmatpush.msra.mxu1 %v5901_v14  ;;  %vm15578_vm9 = vmmov %vm15529_vm6  ;;  %v10531_v14 = vunpack.i.h.bf16 %v13802_v12 }
 0xb84   :  { %9828 = vmatmul.msk.f32.vlgmr.msra.gmra.mxu0 %vm15529_vm6, %v9826_v44  ;;  %9834 = vmatmul.msk.f32.vlgmr.msra.gmra.mxu2 %vm15573_vm7, %v9832_v27  ;;  %vm15579_vm13 = vmmov %vm15529_vm6  ;;  %vm15583_vm7 = vcmask 547840  }
 0xb85   :  { %6061 = vmatpush.msrb.mxu0 %v6036_v57 }
 0xb86   :  { %v13834_v34 = vpop.permute.xlu2 %10543  ;;  %v6035_v2 = vpop.permute.xlu0 %6034 }
 0xb87   :  { %v6037_v6 = vsel %vm15575_vm5, %v10516_v59, %v6035_v2  ;;  %v5967_v33 = vpop.permute.xlu1 %5966  ;;  %v13848_v59 = vpop.f32.mrf.mxu1  ;;  %vm15581_vm5 = vmmov %vm15529_vm6  ;;  %v10545_v53 = vunpack.i.l.bf16 %v13834_v34 }
 0xb88   :  { %v5969_v23 = vsel %vm15577_vm14, %v10511_v20, %v5967_v33  ;;  %6084 = vmatpush.msrb.mxu1 %v6037_v6  ;;  %15580 = vst [vmem:[#allocation68_spill] sm:$0xff] %v13848_v59  ;;  %vm15582_vm6 = vmmov %vm15581_vm5  ;;  %v13858_v2 = vpop.f32.mrf.mxu2  ;;  %v9844_v33 = vld [vmem:[%s15079_s3 + $0xf0] sm:$0xff]  ;;  %v10546_v59 = vunpack.i.h.bf16 %v13834_v34 }
 0xb89   :  { %6016 = vmatpush.msra.mxu3 %v5969_v23  ;;  %v13864_v23 = vpop.f32.mrf.mxu3  ;;  %vm15585_vm8 = vmmov %vm15581_vm5 }
 0xb8a   :  { %9830 = vmatmul.msk.f32.vlgmr.msra.gmra.mxu1 %vm15578_vm9, %v9826_v44  ;;  %9836 = vmatmul.msk.f32.vlgmr.msra.gmra.mxu3 %vm15579_vm13, %v9832_v27  ;;  %v10530_v44 = vunpack.i.l.bf16 %v13802_v12  ;;  %15584 = vst [vmem:[#allocation69_spill] sm:$0xff] %v13864_v23  ;;  %vm15586_vm14 = vmmov %vm15581_vm5  ;;  %vm15587_vm9 = vcmask 556032   ;;  %v13878_v45 = vpop.f32.mrf.mxu0 }
 0xb8b   :  { %vm15588_vm13 = vmmov %vm15587_vm9 }
 0xb8c   :  { %9829 = vmatmul.msk.f32.gmra.mxu0 %vm15581_vm5, %v9827_v48  ;;  %9835 = vmatmul.msk.f32.gmra.mxu2 %vm15582_vm6, %v9833_v0  ;;  %vm15589_vm6 = vcmask 539648  }
 0xb8e   :  { %v13854_v20 = vpop.permute.xlu2 %6510  ;;  %v10524_v63 = vpop.permute.xlu0 %10523 }
 0xb8f   :  { %v10526_v8 = vunpack.i.h.bf16 %v10524_v63  ;;  %v10525_v9 = vunpack.i.l.bf16 %v10524_v63  ;;  %v10519_v49 = vpop.permute.xlu1 %10518 }
 0xb90   :  { %v10521_v57 = vunpack.i.h.bf16 %v10519_v49  ;;  %v10520_v27 = vunpack.i.l.bf16 %v10519_v49  ;;  %v9838_v49 = vld [vmem:[%s15079_s3 + $0xe0] sm:$0xff] }
 0xb91   :  { %v6172_v6 = vsel %vm15583_vm7, %v10525_v9, %v10526_v8  ;;  %v13874_v9 = vpop.f32.mrf.mxu1  ;;  %vm15590_vm7 = vmmov %vm15581_vm5 }
 0xb92   :  { %9831 = vmatmul.msk.f32.gmra.mxu1 %vm15585_vm8, %v9827_v48  ;;  %9837 = vmatmul.msk.f32.gmra.mxu3 %vm15586_vm14, %v9833_v0  ;;  %v6104_v63 = vsel %vm15587_vm9, %v10520_v27, %v10521_v57  ;;  %v6105_v12 = vsel %vm15588_vm13, %v10521_v57, %v13798_v19  ;;  %v6240_v48 = vsel %vm15589_vm6, %v10530_v44, %v10531_v14  ;;  %vm15591_vm8 = vmmov %vm15589_vm6  ;;  %vm15592_vm14 = vcmask 547840   ;;  %v13888_v44 = vpop.f32.mrf.mxu3 }
 0xb93   :  { %6129 = vmatpush.msrb.mxu2 %v6104_v63  ;;  %6152 = vmatpush.msrb.mxu3 %v6105_v12  ;;  %vm15593_vm9 = vmmov %vm15581_vm5  ;;  %v9839_v63 = vld [vmem:[%s15079_s3 + $0xe8] sm:$0xff] }
 0xb94   :  { %6197 = vmatpush.msra.mxu0 %v6172_v6  ;;  %9846 = vmatmul.msk.f32.vlgmr.msrb.gmra.mxu2 %vm15581_vm5, %v9844_v33  ;;  %v9845_v6 = vld [vmem:[%s15079_s3 + $0xf8] sm:$0xff]  ;;  %vm15594_vm13 = vmmov %vm15581_vm5 }
 0xb95   :  { %9840 = vmatmul.msk.f32.vlgmr.msrb.gmra.mxu0 %vm15590_vm7, %v9838_v49  ;;  %6265 = vmatpush.msra.mxu2 %v6240_v48  ;;  %vm15595_vm6 = vmmov %vm15581_vm5  ;;  %v13903_v48 = vpop.f32.mrf.mxu0  ;;  %vm15596_vm7 = vcmask 523264  }
 0xb96   :  { %v13881_v0 = vpop.permute.xlu2 %10558  ;;  %v6239_v19 = vpop.permute.xlu0 %6238 }
 0xb97   :  { %v6241_v57 = vsel %vm15591_vm8, %v10531_v14, %v6239_v19  ;;  %v6171_v27 = vpop.permute.xlu1 %6170  ;;  %v13895_v14 = vpop.f32.mrf.mxu2  ;;  %vm15597_vm8 = vmmov %vm15581_vm5  ;;  %v10561_v40 = vunpack.i.h.bf16 %v13881_v0  ;;  %v10560_v61 = vunpack.i.l.bf16 %v13881_v0 }
 0xb98   :  { %v6173_v23 = vsel %vm15592_vm14, %v10526_v8, %v6171_v27  ;;  %6288 = vmatpush.msra.mxu3 %v6241_v57  ;;  %vm15598_vm14 = vmmov %vm15581_vm5 }
 0xb99   :  { %6220 = vmatpush.msra.mxu1 %v6173_v23  ;;  %v13898_v8 = vpop.f32.mrf.mxu1 }
 0xb9a   :  { %9842 = vmatmul.msk.f32.vlgmr.msrb.gmra.mxu1 %vm15593_vm9, %v9838_v49  ;;  %9848 = vmatmul.msk.f32.vlgmr.msrb.gmra.mxu3 %vm15594_vm13, %v9844_v33  ;;  %vm15599_vm9 = vcmask 531456   ;;  %v13919_v34 = vpop.f32.mrf.mxu3 }
 0xb9b   :  { %vm15600_vm13 = vmmov %vm15599_vm9 }
 0xb9c   :  { %9847 = vmatmul.msk.f32.gmra.mxu2 %vm15581_vm5, %v9845_v6  ;;  %vm15218_vm5 = vcmask 130112  }
 0xb9d   :  { %9841 = vmatmul.msk.f32.gmra.mxu0 %vm15595_vm6, %v9839_v63 }
 0xb9e   :  { %v13901_v23 = vpop.permute.xlu2 %6714  ;;  %v10539_v12 = vpop.permute.xlu0 %10538 }
 0xb9f   :  { %v10541_v49 = vunpack.i.h.bf16 %v10539_v12  ;;  %v10540_v19 = vunpack.i.l.bf16 %v10539_v12  ;;  %v10534_v33 = vpop.permute.xlu1 %10533  ;;  %v9850_v12 = vld [vmem:[%s15079_s3 + $0x100] sm:$0xff] }
 0xba0   :  { %v10536_v57 = vunpack.i.h.bf16 %v10534_v33  ;;  %v10535_v27 = vunpack.i.l.bf16 %v10534_v33  ;;  %v9856_v33 = vld [vmem:[%s15079_s3 + $0x110] sm:$0xff] }
 0xba1   :  { %v6376_v41 = vsel %vm15596_vm7, %v10540_v19, %v10541_v49  ;;  %vm15601_vm7 = vmmov %vm15595_vm6 }
 0xba2   :  { %9843 = vmatmul.msk.f32.gmra.mxu1 %vm15597_vm8, %v9839_v63  ;;  %9849 = vmatmul.msk.f32.gmra.mxu3 %vm15598_vm14, %v9845_v6  ;;  %v6308_v26 = vsel %vm15599_vm9, %v10535_v27, %v10536_v57  ;;  %v6309_v43 = vsel %vm15600_vm13, %v10536_v57, %v13816_v42  ;;  %v13921_v6 = vpop.f32.mrf.mxu2  ;;  %v6444_v42 = vsel %vm629_vm15, %v10545_v53, %v10546_v59  ;;  %vm15602_vm8 = vcmask 523264   ;;  %v13931_v27 = vpop.f32.mrf.mxu0  ;;  %vm15603_vm14 = vmmov %vm15595_vm6  ;;  %v9851_v53 = vld [vmem:[%s15079_s3 + $0x108] sm:$0xff] }
 0xba3   :  { %6333 = vmatpush.msrb.mxu0 %v6308_v26  ;;  %6356 = vmatpush.msrb.mxu1 %v6309_v43  ;;  %v13927_v26 = vpop.f32.mrf.mxu1  ;;  %vm15604_vm9 = vmmov %vm15595_vm6 }
 0xba4   :  { %6401 = vmatpush.msrb.mxu2 %v6376_v41  ;;  %vm15605_vm13 = vmmov %vm15595_vm6 }
 0xba5   :  { %9852 = vmatmul.msk.f32.vlgmr.msra.gmra.mxu0 %vm15595_vm6, %v9850_v12  ;;  %9858 = vmatmul.msk.f32.vlgmr.msra.gmra.mxu2 %vm15601_vm7, %v9856_v33  ;;  %vm15606_vm7 = vmmov %vm15595_vm6 }
 0xba6   :  { %6469 = vmatpush.msra.mxu0 %v6444_v42  ;;  %v6443_v63 = vpop.permute.xlu0 %6442  ;;  %v4313_v19 = vpop.permute.xlu2 %4312  ;;  %v9857_v42 = vld [vmem:[%s15079_s3 + $0x118] sm:$0xff] }
 0xba7   :  { %v6375_v57 = vpop.permute.xlu1 %6374  ;;  %4319 = vst.msk [vmem:[#allocation2] sm:$0xff] %vm15218_vm5, %v4313_v19  ;;  %v6445_v43 = vsel %vm629_vm15, %v10546_v59, %v6443_v63  ;;  %v13943_v59 = vpop.f32.mrf.mxu3 }
 0xba8   :  { %v6377_v41 = vsel %vm15602_vm8, %v10541_v49, %v6375_v57  ;;  %vm15607_vm8 = vmmov %vm15595_vm6 }
 0xba9   :  { %6424 = vmatpush.msrb.mxu3 %v6377_v41 }
 0xbaa   :  { %9854 = vmatmul.msk.f32.vlgmr.msra.gmra.mxu1 %vm15603_vm14, %v9850_v12  ;;  %9860 = vmatmul.msk.f32.vlgmr.msra.gmra.mxu3 %vm15604_vm9, %v9856_v33  ;;  %v13945_v63 = vpop.f32.mrf.mxu2  ;;  %v13962_v0 = vpop.f32.mrf.mxu0  ;;  %vm15608_vm14 = vmmov %vm15595_vm6 }
 0xbab   :  { %6492 = vmatpush.msra.mxu1 %v6445_v43  ;;  %v13949_v50 = vpop.f32.mrf.mxu1  ;;  %vm15609_vm9 = vmmov %vm15595_vm6 }
 0xbad   :  { %9853 = vmatmul.msk.f32.gmra.mxu0 %vm15605_vm13, %v9851_v53  ;;  %9859 = vmatmul.msk.f32.gmra.mxu2 %vm15595_vm6, %v9857_v42  ;;  %vm15610_vm13 = vcmask 367616  }
 0xbae   :  { %v10554_v49 = vpop.permute.xlu0 %10553  ;;  %vm15611_vm6 = vmmov %vm15610_vm13 }
 0xbaf   :  { %v10556_v12 = vunpack.i.h.bf16 %v10554_v49  ;;  %v10555_v33 = vunpack.i.l.bf16 %v10554_v49  ;;  %v10549_v19 = vpop.permute.xlu1 %10548  ;;  %v9862_v49 = vld [vmem:[%s15079_s3 + $0x120] sm:$0xff] }
 0xbb0   :  { %v10551_v57 = vunpack.i.h.bf16 %v10549_v19  ;;  %v10550_v41 = vunpack.i.l.bf16 %v10549_v19  ;;  %v9868_v19 = vld [vmem:[%s15079_s3 + $0x130] sm:$0xff] }
 0xbb2   :  { %9855 = vmatmul.msk.f32.gmra.mxu1 %vm15606_vm7, %v9851_v53  ;;  %9861 = vmatmul.msk.f32.gmra.mxu3 %vm15607_vm8, %v9857_v42  ;;  %v6512_v43 = vsel %vm662_vm12, %v10550_v41, %v10551_v57  ;;  %v6513_v15 = vsel %vm662_vm12, %v10551_v57, %v13854_v20  ;;  %v6580_v53 = vsel %vm695_vm10, %v10555_v33, %v10556_v12  ;;  %v13968_v41 = vpop.f32.mrf.mxu3  ;;  %vm15612_vm8 = vmmov %vm15606_vm7 }
 0xbb3   :  { %6537 = vmatpush.msra.mxu2 %v6512_v43  ;;  %6560 = vmatpush.msra.mxu3 %v6513_v15  ;;  %v6648_v20 = vsel %vm15610_vm13, %v10560_v61, %v10561_v40  ;;  %v13972_v43 = vpop.f32.mrf.mxu2  ;;  %v9863_v15 = vld [vmem:[%s15079_s3 + $0x128] sm:$0xff]  ;;  %v9869_v61 = vld [vmem:[%s15079_s3 + $0x138] sm:$0xff]  ;;  %v13982_v33 = vpop.f32.mrf.mxu1  ;;  %vm4327_vm13 = vcmask 195712  }
 0xbb5   :  { %9864 = vmatmul.msk.f32.vlgmr.msrb.gmra.mxu0 %vm15608_vm14, %v9862_v49  ;;  %9870 = vmatmul.msk.f32.vlgmr.msrb.gmra.mxu2 %vm15609_vm9, %v9868_v19  ;;  %vm15613_vm14 = vmmov %vm15606_vm7 }
 0xbb6   :  { %6605 = vmatpush.msrb.mxu0 %v6580_v53  ;;  %6673 = vmatpush.msrb.mxu2 %v6648_v20  ;;  %v6647_v42 = vpop.permute.xlu0 %6646  ;;  %vm15614_vm9 = vmmov %vm15606_vm7 }
 0xbb7   :  { %v6579_v57 = vpop.permute.xlu1 %6578  ;;  %v6649_v37 = vsel %vm15611_vm6, %v10561_v40, %v6647_v42  ;;  %v13984_v40 = vpop.f32.mrf.mxu0  ;;  %vm15615_vm6 = vmmov %vm15606_vm7  ;;  %v9880_v42 = vld [vmem:[%s15079_s3 + $0x150] sm:$0xff] }
 0xbb8   :  { %v6581_v17 = vsel %vm695_vm10, %v10556_v12, %v6579_v57 }
 0xbba   :  { %9866 = vmatmul.msk.f32.vlgmr.msrb.gmra.mxu1 %vm15606_vm7, %v9862_v49  ;;  %9872 = vmatmul.msk.f32.vlgmr.msrb.gmra.mxu3 %vm15612_vm8, %v9868_v19  ;;  %v4324_v49 = vpop.permute.xlu2 %4323  ;;  %vm15616_vm7 = vmmov %vm15615_vm6  ;;  %vm15617_vm8 = vcmask 359424  }
 0xbbb   :  { %6628 = vmatpush.msrb.mxu1 %v6581_v17  ;;  %6696 = vmatpush.msrb.mxu3 %v6649_v37  ;;  %v13990_v17 = vpop.f32.mrf.mxu3  ;;  %v9874_v37 = vld [vmem:[%s15079_s3 + $0x140] sm:$0xff]  ;;  %v14000_v57 = vpop.f32.mrf.mxu2 }
 0xbbd   :  { %9865 = vmatmul.msk.f32.gmra.mxu0 %vm15613_vm14, %v9863_v15  ;;  %9871 = vmatmul.msk.f32.gmra.mxu2 %vm15614_vm9, %v9869_v61  ;;  %vm15618_vm14 = vmmov %vm15615_vm6 }
 0xbbe   :  { %v4315_v12 = vpop.permute.xlu0 %4314  ;;  %vm15619_vm9 = vmmov %vm15615_vm6 }
 0xbbf   :  { %v10564_v19 = vpop.permute.xlu1 %10563  ;;  %4320 = vst.msk [vmem:[#allocation2 + $0x8] sm:$0xff] %vm15218_vm5, %v4315_v12  ;;  %vm15621_vm5 = vmmov %vm15617_vm8 }
 0xbc0   :  { %v10566_v53 = vunpack.i.h.bf16 %v10564_v19  ;;  %v10565_v20 = vunpack.i.l.bf16 %v10564_v19  ;;  %4329 = vst.msk [vmem:[#allocation2 + $0x8] sm:$0xff] %vm4327_vm13, %v4324_v49  ;;  %v14005_v49 = vpop.f32.mrf.mxu1 }
 0xbc2   :  { %9867 = vmatmul.msk.f32.gmra.mxu1 %vm15615_vm6, %v9863_v15  ;;  %9873 = vmatmul.msk.f32.gmra.mxu3 %vm15616_vm7, %v9869_v61  ;;  %v6716_v12 = vsel %vm15617_vm8, %v10565_v20, %v10566_v53  ;;  %v14007_v15 = vpop.f32.mrf.mxu0  ;;  %vm15620_vm7 = vmmov %vm15615_vm6  ;;  %v6717_v19 = vsel %vm15621_vm5, %v10566_v53, %v13901_v23  ;;  %v9875_v20 = vld [vmem:[%s15079_s3 + $0x148] sm:$0xff]  ;;  %v9886_v53 = vld [vmem:[%s15079_s3 + $0x160] sm:$0xff] }
 0xbc3   :  { %v14020_v36 = vpop.f32.mrf.mxu3  ;;  %v14022_v3 = vpop.f32.mrf.mxu2  ;;  %vm15622_vm8 = vmmov %vm15615_vm6 }
 0xbc4   :  { %vm15624_vm5 = vmmov %vm15615_vm6 }
 0xbc5   :  { %9876 = vmatmul.msk.f32.vlgmr.msra.gmra.mxu0 %vm15618_vm14, %v9874_v37  ;;  %9882 = vmatmul.msk.f32.vlgmr.msra.gmra.mxu2 %vm15619_vm9, %v9880_v42  ;;  %vm15623_vm14 = vmmov %vm15615_vm6 }
 0xbc6   :  { %6741 = vmatpush.msra.mxu0 %v6716_v12  ;;  %v9881_v12 = vld [vmem:[%s15079_s3 + $0x158] sm:$0xff]  ;;  %vm15625_vm9 = vmmov %vm15624_vm5 }
 0xbc7   :  { %v4322_v61 = vpop.permute.xlu1 %4321 }
 0xbc8   :  { %4328 = vst.msk [vmem:[#allocation2] sm:$0xff] %vm4327_vm13, %v4322_v61  ;;  %v14028_v23 = vpop.f32.mrf.mxu1 }
 0xbca   :  { %9878 = vmatmul.msk.f32.vlgmr.msra.gmra.mxu1 %vm15615_vm6, %v9874_v37  ;;  %9884 = vmatmul.msk.f32.vlgmr.msra.gmra.mxu3 %vm15620_vm7, %v9880_v42  ;;  %v14026_v37 = vpop.f32.mrf.mxu0  ;;  %v9892_v42 = vld [vmem:[%s15079_s3 + $0x170] sm:$0xff]  ;;  %vm15626_vm6 = vmmov %vm15624_vm5 }
 0xbcb   :  { %6764 = vmatpush.msra.mxu1 %v6717_v19  ;;  %vm15627_vm7 = vmmov %vm15624_vm5  ;;  %v14040_v61 = vpop.f32.mrf.mxu3  ;;  %v14042_v19 = vpop.f32.mrf.mxu2 }
 0xbcd   :  { %9877 = vmatmul.msk.f32.gmra.mxu0 %vm15622_vm8, %v9875_v20  ;;  %9883 = vmatmul.msk.f32.gmra.mxu2 %vm15623_vm14, %v9881_v12  ;;  %vm15628_vm8 = vmmov %vm15624_vm5 }
 0xbce   :  { %vm15629_vm14 = vmmov %vm15624_vm5 }
 0xbd0   :  { %v14054_v32 = vpop.f32.mrf.mxu1 }
 0xbd2   :  { %9879 = vmatmul.msk.f32.gmra.mxu1 %vm15624_vm5, %v9875_v20  ;;  %9885 = vmatmul.msk.f32.gmra.mxu3 %vm15625_vm9, %v9881_v12  ;;  %v9887_v20 = vld [vmem:[%s15079_s3 + $0x168] sm:$0xff]  ;;  %v9893_v12 = vld [vmem:[%s15079_s3 + $0x178] sm:$0xff]  ;;  %v14052_v39 = vpop.f32.mrf.mxu0  ;;  %vm15630_vm9 = vmmov %vm15624_vm5 }
 0xbd3   :  { %v14058_v38 = vpop.f32.mrf.mxu3 }
 0xbd5   :  { %9888 = vmatmul.msk.f32.vlgmr.msrb.gmra.mxu0 %vm15626_vm6, %v9886_v53  ;;  %9894 = vmatmul.msk.f32.vlgmr.msrb.gmra.mxu2 %vm15627_vm7, %v9892_v42  ;;  %vm15631_vm6 = vmmov %vm15624_vm5 }
 0xbd6   :  { %vm15632_vm7 = vmmov %vm15624_vm5 }
 0xbd8   :  { %v14069_v30 = vpop.f32.mrf.mxu1 }
 0xbda   :  { %9890 = vmatmul.msk.f32.vlgmr.msrb.gmra.mxu1 %vm15628_vm8, %v9886_v53  ;;  %9896 = vmatmul.msk.f32.vlgmr.msrb.gmra.mxu3 %vm15629_vm14, %v9892_v42  ;;  %v14060_v53 = vpop.f32.mrf.mxu2  ;;  %v9898_v42 = vld [vmem:[%s15079_s3 + $0x180] sm:$0xff]  ;;  %v14067_v11 = vpop.f32.mrf.mxu0  ;;  %vm15633_vm8 = vmmov %vm15624_vm5 }
 0xbdb   :  { %v14072_v16 = vpop.f32.mrf.mxu3  ;;  %vm15634_vm14 = vmmov %vm15624_vm5 }
 0xbdd   :  { %9889 = vmatmul.msk.f32.gmra.mxu0 %vm15624_vm5, %v9887_v20  ;;  %9895 = vmatmul.msk.f32.gmra.mxu2 %vm15630_vm9, %v9893_v12  ;;  %vm15635_vm9 = vmmov %vm15624_vm5 }
 0xbe0   :  { %v14083_v51 = vpop.f32.mrf.mxu1 }
 0xbe2   :  { %9891 = vmatmul.msk.f32.gmra.mxu1 %vm15631_vm6, %v9887_v20  ;;  %9897 = vmatmul.msk.f32.gmra.mxu3 %vm15632_vm7, %v9893_v12  ;;  %v9899_v20 = vld [vmem:[%s15079_s3 + $0x188] sm:$0xff]  ;;  %v14078_v35 = vpop.f32.mrf.mxu2  ;;  %v14081_v12 = vpop.f32.mrf.mxu0  ;;  %s15660_s3 = smov 125   ;;  %vm15721_vm7 = vcmask 850944  }
 0xbe3   :  { %v14086_v22 = vpop.f32.mrf.mxu3 }
 0xbe5   :  { %9900 = vmatmul.msk.f32.vlgmr.msra.gmra.mxu0 %vm15633_vm8, %v9898_v42  ;;  %vm15722_vm8 = vmmov %vm15721_vm7 }
 0xbea   :  { %9902 = vmatmul.msk.f32.vlgmr.msra.gmra.mxu1 %vm15634_vm14, %v9898_v42  ;;  %v14088_v28 = vpop.f32.mrf.mxu2  ;;  %v14092_v42 = vpop.f32.mrf.mxu0  ;;  %vm15723_vm14 = vcmask 719872  }
 0xbed   :  { %9901 = vmatmul.msk.f32.gmra.mxu0 %vm15624_vm5, %v9899_v20  ;;  %vm15724_vm5 = vcmask 711680  }
 0xbf2   :  { %9903 = vmatmul.msk.f32.gmra.mxu1 %vm15635_vm9, %v9899_v20  ;;  %v14096_v18 = vpop.f32.mrf.mxu2  ;;  %vm15725_vm9 = vmmov %vm15723_vm14 }
 0xbf7   :  { %v14090_v60 = vpop.f32.mrf.mxu1 }
 0xbfc   :  { %v14094_v29 = vpop.f32.mrf.mxu3 }
 0xbff   :  { %v14098_v1 = vpop.f32.mrf.mxu1 }
 0xc01   :  { %v14100_v62 = vpop.f32.mrf.mxu0 }
 0xc04   :  { %v14102_v7 = vpop.f32.mrf.mxu3 }
 0xc05   :  { %15636 = vst [vmem:[#allocation70_spill] sm:$0xff] %v14102_v7 }
 0xc07   :  { %v14104_v5 = vpop.f32.mrf.mxu1  ;;  %v14106_v20 = vpop.f32.mrf.mxu2 }
 0xc09   :  { %v14108_v46 = vpop.f32.mrf.mxu0 }
 0xc0d   :  { %v14110_v31 = vpop.f32.mrf.mxu3 }
 0xc0f   :  { %v14112_v55 = vpop.f32.mrf.mxu1  ;;  %v14114_v52 = vpop.f32.mrf.mxu2 }
 0xc10   :  { %15637 = vst [vmem:[#allocation71_spill] sm:$0xff] %v14112_v55  ;;  %v5207_v55 = vadd.f32 %v13858_v2, %v13850_v47 }
 0xc11   :  { %15638 = vst [vmem:[#allocation72_spill] sm:$0xff] %v14114_v52 }
 0xc12   :  { %v14116_v54 = vpop.f32.mrf.mxu0  ;;  %v5296_v52 = vadd.f32 %v13903_v48, %v5207_v55 }
 0xc15   :  { %v14118_v10 = vpop.f32.mrf.mxu3 }
 0xc16   :  { %15639 = vst [vmem:[#allocation73_spill] sm:$0xff] %v14118_v10 }
 0xc17   :  { %v14120_v56 = vpop.f32.mrf.mxu1  ;;  %v14122_v4 = vpop.f32.mrf.mxu2 }
 0xc18   :  { %15640 = vst [vmem:[#allocation74_spill] sm:$0xff] %v14120_v56 }
 0xc1a   :  { %v14124_v21 = vpop.f32.mrf.mxu0 }
 0xc1b   :  { %15641 = vst [vmem:[#allocation75_spill] sm:$0xff] %v14124_v21  ;;  %v5230_v21 = vadd.f32 %v13888_v44, %v13874_v9  ;;  %v5233_v9 = vadd.f32 %v13919_v34, %v13898_v8 }
 0xc1d   :  { %v14126_v25 = vpop.f32.mrf.mxu3  ;;  %v5297_v47 = vadd.f32 %v13927_v26, %v5230_v21 }
 0xc1e   :  { %15642 = vst [vmem:[#allocation76_spill] sm:$0xff] %v14126_v25 }
 0xc1f   :  { %v14128_v24 = vpop.f32.mrf.mxu1  ;;  %v14130_v13 = vpop.f32.mrf.mxu2  ;;  %v5362_v44 = vadd.f32 %v13943_v59, %v5297_v47 }
 0xc20   :  { %15643 = vst [vmem:[#allocation77_spill] sm:$0xff] %v14128_v24  ;;  %v5210_v24 = vadd.f32 %v13895_v14, %v13878_v45 }
 0xc21   :  { %15644 = vst [vmem:[#allocation78_spill] sm:$0xff] %v14130_v13  ;;  %v5361_v13 = vadd.f32 %v13921_v6, %v5296_v52  ;;  %v5427_v6 = vadd.f32 %v13982_v33, %v5362_v44 }
 0xc22   :  { %v14132_v58 = vpop.f32.mrf.mxu0  ;;  %v5298_v2 = vadd.f32 %v13931_v27, %v5210_v24  ;;  %v5299_v24 = vadd.f32 %v13949_v50, %v5233_v9 }
 0xc23   :  { %15645 = vst [vmem:[#allocation79_spill] sm:$0xff] %v14132_v58  ;;  %v5426_v55 = vadd.f32 %v13962_v0, %v5361_v13  ;;  %v5492_v59 = vadd.f32 %v13990_v17, %v5427_v6 }
 0xc24   :  { %v5363_v52 = vadd.f32 %v13945_v63, %v5298_v2  ;;  %v5364_v27 = vadd.f32 %v13968_v41, %v5299_v24 }
 0xc25   :  { %v14136_v7 = vpop.f32.mrf.mxu3  ;;  %v5491_v14 = vadd.f32 %v13972_v43, %v5426_v55 }
 0xc26   :  { %15646 = vst [vmem:[#allocation80_spill] sm:$0xff] %v14136_v7  ;;  %v5428_v13 = vadd.f32 %v13984_v40, %v5363_v52  ;;  %v5429_v33 = vadd.f32 %v14005_v49, %v5364_v27  ;;  %v5557_v40 = vadd.f32 %v14028_v23, %v5492_v59 }
 0xc27   :  { %v14138_v10 = vpop.f32.mrf.mxu1  ;;  %v5556_v8 = vadd.f32 %v14007_v15, %v5491_v14 }
 0xc28   :  { %v14141_v56 = vpop.f32.mrf.mxu2  ;;  %v5493_v0 = vadd.f32 %v14000_v57, %v5428_v13  ;;  %v5494_v17 = vadd.f32 %v14020_v36, %v5429_v33  ;;  %v5622_v57 = vadd.f32 %v14040_v61, %v5557_v40  ;;  %v15649_v33 = vld [vmem:[#allocation72_spill] sm:$0xff]  ;;  %v15650_v40 = vld [vmem:[#allocation70_spill] sm:$0xff] }
 0xc29   :  { %v5621_v50 = vadd.f32 %v14022_v3, %v5556_v8 }
 0xc2a   :  { %v14145_v25 = vpop.f32.mrf.mxu0  ;;  %v5558_v15 = vadd.f32 %v14026_v37, %v5493_v0  ;;  %v5559_v23 = vadd.f32 %v14054_v32, %v5494_v17  ;;  %v5687_v37 = vadd.f32 %v14069_v30, %v5622_v57 }
 0xc2b   :  { %v5686_v41 = vadd.f32 %v14052_v39, %v5621_v50  ;;  %v15648_v50 = vld [vmem:[#allocation79_spill] sm:$0xff] }
 0xc2c   :  { %v5623_v3 = vadd.f32 %v14042_v19, %v5558_v15  ;;  %v5624_v36 = vadd.f32 %v14058_v38, %v5559_v23  ;;  %v5752_v61 = vadd.f32 %v14072_v16, %v5687_v37  ;;  %v15651_v15 = vld [vmem:[#allocation76_spill] sm:$0xff]  ;;  %v15654_v23 = vld [vmem:[#allocation78_spill] sm:$0xff] }
 0xc2d   :  { %v14150_v58 = vpop.f32.mrf.mxu3  ;;  %v5751_v9 = vadd.f32 %v14060_v53, %v5686_v41  ;;  %v15652_v41 = vld [vmem:[#allocation75_spill] sm:$0xff] }
 0xc2e   :  { %v5688_v39 = vadd.f32 %v14067_v11, %v5623_v3  ;;  %v5821_v6 = vadd.f32 %v14090_v60, %v5752_v61  ;;  %v5689_v11 = vadd.f32 %v14083_v51, %v5624_v36  ;;  %v15653_v3 = vld [vmem:[#allocation71_spill] sm:$0xff] }
 0xc2f   :  { %v14154_v7 = vpop.f32.mrf.mxu1  ;;  %v5820_v44 = vadd.f32 %v14081_v12, %v5751_v9 }
 0xc30   :  { %v14157_v48 = vpop.f32.mrf.mxu2  ;;  %v5753_v53 = vadd.f32 %v14078_v35, %v5688_v39  ;;  %v5889_v13 = vadd.f32 %v14094_v29, %v5821_v6  ;;  %v5754_v60 = vadd.f32 %v14086_v22, %v5689_v11 }
 0xc31   :  { %v5888_v19 = vadd.f32 %v14088_v28, %v5820_v44  ;;  %v15655_v44 = vld [vmem:[#allocation73_spill] sm:$0xff] }
 0xc32   :  { %v14162_v45 = vpop.f32.mrf.mxu0  ;;  %v5822_v30 = vadd.f32 %v14092_v42, %v5753_v53  ;;  %v5957_v16 = vadd.f32 %v14104_v5, %v5889_v13  ;;  %v5823_v29 = vadd.f32 %v14098_v1, %v5754_v60  ;;  %v15656_v53 = vld [vmem:[#allocation77_spill] sm:$0xff] }
 0xc33   :  { %v5956_v32 = vadd.f32 %v14100_v62, %v5888_v19 }
 0xc34   :  { %v5890_v35 = vadd.f32 %v14096_v18, %v5822_v30  ;;  %v6025_v62 = vadd.f32 %v14110_v31, %v5957_v16  ;;  %v5891_v18 = vadd.f32 %v15650_v40, %v5823_v29 }
 0xc35   :  { %v14166_v21 = vpop.f32.mrf.mxu3  ;;  %v6024_v38 = vadd.f32 %v14106_v20, %v5956_v32  ;;  %v15647_v20 = vld [vmem:[#allocation74_spill] sm:$0xff] }
 0xc36   :  { %v5958_v51 = vadd.f32 %v14108_v46, %v5890_v35  ;;  %v6093_v0 = vadd.f32 %v15647_v20, %v6025_v62  ;;  %v5959_v46 = vadd.f32 %v15653_v3, %v5891_v18 }
 0xc37   :  { %v14171_v26 = vpop.f32.mrf.mxu1  ;;  %v6092_v28 = vadd.f32 %v14116_v54, %v6024_v38 }
 0xc38   :  { %v14174_v34 = vpop.f32.mrf.mxu2  ;;  %v6026_v54 = vadd.f32 %v15649_v33, %v5958_v51  ;;  %v6161_v22 = vadd.f32 %v15651_v15, %v6093_v0  ;;  %v6027_v39 = vadd.f32 %v15655_v44, %v5959_v46 }
 0xc39   :  { %v6160_v42 = vadd.f32 %v14122_v4, %v6092_v28 }
 0xc3a   :  { %v14178_v63 = vpop.f32.mrf.mxu0  ;;  %v6094_v4 = vadd.f32 %v15652_v41, %v6026_v54  ;;  %v6229_v1 = vadd.f32 %v14138_v10, %v6161_v22  ;;  %v6095_v6 = vadd.f32 %v15656_v53, %v6027_v39  ;;  %v15659_v22 = vld [vmem:[#allocation26_spill] sm:$0xff]  ;;  %v15664_v39 = vld [vmem:[#allocation28_spill] sm:$0xff] }
 0xc3b   :  { %v6228_v5 = vadd.f32 %v15648_v50, %v6160_v42  ;;  %v15667_v53 = vld [vmem:[#allocation36_spill] sm:$0xff] }
 0xc3c   :  { %v6162_v37 = vadd.f32 %v15654_v23, %v6094_v4  ;;  %v6297_v36 = vadd.f32 %v14150_v58, %v6229_v1  ;;  %v15661_v1 = vld [vmem:[#allocation27_spill] sm:$0xff] }
 0xc3d   :  { %v14182_v43 = vpop.f32.mrf.mxu3  ;;  %v6296_v31 = vadd.f32 %v14141_v56, %v6228_v5 }
 0xc3e   :  { %v6230_v56 = vadd.f32 %v14145_v25, %v6162_v37  ;;  %v6365_v32 = vadd.f32 %v14171_v26, %v6297_v36  ;;  %v15663_v37 = vld [vmem:[#allocation39_spill] sm:$0xff] }
 0xc3f   :  { %v14187_v47 = vpop.f32.mrf.mxu1  ;;  %v6364_v9 = vadd.f32 %v14162_v45, %v6296_v31  ;;  %v15657_v45 = vld [vmem:[#allocation80_spill] sm:$0xff]  ;;  %v15665_v36 = vld [vmem:[#allocation23_spill] sm:$0xff] }
 0xc40   :  { %v14190_v2 = vpop.f32.mrf.mxu2  ;;  %v6298_v10 = vadd.f32 %v14157_v48, %v6230_v56  ;;  %v6163_v13 = vadd.f32 %v15657_v45, %v6095_v6  ;;  %v6433_v38 = vadd.f32 %v14182_v43, %v6365_v32  ;;  %v15668_v32 = vld [vmem:[#allocation29_spill] sm:$0xff] }
 0xc41   :  { %v6432_v61 = vadd.f32 %v14174_v34, %v6364_v9  ;;  %v15662_v9 = vld [vmem:[#allocation30_spill] sm:$0xff]  ;;  %v15670_v45 = vld [vmem:[#allocation33_spill] sm:$0xff] }
 0xc42   :  { %v6471_v55 = vpop.f32.mrf.mxu0  ;;  %v6366_v58 = vadd.f32 %v14178_v63, %v6298_v10  ;;  %v6231_v34 = vadd.f32 %v14154_v7, %v6163_v13  ;;  %v2606_v23 = vadd.f32 %v15662_v9, %v15661_v1  ;;  %v15691_v1 = vld [vmem:[#allocation17_spill] sm:$0xff] }
 0xc43   :  { %v6500_v30 = vadd.f32 %v6471_v55, %v6432_v61  ;;  %v2609_v61 = vadd.f32 %v15665_v36, %v15664_v39  ;;  %v15693_v36 = vld [vmem:[#allocation52_spill] sm:$0xff] }
 0xc44   :  { %v6434_v60 = vadd.f32 %v14190_v2, %v6366_v58  ;;  %v6299_v26 = vadd.f32 %v14166_v21, %v6231_v34  ;;  %v15658_v2 = vld [vmem:[#allocation19_spill] sm:$0xff]  ;;  %v2681_v44 = vadd.f32 %v15663_v37, %v2606_v23  ;;  %v15672_v58 = vld [vmem:[#allocation34_spill] sm:$0xff]  ;;  %v15673_v34 = vld [vmem:[#allocation25_spill] sm:$0xff] }
 0xc45   :  { %v14196_v49 = vpop.f32.mrf.mxu3  ;;  %v2683_v6 = vadd.f32 %v15667_v53, %v2609_v61  ;;  %v15692_v23 = vld [vmem:[#allocation22_spill] sm:$0xff]  ;;  %v15695_v53 = vld [vmem:[#allocation53_spill] sm:$0xff] }
 0xc46   :  { %v6367_v29 = vadd.f32 %v14187_v47, %v6299_v26 }
 0xc47   :  { %v6494_v52 = vpop.f32.mrf.mxu1 }
 0xc48   :  { %v6539_v14 = vpop.f32.mrf.mxu2  ;;  %v6501_v35 = vadd.f32 %v6494_v52, %v6433_v38  ;;  %v6435_v63 = vadd.f32 %v14196_v49, %v6367_v29  ;;  %v15671_v38 = vld [vmem:[#allocation37_spill] sm:$0xff]  ;;  %v15678_v29 = vld [vmem:[#allocation46_spill] sm:$0xff] }
 0xc49   :  { %v6568_v16 = vadd.f32 %v6539_v14, %v6500_v30 }
 0xc4a   :  { %v6474_v24 = vpop.f32.mrf.mxu0 }
 0xc4b   :  { %v6502_v51 = vadd.f32 %v6474_v24, %v6434_v60 }
 0xc4d   :  { %v6562_v12 = vpop.f32.mrf.mxu3 }
 0xc4e   :  { %v6569_v55 = vadd.f32 %v6562_v12, %v6501_v35 }
 0xc4f   :  { %v6497_v8 = vpop.f32.mrf.mxu1 }
 0xc50   :  { %v6542_v27 = vpop.f32.mrf.mxu2  ;;  %v6503_v50 = vadd.f32 %v6497_v8, %v6435_v63  ;;  %v15680_v63 = vld [vmem:[#allocation48_spill] sm:$0xff] }
 0xc51   :  { %v6570_v20 = vadd.f32 %v6542_v27, %v6502_v51 }
 0xc52   :  { %v6607_v59 = vpop.f32.mrf.mxu0 }
 0xc53   :  { %v6636_v25 = vadd.f32 %v6607_v59, %v6568_v16 }
 0xc55   :  { %v6565_v17 = vpop.f32.mrf.mxu3 }
 0xc56   :  { %v6571_v12 = vadd.f32 %v6565_v17, %v6503_v50 }
 0xc57   :  { %v6630_v57 = vpop.f32.mrf.mxu1 }
 0xc58   :  { %v6675_v11 = vpop.f32.mrf.mxu2  ;;  %v6637_v43 = vadd.f32 %v6630_v57, %v6569_v55  ;;  %v15676_v55 = vld [vmem:[#allocation44_spill] sm:$0xff] }
 0xc59   :  { %v6704_v42 = vadd.f32 %v6675_v11, %v6636_v25  ;;  %v15669_v11 = vld [vmem:[#allocation32_spill] sm:$0xff]  ;;  %v15674_v25 = vld [vmem:[#allocation43_spill] sm:$0xff] }
 0xc5a   :  { %v6610_v19 = vpop.f32.mrf.mxu0  ;;  %v2756_v10 = vadd.f32 %v15669_v11, %v2683_v6 }
 0xc5b   :  { %v6638_v52 = vadd.f32 %v6610_v19, %v6570_v20  ;;  %v15666_v19 = vld [vmem:[#allocation35_spill] sm:$0xff] }
 0xc5c   :  { %v2754_v56 = vadd.f32 %v15666_v19, %v2681_v44  ;;  %v2829_v16 = vadd.f32 %v15671_v38, %v2756_v10  ;;  %v15694_v19 = vld [vmem:[#allocation54_spill] sm:$0xff] }
 0xc5d   :  { %v6698_v62 = vpop.f32.mrf.mxu3 }
 0xc5e   :  { %v6705_v0 = vadd.f32 %v6698_v62, %v6637_v43  ;;  %v2827_v30 = vadd.f32 %v15668_v32, %v2754_v56  ;;  %v2902_v35 = vadd.f32 %v15673_v34, %v2829_v16  ;;  %v15675_v62 = vld [vmem:[#allocation41_spill] sm:$0xff]  ;;  %v15696_v32 = vld [vmem:[#allocation55_spill] sm:$0xff] }
 0xc5f   :  { %v6633_v28 = vpop.f32.mrf.mxu1 }
 0xc60   :  { %v6678_v7 = vpop.f32.mrf.mxu2  ;;  %v6639_v18 = vadd.f32 %v6633_v28, %v6571_v12  ;;  %v2900_v13 = vadd.f32 %v15670_v45, %v2827_v30  ;;  %v2975_v26 = vadd.f32 %v15675_v62, %v2902_v35  ;;  %v15698_v35 = vld [vmem:[#allocation58_spill] sm:$0xff] }
 0xc61   :  { %v6706_v21 = vadd.f32 %v6678_v7, %v6638_v52  ;;  %v15681_v7 = vld [vmem:[#allocation47_spill] sm:$0xff] }
 0xc62   :  { %v6743_v48 = vpop.f32.mrf.mxu0  ;;  %v2973_v28 = vadd.f32 %v15672_v58, %v2900_v13 }
 0xc63   :  { %v6772_v14 = vadd.f32 %v6743_v48, %v6704_v42  ;;  %v15677_v48 = vld [vmem:[#allocation38_spill] sm:$0xff] }
 0xc64   :  { %v3046_v60 = vadd.f32 %v15674_v25, %v2973_v28  ;;  %v3048_v51 = vadd.f32 %v15677_v48, %v2975_v26  ;;  %v15697_v28 = vld [vmem:[#allocation56_spill] sm:$0xff] }
 0xc65   :  { %v6776_v5 = vadd.f32 %v6772_v14, %v15658_v2  ;;  %v6701_v40 = vpop.f32.mrf.mxu3  ;;  %v15679_v14 = vld [vmem:[#allocation45_spill] sm:$0xff] }
 0xc66   :  { %v6707_v31 = vadd.f32 %v6701_v40, %v6639_v18  ;;  %v3119_v42 = vadd.f32 %v15676_v55, %v3046_v60  ;;  %v3121_v20 = vadd.f32 %v15679_v14, %v3048_v51  ;;  %v15700_v51 = vld [vmem:[#allocation59_spill] sm:$0xff] }
 0xc67   :  { %v6766_v59 = vpop.f32.mrf.mxu1  ;;  %v6780_v15 = vmax.f32 %v6776_v5, 0.0  ;;  %v15683_v5 = vld [vmem:[#allocation50_spill] sm:$0xff] }
 0xc68   :  { %v6773_v33 = vadd.f32 %v6766_v59, %v6705_v0  ;;  %v3192_v43 = vadd.f32 %v15678_v29, %v3119_v42  ;;  %v3194_v52 = vadd.f32 %v15681_v7, %v3121_v20  ;;  %v15682_v59 = vld [vmem:[#allocation42_spill] sm:$0xff]  ;;  %v15699_v42 = vld [vmem:[#allocation57_spill] sm:$0xff] }
 0xc6a   :  { %v6777_v54 = vadd.f32 %v6773_v33, %v15658_v2  ;;  %v6746_v24 = vpop.f32.mrf.mxu0  ;;  %v3265_v0 = vadd.f32 %v15680_v63, %v3192_v43  ;;  %v6784_v2 = vld [vmem:[%s15081_s5] sm:$0xff]  ;;  %v3267_v33 = vadd.f32 %v15683_v5, %v3194_v52 }
 0xc6b   :  { %v6774_v47 = vadd.f32 %v6746_v24, %v6706_v21  ;;  %v15684_v21 = vld [vmem:[#allocation51_spill] sm:$0xff]  ;;  %v15685_v24 = vld [vmem:[#allocation49_spill] sm:$0xff]  ;;  %v15701_v43 = vld [vmem:[#allocation16_spill] sm:$0xff] }
 0xc6c   :  { %v6781_v27 = vmax.f32 %v6777_v54, 0.0  ;;  %v3338_v50 = vadd.f32 %v15682_v59, %v3265_v0  ;;  %v3340_v40 = vadd.f32 %v15685_v24, %v3267_v33  ;;  %v15703_v33 = vld [vmem:[#allocation62_spill] sm:$0xff] }
 0xc6d   :  { %v6778_v49 = vadd.f32 %v6774_v47, %v15659_v22  ;;  %v15686_v47 = vld [vmem:[#allocation24_spill] sm:$0xff] }
 0xc6e   :  { %v14249_v41 = vpack.i.bf16 %v6781_v27, %v6780_v15  ;;  %v3411_v12 = vadd.f32 %v15684_v21, %v3338_v50 }
 0xc6f   :  { %v6782_v4 = vmax.f32 %v6778_v49, 0.0  ;;  %v6769_v8 = vpop.f32.mrf.mxu1  ;;  %v15688_v49 = vld [vmem:[#allocation20_spill] sm:$0xff] }
 0xc70   :  { %v6775_v57 = vadd.f32 %v6769_v8, %v6707_v31  ;;  %10573 = vrot.lane.b32.xlu1 %v14249_v41, %s15462_s17  ;;  %v3484_v18 = vadd.f32 %v15686_v47, %v3411_v12  ;;  %v15689_v8 = vld [vmem:[#allocation18_spill] sm:$0xff]  ;;  %v15704_v47 = vld [vmem:[#allocation40_spill] sm:$0xff] }
 0xc71   :  { %6878 = vmatpush.msrb.mxu0 %v6782_v4 }
 0xc72   :  { %v6779_v17 = vadd.f32 %v6775_v57, %v15659_v22  ;;  %v3557_v31 = vadd.f32 %v15688_v49, %v3484_v18  ;;  %v15705_v18 = vld [vmem:[#allocation61_spill] sm:$0xff] }
 0xc73   :  { %6879 = vmatpush.msrb.mxu0 %v6780_v15  ;;  %v6785_v15 = vld [vmem:[%s15081_s5 + $0x8] sm:$0xff] }
 0xc74   :  { %v6783_v3 = vmax.f32 %v6779_v17, 0.0  ;;  %9910 = vmatmul.msk.f32.vlgmr.msrb.gmra.mxu0 %vm2506_vm11, %v6784_v2  ;;  %v15690_v17 = vld [vmem:[#allocation14_spill] sm:$0xff] }
 0xc76   :  { %6901 = vmatpush.msrb.mxu1 %v6783_v3  ;;  %v14254_v46 = vpack.i.bf16 %v6783_v3, %v6782_v4  ;;  %v3630_v3 = vadd.f32 %v15690_v17, %v3557_v31 }
 0xc78   :  { %6902 = vmatpush.msrb.mxu1 %v6781_v27  ;;  %10568 = vrot.lane.b32.xlu0 %v14254_v46, %s15462_s17  ;;  %v15687_v27 = vld [vmem:[#allocation15_spill] sm:$0xff]  ;;  %v3703_v37 = vadd.f32 %v15692_v23, %v3630_v3 }
 0xc79   :  { %10593 = vrot.lane.b32.xlu1 %v14254_v46, %s15363_s25  ;;  %10578 = vrot.lane.b32.xlu2 %v14254_v46, %s15461_s26  ;;  %v3413_v22 = vadd.f32 %v15687_v27, %v3340_v40  ;;  %v9905_v40 = vld [vmem:[%s15081_s5 + $0x18] sm:$0xff] }
 0xc7a   :  { %9912 = vmatmul.msk.f32.vlgmr.msrb.gmra.mxu1 %vm2506_vm11, %v6784_v2  ;;  %v3776_v56 = vadd.f32 %v15694_v19, %v3703_v37  ;;  %v15702_v2 = vld [vmem:[#allocation60_spill] sm:$0xff]  ;;  %v15706_v27 = vld [vmem:[#allocation63_spill] sm:$0xff]  ;;  %v15708_v37 = vld [vmem:[#allocation66_spill] sm:$0xff] }
 0xc7b   :  { %v3486_v57 = vadd.f32 %v15689_v8, %v3413_v22  ;;  %v15709_v19 = vld [vmem:[#allocation67_spill] sm:$0xff] }
 0xc7c   :  { %9911 = vmatmul.msk.f32.gmra.mxu0 %vm2506_vm11, %v6785_v15  ;;  %v3849_v30 = vadd.f32 %v15696_v32, %v3776_v56 }
 0xc7d   :  { %v3559_v9 = vadd.f32 %v15691_v1, %v3486_v57 }
 0xc7e   :  { %v3922_v25 = vadd.f32 %v15698_v35, %v3849_v30 }
 0xc7f   :  { %v3632_v61 = vadd.f32 %v15693_v36, %v3559_v9  ;;  %v15707_v9 = vld [vmem:[#allocation64_spill] sm:$0xff] }
 0xc80   :  { %10583 = vrot.lane.b32.xlu0 %v14249_v41, %s15461_s26  ;;  %v3995_v29 = vadd.f32 %v15700_v51, %v3922_v25 }
 0xc81   :  { %10603 = vrot.lane.b32.xlu1 %v14249_v41, %s15660_s3  ;;  %10588 = vrot.lane.b32.xlu2 %v14249_v41, %s15363_s25  ;;  %v3705_v6 = vadd.f32 %v15695_v53, %v3632_v61  ;;  %v9920_v61 = vld [vmem:[%s15081_s5 + $0x30] sm:$0xff] }
 0xc82   :  { %9913 = vmatmul.msk.f32.gmra.mxu1 %vm2506_vm11, %v6785_v15  ;;  %v4068_v21 = vadd.f32 %v15703_v33, %v3995_v29  ;;  %v9932_v33 = vld [vmem:[%s15081_s5 + $0x50] sm:$0xff] }
 0xc83   :  { %v3778_v34 = vadd.f32 %v15697_v28, %v3705_v6 }
 0xc84   :  { %v4141_v22 = vadd.f32 %v15706_v27, %v4068_v21 }
 0xc85   :  { %v3851_v48 = vadd.f32 %v15699_v42, %v3778_v34  ;;  %v15713_v42 = vld [vmem:[#allocation68_spill] sm:$0xff] }
 0xc87   :  { %v3924_v5 = vadd.f32 %v15702_v2, %v3851_v48 }
 0xc88   :  { %10598 = vrot.lane.b32.xlu0 %v14254_v46, %s15660_s3 }
 0xc89   :  { %10618 = vrot.lane.b32.xlu1 %v14254_v46, %s15311_s23  ;;  %10613 = vrot.lane.b32.xlu2 %v14254_v46, %s15312_s1  ;;  %v3997_v15 = vadd.f32 %v15705_v18, %v3924_v5 }
 0xc8b   :  { %v4070_v23 = vadd.f32 %v15707_v9, %v3997_v15 }
 0xc90   :  { %10608 = vrot.lane.b32.xlu0 %v14249_v41, %s15312_s1 }
 0xc91   :  { %10628 = vrot.lane.b32.xlu1 %v14249_v41, %s15316_s6  ;;  %10623 = vrot.lane.b32.xlu2 %v14249_v41, %s15311_s23 }
 0xc98   :  { %10633 = vrot.lane.b32.xlu0 %v14254_v46, %s15316_s6 }
 0xc99   :  { %10653 = vrot.lane.b32.xlu1 %v14254_v46, %s15318_s29  ;;  %10638 = vrot.lane.b32.xlu2 %v14254_v46, %s15315_s15 }
 0xca0   :  { %10643 = vrot.lane.b32.xlu0 %v14249_v41, %s15315_s15 }
 0xca1   :  { %10663 = vrot.lane.b32.xlu1 %v14249_v41, %s15317_s12  ;;  %10648 = vrot.lane.b32.xlu2 %v14249_v41, %s15318_s29 }
 0xca8   :  { %10658 = vrot.lane.b32.xlu0 %v14254_v46, %s15317_s12 }
 0xca9   :  { %10678 = vrot.lane.b32.xlu1 %v14254_v46, %s15319_s30  ;;  %10673 = vrot.lane.b32.xlu2 %v14254_v46, %s15348_s4 }
 0xcb0   :  { %10668 = vrot.lane.b32.xlu0 %v14249_v41, %s15348_s4  ;;  %s10892_s4 = smov 56  }
 0xcb1   :  { %10688 = vrot.lane.b32.xlu1 %v14249_v41, %s15351_s13  ;;  %10683 = vrot.lane.b32.xlu2 %v14249_v41, %s15319_s30 }
 0xcb8   :  { %10693 = vrot.lane.b32.xlu0 %v14254_v46, %s15351_s13 }
 0xcb9   :  { %10713 = vrot.lane.b32.xlu1 %v14254_v46, %s15273_s2  ;;  %10698 = vrot.lane.b32.xlu2 %v14254_v46, %s15352_s14 }
 0xcc0   :  { %10703 = vrot.lane.b32.xlu0 %v14249_v41, %s15352_s14 }
 0xcc1   :  { %10723 = vrot.lane.b32.xlu1 %v14249_v41, %s15350_s28  ;;  %10708 = vrot.lane.b32.xlu2 %v14249_v41, %s15273_s2 }
 0xcc8   :  { %10718 = vrot.lane.b32.xlu0 %v14254_v46, %s15350_s28 }
 0xcc9   :  { %10738 = vrot.lane.b32.xlu1 %v14254_v46, %s15353_s27  ;;  %10733 = vrot.lane.b32.xlu2 %v14254_v46, %s15274_s19 }
 0xcd0   :  { %10728 = vrot.lane.b32.xlu0 %v14249_v41, %s15274_s19 }
 0xcd1   :  { %10748 = vrot.lane.b32.xlu1 %v14249_v41, %s15275_s22  ;;  %10743 = vrot.lane.b32.xlu2 %v14249_v41, %s15353_s27 }
 0xcd3   :  { %v10579_v54 = vpop.permute.xlu2 %10578 }
 0xcd4   :  { %v10581_v62 = vunpack.i.h.bf16 %v10579_v54  ;;  %v10580_v26 = vunpack.i.l.bf16 %v10579_v54 }
 0xcd6   :  { %v6921_v0 = vsel %vm119_vm1, %v10580_v26, %v10581_v62 }
 0xcd8   :  { %10753 = vrot.lane.b32.xlu0 %v14254_v46, %s15275_s22  ;;  %s10891_s22 = smov 80  }
 0xcd9   :  { %10773 = vrot.lane.b32.xlu1 %v14254_v46, %s15279_s18  ;;  %10758 = vrot.lane.b32.xlu2 %v14254_v46, %s15538_s24 }
 0xcdb   :  { %v14372_v4 = vpop.permute.xlu2 %10588 }
 0xcdc   :  { %v10591_v12 = vunpack.i.h.bf16 %v14372_v4 }
 0xce0   :  { %10763 = vrot.lane.b32.xlu0 %v14249_v41, %s15538_s24 }
 0xce1   :  { %10783 = vrot.lane.b32.xlu1 %v14249_v41, %s15277_s16  ;;  %10768 = vrot.lane.b32.xlu2 %v14249_v41, %s15279_s18 }
 0xce2   :  { %v10574_v44 = vpop.permute.xlu1 %10573 }
 0xce3   :  { %v14384_v39 = vpop.permute.xlu2 %10613  ;;  %v10576_v10 = vunpack.i.h.bf16 %v10574_v44  ;;  %v10575_v45 = vunpack.i.l.bf16 %v10574_v44  ;;  %v4214_v44 = vadd.f32 %v15708_v37, %v4141_v22 }
 0xce4   :  { %v10616_v6 = vunpack.i.h.bf16 %v14384_v39  ;;  %v10615_v32 = vunpack.i.l.bf16 %v14384_v39 }
 0xce5   :  { %v6800_v55 = vsel %vm91_vm0, %v10575_v45, %v10576_v10  ;;  %v4287_v56 = vadd.f32 %v15709_v19, %v4214_v44  ;;  %v15710_v45 = vld [vmem:[#allocation65_spill] sm:$0xff] }
 0xce8   :  { %10778 = vrot.lane.b32.xlu0 %v14254_v46, %s15277_s16  ;;  %s10890_s16 = smov 92  }
 0xce9   :  { %10798 = vrot.lane.b32.xlu1 %v14254_v46, %s15278_s20  ;;  %10793 = vrot.lane.b32.xlu2 %v14254_v46, %s15378_s11  ;;  %v9904_v46 = vld [vmem:[%s15081_s5 + $0x10] sm:$0xff] }
 0xcea   :  { %v10569_v11 = vpop.permute.xlu0 %10568 }
 0xceb   :  { %v10571_v13 = vunpack.i.h.bf16 %v10569_v11  ;;  %v10570_v38 = vunpack.i.l.bf16 %v10569_v11  ;;  %v10594_v16 = vpop.permute.xlu1 %10593  ;;  %v14396_v58 = vpop.permute.xlu2 %10623 }
 0xcec   :  { %v10596_v14 = vunpack.i.h.bf16 %v10594_v16  ;;  %v10595_v20 = vunpack.i.l.bf16 %v10594_v16  ;;  %v10626_v39 = vunpack.i.h.bf16 %v14396_v58 }
 0xced   :  { %6849 = vmatpush.msra.mxu3 %v10571_v13  ;;  %v6801_v60 = vsel %vm91_vm0, %v10570_v38, %v10571_v13  ;;  %v4143_v13 = vadd.f32 %v15710_v45, %v4070_v23  ;;  %v10625_v38 = vunpack.i.l.bf16 %v14396_v58  ;;  %vm15712_vm0 = vcmask 875520  }
 0xcee   :  { %6826 = vmatpush.msra.mxu2 %v6801_v60  ;;  %v7065_v24 = vsel %vm175_vm3, %v10595_v20, %v10596_v14  ;;  %v7209_v26 = vsel %vm15712_vm0, %v10615_v32, %v10616_v6 }
 0xcef   :  { %6850 = vmatpush.msra.mxu3 %v10576_v10  ;;  %v9914_v10 = vld [vmem:[%s15081_s5 + $0x20] sm:$0xff]  ;;  %v4216_v48 = vadd.f32 %v15713_v42, %v4143_v13  ;;  %v7136_v29 = vsel %vm203_vm4, %v10625_v38, %v10626_v39  ;;  %v9956_v42 = vld [vmem:[%s15081_s5 + $0x90] sm:$0xff] }
 0xcf0   :  { %10788 = vrot.lane.b32.xlu0 %v14249_v41, %s15378_s11  ;;  %6827 = vmatpush.msra.mxu2 %v6800_v55 }
 0xcf1   :  { %4332 = vrot.lane.b32.xlu1 %v15701_v43, %s10890_s16  ;;  %9908 = vmatmul.msk.f32.vlgmr.msra.gmra.mxu3 %vm2506_vm11, %v9904_v46 }
 0xcf2   :  { %10803 = vrot.lane.b32.xlu2 %v14249_v41, %s15278_s20  ;;  %6969 = vmatpush.msrb.mxu3 %v10581_v62  ;;  %v10584_v63 = vpop.permute.xlu0 %10583  ;;  %v10590_v41 = vunpack.i.l.bf16 %v14372_v4 }
 0xcf3   :  { %9906 = vmatmul.msk.f32.vlgmr.msra.gmra.mxu2 %vm2506_vm11, %v9904_v46  ;;  %v10586_v7 = vunpack.i.h.bf16 %v10584_v63  ;;  %v10585_v52 = vunpack.i.l.bf16 %v10584_v63  ;;  %v10604_v59 = vpop.permute.xlu1 %10603  ;;  %v14416_v50 = vpop.permute.xlu2 %10638  ;;  %v15711_v46 = vld [vmem:[#allocation21_spill] sm:$0xff] }
 0xcf4   :  { %6946 = vmatpush.msrb.mxu2 %v6921_v0  ;;  %v7064_v49 = vsel %vm175_vm3, %v10590_v41, %v10591_v12  ;;  %v10606_v4 = vunpack.i.h.bf16 %v10604_v59  ;;  %v10605_v8 = vunpack.i.l.bf16 %v10604_v59  ;;  %v10641_v28 = vunpack.i.h.bf16 %v14416_v50  ;;  %v15717_v59 = vld [vmem:[#allocation31_spill] sm:$0xff] }
 0xcf5   :  { %6970 = vmatpush.msrb.mxu3 %v10586_v7  ;;  %v6920_v54 = vsel %vm119_vm1, %v10585_v52, %v10586_v7  ;;  %v10640_v34 = vunpack.i.l.bf16 %v14416_v50  ;;  %v4301_v62 = vadd.f32 %v15711_v46, %v4287_v56  ;;  %vm15714_vm1 = vmmov %vm15712_vm0  ;;  %v9915_v7 = vld [vmem:[%s15081_s5 + $0x28] sm:$0xff]  ;;  %vm15718_vm3 = vcmask 859136  }
 0xcf6   :  { %6947 = vmatpush.msrb.mxu2 %v6920_v54  ;;  %v6992_v53 = vsel %vm147_vm2, %v10605_v8, %v10606_v4  ;;  %v9926_v54 = vld [vmem:[%s15081_s5 + $0x40] sm:$0xff]  ;;  %vm15720_vm6 = vmmov %vm15718_vm3 }
 0xcf7   :  { %7113 = vmatpush.msra.mxu3 %v10596_v14  ;;  %v15715_v14 = vld [vmem:[#allocation69_spill] sm:$0xff]  ;;  %v4305_v0 = vmax.f32 %v4301_v62, 0.0  ;;  %vm15726_vm0 = vmmov %vm15724_vm5 }
 0xcf8   :  { %7090 = vmatpush.msra.mxu2 %v7065_v24  ;;  %4330 = vrot.lane.b32.xlu0 %v15704_v47, %s10890_s16  ;;  %v4289_v20 = vadd.f32 %v15715_v14, %v4216_v48  ;;  %v9950_v14 = vld [vmem:[%s15081_s5 + $0x80] sm:$0xff] }
 0xcf9   :  { %7114 = vmatpush.msra.mxu3 %v10591_v12  ;;  %4348 = vrot.lane.b32.xlu1 %v15704_v47, %s15350_s28 }
 0xcfa   :  { %9909 = vmatmul.msk.f32.gmra.mxu3 %vm2506_vm11, %v9905_v40  ;;  %4339 = vrot.lane.b32.xlu2 %v15704_v47, %s10891_s22  ;;  %v10599_v31 = vpop.permute.xlu0 %10598  ;;  %v4303_v50 = vadd.f32 %v15717_v59, %v4289_v20 }
 0xcfb   :  { %7091 = vmatpush.msra.mxu2 %v7064_v49  ;;  %v10601_v57 = vunpack.i.h.bf16 %v10599_v31  ;;  %v10600_v17 = vunpack.i.l.bf16 %v10599_v31  ;;  %v10619_v3 = vpop.permute.xlu1 %10618  ;;  %v14438_v1 = vpop.permute.xlu2 %10648 }
 0xcfc   :  { %9907 = vmatmul.msk.f32.gmra.mxu2 %vm2506_vm11, %v9905_v40  ;;  %v10621_v30 = vunpack.i.h.bf16 %v10619_v3  ;;  %v10620_v11 = vunpack.i.l.bf16 %v10619_v3  ;;  %v4307_v21 = vmax.f32 %v4303_v50, 0.0 }
 0xcfd   :  { %7041 = vmatpush.msra.mxu1 %v10601_v57  ;;  %v6993_v36 = vsel %vm147_vm2, %v10600_v17, %v10601_v57  ;;  %vm15716_vm2 = vcmask 867328   ;;  %v9927_v57 = vld [vmem:[%s15081_s5 + $0x48] sm:$0xff] }
 0xcfe   :  { %7018 = vmatpush.msra.mxu0 %v6993_v36  ;;  %v7137_v58 = vsel %vm203_vm4, %v10620_v11, %v10621_v30  ;;  %v7281_v63 = vsel %vm15716_vm2, %v10640_v34, %v10641_v28  ;;  %vm15719_vm4 = vmmov %vm15716_vm2  ;;  %v10651_v11 = vunpack.i.h.bf16 %v14438_v1  ;;  %vm15728_vm2 = vcmask 695296  }
 0xcff   :  { %7042 = vmatpush.msra.mxu1 %v10606_v4  ;;  %v9933_v4 = vld [vmem:[%s15081_s5 + $0x58] sm:$0xff] }
 0xd00   :  { %4341 = vrot.lane.b32.xlu0 %v15701_v43, %s10891_s22  ;;  %7019 = vmatpush.msra.mxu0 %v6992_v53 }
 0xd01   :  { %4359 = vrot.lane.b32.xlu1 %v15701_v43, %s10892_s4  ;;  %9924 = vmatmul.msk.f32.vlgmr.msra.gmra.mxu1 %vm2506_vm11, %v9920_v61 }
 0xd02   :  { %7185 = vmatpush.msrb.mxu1 %v10621_v30  ;;  %4350 = vrot.lane.b32.xlu2 %v15701_v43, %s15350_s28  ;;  %v10609_v16 = vpop.permute.xlu0 %10608  ;;  %v9921_v43 = vld [vmem:[%s15081_s5 + $0x38] sm:$0xff]  ;;  %v9938_v30 = vld [vmem:[%s15081_s5 + $0x60] sm:$0xff] }
 0xd03   :  { %9918 = vmatmul.msk.f32.vlgmr.msrb.gmra.mxu3 %vm2506_vm11, %v9914_v10  ;;  %v10611_v35 = vunpack.i.h.bf16 %v10609_v16  ;;  %v10610_v25 = vunpack.i.l.bf16 %v10609_v16  ;;  %v10629_v60 = vpop.permute.xlu1 %10628  ;;  %9922 = vmatmul.msk.f32.vlgmr.msra.gmra.mxu0 %vm2506_vm11, %v9920_v61  ;;  %v14471_v55 = vpop.permute.xlu2 %10673  ;;  %v9944_v61 = vld [vmem:[%s15081_s5 + $0x70] sm:$0xff] }
 0xd04   :  { %9916 = vmatmul.msk.f32.vlgmr.msrb.gmra.mxu2 %vm2506_vm11, %v9914_v10  ;;  %7257 = vmatpush.msrb.mxu3 %v10616_v6  ;;  %v10631_v24 = vunpack.i.h.bf16 %v10629_v60  ;;  %v10630_v40 = vunpack.i.l.bf16 %v10629_v60  ;;  %v10650_v10 = vunpack.i.l.bf16 %v14438_v1  ;;  %v9939_v60 = vld [vmem:[%s15081_s5 + $0x68] sm:$0xff]  ;;  %v10676_v48 = vunpack.i.h.bf16 %v14471_v55 }
 0xd05   :  { %7162 = vmatpush.msrb.mxu0 %v7137_v58  ;;  %7234 = vmatpush.msrb.mxu2 %v7209_v26  ;;  %v7208_v51 = vsel %vm15714_vm1, %v10610_v25, %v10611_v35  ;;  %v9945_v25 = vld [vmem:[%s15081_s5 + $0x78] sm:$0xff]  ;;  %vm15727_vm1 = vcmask 703488  }
 0xd06   :  { %7186 = vmatpush.msrb.mxu1 %v10626_v39  ;;  %7258 = vmatpush.msrb.mxu3 %v10611_v35  ;;  %v7352_v31 = vsel %vm15720_vm6, %v10630_v40, %v10631_v24  ;;  %v7496_v34 = vsel %vm15725_vm9, %v10650_v10, %v10651_v11  ;;  %v9968_v40 = vld [vmem:[%s15081_s5 + $0xb0] sm:$0xff]  ;;  %vm15731_vm6 = vcmask 687104   ;;  %vm15736_vm9 = vcmask 539648  }
 0xd07   :  { %7163 = vmatpush.msrb.mxu0 %v7136_v29  ;;  %7235 = vmatpush.msrb.mxu2 %v7208_v51  ;;  %v10675_v51 = vunpack.i.l.bf16 %v14471_v55 }
 0xd08   :  { %7329 = vmatpush.msra.mxu1 %v10641_v28  ;;  %4357 = vrot.lane.b32.xlu0 %v15704_v47, %s10892_s4 }
 0xd09   :  { %7306 = vmatpush.msra.mxu0 %v7281_v63  ;;  %9925 = vmatmul.msk.f32.gmra.mxu1 %vm2506_vm11, %v9921_v43  ;;  %v7641_v50 = vsel %vm15727_vm1, %v10675_v51, %v10676_v48 }
 0xd0a   :  { %4368 = vrot.lane.b32.xlu2 %v4305_v0, %s15378_s11  ;;  %v10634_v52 = vpop.permute.xlu0 %10633 }
 0xd0b   :  { %9919 = vmatmul.msk.f32.gmra.mxu3 %vm2506_vm11, %v9915_v7  ;;  %v14491_v2 = vpop.permute.xlu1 %10653  ;;  %9923 = vmatmul.msk.f32.gmra.mxu0 %vm2506_vm11, %v9921_v43  ;;  %v14494_v5 = vpop.permute.xlu2 %10683  ;;  %v10636_v12 = vunpack.i.h.bf16 %v10634_v52  ;;  %v10635_v41 = vunpack.i.l.bf16 %v10634_v52 }
 0xd0c   :  { %9917 = vmatmul.msk.f32.gmra.mxu2 %vm2506_vm11, %v9915_v7  ;;  %v10656_v56 = vunpack.i.h.bf16 %v14491_v2  ;;  %v10655_v53 = vunpack.i.l.bf16 %v14491_v2  ;;  %v10686_v45 = vunpack.i.h.bf16 %v14494_v5  ;;  %v10685_v13 = vunpack.i.l.bf16 %v14494_v5 }
 0xd0d   :  { %v7353_v22 = vsel %vm15718_vm3, %v10635_v41, %v10636_v12  ;;  %vm15729_vm3 = vmmov %vm15728_vm2  ;;  %v9951_v41 = vld [vmem:[%s15081_s5 + $0x88] sm:$0xff] }
 0xd0e   :  { %v7497_v28 = vsel %vm15723_vm14, %v10655_v53, %v10656_v56  ;;  %v7568_v35 = vsel %vm15726_vm0, %v10685_v13, %v10686_v45 }
 0xd10   :  { %4370 = vrot.lane.b32.xlu0 %v4307_v21, %s15378_s11 }
 0xd11   :  { %9936 = vmatmul.msk.f32.vlgmr.msrb.gmra.mxu1 %vm2506_vm11, %v9932_v33 }
 0xd12   :  { %v10644_v47 = vpop.permute.xlu0 %10643 }
 0xd13   :  { %9930 = vmatmul.msk.f32.vlgmr.msra.gmra.mxu3 %vm2506_vm11, %v9926_v54  ;;  %v10646_v18 = vunpack.i.h.bf16 %v10644_v47  ;;  %v10645_v15 = vunpack.i.l.bf16 %v10644_v47  ;;  %v10664_v27 = vpop.permute.xlu1 %10663  ;;  %9934 = vmatmul.msk.f32.vlgmr.msrb.gmra.mxu0 %vm2506_vm11, %v9932_v33  ;;  %v14513_v8 = vpop.permute.xlu2 %10698 }
 0xd14   :  { %9928 = vmatmul.msk.f32.vlgmr.msra.gmra.mxu2 %vm2506_vm11, %v9926_v54  ;;  %7401 = vmatpush.msra.mxu3 %v10636_v12  ;;  %v10666_v3 = vunpack.i.h.bf16 %v10664_v27  ;;  %v10665_v9 = vunpack.i.l.bf16 %v10664_v27  ;;  %v10701_v29 = vunpack.i.h.bf16 %v14513_v8  ;;  %v10700_v43 = vunpack.i.l.bf16 %v14513_v8  ;;  %v9957_v12 = vld [vmem:[%s15081_s5 + $0x98] sm:$0xff] }
 0xd15   :  { %7378 = vmatpush.msra.mxu2 %v7353_v22  ;;  %7330 = vmatpush.msra.mxu1 %v10646_v18  ;;  %v7280_v49 = vsel %vm15719_vm4, %v10645_v15, %v10646_v18  ;;  %vm15730_vm4 = vmmov %vm15727_vm1 }
 0xd16   :  { %7402 = vmatpush.msra.mxu3 %v10631_v24  ;;  %7307 = vmatpush.msra.mxu0 %v7280_v49  ;;  %v7424_v19 = vsel %vm15722_vm8, %v10665_v9, %v10666_v3  ;;  %v7713_v2 = vsel %vm15728_vm2, %v10700_v43, %v10701_v29  ;;  %v9962_v49 = vld [vmem:[%s15081_s5 + $0xa0] sm:$0xff]  ;;  %vm15733_vm8 = vmmov %vm15731_vm6  ;;  %v9992_v43 = vld [vmem:[%s15081_s5 + $0xf0] sm:$0xff]  ;;  %vm4336_vm2 = vcmask 261312  }
 0xd17   :  { %7379 = vmatpush.msra.mxu2 %v7352_v31  ;;  %vm15738_vm1 = vmmov %vm15736_vm9 }
 0xd19   :  { %9937 = vmatmul.msk.f32.gmra.mxu1 %vm2506_vm11, %v9933_v4 }
 0xd1a   :  { %v10659_v17 = vpop.permute.xlu0 %10658 }
 0xd1b   :  { %9931 = vmatmul.msk.f32.gmra.mxu3 %vm2506_vm11, %v9927_v57  ;;  %v10661_v23 = vunpack.i.h.bf16 %v10659_v17  ;;  %v10660_v37 = vunpack.i.l.bf16 %v10659_v17  ;;  %v10679_v44 = vpop.permute.xlu1 %10678  ;;  %9935 = vmatmul.msk.f32.gmra.mxu0 %vm2506_vm11, %v9933_v4  ;;  %v14537_v39 = vpop.permute.xlu2 %10708 }
 0xd1c   :  { %9929 = vmatmul.msk.f32.gmra.mxu2 %vm2506_vm11, %v9927_v57  ;;  %v10681_v6 = vunpack.i.h.bf16 %v10679_v44  ;;  %v10680_v32 = vunpack.i.l.bf16 %v10679_v44  ;;  %v10711_v13 = vunpack.i.h.bf16 %v14537_v39 }
 0xd1d   :  { %7473 = vmatpush.msrb.mxu1 %v10661_v23  ;;  %v7425_v36 = vsel %vm15721_vm7, %v10660_v37, %v10661_v23  ;;  %vm15732_vm7 = vcmask 556032  }
 0xd1e   :  { %7450 = vmatpush.msrb.mxu0 %v7425_v36  ;;  %v7569_v1 = vsel %vm15724_vm5, %v10680_v32, %v10681_v6  ;;  %vm15734_vm14 = vmmov %vm15732_vm7  ;;  %v9969_v36 = vld [vmem:[%s15081_s5 + $0xb8] sm:$0xff]  ;;  %vm15735_vm5 = vcmask 547840  }
 0xd1f   :  { %7474 = vmatpush.msrb.mxu1 %v10666_v3  ;;  %vm15737_vm0 = vmmov %vm15735_vm5 }
 0xd20   :  { %7451 = vmatpush.msrb.mxu0 %v7424_v19 }
 0xd21   :  { %9948 = vmatmul.msk.f32.vlgmr.msra.gmra.mxu1 %vm2506_vm11, %v9944_v61 }
 0xd22   :  { %7617 = vmatpush.msra.mxu1 %v10681_v6  ;;  %v10669_v38 = vpop.permute.xlu0 %10668  ;;  %v9980_v6 = vld [vmem:[%s15081_s5 + $0xd0] sm:$0xff] }
 0xd23   :  { %9942 = vmatmul.msk.f32.vlgmr.msrb.gmra.mxu3 %vm2506_vm11, %v9938_v30  ;;  %v14541_v16 = vpop.permute.xlu1 %10688  ;;  %9946 = vmatmul.msk.f32.vlgmr.msra.gmra.mxu0 %vm2506_vm11, %v9944_v61  ;;  %v14561_v26 = vpop.permute.xlu2 %10733  ;;  %v10671_v20 = vunpack.i.h.bf16 %v10669_v38  ;;  %v10670_v63 = vunpack.i.l.bf16 %v10669_v38  ;;  %v9963_v61 = vld [vmem:[%s15081_s5 + $0xa8] sm:$0xff]  ;;  %v10710_v38 = vunpack.i.l.bf16 %v14537_v39 }
 0xd24   :  { %9940 = vmatmul.msk.f32.vlgmr.msrb.gmra.mxu2 %vm2506_vm11, %v9938_v30  ;;  %7545 = vmatpush.msrb.mxu3 %v10656_v56  ;;  %v10691_v31 = vunpack.i.h.bf16 %v14541_v16  ;;  %v10690_v4 = vunpack.i.l.bf16 %v14541_v16 }
 0xd25   :  { %7522 = vmatpush.msrb.mxu2 %v7497_v28  ;;  %7594 = vmatpush.msra.mxu0 %v7569_v1  ;;  %v7640_v21 = vsel %vm15730_vm4, %v10670_v63, %v10671_v20  ;;  %vm15740_vm4 = vcmask 523264  }
 0xd26   :  { %7546 = vmatpush.msrb.mxu3 %v10651_v11  ;;  %7618 = vmatpush.msra.mxu1 %v10686_v45  ;;  %v7784_v37 = vsel %vm15733_vm8, %v10690_v4, %v10691_v31  ;;  %v9974_v45 = vld [vmem:[%s15081_s5 + $0xc0] sm:$0xff]  ;;  %vm4345_vm8 = vcmask 326912  }
 0xd27   :  { %7523 = vmatpush.msrb.mxu2 %v7496_v34  ;;  %7595 = vmatpush.msra.mxu0 %v7568_v35 }
 0xd29   :  { %9949 = vmatmul.msk.f32.gmra.mxu1 %vm2506_vm11, %v9945_v25 }
 0xd2a   :  { %v14555_v62 = vpop.permute.xlu0 %10693 }
 0xd2b   :  { %9943 = vmatmul.msk.f32.gmra.mxu3 %vm2506_vm11, %v9939_v60  ;;  %v14559_v58 = vpop.permute.xlu1 %10713  ;;  %9947 = vmatmul.msk.f32.gmra.mxu0 %vm2506_vm11, %v9945_v25  ;;  %v14581_v33 = vpop.permute.xlu2 %10743  ;;  %v10696_v47 = vunpack.i.h.bf16 %v14555_v62  ;;  %v10695_v18 = vunpack.i.l.bf16 %v14555_v62 }
 0xd2c   :  { %9941 = vmatmul.msk.f32.gmra.mxu2 %vm2506_vm11, %v9939_v60  ;;  %v10716_v32 = vunpack.i.h.bf16 %v14559_v58  ;;  %v10715_v30 = vunpack.i.l.bf16 %v14559_v58  ;;  %v10746_v16 = vunpack.i.h.bf16 %v14581_v33  ;;  %v10745_v28 = vunpack.i.l.bf16 %v14581_v33  ;;  %v9981_v58 = vld [vmem:[%s15081_s5 + $0xd8] sm:$0xff] }
 0xd2d   :  { %v7785_v9 = vsel %vm15731_vm6, %v10695_v18, %v10696_v47  ;;  %v7928_v60 = vsel %vm15737_vm0, %v10710_v38, %v10711_v13 }
 0xd2e   :  { %v7929_v25 = vsel %vm15735_vm5, %v10715_v30, %v10716_v32  ;;  %v8000_v62 = vsel %vm15738_vm1, %v10745_v28, %v10746_v16  ;;  %vm4363_vm5 = vcmask 458112  }
 0xd31   :  { %9960 = vmatmul.msk.f32.vlgmr.msrb.gmra.mxu1 %vm2506_vm11, %v9956_v42 }
 0xd32   :  { %7761 = vmatpush.msrb.mxu1 %v10701_v29  ;;  %v10704_v0 = vpop.permute.xlu0 %10703 }
 0xd33   :  { %9954 = vmatmul.msk.f32.vlgmr.msra.gmra.mxu3 %vm2506_vm11, %v9950_v14  ;;  %v10706_v7 = vunpack.i.h.bf16 %v10704_v0  ;;  %v10705_v55 = vunpack.i.l.bf16 %v10704_v0  ;;  %v10724_v52 = vpop.permute.xlu1 %10723  ;;  %9958 = vmatmul.msk.f32.vlgmr.msrb.gmra.mxu0 %vm2506_vm11, %v9956_v42  ;;  %v14599_v15 = vpop.permute.xlu2 %10758  ;;  %v9975_v42 = vld [vmem:[%s15081_s5 + $0xc8] sm:$0xff] }
 0xd34   :  { %9952 = vmatmul.msk.f32.vlgmr.msra.gmra.mxu2 %vm2506_vm11, %v9950_v14  ;;  %7689 = vmatpush.msra.mxu3 %v10676_v48  ;;  %v10726_v8 = vunpack.i.h.bf16 %v10724_v52  ;;  %v10725_v57 = vunpack.i.l.bf16 %v10724_v52  ;;  %v10736_v14 = vunpack.i.h.bf16 %v14561_v26  ;;  %v10761_v63 = vunpack.i.h.bf16 %v14599_v15 }
 0xd35   :  { %7666 = vmatpush.msra.mxu2 %v7641_v50  ;;  %7738 = vmatpush.msrb.mxu0 %v7713_v2  ;;  %v7712_v5 = vsel %vm15729_vm3, %v10705_v55, %v10706_v7  ;;  %v10760_v0 = vunpack.i.l.bf16 %v14599_v15  ;;  %vm15739_vm3 = vcmask 531456  }
 0xd36   :  { %7690 = vmatpush.msra.mxu3 %v10671_v20  ;;  %7762 = vmatpush.msrb.mxu1 %v10706_v7  ;;  %v7856_v44 = vsel %vm15734_vm14, %v10725_v57, %v10726_v8  ;;  %v10735_v20 = vunpack.i.l.bf16 %v14561_v26  ;;  %v9986_v7 = vld [vmem:[%s15081_s5 + $0xe0] sm:$0xff]  ;;  %vm15741_vm6 = vmmov %vm15739_vm3  ;;  %vm4354_vm14 = vcmask 392512  }
 0xd37   :  { %7667 = vmatpush.msra.mxu2 %v7640_v21  ;;  %7739 = vmatpush.msrb.mxu0 %v7712_v5  ;;  %v8145_v21 = vsel %vm15740_vm4, %v10760_v0, %v10761_v63  ;;  %v9998_v57 = vld [vmem:[%s15081_s5 + $0x100] sm:$0xff] }
 0xd38   :  { %v8073_v33 = vsel %vm15739_vm3, %v10735_v20, %v10736_v14 }
 0xd39   :  { %9961 = vmatmul.msk.f32.gmra.mxu1 %vm2506_vm11, %v9957_v12 }
 0xd3a   :  { %v10719_v54 = vpop.permute.xlu0 %10718 }
 0xd3b   :  { %9955 = vmatmul.msk.f32.gmra.mxu3 %vm2506_vm11, %v9951_v41  ;;  %v10739_v24 = vpop.permute.xlu1 %10738  ;;  %9959 = vmatmul.msk.f32.gmra.mxu0 %vm2506_vm11, %v9957_v12  ;;  %v10721_v27 = vunpack.i.h.bf16 %v10719_v54  ;;  %v10720_v22 = vunpack.i.l.bf16 %v10719_v54  ;;  %v14625_v19 = vpop.permute.xlu2 %10768  ;;  %v9993_v54 = vld [vmem:[%s15081_s5 + $0xf8] sm:$0xff] }
 0xd3c   :  { %9953 = vmatmul.msk.f32.gmra.mxu2 %vm2506_vm11, %v9951_v41  ;;  %v10741_v11 = vunpack.i.h.bf16 %v10739_v24  ;;  %v10740_v10 = vunpack.i.l.bf16 %v10739_v24 }
 0xd3d   :  { %v7857_v23 = vsel %vm15732_vm7, %v10720_v22, %v10721_v27  ;;  %vm15742_vm7 = vmmov %vm15740_vm4  ;;  %v6881_v22 = vpop.f32.mrf.mxu0  ;;  %vm15750_vm4 = vcmask 130112  }
 0xd3e   :  { %v8001_v39 = vsel %vm15736_vm9, %v10740_v10, %v10741_v11  ;;  %vm4374_vm9 = vcmask 523712  }
 0xd41   :  { %9972 = vmatmul.msk.f32.vlgmr.msra.gmra.mxu1 %vm2506_vm11, %v9968_v40 }
 0xd42   :  { %7905 = vmatpush.msra.mxu1 %v10721_v27  ;;  %v14607_v17 = vpop.permute.xlu0 %10728  ;;  %v10004_v27 = vld [vmem:[%s15081_s5 + $0x110] sm:$0xff] }
 0xd43   :  { %9966 = vmatmul.msk.f32.vlgmr.msrb.gmra.mxu3 %vm2506_vm11, %v9962_v49  ;;  %v14611_v3 = vpop.permute.xlu1 %10748  ;;  %9970 = vmatmul.msk.f32.vlgmr.msra.gmra.mxu0 %vm2506_vm11, %v9968_v40  ;;  %v14651_v35 = vpop.permute.xlu2 %10793  ;;  %v10731_v55 = vunpack.i.h.bf16 %v14607_v17  ;;  %v10730_v52 = vunpack.i.l.bf16 %v14607_v17  ;;  %v9987_v40 = vld [vmem:[%s15081_s5 + $0xe8] sm:$0xff] }
 0xd44   :  { %9964 = vmatmul.msk.f32.vlgmr.msrb.gmra.mxu2 %vm2506_vm11, %v9962_v49  ;;  %7833 = vmatpush.msrb.mxu3 %v10696_v47  ;;  %v6904_v47 = vpop.f32.mrf.mxu1  ;;  %v10751_v17 = vunpack.i.h.bf16 %v14611_v3 }
 0xd45   :  { %7810 = vmatpush.msrb.mxu2 %v7785_v9  ;;  %7882 = vmatpush.msra.mxu0 %v7857_v23  ;;  %v8072_v12 = vsel %vm15741_vm6, %v10730_v52, %v10731_v55  ;;  %v10750_v9 = vunpack.i.l.bf16 %v14611_v3  ;;  %v6884_v28 = vpop.f32.mrf.mxu0  ;;  %vm15751_vm6 = vmmov %vm15750_vm4 }
 0xd46   :  { %7834 = vmatpush.msrb.mxu3 %v10691_v31  ;;  %7906 = vmatpush.msra.mxu1 %v10726_v8 }
 0xd47   :  { %7811 = vmatpush.msrb.mxu2 %v7784_v37  ;;  %7883 = vmatpush.msra.mxu0 %v7856_v44 }
 0xd49   :  { %9973 = vmatmul.msk.f32.gmra.mxu1 %vm2506_vm11, %v9969_v36 }
 0xd4a   :  { %v14627_v56 = vpop.permute.xlu0 %10753 }
 0xd4b   :  { %9967 = vmatmul.msk.f32.gmra.mxu3 %vm2506_vm11, %v9963_v61  ;;  %v14631_v53 = vpop.permute.xlu1 %10773  ;;  %9971 = vmatmul.msk.f32.gmra.mxu0 %vm2506_vm11, %v9969_v36  ;;  %v10756_v49 = vunpack.i.h.bf16 %v14627_v56  ;;  %v10755_v31 = vunpack.i.l.bf16 %v14627_v56 }
 0xd4c   :  { %9965 = vmatmul.msk.f32.gmra.mxu2 %vm2506_vm11, %v9963_v61  ;;  %v14672_v29 = vpop.permute.xlu2 %10803  ;;  %v6907_v61 = vpop.f32.mrf.mxu1 }
 0xd4d   :  { %v8217_v3 = vsel %vm629_vm15, %v10755_v31, %v10756_v49  ;;  %v10806_v52 = vunpack.i.h.bf16 %v14672_v29 }
 0xd51   :  { %9984 = vmatmul.msk.f32.vlgmr.msrb.gmra.mxu1 %vm2506_vm11, %v9980_v6 }
 0xd52   :  { %8049 = vmatpush.msrb.mxu1 %v10741_v11  ;;  %v10764_v1 = vpop.permute.xlu0 %10763  ;;  %v8216_v11 = vsel %vm629_vm15, %v10750_v9, %v10751_v17  ;;  %vm15743_vm15 = vcmask 367616   ;;  %v10028_v9 = vld [vmem:[%s15081_s5 + $0x150] sm:$0xff] }
 0xd53   :  { %9978 = vmatmul.msk.f32.vlgmr.msra.gmra.mxu3 %vm2506_vm11, %v9974_v45  ;;  %v14649_v34 = vpop.permute.xlu1 %10783  ;;  %9982 = vmatmul.msk.f32.vlgmr.msrb.gmra.mxu0 %vm2506_vm11, %v9980_v6  ;;  %v10766_v50 = vunpack.i.h.bf16 %v10764_v1  ;;  %v10765_v2 = vunpack.i.l.bf16 %v10764_v1  ;;  %vm15744_vm0 = vmmov %vm15743_vm15 }
 0xd54   :  { %9976 = vmatmul.msk.f32.vlgmr.msra.gmra.mxu2 %vm2506_vm11, %v9974_v45  ;;  %7977 = vmatpush.msra.mxu3 %v10716_v32  ;;  %v4340_v24 = vpop.permute.xlu2 %4339  ;;  %v10786_v23 = vunpack.i.h.bf16 %v14649_v34  ;;  %v10785_v37 = vunpack.i.l.bf16 %v14649_v34 }
 0xd55   :  { %7954 = vmatpush.msra.mxu2 %v7929_v25  ;;  %8026 = vmatpush.msrb.mxu0 %v8001_v39  ;;  %v8144_v41 = vsel %vm15742_vm7, %v10765_v2, %v10766_v50  ;;  %vm4385_vm7 = vcmask 1040896  }
 0xd56   :  { %7978 = vmatpush.msra.mxu3 %v10711_v13  ;;  %8050 = vmatpush.msrb.mxu1 %v10746_v16  ;;  %v8288_v10 = vsel %vm662_vm12, %v10785_v37, %v10786_v23  ;;  %v10005_v13 = vld [vmem:[%s15081_s5 + $0x118] sm:$0xff]  ;;  %v9999_v16 = vld [vmem:[%s15081_s5 + $0x108] sm:$0xff]  ;;  %v10796_v37 = vunpack.i.h.bf16 %v14651_v35 }
 0xd57   :  { %7955 = vmatpush.msra.mxu2 %v7928_v60  ;;  %8027 = vmatpush.msrb.mxu0 %v8000_v62  ;;  %v10016_v62 = vld [vmem:[%s15081_s5 + $0x130] sm:$0xff] }
 0xd59   :  { %9985 = vmatmul.msk.f32.gmra.mxu1 %vm2506_vm11, %v9981_v58 }
 0xd5a   :  { %v14665_v48 = vpop.permute.xlu0 %10778 }
 0xd5b   :  { %9979 = vmatmul.msk.f32.gmra.mxu3 %vm2506_vm11, %v9975_v42  ;;  %v14669_v51 = vpop.permute.xlu1 %10798  ;;  %9983 = vmatmul.msk.f32.gmra.mxu0 %vm2506_vm11, %v9981_v58  ;;  %v10781_v4 = vunpack.i.h.bf16 %v14665_v48  ;;  %v10780_v8 = vunpack.i.l.bf16 %v14665_v48  ;;  %v10776_v48 = vunpack.i.h.bf16 %v14631_v53 }
 0xd5c   :  { %9977 = vmatmul.msk.f32.gmra.mxu2 %vm2506_vm11, %v9975_v42  ;;  %v4351_v44 = vpop.permute.xlu2 %4350  ;;  %v10800_v20 = vunpack.i.l.bf16 %v14669_v51 }
 0xd5d   :  { %v8289_v56 = vsel %vm662_vm12, %v10780_v8, %v10781_v4  ;;  %vm4378_vm12 = vcmask 516096  }
 0xd61   :  { %9996 = vmatmul.msk.f32.vlgmr.msra.gmra.mxu1 %vm2506_vm11, %v9992_v43 }
 0xd62   :  { %8193 = vmatpush.msra.mxu1 %v10761_v63  ;;  %v14687_v5 = vpop.permute.xlu0 %10788  ;;  %v10010_v63 = vld [vmem:[%s15081_s5 + $0x120] sm:$0xff] }
 0xd63   :  { %9990 = vmatmul.msk.f32.vlgmr.msrb.gmra.mxu3 %vm2506_vm11, %v9986_v7  ;;  %v4333_v26 = vpop.permute.xlu1 %4332  ;;  %9994 = vmatmul.msk.f32.vlgmr.msra.gmra.mxu0 %vm2506_vm11, %v9992_v43  ;;  %v10775_v43 = vunpack.i.l.bf16 %v14631_v53 }
 0xd64   :  { %9988 = vmatmul.msk.f32.vlgmr.msrb.gmra.mxu2 %vm2506_vm11, %v9986_v7  ;;  %8121 = vmatpush.msrb.mxu3 %v10736_v14  ;;  %4338 = vst.msk [vmem:[#allocation2 + $0x8] sm:$0xff] %vm4336_vm2, %v4333_v26  ;;  %v4369_v34 = vpop.permute.xlu2 %4368  ;;  %v10801_v14 = vunpack.i.h.bf16 %v14669_v51  ;;  %v10771_v7 = vunpack.i.h.bf16 %v14625_v19 }
 0xd65   :  { %8098 = vmatpush.msrb.mxu2 %v8073_v33  ;;  %8170 = vmatpush.msra.mxu0 %v8145_v21  ;;  %v8361_v51 = vsel %vm695_vm10, %v10775_v43, %v10776_v48 }
 0xd66   :  { %8122 = vmatpush.msrb.mxu3 %v10731_v55  ;;  %8194 = vmatpush.msra.mxu1 %v10766_v50  ;;  %v10770_v55 = vunpack.i.l.bf16 %v14625_v19  ;;  %v10805_v50 = vunpack.i.l.bf16 %v14672_v29  ;;  %v8433_v2 = vsel %vm15743_vm15, %v10800_v20, %v10801_v14  ;;  %v10017_v19 = vld [vmem:[%s15081_s5 + $0x138] sm:$0xff]  ;;  %v10034_v20 = vld [vmem:[%s15081_s5 + $0x160] sm:$0xff] }
 0xd67   :  { %8099 = vmatpush.msrb.mxu2 %v8072_v12  ;;  %8171 = vmatpush.msra.mxu0 %v8144_v41 }
 0xd68   :  { %v8360_v33 = vsel %vm695_vm10, %v10770_v55, %v10771_v7  ;;  %v8432_v21 = vsel %vm15744_vm0, %v10805_v50, %v10806_v52  ;;  %vm15745_vm10 = vcmask 359424   ;;  %v10041_v50 = vld [vmem:[%s15081_s5 + $0x178] sm:$0xff] }
 0xd69   :  { %9997 = vmatmul.msk.f32.gmra.mxu1 %vm2506_vm11, %v9993_v54  ;;  %vm15746_vm1 = vmmov %vm15745_vm10 }
 0xd6a   :  { %v4331_v18 = vpop.permute.xlu0 %4330 }
 0xd6b   :  { %9991 = vmatmul.msk.f32.gmra.mxu3 %vm2506_vm11, %v9987_v40  ;;  %4337 = vst.msk [vmem:[#allocation2] sm:$0xff] %vm4336_vm2, %v4331_v18  ;;  %v4349_v15 = vpop.permute.xlu1 %4348  ;;  %9995 = vmatmul.msk.f32.gmra.mxu0 %vm2506_vm11, %v9993_v54 }
 0xd6c   :  { %9989 = vmatmul.msk.f32.gmra.mxu2 %vm2506_vm11, %v9987_v40  ;;  %4346 = vst.msk [vmem:[#allocation2] sm:$0xff] %vm4345_vm8, %v4340_v24 }
 0xd6d   :  { %4355 = vst.msk [vmem:[#allocation2] sm:$0xff] %vm4354_vm14, %v4349_v15  ;;  %v10011_v15 = vld [vmem:[%s15081_s5 + $0x128] sm:$0xff] }
 0xd71   :  { %10008 = vmatmul.msk.f32.vlgmr.msrb.gmra.mxu1 %vm2506_vm11, %v10004_v27 }
 0xd72   :  { %8337 = vmatpush.msrb.mxu1 %v10781_v4  ;;  %v4342_v36 = vpop.permute.xlu0 %4341 }
 0xd73   :  { %10002 = vmatmul.msk.f32.vlgmr.msra.gmra.mxu3 %vm2506_vm11, %v9998_v57  ;;  %4347 = vst.msk [vmem:[#allocation2 + $0x8] sm:$0xff] %vm4345_vm8, %v4342_v36  ;;  %10006 = vmatmul.msk.f32.vlgmr.msrb.gmra.mxu0 %vm2506_vm11, %v10004_v27  ;;  %v4360_v6 = vpop.permute.xlu1 %4359 }
 0xd74   :  { %10000 = vmatmul.msk.f32.vlgmr.msra.gmra.mxu2 %vm2506_vm11, %v9998_v57  ;;  %8265 = vmatpush.msra.mxu3 %v10756_v49  ;;  %4356 = vst.msk [vmem:[#allocation2 + $0x8] sm:$0xff] %vm4354_vm14, %v4351_v44  ;;  %v6852_v32 = vpop.f32.mrf.mxu3  ;;  %v10795_v44 = vunpack.i.l.bf16 %v14651_v35 }
 0xd75   :  { %8242 = vmatpush.msra.mxu2 %v8217_v3  ;;  %8314 = vmatpush.msrb.mxu0 %v8289_v56  ;;  %4365 = vst.msk [vmem:[#allocation2 + $0x8] sm:$0xff] %vm4363_vm5, %v4360_v6  ;;  %v6905_v30 = vadd.f32 %v6904_v47, %v6852_v32  ;;  %v10022_v56 = vld [vmem:[%s15081_s5 + $0x140] sm:$0xff]  ;;  %v10791_v6 = vunpack.i.h.bf16 %v14687_v5  ;;  %v10790_v32 = vunpack.i.l.bf16 %v14687_v5 }
 0xd76   :  { %8266 = vmatpush.msra.mxu3 %v10751_v17  ;;  %8338 = vmatpush.msrb.mxu1 %v10786_v23  ;;  %v6829_v45 = vpop.f32.mrf.mxu2 }
 0xd77   :  { %8243 = vmatpush.msra.mxu2 %v8216_v11  ;;  %8315 = vmatpush.msrb.mxu0 %v8288_v10  ;;  %v6882_v38 = vadd.f32 %v6881_v22, %v6829_v45  ;;  %v8505_v10 = vsel %vm15745_vm10, %v10795_v44, %v10796_v37  ;;  %v8504_v45 = vsel %vm15746_vm1, %v10790_v32, %v10791_v6 }
 0xd79   :  { %10009 = vmatmul.msk.f32.gmra.mxu1 %vm2506_vm11, %v10005_v13 }
 0xd7a   :  { %v4358_v1 = vpop.permute.xlu0 %4357 }
 0xd7b   :  { %10003 = vmatmul.msk.f32.gmra.mxu3 %vm2506_vm11, %v9999_v16  ;;  %10007 = vmatmul.msk.f32.gmra.mxu0 %vm2506_vm11, %v10005_v13  ;;  %4364 = vst.msk [vmem:[#allocation2] sm:$0xff] %vm4363_vm5, %v4358_v1 }
 0xd7c   :  { %10001 = vmatmul.msk.f32.gmra.mxu2 %vm2506_vm11, %v9999_v16  ;;  %4375 = vst.msk [vmem:[#allocation2] sm:$0xff] %vm4374_vm9, %v4369_v34  ;;  %v10023_v34 = vld [vmem:[%s15081_s5 + $0x148] sm:$0xff] }
 0xd7d   :  { %v6855_v25 = vpop.f32.mrf.mxu3 }
 0xd7e   :  { %v14747_v39 = vadd.f32 %v6907_v61, %v6855_v25  ;;  %v7044_v58 = vpop.f32.mrf.mxu1 }
 0xd7f   :  { %v6832_v60 = vpop.f32.mrf.mxu2 }
 0xd80   :  { %v14752_v42 = vadd.f32 %v6884_v28, %v6832_v60  ;;  %v7021_v0 = vpop.f32.mrf.mxu0 }
 0xd81   :  { %10020 = vmatmul.msk.f32.vlgmr.msra.gmra.mxu1 %vm2506_vm11, %v10016_v62 }
 0xd82   :  { %8481 = vmatpush.msra.mxu1 %v10801_v14  ;;  %v4371_v53 = vpop.permute.xlu0 %4370 }
 0xd83   :  { %10014 = vmatmul.msk.f32.vlgmr.msrb.gmra.mxu3 %vm2506_vm11, %v10010_v63  ;;  %10018 = vmatmul.msk.f32.vlgmr.msra.gmra.mxu0 %vm2506_vm11, %v10016_v62  ;;  %4376 = vst.msk [vmem:[#allocation2 + $0x8] sm:$0xff] %vm4374_vm9, %v4371_v53  ;;  %v4395_v29 = vld [vmem:[#allocation2 + $0x4] sm:$0x1]  ;;  %v4377_v41 = vld [vmem:[#allocation2] sm:$0x1] }
 0xd84   :  { %10012 = vmatmul.msk.f32.vlgmr.msrb.gmra.mxu2 %vm2506_vm11, %v10010_v63  ;;  %8409 = vmatpush.msrb.mxu3 %v10776_v48  ;;  %4396 = vst.msk [vmem:[#allocation3 + $0x4] sm:$0x1] %vm4378_vm12, %v4395_v29  ;;  %v4387_v54 = vld [vmem:[#allocation2 + $0x2] sm:$0x1]  ;;  %v4403_v18 = vld [vmem:[#allocation2 + $0x6] sm:$0x1] }
 0xd85   :  { %8386 = vmatpush.msrb.mxu2 %v8361_v51  ;;  %8458 = vmatpush.msra.mxu0 %v8433_v2  ;;  %4379 = vst.msk [vmem:[#allocation3] sm:$0x1] %vm4378_vm12, %v4377_v41 }
 0xd86   :  { %8410 = vmatpush.msrb.mxu3 %v10771_v7  ;;  %8482 = vmatpush.msra.mxu1 %v10806_v52  ;;  %v6972_v26 = vpop.f32.mrf.mxu3  ;;  %v7047_v47 = vpop.f32.mrf.mxu1  ;;  %4388 = vst.msk [vmem:[#allocation3 + $0x2] sm:$0x1] %vm4378_vm12, %v4387_v54 }
 0xd87   :  { %v6949_v12 = vpop.f32.mrf.mxu2  ;;  %v6979_v24 = vadd.f32 %v6972_v26, %v6905_v30  ;;  %8387 = vmatpush.msrb.mxu2 %v8360_v33  ;;  %8459 = vmatpush.msra.mxu0 %v8432_v21  ;;  %4404 = vst.msk [vmem:[#allocation3 + $0x6] sm:$0x1] %vm4378_vm12, %v4403_v18 }
 0xd88   :  { %v6978_v40 = vadd.f32 %v6949_v12, %v6882_v38  ;;  %v7024_v49 = vpop.f32.mrf.mxu0  ;;  %v10029_v38 = vld [vmem:[%s15081_s5 + $0x158] sm:$0xff] }
 0xd89   :  { %v7051_v27 = vadd.f32 %v7044_v58, %v6979_v24  ;;  %10021 = vmatmul.msk.f32.gmra.mxu1 %vm2506_vm11, %v10017_v19 }
 0xd8a   :  { %v7050_v22 = vadd.f32 %v7021_v0, %v6978_v40  ;;  %v4435_v31 = vld [vmem:[#allocation2 + $0xe] sm:$0x1]  ;;  %v4419_v4 = vld [vmem:[#allocation2 + $0xa] sm:$0x1]  ;;  %v4411_v8 = vld [vmem:[#allocation2 + $0x8] sm:$0x1] }
 0xd8b   :  { %10015 = vmatmul.msk.f32.gmra.mxu3 %vm2506_vm11, %v10011_v15  ;;  %10019 = vmatmul.msk.f32.gmra.mxu0 %vm2506_vm11, %v10017_v19  ;;  %4436 = vst.msk [vmem:[#allocation3 + $0xe] sm:$0x1] %vm4378_vm12, %v4435_v31  ;;  %v4427_v23 = vld [vmem:[#allocation2 + $0xc] sm:$0x1]  ;;  %v10035_v19 = vld [vmem:[%s15081_s5 + $0x168] sm:$0xff]  ;;  %v10046_v40 = vld [vmem:[%s15081_s5 + $0x180] sm:$0xff] }
 0xd8c   :  { %10013 = vmatmul.msk.f32.gmra.mxu2 %vm2506_vm11, %v10011_v15  ;;  %4420 = vst.msk [vmem:[#allocation3 + $0xa] sm:$0x1] %vm4378_vm12, %v4419_v4 }
 0xd8d   :  { %4412 = vst.msk [vmem:[#allocation3 + $0x8] sm:$0x1] %vm4378_vm12, %v4411_v8  ;;  %v10047_v8 = vld [vmem:[%s15081_s5 + $0x188] sm:$0xff] }
 0xd8e   :  { %v6975_v57 = vpop.f32.mrf.mxu3  ;;  %v7188_v3 = vpop.f32.mrf.mxu1  ;;  %4428 = vst.msk [vmem:[#allocation3 + $0xc] sm:$0x1] %vm4378_vm12, %v4427_v23 }
 0xd8f   :  { %v6952_v17 = vpop.f32.mrf.mxu2  ;;  %v6981_v36 = vadd.f32 %v6975_v57, %v14747_v39 }
 0xd90   :  { %v6980_v61 = vadd.f32 %v6952_v17, %v14752_v42  ;;  %v7165_v35 = vpop.f32.mrf.mxu0  ;;  %v10040_v42 = vld [vmem:[%s15081_s5 + $0x170] sm:$0xff]  ;;  %s15748_s5 = smov 116  }
 0xd91   :  { %v7053_v30 = vadd.f32 %v7047_v47, %v6981_v36  ;;  %10032 = vmatmul.msk.f32.vlgmr.msrb.gmra.mxu1 %vm2506_vm11, %v10028_v9 }
 0xd92   :  { %v7052_v11 = vadd.f32 %v7024_v49, %v6980_v61 }
 0xd93   :  { %10026 = vmatmul.msk.f32.vlgmr.msra.gmra.mxu3 %vm2506_vm11, %v10022_v56  ;;  %10030 = vmatmul.msk.f32.vlgmr.msrb.gmra.mxu0 %vm2506_vm11, %v10028_v9 }
 0xd94   :  { %10024 = vmatmul.msk.f32.vlgmr.msra.gmra.mxu2 %vm2506_vm11, %v10022_v56  ;;  %8553 = vmatpush.msra.mxu3 %v10796_v37 }
 0xd95   :  { %8530 = vmatpush.msra.mxu2 %v8505_v10 }
 0xd96   :  { %8554 = vmatpush.msra.mxu3 %v10791_v6  ;;  %v7116_v13 = vpop.f32.mrf.mxu3  ;;  %v7191_v1 = vpop.f32.mrf.mxu1 }
 0xd97   :  { %8531 = vmatpush.msra.mxu2 %v8504_v45  ;;  %v7093_v5 = vpop.f32.mrf.mxu2  ;;  %v7123_v16 = vadd.f32 %v7116_v13, %v7051_v27 }
 0xd98   :  { %v7122_v28 = vadd.f32 %v7093_v5, %v7050_v22  ;;  %v7168_v60 = vpop.f32.mrf.mxu0 }
 0xd99   :  { %v7195_v25 = vadd.f32 %v7188_v3, %v7123_v16  ;;  %10033 = vmatmul.msk.f32.gmra.mxu1 %vm2506_vm11, %v10029_v38 }
 0xd9a   :  { %v7194_v39 = vadd.f32 %v7165_v35, %v7122_v28 }
 0xd9b   :  { %10027 = vmatmul.msk.f32.gmra.mxu3 %vm2506_vm11, %v10023_v34  ;;  %10031 = vmatmul.msk.f32.gmra.mxu0 %vm2506_vm11, %v10029_v38 }
 0xd9c   :  { %10025 = vmatmul.msk.f32.gmra.mxu2 %vm2506_vm11, %v10023_v34 }
 0xd9e   :  { %v7119_v62 = vpop.f32.mrf.mxu3  ;;  %v7332_v14 = vpop.f32.mrf.mxu1 }
 0xd9f   :  { %v7096_v58 = vpop.f32.mrf.mxu2  ;;  %v7125_v48 = vadd.f32 %v7119_v62, %v7053_v30 }
 0xda0   :  { %v7124_v43 = vadd.f32 %v7096_v58, %v7052_v11  ;;  %v7309_v7 = vpop.f32.mrf.mxu0 }
 0xda1   :  { %v7197_v63 = vadd.f32 %v7191_v1, %v7125_v48  ;;  %10044 = vmatmul.msk.f32.vlgmr.msra.gmra.mxu1 %vm2506_vm11, %v10040_v42 }
 0xda2   :  { %v7196_v0 = vadd.f32 %v7168_v60, %v7124_v43 }
 0xda3   :  { %10038 = vmatmul.msk.f32.vlgmr.msrb.gmra.mxu3 %vm2506_vm11, %v10034_v20  ;;  %10042 = vmatmul.msk.f32.vlgmr.msra.gmra.mxu0 %vm2506_vm11, %v10040_v42 }
 0xda4   :  { %10036 = vmatmul.msk.f32.vlgmr.msrb.gmra.mxu2 %vm2506_vm11, %v10034_v20 }
 0xda6   :  { %v7260_v55 = vpop.f32.mrf.mxu3  ;;  %v7335_v2 = vpop.f32.mrf.mxu1 }
 0xda7   :  { %v7237_v52 = vpop.f32.mrf.mxu2  ;;  %v7267_v53 = vadd.f32 %v7260_v55, %v7195_v25 }
 0xda8   :  { %v7266_v51 = vadd.f32 %v7237_v52, %v7194_v39  ;;  %v7312_v33 = vpop.f32.mrf.mxu0 }
 0xda9   :  { %v7339_v29 = vadd.f32 %v7332_v14, %v7267_v53  ;;  %10045 = vmatmul.msk.f32.gmra.mxu1 %vm2506_vm11, %v10041_v50 }
 0xdaa   :  { %v7338_v26 = vadd.f32 %v7309_v7, %v7266_v51 }
 0xdab   :  { %10039 = vmatmul.msk.f32.gmra.mxu3 %vm2506_vm11, %v10035_v19  ;;  %10043 = vmatmul.msk.f32.gmra.mxu0 %vm2506_vm11, %v10041_v50 }
 0xdac   :  { %10037 = vmatmul.msk.f32.gmra.mxu2 %vm2506_vm11, %v10035_v19 }
 0xdae   :  { %v7263_v21 = vpop.f32.mrf.mxu3  ;;  %v7476_v24 = vpop.f32.mrf.mxu1 }
 0xdaf   :  { %v7240_v12 = vpop.f32.mrf.mxu2  ;;  %v7269_v41 = vadd.f32 %v7263_v21, %v7197_v63 }
 0xdb0   :  { %v7268_v54 = vadd.f32 %v7240_v12, %v7196_v0  ;;  %v7453_v15 = vpop.f32.mrf.mxu0 }
 0xdb1   :  { %v7341_v47 = vadd.f32 %v7335_v2, %v7269_v41 }
 0xdb2   :  { %v7340_v18 = vadd.f32 %v7312_v33, %v7268_v54 }
 0xdb3   :  { %10050 = vmatmul.msk.f32.vlgmr.msra.gmra.mxu3 %vm2506_vm11, %v10046_v40 }
 0xdb4   :  { %10048 = vmatmul.msk.f32.vlgmr.msra.gmra.mxu2 %vm2506_vm11, %v10046_v40 }
 0xdb6   :  { %v7404_v27 = vpop.f32.mrf.mxu3  ;;  %v7479_v4 = vpop.f32.mrf.mxu1 }
 0xdb7   :  { %v7381_v22 = vpop.f32.mrf.mxu2  ;;  %v7411_v49 = vadd.f32 %v7404_v27, %v7339_v29 }
 0xdb8   :  { %v7410_v31 = vadd.f32 %v7381_v22, %v7338_v26  ;;  %v7456_v9 = vpop.f32.mrf.mxu0 }
 0xdb9   :  { %v7483_v57 = vadd.f32 %v7476_v24, %v7411_v49 }
 0xdba   :  { %v7482_v17 = vadd.f32 %v7453_v15, %v7410_v31 }
 0xdbb   :  { %10051 = vmatmul.msk.f32.gmra.mxu3 %vm2506_vm11, %v10047_v8 }
 0xdbc   :  { %10049 = vmatmul.msk.f32.gmra.mxu2 %vm2506_vm11, %v10047_v8  ;;  %vm15747_vm11 = vcmask 64512  }
 0xdbd   :  { %vm15749_vm3 = vmmov %vm15747_vm11 }
 0xdbe   :  { %v7407_v23 = vpop.f32.mrf.mxu3  ;;  %v7620_v56 = vpop.f32.mrf.mxu1 }
 0xdbf   :  { %v7384_v37 = vpop.f32.mrf.mxu2  ;;  %v7413_v44 = vadd.f32 %v7407_v23, %v7341_v47 }
 0xdc0   :  { %v7412_v36 = vadd.f32 %v7384_v37, %v7340_v18  ;;  %v7597_v6 = vpop.f32.mrf.mxu0 }
 0xdc1   :  { %v7485_v61 = vadd.f32 %v7479_v4, %v7413_v44 }
 0xdc2   :  { %v7484_v3 = vadd.f32 %v7456_v9, %v7412_v36 }
 0xdc6   :  { %v7548_v32 = vpop.f32.mrf.mxu3  ;;  %v7623_v5 = vpop.f32.mrf.mxu1 }
 0xdc7   :  { %v7525_v30 = vpop.f32.mrf.mxu2  ;;  %v7555_v11 = vadd.f32 %v7548_v32, %v7483_v57 }
 0xdc8   :  { %v7554_v35 = vadd.f32 %v7525_v30, %v7482_v17  ;;  %v7600_v13 = vpop.f32.mrf.mxu0 }
 0xdc9   :  { %v7627_v10 = vadd.f32 %v7620_v56, %v7555_v11 }
 0xdca   :  { %v7626_v45 = vadd.f32 %v7597_v6, %v7554_v35 }
 0xdce   :  { %v7551_v38 = vpop.f32.mrf.mxu3  ;;  %v7764_v60 = vpop.f32.mrf.mxu1 }
 0xdcf   :  { %v7528_v16 = vpop.f32.mrf.mxu2  ;;  %v7557_v28 = vadd.f32 %v7551_v38, %v7485_v61 }
 0xdd0   :  { %v7556_v1 = vadd.f32 %v7528_v16, %v7484_v3  ;;  %v7741_v39 = vpop.f32.mrf.mxu0 }
 0xdd1   :  { %v7629_v34 = vadd.f32 %v7623_v5, %v7557_v28 }
 0xdd2   :  { %v7628_v25 = vadd.f32 %v7600_v13, %v7556_v1 }
 0xdd6   :  { %v7692_v62 = vpop.f32.mrf.mxu3  ;;  %v7767_v51 = vpop.f32.mrf.mxu1 }
 0xdd7   :  { %v7669_v58 = vpop.f32.mrf.mxu2  ;;  %v7699_v42 = vadd.f32 %v7692_v62, %v7627_v10 }
 0xdd8   :  { %v7698_v48 = vadd.f32 %v7669_v58, %v7626_v45  ;;  %v7744_v14 = vpop.f32.mrf.mxu0 }
 0xdd9   :  { %v7771_v43 = vadd.f32 %v7764_v60, %v7699_v42 }
 0xdda   :  { %v7770_v57 = vadd.f32 %v7741_v39, %v7698_v48 }
 0xdde   :  { %v7695_v20 = vpop.f32.mrf.mxu3  ;;  %v7908_v26 = vpop.f32.mrf.mxu1 }
 0xddf   :  { %v7672_v63 = vpop.f32.mrf.mxu2  ;;  %v7701_v0 = vadd.f32 %v7695_v20, %v7629_v34 }
 0xde0   :  { %v7700_v7 = vadd.f32 %v7672_v63, %v7628_v25  ;;  %v7885_v55 = vpop.f32.mrf.mxu0 }
 0xde1   :  { %v7773_v42 = vadd.f32 %v7767_v51, %v7701_v0  ;;  %v4389_v0 = vld [vmem:[#allocation2 + $0x3] sm:$0x1]  ;;  %v4405_v51 = vld [vmem:[#allocation2 + $0x7] sm:$0x1] }
 0xde2   :  { %v7772_v61 = vadd.f32 %v7744_v14, %v7700_v7 }
 0xde6   :  { %v7836_v52 = vpop.f32.mrf.mxu3  ;;  %v7911_v41 = vpop.f32.mrf.mxu1 }
 0xde7   :  { %v7813_v50 = vpop.f32.mrf.mxu2  ;;  %v7843_v53 = vadd.f32 %v7836_v52, %v7771_v43 }
 0xde8   :  { %v7888_v2 = vpop.f32.mrf.mxu0  ;;  %v7842_v17 = vadd.f32 %v7813_v50, %v7770_v57 }
 0xdea   :  { %v7914_v37 = vadd.f32 %v7885_v55, %v7842_v17  ;;  %v4421_v17 = vld [vmem:[#allocation2 + $0xb] sm:$0x1] }
 0xdee   :  { %v7839_v19 = vpop.f32.mrf.mxu3  ;;  %v14850_v18 = vpop.f32.mrf.mxu1 }
 0xdef   :  { %v7816_v29 = vpop.f32.mrf.mxu2  ;;  %v7845_v43 = vadd.f32 %v7839_v19, %v7773_v42 }
 0xdf0   :  { %v8029_v33 = vpop.f32.mrf.mxu0  ;;  %v7844_v56 = vadd.f32 %v7816_v29, %v7772_v61  ;;  %v4437_v61 = vld [vmem:[#allocation2 + $0xf] sm:$0x1] }
 0xdf1   :  { %v7917_v55 = vadd.f32 %v7911_v41, %v7845_v43 }
 0xdf2   :  { %v7916_v32 = vadd.f32 %v7888_v2, %v7844_v56  ;;  %v7915_v2 = vadd.f32 %v7908_v26, %v7843_v53 }
 0xdf6   :  { %v7980_v21 = vpop.f32.mrf.mxu3  ;;  %v8055_v49 = vpop.f32.mrf.mxu1 }
 0xdf7   :  { %v7957_v12 = vpop.f32.mrf.mxu2 }
 0xdf8   :  { %v8032_v24 = vpop.f32.mrf.mxu0  ;;  %v7986_v3 = vadd.f32 %v7957_v12, %v7914_v37  ;;  %v4413_v37 = vld [vmem:[#allocation2 + $0x9] sm:$0x1] }
 0xdfa   :  { %v8058_v6 = vadd.f32 %v8029_v33, %v7986_v3 }
 0xdfe   :  { %v7983_v40 = vpop.f32.mrf.mxu3  ;;  %v14854_v9 = vpop.f32.mrf.mxu1 }
 0xdff   :  { %v7960_v54 = vpop.f32.mrf.mxu2  ;;  %v7989_v12 = vadd.f32 %v7983_v40, %v7917_v55 }
 0xe00   :  { %v8173_v15 = vpop.f32.mrf.mxu0  ;;  %v7988_v45 = vadd.f32 %v7960_v54, %v7916_v32 }
 0xe01   :  { %v8061_v26 = vadd.f32 %v8055_v49, %v7989_v12 }
 0xe02   :  { %v8060_v38 = vadd.f32 %v8032_v24, %v7988_v45  ;;  %v4380_v24 = vld [vmem:[#allocation2 + $0x1] sm:$0x1] }
 0xe06   :  { %v14852_v27 = vpop.f32.mrf.mxu3  ;;  %v8199_v11 = vpop.f32.mrf.mxu1 }
 0xe07   :  { %v8101_v47 = vpop.f32.mrf.mxu2 }
 0xe08   :  { %v8176_v31 = vpop.f32.mrf.mxu0  ;;  %v8130_v30 = vadd.f32 %v8101_v47, %v8058_v6  ;;  %v7987_v47 = vadd.f32 %v7980_v21, %v7915_v2 }
 0xe0a   :  { %v8202_v5 = vadd.f32 %v8173_v15, %v8130_v30  ;;  %v8059_v40 = vadd.f32 %v14850_v18, %v7987_v47 }
 0xe0e   :  { %v8127_v4 = vpop.f32.mrf.mxu3  ;;  %v8340_v25 = vpop.f32.mrf.mxu1 }
 0xe0f   :  { %v8104_v22 = vpop.f32.mrf.mxu2 }
 0xe10   :  { %v8317_v23 = vpop.f32.mrf.mxu0  ;;  %v8132_v28 = vadd.f32 %v8104_v22, %v8060_v38  ;;  %v4397_v22 = vld [vmem:[#allocation2 + $0x5] sm:$0x1] }
 0xe12   :  { %v8204_v60 = vadd.f32 %v8176_v31, %v8132_v28  ;;  %v8133_v31 = vadd.f32 %v8127_v4, %v8061_v26 }
 0xe14   :  { %v8205_v3 = vadd.f32 %v8199_v11, %v8133_v31 }
 0xe16   :  { %v14856_v44 = vpop.f32.mrf.mxu3  ;;  %v8343_v29 = vpop.f32.mrf.mxu1 }
 0xe17   :  { %v8245_v8 = vpop.f32.mrf.mxu2 }
 0xe18   :  { %v8320_v35 = vpop.f32.mrf.mxu0  ;;  %v8274_v16 = vadd.f32 %v8245_v8, %v8202_v5  ;;  %v8131_v8 = vadd.f32 %v14852_v27, %v8059_v40 }
 0xe1a   :  { %v8346_v34 = vadd.f32 %v8317_v23, %v8274_v16  ;;  %v8203_v18 = vadd.f32 %v14854_v9, %v8131_v8 }
 0xe1c   :  { %v8275_v27 = vadd.f32 %v14856_v44, %v8203_v18 }
 0xe1e   :  { %v8271_v13 = vpop.f32.mrf.mxu3  ;;  %v8484_v23 = vpop.f32.mrf.mxu1  ;;  %v8347_v6 = vadd.f32 %v8340_v25, %v8275_v27 }
 0xe1f   :  { %v8248_v36 = vpop.f32.mrf.mxu2  ;;  %v8277_v4 = vadd.f32 %v8271_v13, %v8205_v3 }
 0xe20   :  { %v8461_v39 = vpop.f32.mrf.mxu0  ;;  %v8276_v48 = vadd.f32 %v8248_v36, %v8204_v60  ;;  %v4429_v36 = vld [vmem:[#allocation2 + $0xd] sm:$0x1] }
 0xe21   :  { %v8349_v56 = vadd.f32 %v8343_v29, %v8277_v4 }
 0xe22   :  { %v8348_v63 = vadd.f32 %v8320_v35, %v8276_v48 }
 0xe26   :  { %v8412_v58 = vpop.f32.mrf.mxu3  ;;  %v8487_v11 = vpop.f32.mrf.mxu1 }
 0xe27   :  { %v8389_v10 = vpop.f32.mrf.mxu2  ;;  %v8419_v30 = vadd.f32 %v8412_v58, %v8347_v6 }
 0xe28   :  { %v8418_v62 = vadd.f32 %v8389_v10, %v8346_v34  ;;  %v8464_v33 = vpop.f32.mrf.mxu0 }
 0xe29   :  { %v8491_v9 = vadd.f32 %v8484_v23, %v8419_v30 }
 0xe2a   :  { %v8490_v14 = vadd.f32 %v8461_v39, %v8418_v62 }
 0xe2e   :  { %v8415_v15 = vpop.f32.mrf.mxu3 }
 0xe2f   :  { %v8392_v1 = vpop.f32.mrf.mxu2  ;;  %v8421_v32 = vadd.f32 %v8415_v15, %v8349_v56 }
 0xe30   :  { %v8420_v52 = vadd.f32 %v8392_v1, %v8348_v63 }
 0xe31   :  { %v8493_v10 = vadd.f32 %v8487_v11, %v8421_v32 }
 0xe32   :  { %v8492_v19 = vadd.f32 %v8464_v33, %v8420_v52 }
 0xe36   :  { %v8556_v49 = vpop.f32.mrf.mxu3 }
 0xe37   :  { %v8533_v20 = vpop.f32.mrf.mxu2  ;;  %v8563_v5 = vadd.f32 %v8556_v49, %v8491_v9 }
 0xe38   :  { %v8562_v7 = vadd.f32 %v8533_v20, %v8490_v14 }
 0xe39   :  { %v8567_v13 = vadd.f32 %v8563_v5, %v15711_v46 }
 0xe3a   :  { %v8566_v50 = vadd.f32 %v8562_v7, %v15711_v46 }
 0xe3b   :  { %v8571_v16 = vmax.f32 %v8567_v13, 0.0 }
 0xe3c   :  { %v8570_v54 = vmax.f32 %v8566_v50, 0.0 }
 0xe3e   :  { %8594 = vrot.lane.b32.xlu2 %v8570_v54, %s10890_s16  ;;  %8586 = vrot.lane.b32.xlu0 %v8570_v54, %s15317_s12  ;;  %8574 = vst.msk [vmem:[#allocation2] sm:$0xff] %vm15747_vm11, %v8570_v54  ;;  %v8559_v35 = vpop.f32.mrf.mxu3 }
 0xe3f   :  { %8578 = vrot.lane.b32.xlu1 %v8570_v54, %s15748_s5  ;;  %v8536_v53 = vpop.f32.mrf.mxu2  ;;  %v8565_v45 = vadd.f32 %v8559_v35, %v8493_v10 }
 0xe40   :  { %v8564_v41 = vadd.f32 %v8536_v53, %v8492_v19 }
 0xe41   :  { %v8569_v44 = vadd.f32 %v8565_v45, %v15717_v59 }
 0xe42   :  { %v8568_v21 = vadd.f32 %v8564_v41, %v15717_v59 }
 0xe43   :  { %v8573_v38 = vmax.f32 %v8569_v44, 0.0 }
 0xe44   :  { %v8572_v57 = vmax.f32 %v8568_v21, 0.0 }
 0xe46   :  { %8618 = vrot.lane.b32.xlu2 %v8570_v54, %s10892_s4  ;;  %8610 = vrot.lane.b32.xlu0 %v8570_v54, %s15350_s28  ;;  %8575 = vst.msk [vmem:[#allocation2 + $0x8] sm:$0xff] %vm15749_vm3, %v8572_v57 }
 0xe47   :  { %8602 = vrot.lane.b32.xlu1 %v8570_v54, %s10891_s22 }
 0xe4e   :  { %8596 = vrot.lane.b32.xlu0 %v8572_v57, %s10890_s16  ;;  %8580 = vrot.lane.b32.xlu2 %v8572_v57, %s15748_s5 }
 0xe4f   :  { %8588 = vrot.lane.b32.xlu1 %v8572_v57, %s15317_s12 }
 0xe56   :  { %8620 = vrot.lane.b32.xlu0 %v8572_v57, %s10892_s4  ;;  %8604 = vrot.lane.b32.xlu2 %v8572_v57, %s10891_s22  ;;  %s10893_s22 = smov [#allocation4]  }
 0xe57   :  { %8612 = vrot.lane.b32.xlu1 %v8572_v57, %s15350_s28  ;;  %s46_s4 = sshll.u32 %s10893_s22, 4  ;;  %s47_s4 = int_to_ptr.vmem [resolvable:$true] %s46_s4 }
 0xe5e   :  { %8630 = vrot.lane.b32.xlu2 %v8573_v38, %s15378_s11  ;;  %4382 = vrot.lane.b32.xlu0 %v4380_v24, %s15538_s24 }
 0xe5f   :  { %8628 = vrot.lane.b32.xlu1 %v8571_v16, %s15378_s11  ;;  %s15752_s11 = sld [smem:[#allocation84_spill]] }
 0xe65   :  { %s44_s16 = sshll.u32 %s15752_s11, 4  ;;  %s45_s16 = int_to_ptr.hbm [resolvable:$true] %s44_s16 }
 0xe66   :  { %4399 = vrot.lane.b32.xlu2 %v4397_v22, %s15538_s24  ;;  %4407 = vrot.lane.b32.xlu0 %v4405_v51, %s15538_s24  ;;  %49 = dma.hbm_to_vmem [thread:$0]  %s45_s16, 32768, %s47_s4, [#allocation5] }
 0xe67   :  { %4391 = vrot.lane.b32.xlu1 %v4389_v0, %s15538_s24 }
 0xe6e   :  { %4423 = vrot.lane.b32.xlu2 %v4421_v17, %s15538_s24  ;;  %4431 = vrot.lane.b32.xlu0 %v4429_v36, %s15538_s24 }
 0xe6f   :  { %4415 = vrot.lane.b32.xlu1 %v4413_v37, %s15538_s24 }
 0xe77   :  { %4439 = vrot.lane.b32.xlu1 %v4437_v61, %s15538_s24 }
 0xe98   :  { %v8595_v46 = vpop.permute.xlu2 %8594 }
 0xea0   :  { %v8619_v59 = vpop.permute.xlu2 %8618 }
 0xea8   :  { %v8581_v28 = vpop.permute.xlu2 %8580 }
 0xea9   :  { %8585 = vst.msk [vmem:[#allocation2 + $0x8] sm:$0xff] %vm15750_vm4, %v8581_v28 }
 0xeb0   :  { %v8587_v1 = vpop.permute.xlu0 %8586  ;;  %v8605_v34 = vpop.permute.xlu2 %8604 }
 0xeb1   :  { %v8579_v25 = vpop.permute.xlu1 %8578 }
 0xeb2   :  { %8584 = vst.msk [vmem:[#allocation2] sm:$0xff] %vm15751_vm6, %v8579_v25 }
 0xeb3   :  { %8592 = vst.msk [vmem:[#allocation2] sm:$0xff] %vm4327_vm13, %v8587_v1 }
 0xeb4   :  { %8600 = vst.msk [vmem:[#allocation2] sm:$0xff] %vm4336_vm2, %v8595_v46 }
 0xeb8   :  { %v8611_v39 = vpop.permute.xlu0 %8610  ;;  %v8631_v60 = vpop.permute.xlu2 %8630 }
 0xeb9   :  { %v8603_v62 = vpop.permute.xlu1 %8602 }
 0xeba   :  { %8608 = vst.msk [vmem:[#allocation2] sm:$0xff] %vm4345_vm8, %v8603_v62 }
 0xebb   :  { %8616 = vst.msk [vmem:[#allocation2] sm:$0xff] %vm4354_vm14, %v8611_v39 }
 0xebc   :  { %8624 = vst.msk [vmem:[#allocation2] sm:$0xff] %vm4363_vm5, %v8619_v59 }
 0xec0   :  { %v8597_v58 = vpop.permute.xlu0 %8596  ;;  %v4400_v42 = vpop.permute.xlu2 %4399 }
 0xec1   :  { %v8589_v48 = vpop.permute.xlu1 %8588  ;;  %4402 = vst.msk [vmem:[#allocation3 + $0x4] sm:$0x1] %vm4385_vm7, %v4400_v42 }
 0xec2   :  { %8593 = vst.msk [vmem:[#allocation2 + $0x8] sm:$0xff] %vm4327_vm13, %v8589_v48 }
 0xec3   :  { %8601 = vst.msk [vmem:[#allocation2 + $0x8] sm:$0xff] %vm4336_vm2, %v8597_v58 }
 0xec4   :  { %8609 = vst.msk [vmem:[#allocation2 + $0x8] sm:$0xff] %vm4345_vm8, %v8605_v34 }
 0xec8   :  { %v8621_v43 = vpop.permute.xlu0 %8620  ;;  %v4424_v14 = vpop.permute.xlu2 %4423 }
 0xec9   :  { %v8613_v20 = vpop.permute.xlu1 %8612  ;;  %4426 = vst.msk [vmem:[#allocation3 + $0xa] sm:$0x1] %vm4385_vm7, %v4424_v14 }
 0xeca   :  { %8617 = vst.msk [vmem:[#allocation2 + $0x8] sm:$0xff] %vm4354_vm14, %v8613_v20 }
 0xecb   :  { %8625 = vst.msk [vmem:[#allocation2 + $0x8] sm:$0xff] %vm4363_vm5, %v8621_v43 }
 0xecc   :  { %8635 = vst.msk [vmem:[#allocation2 + $0x8] sm:$0xff] %vm4374_vm9, %v8631_v60 }
 0xed0   :  { %v4383_v63 = vpop.permute.xlu0 %4382 }
 0xed1   :  { %v8629_v7 = vpop.permute.xlu1 %8628  ;;  %4386 = vst.msk [vmem:[#allocation3] sm:$0x1] %vm4385_vm7, %v4383_v63 }
 0xed2   :  { %8634 = vst.msk [vmem:[#allocation2] sm:$0xff] %vm4374_vm9, %v8629_v7 }
 0xed3   :  { %v8684_v55 = vld [vmem:[#allocation2 + $0xc] sm:$0x1]  ;;  %v8676_v52 = vld [vmem:[#allocation2 + $0xa] sm:$0x1]  ;;  %v8668_v50 = vld [vmem:[#allocation2 + $0x8] sm:$0x1] }
 0xed4   :  { %8685 = vst.msk [vmem:[#allocation3 + $0xd] sm:$0x1] %vm4378_vm12, %v8684_v55  ;;  %v8692_v2 = vld [vmem:[#allocation2 + $0xe] sm:$0x1]  ;;  %v8678_v53 = vld [vmem:[#allocation2 + $0xb] sm:$0x1] }
 0xed5   :  { %8677 = vst.msk [vmem:[#allocation3 + $0xb] sm:$0x1] %vm4378_vm12, %v8676_v52  ;;  %v8670_v26 = vld [vmem:[#allocation2 + $0x9] sm:$0x1]  ;;  %v8694_v31 = vld [vmem:[#allocation2 + $0xf] sm:$0x1] }
 0xed6   :  { %8669 = vst.msk [vmem:[#allocation3 + $0x9] sm:$0x1] %vm4378_vm12, %v8668_v50  ;;  %v8686_v21 = vld [vmem:[#allocation2 + $0xd] sm:$0x1] }
 0xed7   :  { %8693 = vst.msk [vmem:[#allocation3 + $0xf] sm:$0x1] %vm4378_vm12, %v8692_v2 }
 0xed8   :  { %v4408_v29 = vpop.permute.xlu0 %4407 }
 0xed9   :  { %v4392_v33 = vpop.permute.xlu1 %4391  ;;  %4410 = vst.msk [vmem:[#allocation3 + $0x6] sm:$0x1] %vm4385_vm7, %v4408_v29  ;;  %v8654_v12 = vld [vmem:[#allocation2 + $0x5] sm:$0x1]  ;;  %v8646_v54 = vld [vmem:[#allocation2 + $0x3] sm:$0x1] }
 0xeda   :  { %4394 = vst.msk [vmem:[#allocation3 + $0x2] sm:$0x1] %vm4385_vm7, %v4392_v33  ;;  %8656 = vrot.lane.b32.xlu1 %v8654_v12, %s15538_s24  ;;  %8648 = vrot.lane.b32.xlu0 %v8646_v54, %s15538_s24  ;;  %v8638_v24 = vld [vmem:[#allocation2 + $0x1] sm:$0x1]  ;;  %v8636_v47 = vld [vmem:[#allocation2] sm:$0x1] }
 0xedb   :  { %8640 = vrot.lane.b32.xlu2 %v8638_v24, %s15538_s24  ;;  %v8660_v15 = vld [vmem:[#allocation2 + $0x6] sm:$0x1]  ;;  %v8652_v22 = vld [vmem:[#allocation2 + $0x4] sm:$0x1]  ;;  %8637 = vst.msk [vmem:[#allocation3 + $0x1] sm:$0x1] %vm4378_vm12, %v8636_v47 }
 0xedc   :  { %v8644_v0 = vld [vmem:[#allocation2 + $0x2] sm:$0x1]  ;;  %8661 = vst.msk [vmem:[#allocation3 + $0x7] sm:$0x1] %vm4378_vm12, %v8660_v15  ;;  %v8662_v41 = vld [vmem:[#allocation2 + $0x7] sm:$0x1] }
 0xedd   :  { %8653 = vst.msk [vmem:[#allocation3 + $0x5] sm:$0x1] %vm4378_vm12, %v8652_v22 }
 0xede   :  { %8645 = vst.msk [vmem:[#allocation3 + $0x3] sm:$0x1] %vm4378_vm12, %v8644_v0 }
 0xee0   :  { %v4432_v51 = vpop.permute.xlu0 %4431 }
 0xee1   :  { %v4416_v19 = vpop.permute.xlu1 %4415  ;;  %4434 = vst.msk [vmem:[#allocation3 + $0xc] sm:$0x1] %vm4385_vm7, %v4432_v51 }
 0xee2   :  { %4418 = vst.msk [vmem:[#allocation3 + $0x8] sm:$0x1] %vm4385_vm7, %v4416_v19  ;;  %8680 = vrot.lane.b32.xlu1 %v8678_v53, %s15538_s24  ;;  %8672 = vrot.lane.b32.xlu0 %v8670_v26, %s15538_s24 }
 0xee3   :  { %8664 = vrot.lane.b32.xlu2 %v8662_v41, %s15538_s24 }
 0xee9   :  { %v4440_v40 = vpop.permute.xlu1 %4439 }
 0xeea   :  { %4442 = vst.msk [vmem:[#allocation3 + $0xe] sm:$0x1] %vm4385_vm7, %v4440_v40  ;;  %8696 = vrot.lane.b32.xlu0 %v8694_v31, %s15538_s24 }
 0xeeb   :  { %8688 = vrot.lane.b32.xlu2 %v8686_v21, %s15538_s24 }
 0xf35   :  { %v8641_v8 = vpop.permute.xlu2 %8640 }
 0xf36   :  { %8643 = vst.msk [vmem:[#allocation3 + $0x1] sm:$0x1] %vm4385_vm7, %v8641_v8 }
 0xf3d   :  { %v8665_v57 = vpop.permute.xlu2 %8664 }
 0xf3e   :  { %8667 = vst.msk [vmem:[#allocation3 + $0x7] sm:$0x1] %vm4385_vm7, %v8665_v57 }
 0xf45   :  { %v8689_v17 = vpop.permute.xlu2 %8688 }
 0xf46   :  { %8691 = vst.msk [vmem:[#allocation3 + $0xd] sm:$0x1] %vm4385_vm7, %v8689_v17 }
 0xf4c   :  { %v8657_v23 = vpop.permute.xlu1 %8656  ;;  %v8649_v37 = vpop.permute.xlu0 %8648 }
 0xf4d   :  { %8659 = vst.msk [vmem:[#allocation3 + $0x5] sm:$0x1] %vm4385_vm7, %v8657_v23 }
 0xf4e   :  { %8651 = vst.msk [vmem:[#allocation3 + $0x3] sm:$0x1] %vm4385_vm7, %v8649_v37 }
 0xf54   :  { %v8681_v36 = vpop.permute.xlu1 %8680  ;;  %v8673_v61 = vpop.permute.xlu0 %8672 }
 0xf55   :  { %8683 = vst.msk [vmem:[#allocation3 + $0xb] sm:$0x1] %vm4385_vm7, %v8681_v36 }
 0xf56   :  { %8675 = vst.msk [vmem:[#allocation3 + $0x9] sm:$0x1] %vm4385_vm7, %v8673_v61 }
 0xf5c   :  { %v8697_v3 = vpop.permute.xlu0 %8696 }
 0xf5d   :  { %8699 = vst.msk [vmem:[#allocation3 + $0xf] sm:$0x1] %vm4385_vm7, %v8697_v3 }
 0xf5e   :  { %10860 = dma.done.wait [#allocation5], 32768 }
 0xf5f   :  { %10861 = vsyncadd [#allocation5], 4294934528  ;;  %v8800_v18 = vld [vmem:[#allocation4 + $0x2f0] sm:$0xff]  ;;  %v8798_v4 = vld [vmem:[#allocation4 + $0x2e0] sm:$0xff]  ;;  %s15753_s6 = sld [smem:[#allocation82_spill]]  ;;  %s10894_s21 = smov [#allocation6]  }
 0xf60   :  { %v8736_v49 = vld [vmem:[#allocation4 + $0xf0] sm:$0xff]  ;;  %9029 = vmatpush.msrb.mxu2 %v8800_v18  ;;  %v8734_v56 = vld [vmem:[#allocation4 + $0xe0] sm:$0xff]  ;;  %s15754_s8 = sld [smem:[#allocation81_spill]]  ;;  %vm9387_vm13 = vcmask 82944  }
 0xf61   :  { %8989 = vmatpush.msrb.mxu0 %v8736_v49  ;;  %v8832_v27 = vld [vmem:[#allocation4 + $0x3f0] sm:$0xff]  ;;  %v8830_v30 = vld [vmem:[#allocation4 + $0x3e0] sm:$0xff]  ;;  %s15755_s10 = sld [smem:[#allocation83_spill]] }
 0xf62   :  { %v8768_v6 = vld [vmem:[#allocation4 + $0x1f0] sm:$0xff]  ;;  %9049 = vmatpush.msrb.mxu3 %v8832_v27  ;;  %9030 = vmatpush.msrb.mxu2 %v8798_v4  ;;  %v8766_v35 = vld [vmem:[#allocation4 + $0x1e0] sm:$0xff]  ;;  %s15756_s7 = sld [smem:[#allocation85_spill]] }
 0xf63   :  { %9009 = vmatpush.msrb.mxu1 %v8768_v6  ;;  %v8796_v32 = vld [vmem:[#allocation4 + $0x2d0] sm:$0xff]  ;;  %8990 = vmatpush.msrb.mxu0 %v8734_v56  ;;  %v8794_v9 = vld [vmem:[#allocation4 + $0x2c0] sm:$0xff] }
 0xf64   :  { %v8732_v11 = vld [vmem:[#allocation4 + $0xd0] sm:$0xff]  ;;  %9050 = vmatpush.msrb.mxu3 %v8830_v30  ;;  %v8730_v45 = vld [vmem:[#allocation4 + $0xc0] sm:$0xff]  ;;  %9031 = vmatpush.msrb.mxu2 %v8796_v32 }
 0xf65   :  { %v8828_v10 = vld [vmem:[#allocation4 + $0x3d0] sm:$0xff]  ;;  %9010 = vmatpush.msrb.mxu1 %v8766_v35  ;;  %8991 = vmatpush.msrb.mxu0 %v8732_v11  ;;  %v8826_v44 = vld [vmem:[#allocation4 + $0x3c0] sm:$0xff] }
 0xf66   :  { %v8764_v5 = vld [vmem:[#allocation4 + $0x1d0] sm:$0xff]  ;;  %v8762_v13 = vld [vmem:[#allocation4 + $0x1c0] sm:$0xff]  ;;  %9051 = vmatpush.msrb.mxu3 %v8828_v10  ;;  %9032 = vmatpush.msrb.mxu2 %v8794_v9 }
 0xf67   :  { %9011 = vmatpush.msrb.mxu1 %v8764_v5  ;;  %v8792_v38 = vld [vmem:[#allocation4 + $0x2b0] sm:$0xff]  ;;  %8992 = vmatpush.msrb.mxu0 %v8730_v45  ;;  %v8790_v28 = vld [vmem:[#allocation4 + $0x2a0] sm:$0xff] }
 0xf68   :  { %v8728_v16 = vld [vmem:[#allocation4 + $0xb0] sm:$0xff]  ;;  %9052 = vmatpush.msrb.mxu3 %v8826_v44  ;;  %v8726_v1 = vld [vmem:[#allocation4 + $0xa0] sm:$0xff]  ;;  %9033 = vmatpush.msrb.mxu2 %v8792_v38  ;;  %s9396_s3 = sshll.u32 %s15756_s7, 4  ;;  %s9397_s3 = int_to_ptr.hbm [resolvable:$true] %s9396_s3 }
 0xf69   :  { %v8824_v46 = vld [vmem:[#allocation4 + $0x3b0] sm:$0xff]  ;;  %9012 = vmatpush.msrb.mxu1 %v8762_v13  ;;  %8993 = vmatpush.msrb.mxu0 %v8728_v16  ;;  %v8822_v34 = vld [vmem:[#allocation4 + $0x3a0] sm:$0xff] }
 0xf6a   :  { %v8760_v59 = vld [vmem:[#allocation4 + $0x1b0] sm:$0xff]  ;;  %v8758_v25 = vld [vmem:[#allocation4 + $0x1a0] sm:$0xff]  ;;  %9053 = vmatpush.msrb.mxu3 %v8824_v46  ;;  %9034 = vmatpush.msrb.mxu2 %v8790_v28 }
 0xf6b   :  { %9013 = vmatpush.msrb.mxu1 %v8760_v59  ;;  %v8788_v39 = vld [vmem:[#allocation4 + $0x290] sm:$0xff]  ;;  %8994 = vmatpush.msrb.mxu0 %v8726_v1  ;;  %v8786_v42 = vld [vmem:[#allocation4 + $0x280] sm:$0xff] }
 0xf6c   :  { %v8724_v60 = vld [vmem:[#allocation4 + $0x90] sm:$0xff]  ;;  %9054 = vmatpush.msrb.mxu3 %v8822_v34  ;;  %v8722_v48 = vld [vmem:[#allocation4 + $0x80] sm:$0xff]  ;;  %9035 = vmatpush.msrb.mxu2 %v8788_v39 }
 0xf6d   :  { %v8820_v62 = vld [vmem:[#allocation4 + $0x390] sm:$0xff]  ;;  %9014 = vmatpush.msrb.mxu1 %v8758_v25  ;;  %8995 = vmatpush.msrb.mxu0 %v8724_v60  ;;  %v8818_v43 = vld [vmem:[#allocation4 + $0x380] sm:$0xff] }
 0xf6e   :  { %v8756_v58 = vld [vmem:[#allocation4 + $0x190] sm:$0xff]  ;;  %v8754_v14 = vld [vmem:[#allocation4 + $0x180] sm:$0xff]  ;;  %9055 = vmatpush.msrb.mxu3 %v8820_v62  ;;  %9036 = vmatpush.msrb.mxu2 %v8786_v42 }
 0xf6f   :  { %9015 = vmatpush.msrb.mxu1 %v8756_v58  ;;  %v8784_v20 = vld [vmem:[#allocation4 + $0x270] sm:$0xff]  ;;  %8996 = vmatpush.msrb.mxu0 %v8722_v48  ;;  %v8782_v52 = vld [vmem:[#allocation4 + $0x260] sm:$0xff] }
 0xf70   :  { %v8720_v63 = vld [vmem:[#allocation4 + $0x70] sm:$0xff]  ;;  %9056 = vmatpush.msrb.mxu3 %v8818_v43  ;;  %v8718_v50 = vld [vmem:[#allocation4 + $0x60] sm:$0xff]  ;;  %9037 = vmatpush.msrb.mxu2 %v8784_v20 }
 0xf71   :  { %v8816_v7 = vld [vmem:[#allocation4 + $0x370] sm:$0xff]  ;;  %9016 = vmatpush.msrb.mxu1 %v8754_v14  ;;  %8997 = vmatpush.msrb.mxu0 %v8720_v63  ;;  %v8814_v2 = vld [vmem:[#allocation4 + $0x360] sm:$0xff] }
 0xf72   :  { %v8752_v55 = vld [vmem:[#allocation4 + $0x170] sm:$0xff]  ;;  %v8750_v29 = vld [vmem:[#allocation4 + $0x160] sm:$0xff]  ;;  %9057 = vmatpush.msrb.mxu3 %v8816_v7  ;;  %9038 = vmatpush.msrb.mxu2 %v8782_v52 }
 0xf73   :  { %9017 = vmatpush.msrb.mxu1 %v8752_v55  ;;  %v8780_v33 = vld [vmem:[#allocation4 + $0x250] sm:$0xff]  ;;  %8998 = vmatpush.msrb.mxu0 %v8718_v50  ;;  %v8778_v47 = vld [vmem:[#allocation4 + $0x240] sm:$0xff]  ;;  %v8705_v50 = vld [vmem:[#allocation3 + $0x8] sm:$0xff] }
 0xf74   :  { %v8716_v12 = vld [vmem:[#allocation4 + $0x50] sm:$0xff]  ;;  %9058 = vmatpush.msrb.mxu3 %v8814_v2  ;;  %v8714_v15 = vld [vmem:[#allocation4 + $0x40] sm:$0xff]  ;;  %9039 = vmatpush.msrb.mxu2 %v8780_v33  ;;  %8972 = vst [vmem:[#allocation1 + $0x20] ss:$4 sm:$0xff] %v8705_v50  ;;  %v8821_v50 = vld [vmem:[#allocation4 + $0x398] sm:$0xff] }
 0xf75   :  { %v8812_v54 = vld [vmem:[#allocation4 + $0x350] sm:$0xff]  ;;  %9018 = vmatpush.msrb.mxu1 %v8750_v29  ;;  %8999 = vmatpush.msrb.mxu0 %v8716_v12  ;;  %v8810_v22 = vld [vmem:[#allocation4 + $0x340] sm:$0xff] }
 0xf76   :  { %v8748_v24 = vld [vmem:[#allocation4 + $0x150] sm:$0xff]  ;;  %v8746_v0 = vld [vmem:[#allocation4 + $0x140] sm:$0xff]  ;;  %9059 = vmatpush.msrb.mxu3 %v8812_v54  ;;  %9040 = vmatpush.msrb.mxu2 %v8778_v47 }
 0xf77   :  { %9019 = vmatpush.msrb.mxu1 %v8748_v24  ;;  %v8776_v51 = vld [vmem:[#allocation4 + $0x230] sm:$0xff]  ;;  %9000 = vmatpush.msrb.mxu0 %v8714_v15  ;;  %v8774_v41 = vld [vmem:[#allocation4 + $0x220] sm:$0xff] }
 0xf78   :  { %v8712_v19 = vld [vmem:[#allocation4 + $0x30] sm:$0xff]  ;;  %9060 = vmatpush.msrb.mxu3 %v8810_v22  ;;  %v8710_v40 = vld [vmem:[#allocation4 + $0x20] sm:$0xff]  ;;  %9041 = vmatpush.msrb.mxu2 %v8776_v51 }
 0xf79   :  { %v8808_v53 = vld [vmem:[#allocation4 + $0x330] sm:$0xff]  ;;  %9020 = vmatpush.msrb.mxu1 %v8746_v0  ;;  %9001 = vmatpush.msrb.mxu0 %v8712_v19  ;;  %v8806_v31 = vld [vmem:[#allocation4 + $0x320] sm:$0xff] }
 0xf7a   :  { %v8744_v26 = vld [vmem:[#allocation4 + $0x130] sm:$0xff]  ;;  %v8742_v21 = vld [vmem:[#allocation4 + $0x120] sm:$0xff]  ;;  %9061 = vmatpush.msrb.mxu3 %v8808_v53  ;;  %9042 = vmatpush.msrb.mxu2 %v8774_v41 }
 0xf7b   :  { %9021 = vmatpush.msrb.mxu1 %v8744_v26  ;;  %v8772_v8 = vld [vmem:[#allocation4 + $0x210] sm:$0xff]  ;;  %9002 = vmatpush.msrb.mxu0 %v8710_v40  ;;  %v8770_v37 = vld [vmem:[#allocation4 + $0x200] sm:$0xff] }
 0xf7c   :  { %v8708_v57 = vld [vmem:[#allocation4 + $0x10] sm:$0xff]  ;;  %9062 = vmatpush.msrb.mxu3 %v8806_v31  ;;  %v8706_v36 = vld [vmem:[#allocation4] sm:$0xff]  ;;  %9043 = vmatpush.msrb.mxu2 %v8772_v8 }
 0xf7d   :  { %v8804_v17 = vld [vmem:[#allocation4 + $0x310] sm:$0xff]  ;;  %9022 = vmatpush.msrb.mxu1 %v8742_v21  ;;  %9003 = vmatpush.msrb.mxu0 %v8708_v57  ;;  %v8802_v3 = vld [vmem:[#allocation4 + $0x300] sm:$0xff] }
 0xf7e   :  { %v8740_v23 = vld [vmem:[#allocation4 + $0x110] sm:$0xff]  ;;  %9063 = vmatpush.msrb.mxu3 %v8804_v17  ;;  %9044 = vmatpush.msrb.mxu2 %v8770_v37  ;;  %v8926_v4 = vld [vmem:[#allocation4 + $0x6e0] sm:$0xff] }
 0xf7f   :  { %v8928_v61 = vld [vmem:[#allocation4 + $0x6f0] sm:$0xff]  ;;  %9023 = vmatpush.msrb.mxu1 %v8740_v23  ;;  %9004 = vmatpush.msrb.mxu0 %v8706_v36  ;;  %v8738_v27 = vld [vmem:[#allocation4 + $0x100] sm:$0xff] }
 0xf80   :  { %v8864_v18 = vld [vmem:[#allocation4 + $0x4f0] sm:$0xff]  ;;  %9109 = vmatpush.msra.mxu2 %v8928_v61  ;;  %9064 = vmatpush.msrb.mxu3 %v8802_v3  ;;  %v8862_v56 = vld [vmem:[#allocation4 + $0x4e0] sm:$0xff] }
 0xf81   :  { %v8960_v49 = vld [vmem:[#allocation4 + $0x7f0] sm:$0xff]  ;;  %9069 = vmatpush.msra.mxu0 %v8864_v18  ;;  %v8958_v30 = vld [vmem:[#allocation4 + $0x7e0] sm:$0xff]  ;;  %9024 = vmatpush.msrb.mxu1 %v8738_v27  ;;  %v8801_v18 = vld [vmem:[#allocation4 + $0x2f8] sm:$0xff] }
 0xf82   :  { %v8896_v6 = vld [vmem:[#allocation4 + $0x5f0] sm:$0xff]  ;;  %9129 = vmatpush.msra.mxu3 %v8960_v49  ;;  %9110 = vmatpush.msra.mxu2 %v8926_v4  ;;  %v8894_v35 = vld [vmem:[#allocation4 + $0x5e0] sm:$0xff] }
 0xf83   :  { %v8924_v32 = vld [vmem:[#allocation4 + $0x6d0] sm:$0xff]  ;;  %9070 = vmatpush.msra.mxu0 %v8862_v56  ;;  %9089 = vmatpush.msra.mxu1 %v8896_v6  ;;  %v8922_v10 = vld [vmem:[#allocation4 + $0x6c0] sm:$0xff]  ;;  %v8737_v6 = vld [vmem:[#allocation4 + $0xf8] sm:$0xff] }
 0xf84   :  { %v8860_v11 = vld [vmem:[#allocation4 + $0x4d0] sm:$0xff]  ;;  %9111 = vmatpush.msra.mxu2 %v8924_v32  ;;  %9130 = vmatpush.msra.mxu3 %v8958_v30  ;;  %v8858_v45 = vld [vmem:[#allocation4 + $0x4c0] sm:$0xff]  ;;  %v8799_v32 = vld [vmem:[#allocation4 + $0x2e8] sm:$0xff] }
 0xf85   :  { %v8956_v9 = vld [vmem:[#allocation4 + $0x7d0] sm:$0xff]  ;;  %9071 = vmatpush.msra.mxu0 %v8860_v11  ;;  %9090 = vmatpush.msra.mxu1 %v8894_v35  ;;  %v8954_v13 = vld [vmem:[#allocation4 + $0x7c0] sm:$0xff]  ;;  %v8833_v30 = vld [vmem:[#allocation4 + $0x3f8] sm:$0xff] }
 0xf86   :  { %v8892_v5 = vld [vmem:[#allocation4 + $0x5d0] sm:$0xff]  ;;  %9112 = vmatpush.msra.mxu2 %v8922_v10  ;;  %9131 = vmatpush.msra.mxu3 %v8956_v9  ;;  %v8890_v16 = vld [vmem:[#allocation4 + $0x5c0] sm:$0xff]  ;;  %v8735_v35 = vld [vmem:[#allocation4 + $0xe8] sm:$0xff] }
 0xf87   :  { %v8920_v44 = vld [vmem:[#allocation4 + $0x6b0] sm:$0xff]  ;;  %9072 = vmatpush.msra.mxu0 %v8858_v45  ;;  %9091 = vmatpush.msra.mxu1 %v8892_v5  ;;  %v8918_v46 = vld [vmem:[#allocation4 + $0x6a0] sm:$0xff]  ;;  %v8797_v9 = vld [vmem:[#allocation4 + $0x2d8] sm:$0xff] }
 0xf88   :  { %v8856_v38 = vld [vmem:[#allocation4 + $0x4b0] sm:$0xff]  ;;  %9113 = vmatpush.msra.mxu2 %v8920_v44  ;;  %9132 = vmatpush.msra.mxu3 %v8954_v13  ;;  %v8854_v28 = vld [vmem:[#allocation4 + $0x4a0] sm:$0xff]  ;;  %v8769_v45 = vld [vmem:[#allocation4 + $0x1f8] sm:$0xff] }
 0xf89   :  { %v8952_v59 = vld [vmem:[#allocation4 + $0x7b0] sm:$0xff]  ;;  %9073 = vmatpush.msra.mxu0 %v8856_v38  ;;  %9092 = vmatpush.msra.mxu1 %v8890_v16  ;;  %v8950_v25 = vld [vmem:[#allocation4 + $0x7a0] sm:$0xff]  ;;  %v8831_v5 = vld [vmem:[#allocation4 + $0x3e8] sm:$0xff] }
 0xf8a   :  { %v8888_v1 = vld [vmem:[#allocation4 + $0x5b0] sm:$0xff]  ;;  %9114 = vmatpush.msra.mxu2 %v8918_v46  ;;  %9133 = vmatpush.msra.mxu3 %v8952_v59  ;;  %v8886_v62 = vld [vmem:[#allocation4 + $0x5a0] sm:$0xff]  ;;  %v8733_v44 = vld [vmem:[#allocation4 + $0xd8] sm:$0xff] }
 0xf8b   :  { %v8916_v34 = vld [vmem:[#allocation4 + $0x690] sm:$0xff]  ;;  %9074 = vmatpush.msra.mxu0 %v8854_v28  ;;  %9093 = vmatpush.msra.mxu1 %v8888_v1  ;;  %v8914_v58 = vld [vmem:[#allocation4 + $0x680] sm:$0xff]  ;;  %v8795_v13 = vld [vmem:[#allocation4 + $0x2c8] sm:$0xff] }
 0xf8c   :  { %v8704_v39 = vld [vmem:[#allocation3] sm:$0xff]  ;;  %9115 = vmatpush.msra.mxu2 %v8916_v34  ;;  %9134 = vmatpush.msra.mxu3 %v8950_v25  ;;  %v8850_v48 = vld [vmem:[#allocation4 + $0x480] sm:$0xff]  ;;  %v8767_v38 = vld [vmem:[#allocation4 + $0x1e8] sm:$0xff] }
 0xf8d   :  { %v8852_v60 = vld [vmem:[#allocation4 + $0x490] sm:$0xff]  ;;  %8970 = vst [vmem:[#allocation1] ss:$4 sm:$0xff] %v8704_v39  ;;  %9094 = vmatpush.msra.mxu1 %v8886_v62  ;;  %v8946_v20 = vld [vmem:[#allocation4 + $0x780] sm:$0xff]  ;;  %v8829_v16 = vld [vmem:[#allocation4 + $0x3d8] sm:$0xff] }
 0xf8e   :  { %v8948_v42 = vld [vmem:[#allocation4 + $0x790] sm:$0xff]  ;;  %9075 = vmatpush.msra.mxu0 %v8852_v60  ;;  %9116 = vmatpush.msra.mxu2 %v8914_v58  ;;  %v8882_v7 = vld [vmem:[#allocation4 + $0x580] sm:$0xff]  ;;  %v14951_v46 = vld.sshfl [vmem:[#allocation1 + $0x30] sm:$0xff pattern:$0x73625140] }
 0xf8f   :  { %v8884_v43 = vld [vmem:[#allocation4 + $0x590] sm:$0xff]  ;;  %9135 = vmatpush.msra.mxu3 %v8948_v42  ;;  %v8910_v55 = vld [vmem:[#allocation4 + $0x660] sm:$0xff]  ;;  %v8731_v59 = vld [vmem:[#allocation4 + $0xc8] sm:$0xff] }
 0xf90   :  { %v8912_v14 = vld [vmem:[#allocation4 + $0x670] sm:$0xff]  ;;  %9076 = vmatpush.msra.mxu0 %v8850_v48  ;;  %9095 = vmatpush.msra.mxu1 %v8884_v43  ;;  %v8846_v2 = vld [vmem:[#allocation4 + $0x460] sm:$0xff]  ;;  %v8765_v28 = vld [vmem:[#allocation4 + $0x1d8] sm:$0xff] }
 0xf91   :  { %v8848_v63 = vld [vmem:[#allocation4 + $0x470] sm:$0xff]  ;;  %9117 = vmatpush.msra.mxu2 %v8912_v14  ;;  %9136 = vmatpush.msra.mxu3 %v8946_v20  ;;  %v8942_v12 = vld [vmem:[#allocation4 + $0x760] sm:$0xff]  ;;  %v8793_v1 = vld [vmem:[#allocation4 + $0x2b8] sm:$0xff] }
 0xf92   :  { %v8944_v52 = vld [vmem:[#allocation4 + $0x770] sm:$0xff]  ;;  %9077 = vmatpush.msra.mxu0 %v8848_v63  ;;  %9096 = vmatpush.msra.mxu1 %v8882_v7  ;;  %v8878_v24 = vld [vmem:[#allocation4 + $0x560] sm:$0xff]  ;;  %v8827_v34 = vld [vmem:[#allocation4 + $0x3c8] sm:$0xff] }
 0xf93   :  { %v8880_v29 = vld [vmem:[#allocation4 + $0x570] sm:$0xff]  ;;  %9118 = vmatpush.msra.mxu2 %v8910_v55  ;;  %9137 = vmatpush.msra.mxu3 %v8944_v52  ;;  %v8906_v47 = vld [vmem:[#allocation4 + $0x640] sm:$0xff]  ;;  %v14953_v25 = vld.sshfl [vmem:[#allocation1 + $0x20] sm:$0xff pattern:$0x73625140] }
 0xf94   :  { %v8908_v33 = vld [vmem:[#allocation4 + $0x650] sm:$0xff]  ;;  %9078 = vmatpush.msra.mxu0 %v8846_v2  ;;  %9097 = vmatpush.msra.mxu1 %v8880_v29  ;;  %v8842_v22 = vld [vmem:[#allocation4 + $0x440] sm:$0xff]  ;;  %v14939_v61 = vld.sshfl [vmem:[#allocation1 + $0x10] sm:$0xff pattern:$0x73625140] }
 0xf95   :  { %v8844_v54 = vld [vmem:[#allocation4 + $0x450] sm:$0xff]  ;;  %9119 = vmatpush.msra.mxu2 %v8908_v33  ;;  %9138 = vmatpush.msra.mxu3 %v8942_v12  ;;  %v8938_v19 = vld [vmem:[#allocation4 + $0x740] sm:$0xff]  ;;  %v14941_v27 = vld.sshfl [vmem:[#allocation1] sm:$0xff pattern:$0x73625140] }
 0xf96   :  { %v8940_v15 = vld [vmem:[#allocation4 + $0x750] sm:$0xff]  ;;  %9079 = vmatpush.msra.mxu0 %v8844_v54  ;;  %9098 = vmatpush.msra.mxu1 %v8878_v24  ;;  %v8874_v26 = vld [vmem:[#allocation4 + $0x540] sm:$0xff]  ;;  %v8729_v60 = vld [vmem:[#allocation4 + $0xb8] sm:$0xff] }
 0xf97   :  { %v8876_v0 = vld [vmem:[#allocation4 + $0x550] sm:$0xff]  ;;  %9120 = vmatpush.msra.mxu2 %v8906_v47  ;;  %9139 = vmatpush.msra.mxu3 %v8940_v15  ;;  %v8902_v41 = vld [vmem:[#allocation4 + $0x620] sm:$0xff]  ;;  %v8763_v62 = vld [vmem:[#allocation4 + $0x1c8] sm:$0xff] }
 0xf98   :  { %v8904_v51 = vld [vmem:[#allocation4 + $0x630] sm:$0xff]  ;;  %9080 = vmatpush.msra.mxu0 %v8842_v22  ;;  %9099 = vmatpush.msra.mxu1 %v8876_v0  ;;  %v8838_v31 = vld [vmem:[#allocation4 + $0x420] sm:$0xff]  ;;  %v8791_v58 = vld [vmem:[#allocation4 + $0x2a8] sm:$0xff] }
 0xf99   :  { %v8840_v53 = vld [vmem:[#allocation4 + $0x430] sm:$0xff]  ;;  %9121 = vmatpush.msra.mxu2 %v8904_v51  ;;  %9140 = vmatpush.msra.mxu3 %v8938_v19  ;;  %v8934_v57 = vld [vmem:[#allocation4 + $0x720] sm:$0xff]  ;;  %v8825_v42 = vld [vmem:[#allocation4 + $0x3b8] sm:$0xff] }
 0xf9a   :  { %v8936_v40 = vld [vmem:[#allocation4 + $0x730] sm:$0xff]  ;;  %9081 = vmatpush.msra.mxu0 %v8840_v53  ;;  %9100 = vmatpush.msra.mxu1 %v8874_v26  ;;  %v8870_v23 = vld [vmem:[#allocation4 + $0x520] sm:$0xff]  ;;  %v8727_v43 = vld [vmem:[#allocation4 + $0xa8] sm:$0xff] }
 0xf9b   :  { %v8872_v21 = vld [vmem:[#allocation4 + $0x530] sm:$0xff]  ;;  %9122 = vmatpush.msra.mxu2 %v8902_v41  ;;  %9141 = vmatpush.msra.mxu3 %v8936_v40  ;;  %v8898_v37 = vld [vmem:[#allocation4 + $0x600] sm:$0xff]  ;;  %v8761_v14 = vld [vmem:[#allocation4 + $0x1b8] sm:$0xff] }
 0xf9c   :  { %v8900_v8 = vld [vmem:[#allocation4 + $0x610] sm:$0xff]  ;;  %9082 = vmatpush.msra.mxu0 %v8838_v31  ;;  %9101 = vmatpush.msra.mxu1 %v8872_v21  ;;  %v8834_v3 = vld [vmem:[#allocation4 + $0x400] sm:$0xff]  ;;  %v8789_v20 = vld [vmem:[#allocation4 + $0x298] sm:$0xff] }
 0xf9d   :  { %v8836_v17 = vld [vmem:[#allocation4 + $0x410] sm:$0xff]  ;;  %9123 = vmatpush.msra.mxu2 %v8900_v8  ;;  %9142 = vmatpush.msra.mxu3 %v8934_v57  ;;  %v8930_v4 = vld [vmem:[#allocation4 + $0x700] sm:$0xff]  ;;  %v8823_v63 = vld [vmem:[#allocation4 + $0x3a8] sm:$0xff] }
 0xf9e   :  { %v8932_v36 = vld [vmem:[#allocation4 + $0x710] sm:$0xff]  ;;  %9083 = vmatpush.msra.mxu0 %v8836_v17  ;;  %9102 = vmatpush.msra.mxu1 %v8870_v23  ;;  %v8866_v11 = vld [vmem:[#allocation4 + $0x500] sm:$0xff]  ;;  %v8725_v7 = vld [vmem:[#allocation4 + $0x98] sm:$0xff] }
 0xf9f   :  { %v8868_v49 = vld [vmem:[#allocation4 + $0x510] sm:$0xff]  ;;  %9124 = vmatpush.msra.mxu2 %v8898_v37  ;;  %9143 = vmatpush.msra.mxu3 %v8932_v36  ;;  %v14948_v10 = vld.sshfl [vmem:[#allocation1 + $0x8] sm:$0xff pattern:$0x73625140]  ;;  %v8759_v55 = vld [vmem:[#allocation4 + $0x1a8] sm:$0xff] }
 0xfa0   :  { %9045 = vmatmul.f32.vlgmr.msrb.gmra.mxu2 %v14939_v61  ;;  %9084 = vmatpush.msra.mxu0 %v8834_v3  ;;  %v14944_v56 = vld.sshfl [vmem:[#allocation1 + $0x18] sm:$0xff pattern:$0x73625140]  ;;  %v14959_v48 = vld.sshfl [vmem:[#allocation1 + $0x28] sm:$0xff pattern:$0x73625140] }
 0xfa1   :  { %9189 = vmatpush.msrb.mxu2 %v8801_v18  ;;  %9103 = vmatpush.msra.mxu1 %v8868_v49  ;;  %v14956_v39 = vld.sshfl [vmem:[#allocation1 + $0x38] sm:$0xff pattern:$0x73625140]  ;;  %v8787_v52 = vld [vmem:[#allocation4 + $0x288] sm:$0xff]  ;;  %v8757_v29 = vld [vmem:[#allocation4 + $0x198] sm:$0xff] }
 0xfa2   :  { %9144 = vmatpush.msra.mxu3 %v8930_v4  ;;  %9005 = vmatmul.f32.vlgmr.msrb.gmra.mxu0 %v14941_v27  ;;  %v8723_v2 = vld [vmem:[#allocation4 + $0x88] sm:$0xff]  ;;  %v8785_v33 = vld [vmem:[#allocation4 + $0x278] sm:$0xff] }
 0xfa3   :  { %9065 = vmatmul.f32.vlgmr.msrb.gmra.mxu3 %v14944_v56  ;;  %9149 = vmatpush.msrb.mxu0 %v8737_v6  ;;  %v8819_v12 = vld [vmem:[#allocation4 + $0x388] sm:$0xff]  ;;  %v8721_v54 = vld [vmem:[#allocation4 + $0x78] sm:$0xff] }
 0xfa4   :  { %9190 = vmatpush.msrb.mxu2 %v8799_v32  ;;  %9209 = vmatpush.msrb.mxu3 %v8833_v30  ;;  %v8755_v24 = vld [vmem:[#allocation4 + $0x188] sm:$0xff]  ;;  %v8817_v15 = vld [vmem:[#allocation4 + $0x378] sm:$0xff] }
 0xfa5   :  { %9104 = vmatpush.msra.mxu1 %v8866_v11  ;;  %9150 = vmatpush.msrb.mxu0 %v8735_v35  ;;  %v8783_v47 = vld [vmem:[#allocation4 + $0x268] sm:$0xff]  ;;  %v8753_v0 = vld [vmem:[#allocation4 + $0x178] sm:$0xff] }
 0xfa6   :  { %9025 = vmatmul.f32.vlgmr.msrb.gmra.mxu1 %v14948_v10  ;;  %9191 = vmatpush.msrb.mxu2 %v8797_v9  ;;  %v8719_v22 = vld [vmem:[#allocation4 + $0x68] sm:$0xff]  ;;  %v8781_v51 = vld [vmem:[#allocation4 + $0x258] sm:$0xff] }
 0xfa7   :  { %9169 = vmatpush.msrb.mxu1 %v8769_v45  ;;  %9210 = vmatpush.msrb.mxu3 %v8831_v5  ;;  %v8815_v19 = vld [vmem:[#allocation4 + $0x368] sm:$0xff]  ;;  %v8717_v53 = vld [vmem:[#allocation4 + $0x58] sm:$0xff] }
 0xfa8   :  { %9151 = vmatpush.msrb.mxu0 %v8733_v44  ;;  %9192 = vmatpush.msrb.mxu2 %v8795_v13  ;;  %v8751_v26 = vld [vmem:[#allocation4 + $0x168] sm:$0xff]  ;;  %v8813_v40 = vld [vmem:[#allocation4 + $0x358] sm:$0xff] }
 0xfa9   :  { %9170 = vmatpush.msrb.mxu1 %v8767_v38  ;;  %9211 = vmatpush.msrb.mxu3 %v8829_v16  ;;  %v8779_v41 = vld [vmem:[#allocation4 + $0x248] sm:$0xff]  ;;  %v8749_v21 = vld [vmem:[#allocation4 + $0x158] sm:$0xff] }
 0xfaa   :  { %9125 = vmatmul.f32.vlgmr.msra.gmra.mxu2 %v14951_v46  ;;  %9152 = vmatpush.msrb.mxu0 %v8731_v59  ;;  %v8715_v31 = vld [vmem:[#allocation4 + $0x48] sm:$0xff]  ;;  %v8777_v8 = vld [vmem:[#allocation4 + $0x238] sm:$0xff] }
 0xfab   :  { %9171 = vmatpush.msrb.mxu1 %v8765_v28  ;;  %9193 = vmatpush.msrb.mxu2 %v8793_v1  ;;  %v8811_v57 = vld [vmem:[#allocation4 + $0x348] sm:$0xff]  ;;  %v8713_v17 = vld [vmem:[#allocation4 + $0x38] sm:$0xff] }
 0xfac   :  { %9212 = vmatpush.msrb.mxu3 %v8827_v34  ;;  %9085 = vmatmul.f32.vlgmr.msra.gmra.mxu0 %v14953_v25  ;;  %v8747_v23 = vld [vmem:[#allocation4 + $0x148] sm:$0xff]  ;;  %v8809_v36 = vld [vmem:[#allocation4 + $0x338] sm:$0xff] }
 0xfad   :  { %9145 = vmatmul.f32.vlgmr.msra.gmra.mxu3 %v14956_v39  ;;  %9153 = vmatpush.msrb.mxu0 %v8729_v60  ;;  %v8775_v37 = vld [vmem:[#allocation4 + $0x228] sm:$0xff]  ;;  %v8745_v18 = vld [vmem:[#allocation4 + $0x138] sm:$0xff] }
 0xfae   :  { %9172 = vmatpush.msrb.mxu1 %v8763_v62  ;;  %9194 = vmatpush.msrb.mxu2 %v8791_v58  ;;  %v8711_v3 = vld [vmem:[#allocation4 + $0x28] sm:$0xff]  ;;  %v8773_v49 = vld [vmem:[#allocation4 + $0x218] sm:$0xff] }
 0xfaf   :  { %9213 = vmatpush.msrb.mxu3 %v8825_v42  ;;  %9105 = vmatmul.f32.vlgmr.msra.gmra.mxu1 %v14959_v48  ;;  %v8807_v4 = vld [vmem:[#allocation4 + $0x328] sm:$0xff]  ;;  %v8709_v6 = vld [vmem:[#allocation4 + $0x18] sm:$0xff] }
 0xfb0   :  { %9154 = vmatpush.msrb.mxu0 %v8727_v43  ;;  %9173 = vmatpush.msrb.mxu1 %v8761_v14  ;;  %v8743_v32 = vld [vmem:[#allocation4 + $0x128] sm:$0xff]  ;;  %v8805_v11 = vld [vmem:[#allocation4 + $0x318] sm:$0xff] }
 0xfb1   :  { %9195 = vmatpush.msrb.mxu2 %v8789_v20  ;;  %9214 = vmatpush.msrb.mxu3 %v8823_v63  ;;  %v8771_v30 = vld [vmem:[#allocation4 + $0x208] sm:$0xff]  ;;  %v8929_v35 = vld [vmem:[#allocation4 + $0x6f8] sm:$0xff] }
 0xfb2   :  { %9155 = vmatpush.msrb.mxu0 %v8725_v7  ;;  %9174 = vmatpush.msrb.mxu1 %v8759_v55  ;;  %v8707_v9 = vld [vmem:[#allocation4 + $0x8] sm:$0xff]  ;;  %v8741_v45 = vld [vmem:[#allocation4 + $0x118] sm:$0xff] }
 0xfb3   :  { %9196 = vmatpush.msrb.mxu2 %v8787_v52  ;;  %9215 = vmatpush.msrb.mxu3 %v8821_v50  ;;  %v8803_v5 = vld [vmem:[#allocation4 + $0x308] sm:$0xff]  ;;  %v8865_v44 = vld [vmem:[#allocation4 + $0x4f8] sm:$0xff] }
 0xfb4   :  { %9156 = vmatpush.msrb.mxu0 %v8723_v2  ;;  %9175 = vmatpush.msrb.mxu1 %v8757_v29  ;;  %v8927_v13 = vld [vmem:[#allocation4 + $0x6e8] sm:$0xff]  ;;  %v8961_v38 = vld [vmem:[#allocation4 + $0x7f8] sm:$0xff] }
 0xfb5   :  { %9197 = vmatpush.msrb.mxu2 %v8785_v33  ;;  %9216 = vmatpush.msrb.mxu3 %v8819_v12  ;;  %v8739_v16 = vld [vmem:[#allocation4 + $0x108] sm:$0xff]  ;;  %v8897_v28 = vld [vmem:[#allocation4 + $0x5f8] sm:$0xff] }
 0xfb6   :  { %9157 = vmatpush.msrb.mxu0 %v8721_v54  ;;  %9176 = vmatpush.msrb.mxu1 %v8755_v24  ;;  %v8863_v59 = vld [vmem:[#allocation4 + $0x4e8] sm:$0xff]  ;;  %v8925_v1 = vld [vmem:[#allocation4 + $0x6d8] sm:$0xff] }
 0xfb7   :  { %9198 = vmatpush.msrb.mxu2 %v8783_v47  ;;  %9217 = vmatpush.msrb.mxu3 %v8817_v15  ;;  %v8959_v34 = vld [vmem:[#allocation4 + $0x7e8] sm:$0xff]  ;;  %v8861_v60 = vld [vmem:[#allocation4 + $0x4d8] sm:$0xff] }
 0xfb8   :  { %9158 = vmatpush.msrb.mxu0 %v8719_v22  ;;  %9177 = vmatpush.msrb.mxu1 %v8753_v0  ;;  %v8895_v62 = vld [vmem:[#allocation4 + $0x5e8] sm:$0xff]  ;;  %v8957_v42 = vld [vmem:[#allocation4 + $0x7d8] sm:$0xff] }
 0xfb9   :  { %9199 = vmatpush.msrb.mxu2 %v8781_v51  ;;  %9218 = vmatpush.msrb.mxu3 %v8815_v19  ;;  %v8923_v58 = vld [vmem:[#allocation4 + $0x6c8] sm:$0xff]  ;;  %v8893_v14 = vld [vmem:[#allocation4 + $0x5d8] sm:$0xff] }
 0xfba   :  { %9159 = vmatpush.msrb.mxu0 %v8717_v53  ;;  %9178 = vmatpush.msrb.mxu1 %v8751_v26  ;;  %v8859_v43 = vld [vmem:[#allocation4 + $0x4c8] sm:$0xff]  ;;  %v8921_v20 = vld [vmem:[#allocation4 + $0x6b8] sm:$0xff] }
 0xfbb   :  { %9200 = vmatpush.msrb.mxu2 %v8779_v41  ;;  %9219 = vmatpush.msrb.mxu3 %v8813_v40  ;;  %v8955_v63 = vld [vmem:[#allocation4 + $0x7c8] sm:$0xff]  ;;  %v8857_v7 = vld [vmem:[#allocation4 + $0x4b8] sm:$0xff] }
 0xfbc   :  { %9160 = vmatpush.msrb.mxu0 %v8715_v31  ;;  %9179 = vmatpush.msrb.mxu1 %v8749_v21  ;;  %v8891_v55 = vld [vmem:[#allocation4 + $0x5c8] sm:$0xff]  ;;  %v8953_v50 = vld [vmem:[#allocation4 + $0x7b8] sm:$0xff] }
 0xfbd   :  { %9201 = vmatpush.msrb.mxu2 %v8777_v8  ;;  %9220 = vmatpush.msrb.mxu3 %v8811_v57  ;;  %v8919_v52 = vld [vmem:[#allocation4 + $0x6a8] sm:$0xff]  ;;  %v8889_v29 = vld [vmem:[#allocation4 + $0x5b8] sm:$0xff] }
 0xfbe   :  { %9161 = vmatpush.msrb.mxu0 %v8713_v17  ;;  %9180 = vmatpush.msrb.mxu1 %v8747_v23  ;;  %v8855_v2 = vld [vmem:[#allocation4 + $0x4a8] sm:$0xff]  ;;  %v8917_v33 = vld [vmem:[#allocation4 + $0x698] sm:$0xff] }
 0xfbf   :  { %9202 = vmatpush.msrb.mxu2 %v8775_v37  ;;  %9221 = vmatpush.msrb.mxu3 %v8809_v36  ;;  %v8951_v12 = vld [vmem:[#allocation4 + $0x7a8] sm:$0xff]  ;;  %v8853_v54 = vld [vmem:[#allocation4 + $0x498] sm:$0xff] }
 0xfc0   :  { %9162 = vmatpush.msrb.mxu0 %v8711_v3  ;;  %9181 = vmatpush.msrb.mxu1 %v8745_v18  ;;  %v8887_v24 = vld [vmem:[#allocation4 + $0x5a8] sm:$0xff]  ;;  %v8949_v15 = vld [vmem:[#allocation4 + $0x798] sm:$0xff] }
 0xfc1   :  { %9203 = vmatpush.msrb.mxu2 %v8773_v49  ;;  %9222 = vmatpush.msrb.mxu3 %v8807_v4  ;;  %v8915_v47 = vld [vmem:[#allocation4 + $0x688] sm:$0xff]  ;;  %v8885_v0 = vld [vmem:[#allocation4 + $0x598] sm:$0xff] }
 0xfc2   :  { %9163 = vmatpush.msrb.mxu0 %v8709_v6  ;;  %9182 = vmatpush.msrb.mxu1 %v8743_v32  ;;  %v8851_v22 = vld [vmem:[#allocation4 + $0x488] sm:$0xff]  ;;  %v8913_v51 = vld [vmem:[#allocation4 + $0x678] sm:$0xff] }
 0xfc3   :  { %9204 = vmatpush.msrb.mxu2 %v8771_v30  ;;  %9223 = vmatpush.msrb.mxu3 %v8805_v11  ;;  %v8947_v19 = vld [vmem:[#allocation4 + $0x788] sm:$0xff]  ;;  %v8849_v53 = vld [vmem:[#allocation4 + $0x478] sm:$0xff] }
 0xfc4   :  { %9164 = vmatpush.msrb.mxu0 %v8707_v9  ;;  %9183 = vmatpush.msrb.mxu1 %v8741_v45  ;;  %v8883_v26 = vld [vmem:[#allocation4 + $0x588] sm:$0xff]  ;;  %v8945_v40 = vld [vmem:[#allocation4 + $0x778] sm:$0xff] }
 0xfc5   :  { %9269 = vmatpush.msra.mxu2 %v8929_v35  ;;  %9224 = vmatpush.msrb.mxu3 %v8803_v5  ;;  %v8911_v41 = vld [vmem:[#allocation4 + $0x668] sm:$0xff]  ;;  %v8881_v21 = vld [vmem:[#allocation4 + $0x578] sm:$0xff] }
 0xfc6   :  { %9229 = vmatpush.msra.mxu0 %v8865_v44  ;;  %9184 = vmatpush.msrb.mxu1 %v8739_v16  ;;  %v8847_v31 = vld [vmem:[#allocation4 + $0x468] sm:$0xff]  ;;  %v8909_v8 = vld [vmem:[#allocation4 + $0x658] sm:$0xff] }
 0xfc7   :  { %9270 = vmatpush.msra.mxu2 %v8927_v13  ;;  %9289 = vmatpush.msra.mxu3 %v8961_v38  ;;  %v8943_v57 = vld [vmem:[#allocation4 + $0x768] sm:$0xff]  ;;  %v8845_v17 = vld [vmem:[#allocation4 + $0x458] sm:$0xff] }
 0xfc8   :  { %9230 = vmatpush.msra.mxu0 %v8863_v59  ;;  %9249 = vmatpush.msra.mxu1 %v8897_v28  ;;  %v8879_v23 = vld [vmem:[#allocation4 + $0x568] sm:$0xff]  ;;  %v8941_v36 = vld [vmem:[#allocation4 + $0x758] sm:$0xff] }
 0xfc9   :  { %9271 = vmatpush.msra.mxu2 %v8925_v1  ;;  %9290 = vmatpush.msra.mxu3 %v8959_v34  ;;  %v8907_v37 = vld [vmem:[#allocation4 + $0x648] sm:$0xff]  ;;  %v8877_v18 = vld [vmem:[#allocation4 + $0x558] sm:$0xff] }
 0xfca   :  { %9231 = vmatpush.msra.mxu0 %v8861_v60  ;;  %9250 = vmatpush.msra.mxu1 %v8895_v62  ;;  %v8843_v3 = vld [vmem:[#allocation4 + $0x448] sm:$0xff]  ;;  %v8905_v49 = vld [vmem:[#allocation4 + $0x638] sm:$0xff]  ;;  %v9318_v60 = vld [vmem:[%s15753_s6 + $0x38] sm:$0xff] }
 0xfcb   :  { %9272 = vmatpush.msra.mxu2 %v8923_v58  ;;  %9291 = vmatpush.msra.mxu3 %v8957_v42  ;;  %v8939_v4 = vld [vmem:[#allocation4 + $0x748] sm:$0xff]  ;;  %v8841_v6 = vld [vmem:[#allocation4 + $0x438] sm:$0xff]  ;;  %v9316_v58 = vld [vmem:[%s15753_s6 + $0x28] sm:$0xff] }
 0xfcc   :  { %9232 = vmatpush.msra.mxu0 %v8859_v43  ;;  %9251 = vmatpush.msra.mxu1 %v8893_v14  ;;  %v8875_v32 = vld [vmem:[#allocation4 + $0x548] sm:$0xff]  ;;  %v8937_v11 = vld [vmem:[#allocation4 + $0x738] sm:$0xff]  ;;  %v9314_v43 = vld [vmem:[%s15753_s6 + $0x18] sm:$0xff] }
 0xfcd   :  { %9273 = vmatpush.msra.mxu2 %v8921_v20  ;;  %9292 = vmatpush.msra.mxu3 %v8955_v63  ;;  %v8903_v30 = vld [vmem:[#allocation4 + $0x628] sm:$0xff]  ;;  %v8873_v9 = vld [vmem:[#allocation4 + $0x538] sm:$0xff]  ;;  %v9312_v20 = vld [vmem:[%s15753_s6 + $0x8] sm:$0xff] }
 0xfce   :  { %9233 = vmatpush.msra.mxu0 %v8857_v7  ;;  %9252 = vmatpush.msra.mxu1 %v8891_v55  ;;  %v8839_v35 = vld [vmem:[#allocation4 + $0x428] sm:$0xff]  ;;  %v8901_v45 = vld [vmem:[#allocation4 + $0x618] sm:$0xff]  ;;  %v9342_v7 = vld [vmem:[%s15753_s6 + $0xf8] sm:$0xff] }
 0xfcf   :  { %9274 = vmatpush.msra.mxu2 %v8919_v52  ;;  %9293 = vmatpush.msra.mxu3 %v8953_v50  ;;  %v8935_v5 = vld [vmem:[#allocation4 + $0x728] sm:$0xff]  ;;  %v8933_v38 = vld [vmem:[#allocation4 + $0x718] sm:$0xff]  ;;  %v9340_v52 = vld [vmem:[%s15753_s6 + $0xe8] sm:$0xff] }
 0xfd0   :  { %9234 = vmatpush.msra.mxu0 %v8855_v2  ;;  %9253 = vmatpush.msra.mxu1 %v8889_v29  ;;  %v8871_v44 = vld [vmem:[#allocation4 + $0x528] sm:$0xff]  ;;  %v9323_v1 = vld [vmem:[%s15753_s6 + $0x60] sm:$0xff]  ;;  %v9338_v29 = vld [vmem:[%s15753_s6 + $0xd8] sm:$0xff] }
 0xfd1   :  { %9275 = vmatpush.msra.mxu2 %v8917_v33  ;;  %9294 = vmatpush.msra.mxu3 %v8951_v12  ;;  %v8899_v13 = vld [vmem:[#allocation4 + $0x608] sm:$0xff]  ;;  %v9319_v34 = vld [vmem:[%s15753_s6 + $0x40] sm:$0xff] }
 0xfd2   :  { %9235 = vmatpush.msra.mxu0 %v8853_v54  ;;  %9254 = vmatpush.msra.mxu1 %v8887_v24  ;;  %v8931_v16 = vld [vmem:[#allocation4 + $0x708] sm:$0xff]  ;;  %v9315_v42 = vld [vmem:[%s15753_s6 + $0x20] sm:$0xff] }
 0xfd3   :  { %9276 = vmatpush.msra.mxu2 %v8915_v47  ;;  %9295 = vmatpush.msra.mxu3 %v8949_v15  ;;  %v8867_v59 = vld [vmem:[#allocation4 + $0x508] sm:$0xff]  ;;  %v9311_v63 = vld [vmem:[%s15753_s6] sm:$0xff] }
 0xfd4   :  { %9236 = vmatpush.msra.mxu0 %v8851_v22  ;;  %9255 = vmatpush.msra.mxu1 %v8885_v0  ;;  %v9325_v28 = vld [vmem:[%s15753_s6 + $0x70] sm:$0xff]  ;;  %v8962_v50 = vld [vmem:[%s15754_s8] sm:$0x3]  ;;  %s9394_s8 = sshll.u32 %s10894_s21, 4  ;;  %s9395_s8 = int_to_ptr.vmem [resolvable:$true] %s9394_s8 }
 0xfd5   :  { %9277 = vmatpush.msra.mxu2 %v8913_v51  ;;  %9296 = vmatpush.msra.mxu3 %v8947_v19  ;;  %v9317_v62 = vld [vmem:[%s15753_s6 + $0x30] sm:$0xff]  ;;  %v9339_v2 = vld [vmem:[%s15753_s6 + $0xe0] sm:$0xff]  ;;  %v8964_v33 = vperm.slane %v8962_v50, 0 }
 0xfd6   :  { %9237 = vmatpush.msra.mxu0 %v8849_v53  ;;  %9256 = vmatpush.msra.mxu1 %v8883_v26  ;;  %v9313_v14 = vld [vmem:[%s15753_s6 + $0x10] sm:$0xff] }
 0xfd7   :  { %9278 = vmatpush.msra.mxu2 %v8911_v41  ;;  %9297 = vmatpush.msra.mxu3 %v8945_v40  ;;  %v9341_v55 = vld [vmem:[%s15753_s6 + $0xf0] sm:$0xff] }
 0xfd8   :  { %9238 = vmatpush.msra.mxu0 %v8847_v31  ;;  %9257 = vmatpush.msra.mxu1 %v8881_v21  ;;  %v9337_v12 = vld [vmem:[%s15753_s6 + $0xd0] sm:$0xff] }
 0xfd9   :  { %9279 = vmatpush.msra.mxu2 %v8909_v8  ;;  %9298 = vmatpush.msra.mxu3 %v8943_v57 }
 0xfda   :  { %9239 = vmatpush.msra.mxu0 %v8845_v17  ;;  %9258 = vmatpush.msra.mxu1 %v8879_v23  ;;  %v9336_v23 = vld [vmem:[%s15753_s6 + $0xc8] sm:$0xff] }
 0xfdb   :  { %9280 = vmatpush.msra.mxu2 %v8907_v37  ;;  %9299 = vmatpush.msra.mxu3 %v8941_v36  ;;  %v9335_v37 = vld [vmem:[%s15753_s6 + $0xc0] sm:$0xff]  ;;  %v9334_v36 = vld [vmem:[%s15753_s6 + $0xb8] sm:$0xff] }
 0xfdc   :  { %9205 = vmatmul.f32.vlgmr.msrb.gmra.mxu2 %v14939_v61  ;;  %9240 = vmatpush.msra.mxu0 %v8843_v3  ;;  %v8837_v61 = vld [vmem:[#allocation4 + $0x418] sm:$0xff]  ;;  %v9333_v3 = vld [vmem:[%s15753_s6 + $0xb0] sm:$0xff] }
 0xfdd   :  { %9259 = vmatpush.msra.mxu1 %v8877_v18  ;;  %9281 = vmatpush.msra.mxu2 %v8905_v49  ;;  %v9332_v18 = vld [vmem:[%s15753_s6 + $0xa8] sm:$0xff]  ;;  %v9331_v49 = vld [vmem:[%s15753_s6 + $0xa0] sm:$0xff] }
 0xfde   :  { %9300 = vmatpush.msra.mxu3 %v8939_v4  ;;  %9165 = vmatmul.f32.vlgmr.msrb.gmra.mxu0 %v14941_v27  ;;  %v8835_v27 = vld [vmem:[#allocation4 + $0x408] sm:$0xff]  ;;  %v9330_v4 = vld [vmem:[%s15753_s6 + $0x98] sm:$0xff] }
 0xfdf   :  { %9225 = vmatmul.f32.vlgmr.msrb.gmra.mxu3 %v14944_v56  ;;  %9241 = vmatpush.msra.mxu0 %v8841_v6  ;;  %v8869_v56 = vld [vmem:[#allocation4 + $0x518] sm:$0xff]  ;;  %v9329_v6 = vld [vmem:[%s15753_s6 + $0x90] sm:$0xff] }
 0xfe0   :  { %9260 = vmatpush.msra.mxu1 %v8875_v32  ;;  %9282 = vmatpush.msra.mxu2 %v8903_v30  ;;  %v9328_v32 = vld [vmem:[%s15753_s6 + $0x88] sm:$0xff]  ;;  %v9327_v30 = vld [vmem:[%s15753_s6 + $0x80] sm:$0xff] }
 0xfe1   :  { %9301 = vmatpush.msra.mxu3 %v8937_v11  ;;  %9185 = vmatmul.f32.vlgmr.msrb.gmra.mxu1 %v14948_v10  ;;  %v9326_v10 = vld [vmem:[%s15753_s6 + $0x78] sm:$0xff]  ;;  %v8965_v11 = vperm.slane %v8962_v50, 1 }
 0xfe2   :  { %9242 = vmatpush.msra.mxu0 %v8839_v35  ;;  %9261 = vmatpush.msra.mxu1 %v8873_v9 }
 0xfe3   :  { %9283 = vmatpush.msra.mxu2 %v8901_v45  ;;  %9302 = vmatpush.msra.mxu3 %v8935_v5 }
 0xfe4   :  { %9243 = vmatpush.msra.mxu0 %v8837_v61  ;;  %9262 = vmatpush.msra.mxu1 %v8871_v44 }
 0xfe5   :  { %9284 = vmatpush.msra.mxu2 %v8899_v13  ;;  %9303 = vmatpush.msra.mxu3 %v8933_v38 }
 0xfe6   :  { %9285 = vmatmul.f32.vlgmr.msra.gmra.mxu2 %v14951_v46  ;;  %9244 = vmatpush.msra.mxu0 %v8835_v27  ;;  %v9324_v46 = vld [vmem:[%s15753_s6 + $0x68] sm:$0xff] }
 0xfe7   :  { %9263 = vmatpush.msra.mxu1 %v8869_v56  ;;  %9304 = vmatpush.msra.mxu3 %v8931_v16 }
 0xfe8   :  { %9245 = vmatmul.f32.vlgmr.msra.gmra.mxu0 %v14953_v25  ;;  %9305 = vmatmul.f32.vlgmr.msra.gmra.mxu3 %v14956_v39  ;;  %v9322_v25 = vld [vmem:[%s15753_s6 + $0x58] sm:$0xff]  ;;  %v9321_v39 = vld [vmem:[%s15753_s6 + $0x50] sm:$0xff] }
 0xfe9   :  { %9264 = vmatpush.msra.mxu1 %v8867_v59  ;;  %9347 = vmatpush.msrb.mxu0 %v9326_v10 }
 0xfea   :  { %9265 = vmatmul.f32.vlgmr.msra.gmra.mxu1 %v14959_v48  ;;  %v9320_v48 = vld [vmem:[%s15753_s6 + $0x48] sm:$0xff] }
 0xfeb   :  { %9348 = vmatpush.msrb.mxu0 %v9325_v28  ;;  %9367 = vmatpush.msrb.mxu1 %v9342_v7 }
 0xfed   :  { %9349 = vmatpush.msrb.mxu0 %v9324_v46  ;;  %9368 = vmatpush.msrb.mxu1 %v9341_v55 }
 0xfef   :  { %9350 = vmatpush.msrb.mxu0 %v9323_v1  ;;  %9369 = vmatpush.msrb.mxu1 %v9340_v52 }
 0xff1   :  { %9351 = vmatpush.msrb.mxu0 %v9322_v25  ;;  %9370 = vmatpush.msrb.mxu1 %v9339_v2 }
 0xff3   :  { %9352 = vmatpush.msrb.mxu0 %v9321_v39  ;;  %9371 = vmatpush.msrb.mxu1 %v9338_v29  ;;  %v10811_v39 = vld [vmem:[%s15755_s10] ss:$0 sm:$0xff] }
 0xff5   :  { %9353 = vmatpush.msrb.mxu0 %v9320_v48  ;;  %9372 = vmatpush.msrb.mxu1 %v9337_v12 }
 0xff7   :  { %9354 = vmatpush.msrb.mxu0 %v9319_v34  ;;  %9373 = vmatpush.msrb.mxu1 %v9336_v23 }
 0xff9   :  { %9355 = vmatpush.msrb.mxu0 %v9318_v60  ;;  %9374 = vmatpush.msrb.mxu1 %v9335_v37 }
 0xffb   :  { %9356 = vmatpush.msrb.mxu0 %v9317_v62  ;;  %9375 = vmatpush.msrb.mxu1 %v9334_v36 }
 0xffd   :  { %9357 = vmatpush.msrb.mxu0 %v9316_v58  ;;  %9376 = vmatpush.msrb.mxu1 %v9333_v3 }
 0xfff   :  { %9358 = vmatpush.msrb.mxu0 %v9315_v42  ;;  %9377 = vmatpush.msrb.mxu1 %v9332_v18 }
0x1001   :  { %9359 = vmatpush.msrb.mxu0 %v9314_v43  ;;  %9378 = vmatpush.msrb.mxu1 %v9331_v49 }
0x1003   :  { %9360 = vmatpush.msrb.mxu0 %v9313_v14  ;;  %9379 = vmatpush.msrb.mxu1 %v9330_v4 }
0x1005   :  { %9361 = vmatpush.msrb.mxu0 %v9312_v20  ;;  %9380 = vmatpush.msrb.mxu1 %v9329_v6 }
0x1007   :  { %9362 = vmatpush.msrb.mxu0 %v9311_v63  ;;  %9381 = vmatpush.msrb.mxu1 %v9328_v32 }
0x1009   :  { %9382 = vmatpush.msrb.mxu1 %v9327_v30 }
0x101f   :  { %v9006_v54 = vpop.f32.mrf.mxu0 }
0x1020   :  { %v9007_v24 = vadd.f32 %v9006_v54, %v8964_v33 }
0x1023   :  { %v9026_v47 = vpop.f32.mrf.mxu1  ;;  %v9046_v15 = vpop.f32.mrf.mxu2 }
0x1024   :  { %v9027_v22 = vadd.f32 %v9026_v47, %v9007_v24 }
0x1026   :  { %v9047_v0 = vadd.f32 %v9046_v15, %v9027_v22  ;;  %v9066_v51 = vpop.f32.mrf.mxu3 }
0x1028   :  { %v9067_v19 = vadd.f32 %v9066_v51, %v9047_v0 }
0x1029   :  { %v9086_v53 = vpop.f32.mrf.mxu0 }
0x102a   :  { %v9087_v26 = vadd.f32 %v9086_v53, %v9067_v19 }
0x102c   :  { %v9106_v41 = vpop.f32.mrf.mxu1 }
0x102d   :  { %v9107_v40 = vadd.f32 %v9106_v41, %v9087_v26  ;;  %v9126_v31 = vpop.f32.mrf.mxu2 }
0x102f   :  { %v9127_v21 = vadd.f32 %v9126_v31, %v9107_v40 }
0x1030   :  { %v9146_v8 = vpop.f32.mrf.mxu3 }
0x1031   :  { %v9147_v57 = vadd.f32 %v9146_v8, %v9127_v21 }
0x1033   :  { %v9309_v17 = vmax.f32 %v9147_v57, 0.0 }
0x1035   :  { %9363 = vmatmul.f32.vlgmr.msrb.gmra.mxu0 %v9309_v17 }
0x105b   :  { %v9166_v35 = vpop.f32.mrf.mxu0 }
0x105c   :  { %v9167_v9 = vadd.f32 %v9166_v35, %v8965_v11 }
0x105e   :  { %v9186_v45 = vpop.f32.mrf.mxu1 }
0x105f   :  { %v9187_v5 = vadd.f32 %v9186_v45, %v9167_v9  ;;  %v9206_v61 = vpop.f32.mrf.mxu2 }
0x1061   :  { %v9207_v44 = vadd.f32 %v9206_v61, %v9187_v5 }
0x1062   :  { %v9226_v13 = vpop.f32.mrf.mxu3 }
0x1063   :  { %v9227_v38 = vadd.f32 %v9226_v13, %v9207_v44 }
0x1065   :  { %v9246_v27 = vpop.f32.mrf.mxu0 }
0x1066   :  { %v9247_v56 = vadd.f32 %v9246_v27, %v9227_v38 }
0x1067   :  { %v9266_v16 = vpop.f32.mrf.mxu1 }
0x1068   :  { %v9267_v59 = vadd.f32 %v9266_v16, %v9247_v56 }
0x1069   :  { %v9286_v10 = vpop.f32.mrf.mxu2 }
0x106a   :  { %v9287_v28 = vadd.f32 %v9286_v10, %v9267_v59 }
0x106b   :  { %v9306_v46 = vpop.f32.mrf.mxu3 }
0x106c   :  { %v9307_v1 = vadd.f32 %v9306_v46, %v9287_v28 }
0x106e   :  { %v9310_v25 = vmax.f32 %v9307_v1, 0.0 }
0x1070   :  { %9383 = vmatmul.f32.vlgmr.msrb.gmra.mxu1 %v9310_v25 }
0x10b2   :  { %v9364_v48 = vpop.f32.mrf.mxu0 }
0x10b3   :  { %v9365_v34 = vadd.f32 %v10811_v39, %v9364_v48 }
0x10ed   :  { %v9384_v60 = vpop.f32.mrf.mxu1 }
0x10ee   :  { %v9385_v62 = vadd.f32 %v9384_v60, %v9365_v34 }
0x10f0   :  { %9388 = vst.msk [vmem:[#allocation6] sm:$0x3] %vm9387_vm13, %v9385_v62 }
0x10f1   :  { %9399 = dma.vmem_to_hbm [thread:$0]  %s9395_s8, 32, %s9397_s3, [#allocation7]  }
0x10f2   :  { %10862 = dma.done.wait [#allocation7], 32  }
0x10f3   :  { %10863 = vsyncadd [#allocation7], 4294967264 }
0x10f4   :  { %9404 = vsyncpa [#allocation7], 1 }
0x10f5   :  { %9405 = vsyncmov [#allocation5] }
0x10f8   :  { %s9406_s25 = vpop.sfrf %9405 }
0x10f9   :  { %p10052_p0 = scmp.ne.s32.totalorder %s9406_s25, 0 }
0x10fb   :  { %9410 = shalt.err (%p10052_p0)  }

</bundles_post_ra>
